<compile_context>
chip_gen: v6e
topology: v6e:2x2x1
jax: 0.10.0
libtpu: 0.0.40
codegen_flags: <defaults>
</compile_context>

<pallas_src>
import functools

import jax
import jax.numpy as jnp
from jax.experimental import pallas as pl
from jax.experimental.pallas import tpu as pltpu


C_IMG = 256          # conv trunk feature width (conv3 out channels)
C_EMB = 32           # fc_embed width
KH = KW = 5          # conv kernel size
STRIDE = 2           # conv stride


def _conv_out(n, k=KH, s=STRIDE):
    return (n - k) // s + 1


# ----------------------------------------------------------------------------
# One-time weight preparation (run OUTSIDE the per-step forward)
# ----------------------------------------------------------------------------
def _row_select(h_in):
    """Sel[di, oh, h] = 1.0 iff h == stride*oh + di.   Shape [KH, OH, H]."""
    oh = _conv_out(h_in)
    h = jnp.arange(h_in)
    sel = (h[None, None, :] ==
           (STRIDE * jnp.arange(oh)[None, :, None]
            + jnp.arange(KH)[:, None, None]))
    return sel.astype(jnp.float32), oh


def _toeplitz(w, w_in):
    """Conv weight [Cout, Cin, KH, KW] -> banded T [KH, W_in*Cin, OW*Cout].

    T[di, w*Cin+cin, ow*Cout+cout] = w[cout, cin, di, w - stride*ow]
    when 0 <= w - stride*ow < KW, else 0.  Applied as (Sel_di @ X) @ T_di."""
    cout, cin, kh, kw = w.shape
    ow = _conv_out(w_in)
    wd = jnp.transpose(w, (2, 3, 1, 0))                       # [KH, KW, Cin, Cout]
    scat = (jnp.arange(w_in)[None, None, :] ==
            (STRIDE * jnp.arange(ow)[None, :, None]
             + jnp.arange(kw)[:, None, None])).astype(w.dtype)  # [KW, OW, W]
    t = jnp.einsum("jow,djic->dwioc", scat, wd)                # [KH, W, Cin, OW, Cout]
    return t.reshape(kh, w_in * cin, ow * cout), ow


def _conv_bias_row(b, ow):
    # bias broadcast over the flattened [OW*Cout] lane axis
    return jnp.tile(b, ow).reshape(1, -1)


def _block_diag(a, b):
    top = jnp.concatenate([a, jnp.zeros((a.shape[0], b.shape[1]), a.dtype)], axis=1)
    bot = jnp.concatenate([jnp.zeros((b.shape[0], a.shape[1]), b.dtype), b], axis=1)
    return jnp.concatenate([top, bot], axis=0)


def prepare_qnet(params, hw):
    """Build kernel-ready weights (Toeplitz convs, merged twin-head tail)."""
    h, w = hw
    prep = {}

    sel1, oh1 = _row_select(h)
    t1, ow1 = _toeplitz(params["conv1_w"], w)
    sel2, oh2 = _row_select(oh1)
    t2, ow2 = _toeplitz(params["conv2_w"], ow1)
    sel3, _ = _row_select(oh2)
    t3, ow3 = _toeplitz(params["conv3_w"], ow2)

    prep["sel1"], prep["t1"] = sel1, t1
    prep["cb1"] = _conv_bias_row(params["conv1_b"], ow1)
    prep["sel2"], prep["t2"] = sel2, t2
    prep["cb2"] = _conv_bias_row(params["conv2_b"], ow2)
    prep["sel3"], prep["t3"] = sel3, t3
    prep["cb3"] = _conv_bias_row(params["conv3_b"], ow3)

    # Twin heads merged: fc1||fc11 -> [*, 256]; fc2/fc21 and fc3/fc31 block-diag.
    fc1_w, fc11_w = params["fc1_w"], params["fc11_w"]
    prep["w1x1"] = jnp.concatenate([fc1_w[:C_IMG], fc11_w[:C_IMG]], axis=1)
    prep["w1x2"] = jnp.concatenate([fc1_w[C_IMG:C_IMG + C_EMB],
                                    fc11_w[C_IMG:C_IMG + C_EMB]], axis=1)
    prep["w1a"] = jnp.concatenate([fc1_w[C_IMG + C_EMB:],
                                   fc11_w[C_IMG + C_EMB:]], axis=1)
    prep["fb1"] = jnp.concatenate([params["fc1_b"], params["fc11_b"]]).reshape(1, -1)
    prep["w2"] = _block_diag(params["fc2_w"], params["fc21_w"])
    prep["fb2"] = jnp.concatenate([params["fc2_b"], params["fc21_b"]]).reshape(1, -1)
    prep["w3"] = _block_diag(params["fc3_w"], params["fc31_w"])
    prep["fb3"] = jnp.concatenate([params["fc3_b"], params["fc31_b"]]).reshape(1, -1)
    prep["we"] = params["fc_embed_w"]
    prep["be"] = params["fc_embed_b"].reshape(1, -1)
    return prep


# ----------------------------------------------------------------------------
# The fused kernel: per-sample conv trunk + pool + twin-head tail
# ----------------------------------------------------------------------------
def _qnet_kernel(x_ref, ps_ref, a_ref,
                 sel1_ref, t1_ref, cb1_ref,
                 sel2_ref, t2_ref, cb2_ref,
                 sel3_ref, t3_ref, cb3_ref,
                 we_ref, be_ref,
                 w1x1_ref, w1x2_ref, w1a_ref, fb1_ref,
                 w2_ref, fb2_ref, w3_ref, fb3_ref,
                 o_ref, *, kh, c_img):
    f32 = jnp.float32

    def conv_relu(x2d, sel_ref, t_ref, b_ref):
        # x2d: [H, W*Cin] -> [OH, OW*Cout]
        acc = None
        for di in range(kh):
            rows = jnp.dot(sel_ref[di], x2d, preferred_element_type=f32)  # [OH, W*Cin]
            y = jnp.dot(rows, t_ref[di], preferred_element_type=f32)      # [OH, OW*Cout]
            acc = y if acc is None else acc + y
        return jnp.maximum(acc + b_ref[...], 0.0)

    x = x_ref[0]                                        # [H, W*Cin]
    x = conv_relu(x, sel1_ref, t1_ref, cb1_ref)         # conv1 + ReLU
    x = conv_relu(x, sel2_ref, t2_ref, cb2_ref)         # conv2 + ReLU
    x = conv_relu(x, sel3_ref, t3_ref, cb3_ref)         # conv3 + ReLU  [OH3, OW3*256]

    # AdaptiveAvgPool2d((1,1)) + flatten: mean over all spatial positions.
    oh3 = x.shape[0]
    ow3 = x.shape[1] // c_img
    pooled = x[:, :c_img]
    for ow in range(1, ow3):
        pooled = pooled + x[:, ow * c_img:(ow + 1) * c_img]
    x1 = jnp.sum(pooled, axis=0, keepdims=True) * (1.0 / (oh3 * ow3))     # [1, 256]

    # pstate embedding.
    x2 = jnp.maximum(
        jnp.dot(ps_ref[0], we_ref[...], preferred_element_type=f32) + be_ref[...],
        0.0)                                                              # [1, 32]

    # concat([x1, x2, a]) @ [fc1 || fc11]  ==  sum of three dots.
    h1 = (jnp.dot(x1, w1x1_ref[...], preferred_element_type=f32)
          + jnp.dot(x2, w1x2_ref[...], preferred_element_type=f32)
          + jnp.dot(a_ref[0], w1a_ref[...], preferred_element_type=f32)
          + fb1_ref[...])
    h1 = jnp.maximum(h1, 0.0)                                             # [1, 256]
    h2 = jnp.maximum(
        jnp.dot(h1, w2_ref[...], preferred_element_type=f32) + fb2_ref[...], 0.0)
    q = jnp.dot(h2, w3_ref[...], preferred_element_type=f32) + fb3_ref[...]
    o_ref[0] = q.astype(o_ref.dtype)                                      # [1, 2*na]


def _const_spec(shape):
    nd = len(shape)
    return pl.BlockSpec(tuple(shape), lambda b, _nd=nd: (0,) * _nd)


def _batch_spec(tail):
    nd = 1 + len(tail)
    return pl.BlockSpec((1,) + tuple(tail),
                        lambda b, _nd=nd: (b,) + (0,) * (_nd - 1))


# ----------------------------------------------------------------------------
# Forward pass (mirrors QNetwork.forward) -- one pallas_call per call
# ----------------------------------------------------------------------------
def qnetwork_forward(prep, istate, pstate, a):
    B, C, H, W = istate.shape
    na = a.shape[1]

    # Single cheap relayout of the input: NCHW -> per-sample [H, W*C].
    x = jnp.transpose(istate, (0, 2, 3, 1)).reshape(B, H, W * C)
    ps3 = pstate.reshape(B, 1, -1)
    a3 = a.reshape(B, 1, -1)

    args = (x, ps3, a3,
            prep["sel1"], prep["t1"], prep["cb1"],
            prep["sel2"], prep["t2"], prep["cb2"],
            prep["sel3"], prep["t3"], prep["cb3"],
            prep["we"], prep["be"],
            prep["w1x1"], prep["w1x2"], prep["w1a"], prep["fb1"],
            prep["w2"], prep["fb2"], prep["w3"], prep["fb3"])

    in_specs = [_batch_spec((H, W * C)),
                _batch_spec((1, ps3.shape[-1])),
                _batch_spec((1, na))]
    in_specs += [_const_spec(t.shape) for t in args[3:]]

    n_out = prep["w3"].shape[1]                      # 2 * nb_actions
    out = pl.pallas_call(
        functools.partial(_qnet_kernel, kh=KH, c_img=C_IMG),
        out_shape=jax.ShapeDtypeStruct((B, 1, n_out), jnp.float32),
        grid=(B,),                                   # one sample per grid step
        in_specs=in_specs,
        out_specs=_batch_spec((1, n_out)),
        compiler_params=pltpu.CompilerParams(
            dimension_semantics=("parallel",),       # v7x: one sample per TC
            vmem_limit_bytes=32 * 1024 * 1024),      # ~17 MiB needed; v5e default is ~16
    )(*args)

    out = out[:, 0, :]
    return out[:, :na], out[:, na:]


# ----------------------------------------------------------------------------
# Deterministic parameter init (xavier-uniform for Linear, as in the module)
# ----------------------------------------------------------------------------
def xavier_uniform(key, fan_in, fan_out):
    limit = jnp.sqrt(6.0 / (fan_in + fan_out))
    return jax.random.uniform(key, (fan_in, fan_out), jnp.float32, -limit, limit)


def make_params(key, nb_actions, channel, nb_pstate):
    keys = jax.random.split(key, 16)
    p = {}
    p["conv1_w"] = 0.05 * jax.random.normal(keys[0], (16, channel, 5, 5), jnp.float32)
    p["conv1_b"] = jnp.zeros((16,), jnp.float32)
    p["conv2_w"] = 0.05 * jax.random.normal(keys[1], (64, 16, 5, 5), jnp.float32)
    p["conv2_b"] = jnp.zeros((64,), jnp.float32)
    p["conv3_w"] = 0.05 * jax.random.normal(keys[2], (256, 64, 5, 5), jnp.float32)
    p["conv3_b"] = jnp.zeros((256,), jnp.float32)
    d_cat = C_IMG + C_EMB + nb_actions
    p["fc_embed_w"] = xavier_uniform(keys[3], nb_pstate, C_EMB)
    p["fc_embed_b"] = jnp.zeros((C_EMB,), jnp.float32)
    p["fc1_w"] = xavier_uniform(keys[4], d_cat, 128)
    p["fc1_b"] = jnp.zeros((128,), jnp.float32)
    p["fc2_w"] = xavier_uniform(keys[5], 128, 32)
    p["fc2_b"] = jnp.zeros((32,), jnp.float32)
    p["fc3_w"] = xavier_uniform(keys[6], 32, nb_actions)
    p["fc3_b"] = jnp.zeros((nb_actions,), jnp.float32)
    p["fc11_w"] = xavier_uniform(keys[7], d_cat, 128)
    p["fc11_b"] = jnp.zeros((128,), jnp.float32)
    p["fc21_w"] = xavier_uniform(keys[8], 128, 32)
    p["fc21_b"] = jnp.zeros((32,), jnp.float32)
    p["fc31_w"] = xavier_uniform(keys[9], 32, nb_actions)
    p["fc31_b"] = jnp.zeros((nb_actions,), jnp.float32)
    return p


# ----------------------------------------------------------------------------
# Pure-JAX reference (PyTorch semantics) for correctness checking
# ----------------------------------------------------------------------------
def qnetwork_reference(params, istate, pstate, a):
    prec = jax.lax.Precision.HIGHEST

    def conv(x, w, b):
        y = jax.lax.conv_general_dilated(
            x, w, window_strides=(STRIDE, STRIDE), padding="VALID",
            dimension_numbers=("NCHW", "OIHW", "NCHW"), precision=prec)
        return jax.nn.relu(y + b[None, :, None, None])

    x = conv(istate, params["conv1_w"], params["conv1_b"])
    x = conv(x, params["conv2_w"], params["conv2_b"])
    x = conv(x, params["conv3_w"], params["conv3_b"])
    x1 = jnp.mean(x, axis=(2, 3))
    x2 = jax.nn.relu(jnp.dot(pstate, params["fc_embed_w"], precision=prec)
                     + params["fc_embed_b"])
    cat = jnp.concatenate([x1, x2, a], axis=1)

    def head(w1, b1, w2, b2, w3, b3):
        h = jax.nn.relu(jnp.dot(cat, w1, precision=prec) + b1)
        h = jax.nn.relu(jnp.dot(h, w2, precision=prec) + b2)
        return jnp.dot(h, w3, precision=prec) + b3

    q1 = head(params["fc1_w"], params["fc1_b"], params["fc2_w"], params["fc2_b"],
              params["fc3_w"], params["fc3_b"])
    q2 = head(params["fc11_w"], params["fc11_b"], params["fc21_w"], params["fc21_b"],
              params["fc31_w"], params["fc31_b"])
    return q1, q2


if __name__ == "__main__":
    # Three 5x5/stride-2 valid convs need H=W>=29; use 37 so the final feature
    # map is 2x2 and the fused adaptive avg-pool reduction is non-trivial.
    B, C, H, W = 2, 4, 37, 37
    nb_actions, nb_pstate = 6, 8

    key = jax.random.PRNGKey(0)
    k_is, k_ps, k_a, k_par = jax.random.split(key, 4)
    istate = jax.random.normal(k_is, (B, C, H, W), jnp.float32)
    pstate = jax.random.normal(k_ps, (B, nb_pstate), jnp.float32)
    a = jax.random.normal(k_a, (B, nb_actions), jnp.float32)
    params = make_params(k_par, nb_actions, C, nb_pstate)

    prep = prepare_qnet(params, (H, W))          # one-time weight prep, not in hot path
    fwd = jax.jit(qnetwork_forward)
    q1, q2 = fwd(prep, istate, pstate, a)
    jax.block_until_ready((q1, q2))

    assert q1.shape == (B, nb_actions) and q2.shape == (B, nb_actions)
    r1, r2 = qnetwork_reference(params, istate, pstate, a)
    ok = (bool(jnp.allclose(q1, r1, rtol=2e-3, atol=2e-3))
          and bool(jnp.allclose(q2, r2, rtol=2e-3, atol=2e-3)))
    assert ok, (jnp.max(jnp.abs(q1 - r1)), jnp.max(jnp.abs(q2 - r2)))
    print("KERNEL_OK")
</pallas_src>

<mosaic_0001>
module attributes {stable_mosaic.version = 11 : i64} {
  func.func @_qnet_kernel(%arg0: i32, %arg1: memref<1x37x148xf32, #tpu.memory_space<vmem>>, %arg2: memref<1x1x8xf32, #tpu.memory_space<vmem>>, %arg3: memref<1x1x6xf32, #tpu.memory_space<vmem>>, %arg4: memref<5x17x37xf32, #tpu.memory_space<vmem>>, %arg5: memref<5x148x272xf32, #tpu.memory_space<vmem>>, %arg6: memref<1x272xf32, #tpu.memory_space<vmem>>, %arg7: memref<5x7x17xf32, #tpu.memory_space<vmem>>, %arg8: memref<5x272x448xf32, #tpu.memory_space<vmem>>, %arg9: memref<1x448xf32, #tpu.memory_space<vmem>>, %arg10: memref<5x2x7xf32, #tpu.memory_space<vmem>>, %arg11: memref<5x448x512xf32, #tpu.memory_space<vmem>>, %arg12: memref<1x512xf32, #tpu.memory_space<vmem>>, %arg13: memref<8x32xf32, #tpu.memory_space<vmem>>, %arg14: memref<1x32xf32, #tpu.memory_space<vmem>>, %arg15: memref<256x256xf32, #tpu.memory_space<vmem>>, %arg16: memref<32x256xf32, #tpu.memory_space<vmem>>, %arg17: memref<6x256xf32, #tpu.memory_space<vmem>>, %arg18: memref<1x256xf32, #tpu.memory_space<vmem>>, %arg19: memref<256x64xf32, #tpu.memory_space<vmem>>, %arg20: memref<1x64xf32, #tpu.memory_space<vmem>>, %arg21: memref<64x12xf32, #tpu.memory_space<vmem>>, %arg22: memref<1x12xf32, #tpu.memory_space<vmem>>, %arg23: memref<1x1x12xf32, #tpu.memory_space<vmem>>) attributes {dimension_semantics = [#tpu.dimension_semantics<parallel>], iteration_bounds = array<i64: 2>, scalar_prefetch = 0 : i64, scratch_operands = 0 : i64, tpu.core_type = #tpu.core_type<tc>, window_params = [{transform_indices = @transform_0, window_bounds = array<i64: 1, 37, 148>}, {transform_indices = @transform_1, window_bounds = array<i64: 1, 1, 8>}, {transform_indices = @transform_2, window_bounds = array<i64: 1, 1, 6>}, {pipeline_mode = #tpu.pipeline_mode<synchronous>, transform_indices = @transform_3, window_bounds = array<i64: 5, 17, 37>}, {pipeline_mode = #tpu.pipeline_mode<synchronous>, transform_indices = @transform_4, window_bounds = array<i64: 5, 148, 272>}, {pipeline_mode = #tpu.pipeline_mode<synchronous>, transform_indices = @transform_5, window_bounds = array<i64: 1, 272>}, {pipeline_mode = #tpu.pipeline_mode<synchronous>, transform_indices = @transform_6, window_bounds = array<i64: 5, 7, 17>}, {pipeline_mode = #tpu.pipeline_mode<synchronous>, transform_indices = @transform_7, window_bounds = array<i64: 5, 272, 448>}, {pipeline_mode = #tpu.pipeline_mode<synchronous>, transform_indices = @transform_8, window_bounds = array<i64: 1, 448>}, {pipeline_mode = #tpu.pipeline_mode<synchronous>, transform_indices = @transform_9, window_bounds = array<i64: 5, 2, 7>}, {pipeline_mode = #tpu.pipeline_mode<synchronous>, transform_indices = @transform_10, window_bounds = array<i64: 5, 448, 512>}, {pipeline_mode = #tpu.pipeline_mode<synchronous>, transform_indices = @transform_11, window_bounds = array<i64: 1, 512>}, {pipeline_mode = #tpu.pipeline_mode<synchronous>, transform_indices = @transform_12, window_bounds = array<i64: 8, 32>}, {pipeline_mode = #tpu.pipeline_mode<synchronous>, transform_indices = @transform_13, window_bounds = array<i64: 1, 32>}, {pipeline_mode = #tpu.pipeline_mode<synchronous>, transform_indices = @transform_14, window_bounds = array<i64: 256, 256>}, {pipeline_mode = #tpu.pipeline_mode<synchronous>, transform_indices = @transform_15, window_bounds = array<i64: 32, 256>}, {pipeline_mode = #tpu.pipeline_mode<synchronous>, transform_indices = @transform_16, window_bounds = array<i64: 6, 256>}, {pipeline_mode = #tpu.pipeline_mode<synchronous>, transform_indices = @transform_17, window_bounds = array<i64: 1, 256>}, {pipeline_mode = #tpu.pipeline_mode<synchronous>, transform_indices = @transform_18, window_bounds = array<i64: 256, 64>}, {pipeline_mode = #tpu.pipeline_mode<synchronous>, transform_indices = @transform_19, window_bounds = array<i64: 1, 64>}, {pipeline_mode = #tpu.pipeline_mode<synchronous>, transform_indices = @transform_20, window_bounds = array<i64: 64, 12>}, {pipeline_mode = #tpu.pipeline_mode<synchronous>, transform_indices = @transform_21, window_bounds = array<i64: 1, 12>}, {transform_indices = @transform_22, window_bounds = array<i64: 1, 1, 12>}]} {
    %c0 = arith.constant 0 : index
    %c0_0 = arith.constant 0 : index
    %c0_1 = arith.constant 0 : index
    %0 = vector.load %arg1[%c0, %c0_0, %c0_1] : memref<1x37x148xf32, #tpu.memory_space<vmem>>, vector<1x37x148xf32>
    %1 = vector.shape_cast %0 : vector<1x37x148xf32> to vector<37x148xf32>
    %c0_2 = arith.constant 0 : index
    %c0_3 = arith.constant 0 : index
    %c0_4 = arith.constant 0 : index
    %2 = vector.load %arg4[%c0_2, %c0_3, %c0_4] : memref<5x17x37xf32, #tpu.memory_space<vmem>>, vector<1x17x37xf32>
    %3 = vector.shape_cast %2 : vector<1x17x37xf32> to vector<17x37xf32>
    %cst = arith.constant dense<0.000000e+00> : vector<17x148xf32>
    %4 = tpu.matmul %3, %1, %cst {dimension_numbers = #tpu.dot_dimension_numbers<[1], [0], [0], [1], [0, 0, 1, 1], [], []>} : vector<17x37xf32>, vector<37x148xf32>, vector<17x148xf32> -> vector<17x148xf32>
    %c0_5 = arith.constant 0 : index
    %c0_6 = arith.constant 0 : index
    %c0_7 = arith.constant 0 : index
    %5 = vector.load %arg5[%c0_5, %c0_6, %c0_7] : memref<5x148x272xf32, #tpu.memory_space<vmem>>, vector<1x148x272xf32>
    %6 = vector.shape_cast %5 : vector<1x148x272xf32> to vector<148x272xf32>
    %cst_8 = arith.constant dense<0.000000e+00> : vector<17x272xf32>
    %7 = tpu.matmul %4, %6, %cst_8 {dimension_numbers = #tpu.dot_dimension_numbers<[1], [0], [0], [1], [0, 0, 1, 1], [], []>} : vector<17x148xf32>, vector<148x272xf32>, vector<17x272xf32> -> vector<17x272xf32>
    %c1 = arith.constant 1 : index
    %c0_9 = arith.constant 0 : index
    %c0_10 = arith.constant 0 : index
    %8 = vector.load %arg4[%c1, %c0_9, %c0_10] : memref<5x17x37xf32, #tpu.memory_space<vmem>>, vector<1x17x37xf32>
    %9 = vector.shape_cast %8 : vector<1x17x37xf32> to vector<17x37xf32>
    %cst_11 = arith.constant dense<0.000000e+00> : vector<17x148xf32>
    %10 = tpu.matmul %9, %1, %cst_11 {dimension_numbers = #tpu.dot_dimension_numbers<[1], [0], [0], [1], [0, 0, 1, 1], [], []>} : vector<17x37xf32>, vector<37x148xf32>, vector<17x148xf32> -> vector<17x148xf32>
    %c1_12 = arith.constant 1 : index
    %c0_13 = arith.constant 0 : index
    %c0_14 = arith.constant 0 : index
    %11 = vector.load %arg5[%c1_12, %c0_13, %c0_14] : memref<5x148x272xf32, #tpu.memory_space<vmem>>, vector<1x148x272xf32>
    %12 = vector.shape_cast %11 : vector<1x148x272xf32> to vector<148x272xf32>
    %cst_15 = arith.constant dense<0.000000e+00> : vector<17x272xf32>
    %13 = tpu.matmul %10, %12, %cst_15 {dimension_numbers = #tpu.dot_dimension_numbers<[1], [0], [0], [1], [0, 0, 1, 1], [], []>} : vector<17x148xf32>, vector<148x272xf32>, vector<17x272xf32> -> vector<17x272xf32>
    %14 = arith.addf %7, %13 : vector<17x272xf32>
    %c2 = arith.constant 2 : index
    %c0_16 = arith.constant 0 : index
    %c0_17 = arith.constant 0 : index
    %15 = vector.load %arg4[%c2, %c0_16, %c0_17] : memref<5x17x37xf32, #tpu.memory_space<vmem>>, vector<1x17x37xf32>
    %16 = vector.shape_cast %15 : vector<1x17x37xf32> to vector<17x37xf32>
    %cst_18 = arith.constant dense<0.000000e+00> : vector<17x148xf32>
    %17 = tpu.matmul %16, %1, %cst_18 {dimension_numbers = #tpu.dot_dimension_numbers<[1], [0], [0], [1], [0, 0, 1, 1], [], []>} : vector<17x37xf32>, vector<37x148xf32>, vector<17x148xf32> -> vector<17x148xf32>
    %c2_19 = arith.constant 2 : index
    %c0_20 = arith.constant 0 : index
    %c0_21 = arith.constant 0 : index
    %18 = vector.load %arg5[%c2_19, %c0_20, %c0_21] : memref<5x148x272xf32, #tpu.memory_space<vmem>>, vector<1x148x272xf32>
    %19 = vector.shape_cast %18 : vector<1x148x272xf32> to vector<148x272xf32>
    %cst_22 = arith.constant dense<0.000000e+00> : vector<17x272xf32>
    %20 = tpu.matmul %17, %19, %cst_22 {dimension_numbers = #tpu.dot_dimension_numbers<[1], [0], [0], [1], [0, 0, 1, 1], [], []>} : vector<17x148xf32>, vector<148x272xf32>, vector<17x272xf32> -> vector<17x272xf32>
    %21 = arith.addf %14, %20 : vector<17x272xf32>
    %c3 = arith.constant 3 : index
    %c0_23 = arith.constant 0 : index
    %c0_24 = arith.constant 0 : index
    %22 = vector.load %arg4[%c3, %c0_23, %c0_24] : memref<5x17x37xf32, #tpu.memory_space<vmem>>, vector<1x17x37xf32>
    %23 = vector.shape_cast %22 : vector<1x17x37xf32> to vector<17x37xf32>
    %cst_25 = arith.constant dense<0.000000e+00> : vector<17x148xf32>
    %24 = tpu.matmul %23, %1, %cst_25 {dimension_numbers = #tpu.dot_dimension_numbers<[1], [0], [0], [1], [0, 0, 1, 1], [], []>} : vector<17x37xf32>, vector<37x148xf32>, vector<17x148xf32> -> vector<17x148xf32>
    %c3_26 = arith.constant 3 : index
    %c0_27 = arith.constant 0 : index
    %c0_28 = arith.constant 0 : index
    %25 = vector.load %arg5[%c3_26, %c0_27, %c0_28] : memref<5x148x272xf32, #tpu.memory_space<vmem>>, vector<1x148x272xf32>
    %26 = vector.shape_cast %25 : vector<1x148x272xf32> to vector<148x272xf32>
    %cst_29 = arith.constant dense<0.000000e+00> : vector<17x272xf32>
    %27 = tpu.matmul %24, %26, %cst_29 {dimension_numbers = #tpu.dot_dimension_numbers<[1], [0], [0], [1], [0, 0, 1, 1], [], []>} : vector<17x148xf32>, vector<148x272xf32>, vector<17x272xf32> -> vector<17x272xf32>
    %28 = arith.addf %21, %27 : vector<17x272xf32>
    %c4 = arith.constant 4 : index
    %c0_30 = arith.constant 0 : index
    %c0_31 = arith.constant 0 : index
    %29 = vector.load %arg4[%c4, %c0_30, %c0_31] : memref<5x17x37xf32, #tpu.memory_space<vmem>>, vector<1x17x37xf32>
    %30 = vector.shape_cast %29 : vector<1x17x37xf32> to vector<17x37xf32>
    %cst_32 = arith.constant dense<0.000000e+00> : vector<17x148xf32>
    %31 = tpu.matmul %30, %1, %cst_32 {dimension_numbers = #tpu.dot_dimension_numbers<[1], [0], [0], [1], [0, 0, 1, 1], [], []>} : vector<17x37xf32>, vector<37x148xf32>, vector<17x148xf32> -> vector<17x148xf32>
    %c4_33 = arith.constant 4 : index
    %c0_34 = arith.constant 0 : index
    %c0_35 = arith.constant 0 : index
    %32 = vector.load %arg5[%c4_33, %c0_34, %c0_35] : memref<5x148x272xf32, #tpu.memory_space<vmem>>, vector<1x148x272xf32>
    %33 = vector.shape_cast %32 : vector<1x148x272xf32> to vector<148x272xf32>
    %cst_36 = arith.constant dense<0.000000e+00> : vector<17x272xf32>
    %34 = tpu.matmul %31, %33, %cst_36 {dimension_numbers = #tpu.dot_dimension_numbers<[1], [0], [0], [1], [0, 0, 1, 1], [], []>} : vector<17x148xf32>, vector<148x272xf32>, vector<17x272xf32> -> vector<17x272xf32>
    %35 = arith.addf %28, %34 : vector<17x272xf32>
    %c0_37 = arith.constant 0 : index
    %c0_38 = arith.constant 0 : index
    %36 = vector.load %arg6[%c0_37, %c0_38] : memref<1x272xf32, #tpu.memory_space<vmem>>, vector<1x272xf32>
    %37 = vector.broadcast %36 : vector<1x272xf32> to vector<17x272xf32>
    %38 = arith.addf %35, %37 : vector<17x272xf32>
    %cst_39 = arith.constant 0.000000e+00 : f32
    %39 = vector.broadcast %cst_39 : f32 to vector<17x272xf32>
    %40 = arith.maximumf %38, %39 : vector<17x272xf32>
    %c0_40 = arith.constant 0 : index
    %c0_41 = arith.constant 0 : index
    %c0_42 = arith.constant 0 : index
    %41 = vector.load %arg7[%c0_40, %c0_41, %c0_42] : memref<5x7x17xf32, #tpu.memory_space<vmem>>, vector<1x7x17xf32>
    %42 = vector.shape_cast %41 : vector<1x7x17xf32> to vector<7x17xf32>
    %cst_43 = arith.constant dense<0.000000e+00> : vector<7x272xf32>
    %43 = tpu.matmul %42, %40, %cst_43 {dimension_numbers = #tpu.dot_dimension_numbers<[1], [0], [0], [1], [0, 0, 1, 1], [], []>} : vector<7x17xf32>, vector<17x272xf32>, vector<7x272xf32> -> vector<7x272xf32>
    %c0_44 = arith.constant 0 : index
    %c0_45 = arith.constant 0 : index
    %c0_46 = arith.constant 0 : index
    %44 = vector.load %arg8[%c0_44, %c0_45, %c0_46] : memref<5x272x448xf32, #tpu.memory_space<vmem>>, vector<1x272x448xf32>
    %45 = vector.shape_cast %44 : vector<1x272x448xf32> to vector<272x448xf32>
    %cst_47 = arith.constant dense<0.000000e+00> : vector<7x448xf32>
    %46 = tpu.matmul %43, %45, %cst_47 {dimension_numbers = #tpu.dot_dimension_numbers<[1], [0], [0], [1], [0, 0, 1, 1], [], []>} : vector<7x272xf32>, vector<272x448xf32>, vector<7x448xf32> -> vector<7x448xf32>
    %c1_48 = arith.constant 1 : index
    %c0_49 = arith.constant 0 : index
    %c0_50 = arith.constant 0 : index
    %47 = vector.load %arg7[%c1_48, %c0_49, %c0_50] : memref<5x7x17xf32, #tpu.memory_space<vmem>>, vector<1x7x17xf32>
    %48 = vector.shape_cast %47 : vector<1x7x17xf32> to vector<7x17xf32>
    %cst_51 = arith.constant dense<0.000000e+00> : vector<7x272xf32>
    %49 = tpu.matmul %48, %40, %cst_51 {dimension_numbers = #tpu.dot_dimension_numbers<[1], [0], [0], [1], [0, 0, 1, 1], [], []>} : vector<7x17xf32>, vector<17x272xf32>, vector<7x272xf32> -> vector<7x272xf32>
    %c1_52 = arith.constant 1 : index
    %c0_53 = arith.constant 0 : index
    %c0_54 = arith.constant 0 : index
    %50 = vector.load %arg8[%c1_52, %c0_53, %c0_54] : memref<5x272x448xf32, #tpu.memory_space<vmem>>, vector<1x272x448xf32>
    %51 = vector.shape_cast %50 : vector<1x272x448xf32> to vector<272x448xf32>
    %cst_55 = arith.constant dense<0.000000e+00> : vector<7x448xf32>
    %52 = tpu.matmul %49, %51, %cst_55 {dimension_numbers = #tpu.dot_dimension_numbers<[1], [0], [0], [1], [0, 0, 1, 1], [], []>} : vector<7x272xf32>, vector<272x448xf32>, vector<7x448xf32> -> vector<7x448xf32>
    %53 = arith.addf %46, %52 : vector<7x448xf32>
    %c2_56 = arith.constant 2 : index
    %c0_57 = arith.constant 0 : index
    %c0_58 = arith.constant 0 : index
    %54 = vector.load %arg7[%c2_56, %c0_57, %c0_58] : memref<5x7x17xf32, #tpu.memory_space<vmem>>, vector<1x7x17xf32>
    %55 = vector.shape_cast %54 : vector<1x7x17xf32> to vector<7x17xf32>
    %cst_59 = arith.constant dense<0.000000e+00> : vector<7x272xf32>
    %56 = tpu.matmul %55, %40, %cst_59 {dimension_numbers = #tpu.dot_dimension_numbers<[1], [0], [0], [1], [0, 0, 1, 1], [], []>} : vector<7x17xf32>, vector<17x272xf32>, vector<7x272xf32> -> vector<7x272xf32>
    %c2_60 = arith.constant 2 : index
    %c0_61 = arith.constant 0 : index
    %c0_62 = arith.constant 0 : index
    %57 = vector.load %arg8[%c2_60, %c0_61, %c0_62] : memref<5x272x448xf32, #tpu.memory_space<vmem>>, vector<1x272x448xf32>
    %58 = vector.shape_cast %57 : vector<1x272x448xf32> to vector<272x448xf32>
    %cst_63 = arith.constant dense<0.000000e+00> : vector<7x448xf32>
    %59 = tpu.matmul %56, %58, %cst_63 {dimension_numbers = #tpu.dot_dimension_numbers<[1], [0], [0], [1], [0, 0, 1, 1], [], []>} : vector<7x272xf32>, vector<272x448xf32>, vector<7x448xf32> -> vector<7x448xf32>
    %60 = arith.addf %53, %59 : vector<7x448xf32>
    %c3_64 = arith.constant 3 : index
    %c0_65 = arith.constant 0 : index
    %c0_66 = arith.constant 0 : index
    %61 = vector.load %arg7[%c3_64, %c0_65, %c0_66] : memref<5x7x17xf32, #tpu.memory_space<vmem>>, vector<1x7x17xf32>
    %62 = vector.shape_cast %61 : vector<1x7x17xf32> to vector<7x17xf32>
    %cst_67 = arith.constant dense<0.000000e+00> : vector<7x272xf32>
    %63 = tpu.matmul %62, %40, %cst_67 {dimension_numbers = #tpu.dot_dimension_numbers<[1], [0], [0], [1], [0, 0, 1, 1], [], []>} : vector<7x17xf32>, vector<17x272xf32>, vector<7x272xf32> -> vector<7x272xf32>
    %c3_68 = arith.constant 3 : index
    %c0_69 = arith.constant 0 : index
    %c0_70 = arith.constant 0 : index
    %64 = vector.load %arg8[%c3_68, %c0_69, %c0_70] : memref<5x272x448xf32, #tpu.memory_space<vmem>>, vector<1x272x448xf32>
    %65 = vector.shape_cast %64 : vector<1x272x448xf32> to vector<272x448xf32>
    %cst_71 = arith.constant dense<0.000000e+00> : vector<7x448xf32>
    %66 = tpu.matmul %63, %65, %cst_71 {dimension_numbers = #tpu.dot_dimension_numbers<[1], [0], [0], [1], [0, 0, 1, 1], [], []>} : vector<7x272xf32>, vector<272x448xf32>, vector<7x448xf32> -> vector<7x448xf32>
    %67 = arith.addf %60, %66 : vector<7x448xf32>
    %c4_72 = arith.constant 4 : index
    %c0_73 = arith.constant 0 : index
    %c0_74 = arith.constant 0 : index
    %68 = vector.load %arg7[%c4_72, %c0_73, %c0_74] : memref<5x7x17xf32, #tpu.memory_space<vmem>>, vector<1x7x17xf32>
    %69 = vector.shape_cast %68 : vector<1x7x17xf32> to vector<7x17xf32>
    %cst_75 = arith.constant dense<0.000000e+00> : vector<7x272xf32>
    %70 = tpu.matmul %69, %40, %cst_75 {dimension_numbers = #tpu.dot_dimension_numbers<[1], [0], [0], [1], [0, 0, 1, 1], [], []>} : vector<7x17xf32>, vector<17x272xf32>, vector<7x272xf32> -> vector<7x272xf32>
    %c4_76 = arith.constant 4 : index
    %c0_77 = arith.constant 0 : index
    %c0_78 = arith.constant 0 : index
    %71 = vector.load %arg8[%c4_76, %c0_77, %c0_78] : memref<5x272x448xf32, #tpu.memory_space<vmem>>, vector<1x272x448xf32>
    %72 = vector.shape_cast %71 : vector<1x272x448xf32> to vector<272x448xf32>
    %cst_79 = arith.constant dense<0.000000e+00> : vector<7x448xf32>
    %73 = tpu.matmul %70, %72, %cst_79 {dimension_numbers = #tpu.dot_dimension_numbers<[1], [0], [0], [1], [0, 0, 1, 1], [], []>} : vector<7x272xf32>, vector<272x448xf32>, vector<7x448xf32> -> vector<7x448xf32>
    %74 = arith.addf %67, %73 : vector<7x448xf32>
    %c0_80 = arith.constant 0 : index
    %c0_81 = arith.constant 0 : index
    %75 = vector.load %arg9[%c0_80, %c0_81] : memref<1x448xf32, #tpu.memory_space<vmem>>, vector<1x448xf32>
    %76 = vector.broadcast %75 : vector<1x448xf32> to vector<7x448xf32>
    %77 = arith.addf %74, %76 : vector<7x448xf32>
    %cst_82 = arith.constant 0.000000e+00 : f32
    %78 = vector.broadcast %cst_82 : f32 to vector<7x448xf32>
    %79 = arith.maximumf %77, %78 : vector<7x448xf32>
    %c0_83 = arith.constant 0 : index
    %c0_84 = arith.constant 0 : index
    %c0_85 = arith.constant 0 : index
    %80 = vector.load %arg10[%c0_83, %c0_84, %c0_85] : memref<5x2x7xf32, #tpu.memory_space<vmem>>, vector<1x2x7xf32>
    %81 = vector.shape_cast %80 : vector<1x2x7xf32> to vector<2x7xf32>
    %cst_86 = arith.constant dense<0.000000e+00> : vector<2x448xf32>
    %82 = tpu.matmul %81, %79, %cst_86 {dimension_numbers = #tpu.dot_dimension_numbers<[1], [0], [0], [1], [0, 0, 1, 1], [], []>} : vector<2x7xf32>, vector<7x448xf32>, vector<2x448xf32> -> vector<2x448xf32>
    %c0_87 = arith.constant 0 : index
    %c0_88 = arith.constant 0 : index
    %c0_89 = arith.constant 0 : index
    %83 = vector.load %arg11[%c0_87, %c0_88, %c0_89] : memref<5x448x512xf32, #tpu.memory_space<vmem>>, vector<1x448x512xf32>
    %84 = vector.shape_cast %83 : vector<1x448x512xf32> to vector<448x512xf32>
    %cst_90 = arith.constant dense<0.000000e+00> : vector<2x512xf32>
    %85 = tpu.matmul %82, %84, %cst_90 {dimension_numbers = #tpu.dot_dimension_numbers<[1], [0], [0], [1], [0, 0, 1, 1], [], []>} : vector<2x448xf32>, vector<448x512xf32>, vector<2x512xf32> -> vector<2x512xf32>
    %c1_91 = arith.constant 1 : index
    %c0_92 = arith.constant 0 : index
    %c0_93 = arith.constant 0 : index
    %86 = vector.load %arg10[%c1_91, %c0_92, %c0_93] : memref<5x2x7xf32, #tpu.memory_space<vmem>>, vector<1x2x7xf32>
    %87 = vector.shape_cast %86 : vector<1x2x7xf32> to vector<2x7xf32>
    %cst_94 = arith.constant dense<0.000000e+00> : vector<2x448xf32>
    %88 = tpu.matmul %87, %79, %cst_94 {dimension_numbers = #tpu.dot_dimension_numbers<[1], [0], [0], [1], [0, 0, 1, 1], [], []>} : vector<2x7xf32>, vector<7x448xf32>, vector<2x448xf32> -> vector<2x448xf32>
    %c1_95 = arith.constant 1 : index
    %c0_96 = arith.constant 0 : index
    %c0_97 = arith.constant 0 : index
    %89 = vector.load %arg11[%c1_95, %c0_96, %c0_97] : memref<5x448x512xf32, #tpu.memory_space<vmem>>, vector<1x448x512xf32>
    %90 = vector.shape_cast %89 : vector<1x448x512xf32> to vector<448x512xf32>
    %cst_98 = arith.constant dense<0.000000e+00> : vector<2x512xf32>
    %91 = tpu.matmul %88, %90, %cst_98 {dimension_numbers = #tpu.dot_dimension_numbers<[1], [0], [0], [1], [0, 0, 1, 1], [], []>} : vector<2x448xf32>, vector<448x512xf32>, vector<2x512xf32> -> vector<2x512xf32>
    %92 = arith.addf %85, %91 : vector<2x512xf32>
    %c2_99 = arith.constant 2 : index
    %c0_100 = arith.constant 0 : index
    %c0_101 = arith.constant 0 : index
    %93 = vector.load %arg10[%c2_99, %c0_100, %c0_101] : memref<5x2x7xf32, #tpu.memory_space<vmem>>, vector<1x2x7xf32>
    %94 = vector.shape_cast %93 : vector<1x2x7xf32> to vector<2x7xf32>
    %cst_102 = arith.constant dense<0.000000e+00> : vector<2x448xf32>
    %95 = tpu.matmul %94, %79, %cst_102 {dimension_numbers = #tpu.dot_dimension_numbers<[1], [0], [0], [1], [0, 0, 1, 1], [], []>} : vector<2x7xf32>, vector<7x448xf32>, vector<2x448xf32> -> vector<2x448xf32>
    %c2_103 = arith.constant 2 : index
    %c0_104 = arith.constant 0 : index
    %c0_105 = arith.constant 0 : index
    %96 = vector.load %arg11[%c2_103, %c0_104, %c0_105] : memref<5x448x512xf32, #tpu.memory_space<vmem>>, vector<1x448x512xf32>
    %97 = vector.shape_cast %96 : vector<1x448x512xf32> to vector<448x512xf32>
    %cst_106 = arith.constant dense<0.000000e+00> : vector<2x512xf32>
    %98 = tpu.matmul %95, %97, %cst_106 {dimension_numbers = #tpu.dot_dimension_numbers<[1], [0], [0], [1], [0, 0, 1, 1], [], []>} : vector<2x448xf32>, vector<448x512xf32>, vector<2x512xf32> -> vector<2x512xf32>
    %99 = arith.addf %92, %98 : vector<2x512xf32>
    %c3_107 = arith.constant 3 : index
    %c0_108 = arith.constant 0 : index
    %c0_109 = arith.constant 0 : index
    %100 = vector.load %arg10[%c3_107, %c0_108, %c0_109] : memref<5x2x7xf32, #tpu.memory_space<vmem>>, vector<1x2x7xf32>
    %101 = vector.shape_cast %100 : vector<1x2x7xf32> to vector<2x7xf32>
    %cst_110 = arith.constant dense<0.000000e+00> : vector<2x448xf32>
    %102 = tpu.matmul %101, %79, %cst_110 {dimension_numbers = #tpu.dot_dimension_numbers<[1], [0], [0], [1], [0, 0, 1, 1], [], []>} : vector<2x7xf32>, vector<7x448xf32>, vector<2x448xf32> -> vector<2x448xf32>
    %c3_111 = arith.constant 3 : index
    %c0_112 = arith.constant 0 : index
    %c0_113 = arith.constant 0 : index
    %103 = vector.load %arg11[%c3_111, %c0_112, %c0_113] : memref<5x448x512xf32, #tpu.memory_space<vmem>>, vector<1x448x512xf32>
    %104 = vector.shape_cast %103 : vector<1x448x512xf32> to vector<448x512xf32>
    %cst_114 = arith.constant dense<0.000000e+00> : vector<2x512xf32>
    %105 = tpu.matmul %102, %104, %cst_114 {dimension_numbers = #tpu.dot_dimension_numbers<[1], [0], [0], [1], [0, 0, 1, 1], [], []>} : vector<2x448xf32>, vector<448x512xf32>, vector<2x512xf32> -> vector<2x512xf32>
    %106 = arith.addf %99, %105 : vector<2x512xf32>
    %c4_115 = arith.constant 4 : index
    %c0_116 = arith.constant 0 : index
    %c0_117 = arith.constant 0 : index
    %107 = vector.load %arg10[%c4_115, %c0_116, %c0_117] : memref<5x2x7xf32, #tpu.memory_space<vmem>>, vector<1x2x7xf32>
    %108 = vector.shape_cast %107 : vector<1x2x7xf32> to vector<2x7xf32>
    %cst_118 = arith.constant dense<0.000000e+00> : vector<2x448xf32>
    %109 = tpu.matmul %108, %79, %cst_118 {dimension_numbers = #tpu.dot_dimension_numbers<[1], [0], [0], [1], [0, 0, 1, 1], [], []>} : vector<2x7xf32>, vector<7x448xf32>, vector<2x448xf32> -> vector<2x448xf32>
    %c4_119 = arith.constant 4 : index
    %c0_120 = arith.constant 0 : index
    %c0_121 = arith.constant 0 : index
    %110 = vector.load %arg11[%c4_119, %c0_120, %c0_121] : memref<5x448x512xf32, #tpu.memory_space<vmem>>, vector<1x448x512xf32>
    %111 = vector.shape_cast %110 : vector<1x448x512xf32> to vector<448x512xf32>
    %cst_122 = arith.constant dense<0.000000e+00> : vector<2x512xf32>
    %112 = tpu.matmul %109, %111, %cst_122 {dimension_numbers = #tpu.dot_dimension_numbers<[1], [0], [0], [1], [0, 0, 1, 1], [], []>} : vector<2x448xf32>, vector<448x512xf32>, vector<2x512xf32> -> vector<2x512xf32>
    %113 = arith.addf %106, %112 : vector<2x512xf32>
    %c0_123 = arith.constant 0 : index
    %c0_124 = arith.constant 0 : index
    %114 = vector.load %arg12[%c0_123, %c0_124] : memref<1x512xf32, #tpu.memory_space<vmem>>, vector<1x512xf32>
    %115 = vector.broadcast %114 : vector<1x512xf32> to vector<2x512xf32>
    %116 = arith.addf %113, %115 : vector<2x512xf32>
    %cst_125 = arith.constant 0.000000e+00 : f32
    %117 = vector.broadcast %cst_125 : f32 to vector<2x512xf32>
    %118 = arith.maximumf %116, %117 : vector<2x512xf32>
    %119 = vector.extract_strided_slice %118 {offsets = [0, 0], sizes = [2, 256], strides = [1, 1]} : vector<2x512xf32> to vector<2x256xf32>
    %120 = vector.extract_strided_slice %118 {offsets = [0, 256], sizes = [2, 256], strides = [1, 1]} : vector<2x512xf32> to vector<2x256xf32>
    %121 = arith.addf %119, %120 : vector<2x256xf32>
    %cst_126 = arith.constant dense<0.000000e+00> : vector<256xf32>
    %122 = vector.multi_reduction <add>, %121, %cst_126 [0] : vector<2x256xf32> to vector<256xf32>
    %123 = vector.shape_cast %122 : vector<256xf32> to vector<1x256xf32>
    %cst_127 = arith.constant 2.500000e-01 : f32
    %124 = vector.broadcast %cst_127 : f32 to vector<1x256xf32>
    %125 = arith.mulf %123, %124 : vector<1x256xf32>
    %c0_128 = arith.constant 0 : index
    %c0_129 = arith.constant 0 : index
    %c0_130 = arith.constant 0 : index
    %126 = vector.load %arg2[%c0_128, %c0_129, %c0_130] : memref<1x1x8xf32, #tpu.memory_space<vmem>>, vector<1x1x8xf32>
    %127 = vector.shape_cast %126 : vector<1x1x8xf32> to vector<1x8xf32>
    %c0_131 = arith.constant 0 : index
    %c0_132 = arith.constant 0 : index
    %128 = vector.load %arg13[%c0_131, %c0_132] : memref<8x32xf32, #tpu.memory_space<vmem>>, vector<8x32xf32>
    %cst_133 = arith.constant dense<0.000000e+00> : vector<1x32xf32>
    %129 = tpu.matmul %127, %128, %cst_133 {dimension_numbers = #tpu.dot_dimension_numbers<[1], [0], [0], [1], [0, 0, 1, 1], [], []>} : vector<1x8xf32>, vector<8x32xf32>, vector<1x32xf32> -> vector<1x32xf32>
    %c0_134 = arith.constant 0 : index
    %c0_135 = arith.constant 0 : index
    %130 = vector.load %arg14[%c0_134, %c0_135] : memref<1x32xf32, #tpu.memory_space<vmem>>, vector<1x32xf32>
    %131 = arith.addf %129, %130 : vector<1x32xf32>
    %cst_136 = arith.constant 0.000000e+00 : f32
    %132 = vector.broadcast %cst_136 : f32 to vector<1x32xf32>
    %133 = arith.maximumf %131, %132 : vector<1x32xf32>
    %c0_137 = arith.constant 0 : index
    %c0_138 = arith.constant 0 : index
    %134 = vector.load %arg15[%c0_137, %c0_138] : memref<256x256xf32, #tpu.memory_space<vmem>>, vector<256x256xf32>
    %cst_139 = arith.constant dense<0.000000e+00> : vector<1x256xf32>
    %135 = tpu.matmul %125, %134, %cst_139 {dimension_numbers = #tpu.dot_dimension_numbers<[1], [0], [0], [1], [0, 0, 1, 1], [], []>} : vector<1x256xf32>, vector<256x256xf32>, vector<1x256xf32> -> vector<1x256xf32>
    %c0_140 = arith.constant 0 : index
    %c0_141 = arith.constant 0 : index
    %136 = vector.load %arg16[%c0_140, %c0_141] : memref<32x256xf32, #tpu.memory_space<vmem>>, vector<32x256xf32>
    %cst_142 = arith.constant dense<0.000000e+00> : vector<1x256xf32>
    %137 = tpu.matmul %133, %136, %cst_142 {dimension_numbers = #tpu.dot_dimension_numbers<[1], [0], [0], [1], [0, 0, 1, 1], [], []>} : vector<1x32xf32>, vector<32x256xf32>, vector<1x256xf32> -> vector<1x256xf32>
    %138 = arith.addf %135, %137 : vector<1x256xf32>
    %c0_143 = arith.constant 0 : index
    %c0_144 = arith.constant 0 : index
    %c0_145 = arith.constant 0 : index
    %139 = vector.load %arg3[%c0_143, %c0_144, %c0_145] : memref<1x1x6xf32, #tpu.memory_space<vmem>>, vector<1x1x6xf32>
    %140 = vector.shape_cast %139 : vector<1x1x6xf32> to vector<1x6xf32>
    %c0_146 = arith.constant 0 : index
    %c0_147 = arith.constant 0 : index
    %141 = vector.load %arg17[%c0_146, %c0_147] : memref<6x256xf32, #tpu.memory_space<vmem>>, vector<6x256xf32>
    %cst_148 = arith.constant dense<0.000000e+00> : vector<1x256xf32>
    %142 = tpu.matmul %140, %141, %cst_148 {dimension_numbers = #tpu.dot_dimension_numbers<[1], [0], [0], [1], [0, 0, 1, 1], [], []>} : vector<1x6xf32>, vector<6x256xf32>, vector<1x256xf32> -> vector<1x256xf32>
    %143 = arith.addf %138, %142 : vector<1x256xf32>
    %c0_149 = arith.constant 0 : index
    %c0_150 = arith.constant 0 : index
    %144 = vector.load %arg18[%c0_149, %c0_150] : memref<1x256xf32, #tpu.memory_space<vmem>>, vector<1x256xf32>
    %145 = arith.addf %143, %144 : vector<1x256xf32>
    %cst_151 = arith.constant 0.000000e+00 : f32
    %146 = vector.broadcast %cst_151 : f32 to vector<1x256xf32>
    %147 = arith.maximumf %145, %146 : vector<1x256xf32>
    %c0_152 = arith.constant 0 : index
    %c0_153 = arith.constant 0 : index
    %148 = vector.load %arg19[%c0_152, %c0_153] : memref<256x64xf32, #tpu.memory_space<vmem>>, vector<256x64xf32>
    %cst_154 = arith.constant dense<0.000000e+00> : vector<1x64xf32>
    %149 = tpu.matmul %147, %148, %cst_154 {dimension_numbers = #tpu.dot_dimension_numbers<[1], [0], [0], [1], [0, 0, 1, 1], [], []>} : vector<1x256xf32>, vector<256x64xf32>, vector<1x64xf32> -> vector<1x64xf32>
    %c0_155 = arith.constant 0 : index
    %c0_156 = arith.constant 0 : index
    %150 = vector.load %arg20[%c0_155, %c0_156] : memref<1x64xf32, #tpu.memory_space<vmem>>, vector<1x64xf32>
    %151 = arith.addf %149, %150 : vector<1x64xf32>
    %cst_157 = arith.constant 0.000000e+00 : f32
    %152 = vector.broadcast %cst_157 : f32 to vector<1x64xf32>
    %153 = arith.maximumf %151, %152 : vector<1x64xf32>
    %c0_158 = arith.constant 0 : index
    %c0_159 = arith.constant 0 : index
    %154 = vector.load %arg21[%c0_158, %c0_159] : memref<64x12xf32, #tpu.memory_space<vmem>>, vector<64x12xf32>
    %cst_160 = arith.constant dense<0.000000e+00> : vector<1x12xf32>
    %155 = tpu.matmul %153, %154, %cst_160 {dimension_numbers = #tpu.dot_dimension_numbers<[1], [0], [0], [1], [0, 0, 1, 1], [], []>} : vector<1x64xf32>, vector<64x12xf32>, vector<1x12xf32> -> vector<1x12xf32>
    %c0_161 = arith.constant 0 : index
    %c0_162 = arith.constant 0 : index
    %156 = vector.load %arg22[%c0_161, %c0_162] : memref<1x12xf32, #tpu.memory_space<vmem>>, vector<1x12xf32>
    %157 = arith.addf %155, %156 : vector<1x12xf32>
    %c0_163 = arith.constant 0 : index
    %c0_164 = arith.constant 0 : index
    %c0_165 = arith.constant 0 : index
    %158 = vector.load %arg23[%c0_163, %c0_164, %c0_165] : memref<1x1x12xf32, #tpu.memory_space<vmem>>, vector<1x1x12xf32>
    %159 = vector.shape_cast %158 : vector<1x1x12xf32> to vector<1x12xf32>
    %160 = vector.shape_cast %157 : vector<1x12xf32> to vector<1x1x12xf32>
    tpu.vector_store %arg23[%c0_163, %c0_164, %c0_165], %160 {strides = array<i32>} : memref<1x1x12xf32, #tpu.memory_space<vmem>>, vector<1x1x12xf32>,
    return
  }
  func.func @transform_0(%arg0: i32) -> (i32, i32, i32) {
    %c0_i32 = arith.constant 0 : i32
    %c0_i32_0 = arith.constant 0 : i32
    %c0_i32_1 = arith.constant 0 : i32
    return %arg0, %c0_i32, %c0_i32_0 : i32, i32, i32
  }
  func.func @transform_1(%arg0: i32) -> (i32, i32, i32) {
    %c0_i32 = arith.constant 0 : i32
    %c0_i32_0 = arith.constant 0 : i32
    %c0_i32_1 = arith.constant 0 : i32
    return %arg0, %c0_i32, %c0_i32_0 : i32, i32, i32
  }
  func.func @transform_2(%arg0: i32) -> (i32, i32, i32) {
    %c0_i32 = arith.constant 0 : i32
    %c0_i32_0 = arith.constant 0 : i32
    %c0_i32_1 = arith.constant 0 : i32
    return %arg0, %c0_i32, %c0_i32_0 : i32, i32, i32
  }
  func.func @transform_3(%arg0: i32) -> (i32, i32, i32) {
    %c0_i32 = arith.constant 0 : i32
    %c0_i32_0 = arith.constant 0 : i32
    %c0_i32_1 = arith.constant 0 : i32
    %c0_i32_2 = arith.constant 0 : i32
    return %c0_i32, %c0_i32_0, %c0_i32_1 : i32, i32, i32
  }
  func.func @transform_4(%arg0: i32) -> (i32, i32, i32) {
    %c0_i32 = arith.constant 0 : i32
    %c0_i32_0 = arith.constant 0 : i32
    %c0_i32_1 = arith.constant 0 : i32
    %c0_i32_2 = arith.constant 0 : i32
    return %c0_i32, %c0_i32_0, %c0_i32_1 : i32, i32, i32
  }
  func.func @transform_5(%arg0: i32) -> (i32, i32) {
    %c0_i32 = arith.constant 0 : i32
    %c0_i32_0 = arith.constant 0 : i32
    %c0_i32_1 = arith.constant 0 : i32
    return %c0_i32, %c0_i32_0 : i32, i32
  }
  func.func @transform_6(%arg0: i32) -> (i32, i32, i32) {
    %c0_i32 = arith.constant 0 : i32
    %c0_i32_0 = arith.constant 0 : i32
    %c0_i32_1 = arith.constant 0 : i32
    %c0_i32_2 = arith.constant 0 : i32
    return %c0_i32, %c0_i32_0, %c0_i32_1 : i32, i32, i32
  }
  func.func @transform_7(%arg0: i32) -> (i32, i32, i32) {
    %c0_i32 = arith.constant 0 : i32
    %c0_i32_0 = arith.constant 0 : i32
    %c0_i32_1 = arith.constant 0 : i32
    %c0_i32_2 = arith.constant 0 : i32
    return %c0_i32, %c0_i32_0, %c0_i32_1 : i32, i32, i32
  }
  func.func @transform_8(%arg0: i32) -> (i32, i32) {
    %c0_i32 = arith.constant 0 : i32
    %c0_i32_0 = arith.constant 0 : i32
    %c0_i32_1 = arith.constant 0 : i32
    return %c0_i32, %c0_i32_0 : i32, i32
  }
  func.func @transform_9(%arg0: i32) -> (i32, i32, i32) {
    %c0_i32 = arith.constant 0 : i32
    %c0_i32_0 = arith.constant 0 : i32
    %c0_i32_1 = arith.constant 0 : i32
    %c0_i32_2 = arith.constant 0 : i32
    return %c0_i32, %c0_i32_0, %c0_i32_1 : i32, i32, i32
  }
  func.func @transform_10(%arg0: i32) -> (i32, i32, i32) {
    %c0_i32 = arith.constant 0 : i32
    %c0_i32_0 = arith.constant 0 : i32
    %c0_i32_1 = arith.constant 0 : i32
    %c0_i32_2 = arith.constant 0 : i32
    return %c0_i32, %c0_i32_0, %c0_i32_1 : i32, i32, i32
  }
  func.func @transform_11(%arg0: i32) -> (i32, i32) {
    %c0_i32 = arith.constant 0 : i32
    %c0_i32_0 = arith.constant 0 : i32
    %c0_i32_1 = arith.constant 0 : i32
    return %c0_i32, %c0_i32_0 : i32, i32
  }
  func.func @transform_12(%arg0: i32) -> (i32, i32) {
    %c0_i32 = arith.constant 0 : i32
    %c0_i32_0 = arith.constant 0 : i32
    %c0_i32_1 = arith.constant 0 : i32
    return %c0_i32, %c0_i32_0 : i32, i32
  }
  func.func @transform_13(%arg0: i32) -> (i32, i32) {
    %c0_i32 = arith.constant 0 : i32
    %c0_i32_0 = arith.constant 0 : i32
    %c0_i32_1 = arith.constant 0 : i32
    return %c0_i32, %c0_i32_0 : i32, i32
  }
  func.func @transform_14(%arg0: i32) -> (i32, i32) {
    %c0_i32 = arith.constant 0 : i32
    %c0_i32_0 = arith.constant 0 : i32
    %c0_i32_1 = arith.constant 0 : i32
    return %c0_i32, %c0_i32_0 : i32, i32
  }
  func.func @transform_15(%arg0: i32) -> (i32, i32) {
    %c0_i32 = arith.constant 0 : i32
    %c0_i32_0 = arith.constant 0 : i32
    %c0_i32_1 = arith.constant 0 : i32
    return %c0_i32, %c0_i32_0 : i32, i32
  }
  func.func @transform_16(%arg0: i32) -> (i32, i32) {
    %c0_i32 = arith.constant 0 : i32
    %c0_i32_0 = arith.constant 0 : i32
    %c0_i32_1 = arith.constant 0 : i32
    return %c0_i32, %c0_i32_0 : i32, i32
  }
  func.func @transform_17(%arg0: i32) -> (i32, i32) {
    %c0_i32 = arith.constant 0 : i32
    %c0_i32_0 = arith.constant 0 : i32
    %c0_i32_1 = arith.constant 0 : i32
    return %c0_i32, %c0_i32_0 : i32, i32
  }
  func.func @transform_18(%arg0: i32) -> (i32, i32) {
    %c0_i32 = arith.constant 0 : i32
    %c0_i32_0 = arith.constant 0 : i32
    %c0_i32_1 = arith.constant 0 : i32
    return %c0_i32, %c0_i32_0 : i32, i32
  }
  func.func @transform_19(%arg0: i32) -> (i32, i32) {
    %c0_i32 = arith.constant 0 : i32
    %c0_i32_0 = arith.constant 0 : i32
    %c0_i32_1 = arith.constant 0 : i32
    return %c0_i32, %c0_i32_0 : i32, i32
  }
  func.func @transform_20(%arg0: i32) -> (i32, i32) {
    %c0_i32 = arith.constant 0 : i32
    %c0_i32_0 = arith.constant 0 : i32
    %c0_i32_1 = arith.constant 0 : i32
    return %c0_i32, %c0_i32_0 : i32, i32
  }
  func.func @transform_21(%arg0: i32) -> (i32, i32) {
    %c0_i32 = arith.constant 0 : i32
    %c0_i32_0 = arith.constant 0 : i32
    %c0_i32_1 = arith.constant 0 : i32
    return %c0_i32, %c0_i32_0 : i32, i32
  }
  func.func @transform_22(%arg0: i32) -> (i32, i32, i32) {
    %c0_i32 = arith.constant 0 : i32
    %c0_i32_0 = arith.constant 0 : i32
    %c0_i32_1 = arith.constant 0 : i32
    return %arg0, %c0_i32, %c0_i32_0 : i32, i32, i32
  }
}

</mosaic_0001>

<bundles_post_ra>
// kernel: qnetwork_forward.1
= control target key start
LH: loop header
LB: loop body
LE: loop exit
PB: predicated region body
PF: predicated region fallthrough
CT: control target
= control target key end

     0   :  { %s12444_s0 = inlined_call_operand.vmem [shape: f32[2,37,148], index: 0, kind: input, shape index: {}]   ;;  %s12445_s1 = inlined_call_operand.hbm [shape: f32[2,1,8], index: 1, kind: input, shape index: {}]   ;;  %s12446_s2 = inlined_call_operand.hbm [shape: f32[2,1,6], index: 2, kind: input, shape index: {}]   ;;  %s12447_s3 = inlined_call_operand.hbm [shape: f32[5,17,37], index: 3, kind: input, shape index: {}]   ;;  %s12448_s4 = inlined_call_operand.hbm [shape: f32[5,148,272], index: 4, kind: input, shape index: {}]   ;;  %s12449_s5 = inlined_call_operand.hbm [shape: f32[1,272], index: 5, kind: input, shape index: {}]   ;;  %s12450_s6 = inlined_call_operand.hbm [shape: f32[5,7,17], index: 6, kind: input, shape index: {}]   ;;  %s12451_s7 = inlined_call_operand.hbm [shape: f32[5,272,448], index: 7, kind: input, shape index: {}]   ;;  %s12452_s8 = inlined_call_operand.hbm [shape: f32[1,448], index: 8, kind: input, shape index: {}]   ;;  %s12453_s9 = inlined_call_operand.hbm [shape: f32[5,2,7], index: 9, kind: input, shape index: {}]   ;;  %s12454_s10 = inlined_call_operand.hbm [shape: f32[5,448,512], index: 10, kind: input, shape index: {}]   ;;  %s12455_s11 = inlined_call_operand.hbm [shape: f32[1,512], index: 11, kind: input, shape index: {}]   ;;  %s12456_s12 = inlined_call_operand.hbm [shape: f32[8,32], index: 12, kind: input, shape index: {}]   ;;  %s12457_s13 = inlined_call_operand.hbm [shape: f32[1,32], index: 13, kind: input, shape index: {}]   ;;  %s12458_s14 = inlined_call_operand.hbm [shape: f32[256,256], index: 14, kind: input, shape index: {}]   ;;  %s12459_s15 = inlined_call_operand.hbm [shape: f32[32,256], index: 15, kind: input, shape index: {}]   ;;  %s12460_s16 = inlined_call_operand.hbm [shape: f32[6,256], index: 16, kind: input, shape index: {}]   ;;  %s12461_s17 = inlined_call_operand.hbm [shape: f32[1,256], index: 17, kind: input, shape index: {}]   ;;  %s12462_s18 = inlined_call_operand.vmem [shape: f32[256,64], index: 18, kind: input, shape index: {}]   ;;  %s12463_s19 = inlined_call_operand.hbm [shape: f32[1,64], index: 19, kind: input, shape index: {}]   ;;  %s12464_s20 = inlined_call_operand.vmem [shape: f32[64,12], index: 20, kind: input, shape index: {}]   ;;  %s12465_s21 = inlined_call_operand.hbm [shape: f32[1,12], index: 21, kind: input, shape index: {}]   ;;  %s12466_s22 = inlined_call_operand.vmem [shape: f32[2,1,12], index: 22, kind: output, shape index: {}]  }
   0x1   :  { %12479 = sst [smem:[#allocation45_spill]] %s12444_s0 }
   0x2   :  { %12480 = sst [smem:[#allocation46_spill]] %s12445_s1 }
   0x3   :  { %12481 = sst [smem:[#allocation47_spill]] %s12446_s2 }
   0x4   :  { %12482 = sst [smem:[#allocation48_spill]] %s12447_s3 }
   0x5   :  { %12483 = sst [smem:[#allocation49_spill]] %s12448_s4 }
   0x6   :  { %12484 = sst [smem:[#allocation50_spill]] %s12449_s5 }
   0x7   :  { %12485 = sst [smem:[#allocation51_spill]] %s12450_s6 }
   0x8   :  { %12486 = sst [smem:[#allocation52_spill]] %s12451_s7 }
   0x9   :  { %12487 = sst [smem:[#allocation53_spill]] %s12452_s8 }
   0xa   :  { %12488 = sst [smem:[#allocation54_spill]] %s12453_s9 }
   0xb   :  { %12489 = sst [smem:[#allocation55_spill]] %s12454_s10 }
   0xc   :  { %12490 = sst [smem:[#allocation56_spill]] %s12455_s11 }
   0xd   :  { %12491 = sst [smem:[#allocation57_spill]] %s12462_s18 }
   0xe   :  { %12492 = sst [smem:[#allocation58_spill]] %s12464_s20 }
   0xf   :  { %12493 = sst [smem:[#allocation59_spill]] %s12466_s22 }
  0x10   :  { %27 = vsyncpa [#allocation3], 0 }
  0x11   :  { %29 = vsyncpa [#allocation3 + $0x1], 0 }
  0x12   :  { %30 = vsyncpa [#allocation5], 0 }
  0x13   :  { %32 = vsyncpa [#allocation5 + $0x1], 0 }
  0x14   :  { %33 = vsyncpa [#allocation8], 0 }
  0x15   :  { %34 = vsyncpa [#allocation11], 0 }
  0x16   :  { %35 = vsyncpa [#allocation14], 0 }
  0x17   :  { %36 = vsyncpa [#allocation17], 0 }
  0x18   :  { %37 = vsyncpa [#allocation20], 0 }
  0x19   :  { %38 = vsyncpa [#allocation23], 0 }
  0x1a   :  { %39 = vsyncpa [#allocation26], 0 }
  0x1b   :  { %40 = vsyncpa [#allocation29], 0  ;;  %s11123_s3 = smov 0   ;;  %s11125_s28 = smov 0  }
  0x1c   :  { %s11127_s29 = smov 0   ;;  %s11129_s30 = smov 0  }
  0x1d LB: > { %12494 = sst [smem:[#allocation42_spill]] %s10964_s3  ;;  %s10978_s4 = smov [#allocation6]   ;;  %s10976_s30 = sphi %s11129_s30, %s12548_s30   ;;  %s10972_s29 = sphi %s11127_s29, %s12547_s29   ;;  %s10968_s28 = sphi %s11125_s28, %s12546_s28   ;;  %s10964_s3 = sphi %s11123_s3, %s12545_s3  }
  0x1e   : > { %s566_s0 = sshll.u32 %s10978_s4, 4  ;;  %s11144_s23 = sadd.s32 4294967295, %s10976_s30   ;;  %s567_s0 = int_to_ptr.vmem [resolvable:$true] %s566_s0 }
  0x1f   : > { %12495 = sst [smem:[#allocation43_spill]] %s11144_s23  ;;  %p9839_p0 = scmp.ge.s32.totalorder %s10976_s30, 1 }
  0x20   : > { %p12474_p1 = scmp.eq.s32.totalorder %s11144_s23, 0  ;;  %p554_p2 = scmp.lt.s32.totalorder %s10976_s30, 3 }
  0x21   : > { %s10979_s5 = smov [#allocation7]   ;;  %s10980_s25 = smov [#allocation10]  }
  0x22   : > { %p11149_p3 = pnand %p9839_p0, %p554_p2  ;;  %s579_s24 = sshll.u32 %s10979_s5, 4  ;;  %s11161_s24 = int_to_ptr.vmem [resolvable:$true] %s579_s24 }
  0x23   : > { %s11163_s26 = sshll.u32 %s10980_s25, 4  ;;  %s10415_s27 = scalar_lea.vmem %s567_s0, 1920  ;;  %s604_s26 = int_to_ptr.vmem [resolvable:$true] %s11163_s26 }
  0x24   : > { %s12496_s1 = scalar_select %p11149_p3, 1, 0 }
  0x25   : > { %p10240_p4 = pneg %p11149_p3  ;;  %p10416_p7 = scmp.ne.s32.totalorder %s567_s0, %s10415_s27 }
  0x26   : > { %12497 = sst [smem:[#allocation44_spill]] %s12496_s1  ;;  %p10423_p10 = scmp.lt.s32.totalorder %s567_s0, %s567_s0 }
  0x27   : > { %p11157_p5 = pnand %p10240_p4, %p12474_p1  ;;  %p10424_p11 = scmp.lt.s32.totalorder %s10415_s27, %s10415_s27 }
  0x29   : > { %p11167_p6 = pneg %p11157_p5  ;;  %p10425_p12 = por %p10424_p11, %p10423_p10 }
  0x2b   : > { %p10418_p8 = pnand %p10416_p7, %p11167_p6 }
  0x2d   : > { %p10419_p9 = pneg %p10418_p8 }
  0x2f   : > { %p10426_p13 = pnand %p10425_p12, %p10419_p9 }
  0x31   : > { %10429 = shalt.err (!%p10426_p13)
}
  0x32   : > { %s10981_s4 = smov 128   ;;  %s10982_s5 = smov 8  }
  0x33   : > { %s12500_s20 = sld [smem:[#allocation48_spill]]  ;;  %s10441_s18 = scalar_lea.vmem %s11161_s24, 36480 }
  0x34   : > { %p10442_p0 = scmp.ne.s32.totalorder %s11161_s24, %s10441_s18  ;;  %p10449_p7 = scmp.lt.s32.totalorder %s11161_s24, %s11161_s24 }
  0x35   : > { %p10450_p8 = scmp.lt.s32.totalorder %s10441_s18, %s10441_s18 }
  0x36   : > { %p10444_p2 = pnand %p10442_p0, %p11167_p6 }
  0x37   : > { %p10451_p9 = por %p10450_p8, %p10449_p7 }
  0x38   : > { %p10445_p4 = pneg %p10444_p2 }
  0x39   : > { %10243 = dma.hbm_to_vmem [thread:$0]  (!%p11157_p5), %s12500_s20, 1920, %s567_s0, [#allocation5], %s10981_s4, %s10981_s4, %s10982_s5  }
  0x3a   : > { %p10452_p10 = pnand %p10451_p9, %p10445_p4 }
  0x3c   : > { %10455 = shalt.err (!%p10452_p10)
}
  0x3d   : > { %s10983_s27 = smov 384   ;;  %s10984_s1 = smov 24  }
  0x3e   : > { %s12501_s0 = sld [smem:[#allocation49_spill]]  ;;  %s10467_s25 = scalar_lea.vmem %s604_s26, 640 }
  0x3f   : > { %p10468_p11 = scmp.ne.s32.totalorder %s604_s26, %s10467_s25  ;;  %p10475_p0 = scmp.lt.s32.totalorder %s604_s26, %s604_s26 }
  0x40   : > { %p10476_p2 = scmp.lt.s32.totalorder %s10467_s25, %s10467_s25 }
  0x41   : > { %p10470_p12 = pnand %p10468_p11, %p11167_p6 }
  0x42   : > { %p10477_p4 = por %p10476_p2, %p10475_p0 }
  0x43   : > { %p10471_p13 = pneg %p10470_p12 }
  0x44   : > { %10246 = dma.hbm_to_vmem [thread:$0]  (!%p11157_p5), %s12501_s0, 36480, %s11161_s24, [#allocation8], %s10983_s27, %s10983_s27, %s10984_s1  }
  0x45   : > { %p10478_p7 = pnand %p10477_p4, %p10471_p13 }
  0x47   : > { %10481 = shalt.err (!%p10478_p7)
}
  0x48   : > { %s12502_s3 = sld [smem:[#allocation51_spill]]  ;;  %s10985_s22 = smov [#allocation13]  }
  0x49   : > { %s630_s1 = sshll.u32 %s10985_s22, 4  ;;  %s631_s1 = int_to_ptr.vmem [resolvable:$true] %s630_s1 }
  0x4a   : > { %s10493_s24 = scalar_lea.vmem %s631_s1, 64  ;;  %p10501_p11 = scmp.lt.s32.totalorder %s631_s1, %s631_s1 }
  0x4b   : > { %p10494_p8 = scmp.ne.s32.totalorder %s631_s1, %s10493_s24  ;;  %p10502_p12 = scmp.lt.s32.totalorder %s10493_s24, %s10493_s24 }
  0x4d   : > { %p10496_p9 = pnand %p10494_p8, %p11167_p6  ;;  %p10503_p0 = por %p10502_p12, %p10501_p11 }
  0x4e   : > { %10252 = dma.hbm_to_vmem [thread:$0]  (!%p11157_p5), %s12502_s3, 640, %s604_s26, [#allocation11], %s10981_s4, %s10981_s4, %s10982_s5  }
  0x4f   : > { %p10497_p10 = pneg %p10496_p9 }
  0x51   : > { %p10504_p13 = pnand %p10503_p0, %p10497_p10 }
  0x53   : > { %10507 = shalt.err (!%p10504_p13)
}
  0x54   : > { %s12503_s8 = sld [smem:[#allocation53_spill]]  ;;  %s10986_s3 = smov [#allocation16]  }
  0x55   : > { %s653_s23 = sshll.u32 %s10986_s3, 4  ;;  %s10987_s26 = smov [#allocation19]   ;;  %s654_s23 = int_to_ptr.vmem [resolvable:$true] %s653_s23 }
  0x56   : > { %s678_s4 = sshll.u32 %s10987_s26, 4  ;;  %s10519_s5 = scalar_lea.vmem %s654_s23, 143360  ;;  %s679_s4 = int_to_ptr.vmem [resolvable:$true] %s678_s4 }
  0x57   : > { %p10520_p2 = scmp.ne.s32.totalorder %s654_s23, %s10519_s5  ;;  %p10527_p8 = scmp.lt.s32.totalorder %s654_s23, %s654_s23 }
  0x58   : > { %p10528_p9 = scmp.lt.s32.totalorder %s10519_s5, %s10519_s5 }
  0x59   : > { %p10522_p4 = pnand %p10520_p2, %p11167_p6 }
  0x5a   : > { %10258 = dma.hbm_to_vmem [thread:$0]  (!%p11157_p5), %s12503_s8, 64, %s631_s1, [#allocation14]  }
  0x5b   : > { %p10523_p7 = pneg %p10522_p4  ;;  %p10529_p10 = por %p10528_p9, %p10527_p8 }
  0x5d   : > { %p10530_p11 = pnand %p10529_p10, %p10523_p7 }
  0x5f   : > { %10533 = shalt.err (!%p10530_p11)
}
  0x60   : > { %s10988_s0 = smov 512   ;;  %s10989_s25 = smov 32  }
  0x61   : > { %s12504_s10 = sld [smem:[#allocation55_spill]]  ;;  %s10545_s1 = scalar_lea.vmem %s679_s4, 128 }
  0x62   : > { %p10546_p12 = scmp.ne.s32.totalorder %s679_s4, %s10545_s1  ;;  %p10553_p2 = scmp.lt.s32.totalorder %s679_s4, %s679_s4 }
  0x63   : > { %p10554_p4 = scmp.lt.s32.totalorder %s10545_s1, %s10545_s1 }
  0x64   : > { %p10548_p0 = pnand %p10546_p12, %p11167_p6 }
  0x65   : > { %p10555_p7 = por %p10554_p4, %p10553_p2 }
  0x66   : > { %p10549_p13 = pneg %p10548_p0 }
  0x67   : > { %10264 = dma.hbm_to_vmem [thread:$0]  (!%p11157_p5), %s12504_s10, 143360, %s654_s23, [#allocation17], %s10988_s0, %s10988_s0, %s10989_s25  }
  0x68   : > { %p10556_p8 = pnand %p10555_p7, %p10549_p13 }
  0x6a   : > { %10559 = shalt.err (!%p10556_p8)
}
  0x6b   : > { %10270 = dma.hbm_to_vmem [thread:$0]  (!%p11157_p5), %s12456_s12, 128, %s679_s4, [#allocation20]  }
  0x6c   : > { %s10990_s20 = smov [#allocation22]  }
  0x6d   : > { %s699_s3 = sshll.u32 %s10990_s20, 4  ;;  %s700_s3 = int_to_ptr.vmem [resolvable:$true] %s699_s3 }
  0x6e   : > { %s10571_s23 = scalar_lea.vmem %s700_s3, 8192  ;;  %p10579_p12 = scmp.lt.s32.totalorder %s700_s3, %s700_s3 }
  0x6f   : > { %p10572_p9 = scmp.ne.s32.totalorder %s700_s3, %s10571_s23  ;;  %p10580_p0 = scmp.lt.s32.totalorder %s10571_s23, %s10571_s23 }
  0x71   : > { %p10574_p10 = pnand %p10572_p9, %p11167_p6  ;;  %p10581_p2 = por %p10580_p0, %p10579_p12 }
  0x73   : > { %p10575_p11 = pneg %p10574_p10 }
  0x75   : > { %p10582_p13 = pnand %p10581_p2, %p10575_p11 }
  0x77   : > { %10585 = shalt.err (!%p10582_p13)
}
  0x78   : > { %s12475_s26 = smov 256   ;;  %s10992_s5 = smov 16  }
  0x79   : > { %10276 = dma.hbm_to_vmem [thread:$0]  (!%p11157_p5), %s12458_s14, 8192, %s700_s3, [#allocation23], %s12475_s26, %s12475_s26, %s10992_s5  }
  0x7a   : > { %s10993_s22 = smov [#allocation25]   ;;  %s10994_s24 = smov [#allocation28]  }
  0x7b   : > { %s726_s1 = sshll.u32 %s10993_s22, 4  ;;  %s751_s27 = sshll.u32 %s10994_s24, 4  ;;  %s727_s1 = int_to_ptr.vmem [resolvable:$true] %s726_s1  ;;  %s752_s27 = int_to_ptr.vmem [resolvable:$true] %s751_s27 }
  0x7c   : > { %s10597_s20 = scalar_lea.vmem %s727_s1, 256  ;;  %p10605_p9 = scmp.lt.s32.totalorder %s727_s1, %s727_s1 }
  0x7d   : > { %p10598_p4 = scmp.ne.s32.totalorder %s727_s1, %s10597_s20  ;;  %p10606_p10 = scmp.lt.s32.totalorder %s10597_s20, %s10597_s20 }
  0x7f   : > { %p10600_p7 = pnand %p10598_p4, %p11167_p6  ;;  %p10607_p11 = por %p10606_p10, %p10605_p9 }
  0x81   : > { %p10601_p8 = pneg %p10600_p7 }
  0x83   : > { %p10608_p12 = pnand %p10607_p11, %p10601_p8 }
  0x85   : > { %10611 = shalt.err (!%p10608_p12)
}
  0x86   : > { %10282 = dma.hbm_to_vmem [thread:$0]  (!%p11157_p5), %s12460_s16, 256, %s727_s1, [#allocation26]  }
  0x87   : > { %s10623_s3 = scalar_lea.vmem %s752_s27, 16  ;;  %s10630_s18 = scalar_lea.vmem %s752_s27, 32 }
  0x88   : > { %p10624_p0 = scmp.ne.s32.totalorder %s752_s27, %s10623_s3  ;;  %p10631_p4 = scmp.lt.s32.totalorder %s752_s27, %s752_s27 }
  0x89   : > { %p10632_p7 = scmp.lt.s32.totalorder %s10630_s18, %s10623_s3 }
  0x8a   : > { %p10626_p2 = pnand %p10624_p0, %p11167_p6 }
  0x8b   : > { %p10633_p1 = por %p10632_p7, %p10631_p4 }
  0x8c   : > { %p10627_p13 = pneg %p10626_p2 }
  0x8e   : > { %p10634_p9 = pnand %p10633_p1, %p10627_p13 }
  0x90   : > { %10637 = shalt.err (!%p10634_p9)
}
  0x91   : > { %10288 = dma.hbm_to_vmem [thread:$0]  (!%p11157_p5), %s12463_s19, 16, %s752_s27, [#allocation29]  }
  0x92   : > { %s10995_s1 = smov [#allocation9]   ;;  %s10996_s23 = smov [#allocation12]  }
  0x93   : > { %s593_s20 = sshll.u32 %s10995_s1, 4  ;;  %s616_s4 = sshll.u32 %s10996_s23, 4  ;;  %s594_s20 = int_to_ptr.vmem [resolvable:$true] %s593_s20  ;;  %s617_s4 = int_to_ptr.vmem [resolvable:$true] %s616_s4 }
  0x94   : > { %s10649_s26 = scalar_lea.vmem %s594_s20, 48  ;;  %s10656_s3 = scalar_lea.vmem %s594_s20, 64 }
  0x95   : > { %p10650_p8 = scmp.ne.s32.totalorder %s594_s20, %s10649_s26  ;;  %p10657_p1 = scmp.lt.s32.totalorder %s594_s20, %s594_s20 }
  0x96   : > { %p10658_p12 = scmp.lt.s32.totalorder %s10656_s3, %s10649_s26 }
  0x97   : > { %p10652_p10 = pnand %p10650_p8, %p11167_p6 }
  0x98   : > { %p10659_p0 = por %p10658_p12, %p10657_p1 }
  0x99   : > { %p10653_p11 = pneg %p10652_p10 }
  0x9b   : > { %p10660_p2 = pnand %p10659_p0, %p10653_p11 }
  0x9d   : > { %10663 = shalt.err (!%p10660_p2)
}
  0x9e   : > { %s12505_s22 = sld [smem:[#allocation50_spill]]  ;;  %s10675_s24 = scalar_lea.vmem %s617_s4, 87040 }
  0x9f   : > { %p10676_p13 = scmp.ne.s32.totalorder %s617_s4, %s10675_s24  ;;  %p10683_p9 = scmp.lt.s32.totalorder %s617_s4, %s617_s4 }
  0xa0   : > { %p10684_p8 = scmp.lt.s32.totalorder %s10675_s24, %s10675_s24 }
  0xa1   : > { %p10678_p4 = pnand %p10676_p13, %p11167_p6 }
  0xa2   : > { %p10685_p10 = por %p10684_p8, %p10683_p9 }
  0xa3   : > { %p10679_p7 = pneg %p10678_p4 }
  0xa4   : > { %10249 = dma.hbm_to_vmem [thread:$0]  (!%p11157_p5), %s12505_s22, 48, %s594_s20, [#allocation8]  }
  0xa5   : > { %p10686_p3 = pnand %p10685_p10, %p10679_p7 }
  0xa7   : > { %10689 = shalt.err (!%p10686_p3)
}
  0xa8   : > { %s12506_s7 = sld [smem:[#allocation52_spill]]  ;;  %s10997_s20 = smov [#allocation15]  }
  0xa9   : > { %s640_s23 = sshll.u32 %s10997_s20, 4  ;;  %s641_s23 = int_to_ptr.vmem [resolvable:$true] %s640_s23 }
  0xaa   : > { %s10701_s3 = scalar_lea.vmem %s641_s23, 160  ;;  %p10709_p0 = scmp.lt.s32.totalorder %s641_s23, %s641_s23 }
  0xab   : > { %p10702_p11 = scmp.ne.s32.totalorder %s641_s23, %s10701_s3  ;;  %p10710_p3 = scmp.lt.s32.totalorder %s10701_s3, %s10701_s3 }
  0xad   : > { %p10704_p1 = pnand %p10702_p11, %p11167_p6  ;;  %p10711_p2 = por %p10710_p3, %p10709_p0 }
  0xae   : > { %10255 = dma.hbm_to_vmem [thread:$0]  (!%p11157_p5), %s12506_s7, 87040, %s617_s4, [#allocation11], %s10988_s0, %s10988_s0, %s10989_s25  }
  0xaf   : > { %p10705_p12 = pneg %p10704_p1 }
  0xb1   : > { %p10712_p13 = pnand %p10711_p2, %p10705_p12 }
  0xb3   : > { %10715 = shalt.err (!%p10712_p13)
}
  0xb4   : > { %s10998_s18 = smov 2   ;;  %s12507_s9 = sld [smem:[#allocation54_spill]] }
  0xb5   : > { %s10999_s4 = smov [#allocation18]   ;;  %s11000_s24 = smov [#allocation21]  }
  0xb6   : > { %s667_s22 = sshll.u32 %s10999_s4, 4  ;;  %s689_s26 = sshll.u32 %s11000_s24, 4  ;;  %s668_s22 = int_to_ptr.vmem [resolvable:$true] %s667_s22  ;;  %s690_s26 = int_to_ptr.vmem [resolvable:$true] %s689_s26 }
  0xb7   : > { %s10727_s1 = scalar_lea.vmem %s668_s22, 64  ;;  %p10735_p8 = scmp.lt.s32.totalorder %s668_s22, %s668_s22 }
  0xb8   : > { %p10728_p4 = scmp.ne.s32.totalorder %s668_s22, %s10727_s1  ;;  %p10736_p10 = scmp.lt.s32.totalorder %s10727_s1, %s10727_s1 }
  0xba   : > { %10261 = dma.hbm_to_vmem [thread:$0]  (!%p11157_p5), %s12507_s9, 160, %s641_s23, [#allocation14], %s10989_s25, %s10989_s25, %s10998_s18  }
  0xbb   : > { %p10730_p7 = pnand %p10728_p4, %p11167_p6  ;;  %p10737_p11 = por %p10736_p10, %p10735_p8 }
  0xbd   : > { %p10731_p9 = pneg %p10730_p7 }
  0xbf   : > { %p10738_p1 = pnand %p10737_p11, %p10731_p9 }
  0xc1   : > { %10741 = shalt.err (!%p10738_p1)
}
  0xc2   : > { %s12508_s11 = sld [smem:[#allocation56_spill]]  ;;  %s10753_s25 = scalar_lea.vmem %s690_s26, 16 }
  0xc3   : > { %p10754_p12 = scmp.ne.s32.totalorder %s690_s26, %s10753_s25  ;;  %s10760_s23 = scalar_lea.vmem %s690_s26, 32 }
  0xc4   : > { %p10761_p2 = scmp.lt.s32.totalorder %s690_s26, %s690_s26  ;;  %p10762_p13 = scmp.lt.s32.totalorder %s10760_s23, %s10753_s25 }
  0xc5   : > { %p10756_p0 = pnand %p10754_p12, %p11167_p6 }
  0xc6   : > { %p10763_p4 = por %p10762_p13, %p10761_p2 }
  0xc7   : > { %p10757_p3 = pneg %p10756_p0 }
  0xc8   : > { %10267 = dma.hbm_to_vmem [thread:$0]  (!%p11157_p5), %s12508_s11, 64, %s668_s22, [#allocation17]  }
  0xc9   : > { %p10764_p7 = pnand %p10763_p4, %p10757_p3 }
  0xcb   : > { %10767 = shalt.err (!%p10764_p7)
}
  0xcc   : > { %10273 = dma.hbm_to_vmem [thread:$0]  (!%p11157_p5), %s12457_s13, 16, %s690_s26, [#allocation20]  }
  0xcd   : > { %s11001_s0 = smov [#allocation24]   ;;  %s11002_s22 = smov [#allocation27]  }
  0xce   : > { %s712_s4 = sshll.u32 %s11001_s0, 4  ;;  %s737_s24 = sshll.u32 %s11002_s22, 4  ;;  %s713_s4 = int_to_ptr.vmem [resolvable:$true] %s712_s4  ;;  %s738_s24 = int_to_ptr.vmem [resolvable:$true] %s737_s24 }
  0xcf   : > { %s10779_s1 = scalar_lea.vmem %s713_s4, 1024  ;;  %p10787_p11 = scmp.lt.s32.totalorder %s713_s4, %s713_s4 }
  0xd0   : > { %p10780_p9 = scmp.ne.s32.totalorder %s713_s4, %s10779_s1  ;;  %p10788_p1 = scmp.lt.s32.totalorder %s10779_s1, %s10779_s1 }
  0xd2   : > { %p10782_p8 = pnand %p10780_p9, %p11167_p6  ;;  %p10789_p12 = por %p10788_p1, %p10787_p11 }
  0xd4   : > { %p10783_p10 = pneg %p10782_p8 }
  0xd6   : > { %p10790_p0 = pnand %p10789_p12, %p10783_p10 }
  0xd8   : > { %10793 = shalt.err (!%p10790_p0)
}
  0xd9   : > { %s12509_s20 = smov 256   ;;  %s10805_s25 = scalar_lea.vmem %s738_s24, 32 }
  0xda   : > { %10279 = dma.hbm_to_vmem [thread:$0]  (!%p11157_p5), %s12459_s15, 1024, %s713_s4, [#allocation23], %s12509_s20, %s12509_s20, %s10992_s5  }
  0xdb   : > { %p10806_p3 = scmp.ne.s32.totalorder %s738_s24, %s10805_s25  ;;  %p10813_p4 = scmp.lt.s32.totalorder %s738_s24, %s738_s24 }
  0xdc   : > { %p10814_p7 = scmp.lt.s32.totalorder %s10805_s25, %s10805_s25 }
  0xdd   : > { %p10808_p2 = pnand %p10806_p3, %p11167_p6 }
  0xde   : > { %p10815_p9 = por %p10814_p7, %p10813_p4 }
  0xdf   : > { %p10809_p13 = pneg %p10808_p2 }
  0xe1   : > { %p10816_p8 = pnand %p10815_p9, %p10809_p13 }
  0xe3   : > { %10819 = shalt.err (!%p10816_p8)
}
  0xe4   : > { %10285 = dma.hbm_to_vmem [thread:$0]  (!%p11157_p5), %s12461_s17, 32, %s738_s24, [#allocation26]  }
  0xe5   : > { %s11003_s27 = smov [#allocation30]  }
  0xe6   : > { %s765_s5 = sshll.u32 %s11003_s27, 4  ;;  %s766_s5 = int_to_ptr.vmem [resolvable:$true] %s765_s5 }
  0xe7   : > { %s10831_s0 = scalar_lea.vmem %s766_s5, 16  ;;  %s10838_s4 = scalar_lea.vmem %s766_s5, 32 }
  0xe8   : > { %p10832_p10 = scmp.ne.s32.totalorder %s766_s5, %s10831_s0  ;;  %p10839_p12 = scmp.lt.s32.totalorder %s766_s5, %s766_s5 }
  0xe9   : > { %p10840_p0 = scmp.lt.s32.totalorder %s10838_s4, %s10831_s0 }
  0xea   : > { %p10834_p11 = pnand %p10832_p10, %p11167_p6 }
  0xeb   : > { %p10841_p3 = por %p10840_p0, %p10839_p12 }
  0xec   : > { %p10835_p1 = pneg %p10834_p11 }
  0xee   : > { %p10842_p2 = pnand %p10841_p3, %p10835_p1 }
  0xf0   : > { %10845 = shalt.err (!%p10842_p2)
}
  0xf1   : > { %s12510_s2 = sld [smem:[#allocation42_spill]]  ;;  %s11311_s20 = sadd.s32 1, %s10976_s30  }
  0xf2   : > { %s12511_s24 = sld [smem:[#allocation43_spill]]  ;;  %s79_s6 = sadd.s32 1, %s10972_s29 }
  0xf3   : > { %10291 = dma.hbm_to_vmem [thread:$0]  (!%p11157_p5), %s12465_s21, 16, %s766_s5, [#allocation29]  }
  0xf4   : > { %s76_s26 = ssub.s32 %s10976_s30, %s11311_s20  ;;  %p86_p6 = scmp.ne.s32.totalorder %s10972_s29, %s10968_s28 }
  0xf5   : > { %p77_p13 = scmp.eq.s32.totalorder %s76_s26, 0  ;;  %p87_p4 = scmp.eq.s32.totalorder %s10976_s30, 0 }
  0xf6   : > { %p10316_p9 = scmp.lt.s32.totalorder %s10976_s30, 2  ;;  %s11332_s23 = sand.u32 1, %s10972_s29  }
  0xf7   : > { %p92_p7 = scmp.ne.s32.totalorder %s10968_s28, %s12510_s2  ;;  %p88_p8 = por %p87_p4, %p86_p6 }
  0xf8   : > { %s11323_s3 = scalar_select %p77_p13, %s10972_s29, %s79_s6  }
  0xf9   : > { %p12512_p10 = scmp.eq.s32.totalorder %s12511_s24, 0  ;;  %s9858_s18 = sshll.u32 %s10976_s30, 4 }
  0xfa   : > { %s12514_s0 = sld [smem:[#allocation46_spill]]  ;;  %s787_s22 = scalar_lea.vmem [#allocation2], %s11332_s23 }
  0xfb   : > { %p11327_p11 = por %p12512_p10, %p92_p7  ;;  %s794_s1 = sshll.u32 %s787_s22, 4  ;;  %s11341_s1 = int_to_ptr.vmem [resolvable:$true] %s794_s1 }
  0xfc   : > { %p11343_p5 = pnand %p10316_p9, %p88_p8  ;;  %s12516_s7 = sld [smem:[#allocation47_spill]] }
  0xfd   : > { %s12513_s25 = scalar_select %p11327_p11, 1, 0 }
  0xfe   : > { %s785_s5 = scalar_lea.sflag [#allocation3], %s11332_s23  ;;  %p10848_p12 = pneg %p11343_p5 }
 0x100   : > { %s11338_s4 = scalar_lea.hbm %s12514_s0, %s9858_s18  ;;  %s10851_s10 = scalar_lea.hbm %s12514_s0, 32 }
 0x101   : > { %s10846_s8 = scalar_lea.hbm %s11338_s4, 16  ;;  %p10852_p2 = scmp.lt.s32.totalorder %s11338_s4, %s12514_s0 }
 0x102   : > { %s11351_s27 = scalar_lea.hbm %s12516_s7, %s9858_s18  ;;  %p10847_p1 = scmp.ne.s32.totalorder %s11338_s4, %s10846_s8 }
 0x103   : > { %p10853_p6 = scmp.lt.s32.totalorder %s10851_s10, %s10846_s8 }
 0x104   : > { %p10849_p0 = pnand %p10848_p12, %p10847_p1 }
 0x105   : > { %p10854_p13 = por %p10853_p6, %p10852_p2 }
 0x106   : > { %p10850_p3 = pneg %p10849_p0 }
 0x108   : > { %p10855_p4 = pnand %p10854_p13, %p10850_p3 }
 0x10a   : > { %10858 = shalt.err (!%p10855_p4)
}
 0x10b   : > { %s10859_s18 = scalar_lea.vmem %s11341_s1, 16  ;;  %s11004_s9 = smov [#allocation2]  }
 0x10c   : > { %p10860_p7 = scmp.ne.s32.totalorder %s11341_s1, %s10859_s18  ;;  %s10864_s6 = sshll.u32 %s11004_s9, 4  ;;  %s10865_s6 = int_to_ptr.vmem [resolvable:$false] %s10864_s6 }
 0x10d   : > { %s10866_s26 = scalar_lea.vmem %s10865_s6, 32  ;;  %p10867_p10 = scmp.lt.s32.totalorder %s11341_s1, %s10865_s6 }
 0x10e   : > { %p10862_p9 = pnand %p10860_p7, %p10848_p12  ;;  %p10868_p1 = scmp.lt.s32.totalorder %s10866_s26, %s10859_s18 }
 0x110   : > { %p10863_p8 = pneg %p10862_p9  ;;  %p10869_p0 = por %p10868_p1, %p10867_p10 }
 0x112   : > { %p10870_p2 = pnand %p10869_p0, %p10863_p8 }
 0x114   : > { %10873 = shalt.err (!%p10870_p2)
}
 0x115   : > { %10295 = dma.hbm_to_vmem [thread:$0]  (!%p11343_p5), %s11338_s4, 16, %s11341_s1, %s785_s5  }
 0x116   : > { %s804_s8 = scalar_lea.vmem [#allocation4], %s11332_s23  ;;  %s12517_s11 = sand.u32 1, %s10976_s30  }
 0x117   : > { %s811_s10 = sshll.u32 %s804_s8, 4  ;;  %s802_s24 = scalar_lea.sflag [#allocation5], %s12517_s11  ;;  %s812_s10 = int_to_ptr.vmem [resolvable:$true] %s811_s10 }
 0x118   : > { %s10874_s22 = scalar_lea.hbm %s11351_s27, 16  ;;  %s10879_s6 = scalar_lea.hbm %s12516_s7, 32 }
 0x119   : > { %p10875_p3 = scmp.ne.s32.totalorder %s11351_s27, %s10874_s22  ;;  %p10880_p4 = scmp.lt.s32.totalorder %s11351_s27, %s12516_s7 }
 0x11a   : > { %p10881_p7 = scmp.lt.s32.totalorder %s10879_s6, %s10874_s22 }
 0x11b   : > { %p10877_p6 = pnand %p10875_p3, %p10848_p12 }
 0x11c   : > { %p10882_p9 = por %p10881_p7, %p10880_p4 }
 0x11d   : > { %p10878_p13 = pneg %p10877_p6 }
 0x11f   : > { %p10883_p8 = pnand %p10882_p9, %p10878_p13 }
 0x121   : > { %10886 = shalt.err (!%p10883_p8)
}
 0x122   : > { %s10887_s30 = scalar_lea.vmem %s812_s10, 16  ;;  %s11005_s23 = smov [#allocation4]  }
 0x123   : > { %p10888_p10 = scmp.ne.s32.totalorder %s812_s10, %s10887_s30  ;;  %s10892_s4 = sshll.u32 %s11005_s23, 4  ;;  %s10893_s4 = int_to_ptr.vmem [resolvable:$false] %s10892_s4 }
 0x124   : > { %s10894_s1 = scalar_lea.vmem %s10893_s4, 32  ;;  %p10895_p2 = scmp.lt.s32.totalorder %s812_s10, %s10893_s4 }
 0x125   : > { %p10890_p1 = pnand %p10888_p10, %p10848_p12  ;;  %p10896_p3 = scmp.lt.s32.totalorder %s10894_s1, %s10887_s30 }
 0x127   : > { %p10891_p0 = pneg %p10890_p1  ;;  %p10897_p6 = por %p10896_p3, %p10895_p2 }
 0x129   : > { %p10898_p11 = pnand %p10897_p6, %p10891_p0 }
 0x12b   : > { %10901 = shalt.err (!%p10898_p11)
}
 0x12c   : > { %10298 = dma.hbm_to_vmem [thread:$0]  (!%p11343_p5), %s11351_s27, 16, %s812_s10, %s802_s24  }
 0x12d   : > { %s12518_s0 = sld [smem:[#allocation44_spill]] }
 0x133   : > { %p12519_p13 = scmp.ne.s32.totalorder %s12518_s0, 0 }
 0x134   : > { %s11402_s5 = sand.u32 (!%p12519_p13), 1, %s10968_s28   ;;  %p12520_p12 = scmp.ne.s32.totalorder (!%p12519_p13), %s12513_s25, 0 }
 0x135   : > { %820 = sbr.rel (%p12519_p13) target bundleno = 4784 (0x12b0), region = 108  ;;  %s823_s8 = scalar_lea.sflag (!%p12519_p13), [#allocation3], %s11402_s5 }
 0x136   : > { %s825_s11 = scalar_lea.vmem (!%p12519_p13), [#allocation2], %s11402_s5 }
 0x13a   : > { %10919 = dma.done.wait (%p12520_p12), %s823_s8, 16  }
 0x13b   : > { %10921 = vsyncadd (%p12520_p12), %s823_s8, 4294967280  ;;  %s12521_s22 = sld [smem:[#allocation43_spill]]  ;;  %s833_s10 = scalar_lea.vmem [#allocation4], %s11402_s5 }
 0x141   : > { %s830_s2 = sand.u32 1, %s12521_s22  }
 0x142   : > { %s831_s27 = scalar_lea.sflag [#allocation5], %s830_s2 }
 0x143   : > { %10923 = dma.done.wait (%p12520_p12), %s831_s27, 16  }
 0x144   : > { %10925 = vsyncadd (%p12520_p12), %s831_s27, 4294967280  ;;  %p12522_p11 = scmp.eq.s32.totalorder %s12521_s22, 0 }
 0x146   : > { %10927 = dma.done.wait (%p12522_p11), [#allocation5], 1920   ;;  %p12523_p5 = pmov %p12522_p11 }
 0x148   : > { %10929 = vsyncadd (%p12523_p5), [#allocation5], 4294965376  ;;  %p12524_p4 = pmov %p12523_p5 }
 0x14a   : > { %10931 = dma.done.wait (%p12524_p4), [#allocation8], 36528   ;;  %p12525_p7 = pmov %p12524_p4 }
 0x14b   : > { %p12526_p9 = pmov %p12524_p4 }
 0x14c   : > { %10933 = vsyncadd (%p12525_p7), [#allocation8], 4294930768 }
 0x14d   : > { %10935 = dma.done.wait (%p12526_p9), [#allocation11], 87680   ;;  %p12527_p8 = pmov %p12524_p4 }
 0x14e   : > { %p12528_p10 = pmov %p12524_p4 }
 0x14f   : > { %10937 = vsyncadd (%p12527_p8), [#allocation11], 4294879616 }
 0x150   : > { %10939 = dma.done.wait (%p12528_p10), [#allocation14], 224   ;;  %p12529_p1 = pmov %p12524_p4 }
 0x152   : > { %10941 = vsyncadd (%p12529_p1), [#allocation14], 4294967072  ;;  %p12530_p0 = pmov %p12529_p1 }
 0x154   : > { %10943 = dma.done.wait (%p12530_p0), [#allocation17], 143424   ;;  %p12531_p2 = pmov %p12530_p0 }
 0x155   : > { %p12532_p3 = pmov %p12530_p0 }
 0x156   : > { %10945 = vsyncadd (%p12531_p2), [#allocation17], 4294823872 }
 0x157   : > { %10947 = dma.done.wait (%p12532_p3), [#allocation20], 144   ;;  %p12533_p6 = pmov %p12530_p0 }
 0x158   : > { %p12534_p13 = pmov %p12530_p0 }
 0x159   : > { %10949 = vsyncadd (%p12533_p6), [#allocation20], 4294967152 }
 0x15a   : > { %10951 = dma.done.wait (%p12534_p13), [#allocation23], 9216   ;;  %p12535_p12 = pmov %p12530_p0 }
 0x15b   : > { %p12536_p11 = pmov %p12530_p0 }
 0x15c   : > { %10953 = vsyncadd (%p12535_p12), [#allocation23], 4294958080 }
 0x15d   : > { %10955 = dma.done.wait (%p12536_p11), [#allocation26], 288   ;;  %p12537_p5 = pmov %p12530_p0 }
 0x15e   : > { %p12538_p4 = pmov %p12530_p0 }
 0x15f   : > { %10957 = vsyncadd (%p12537_p5), [#allocation26], 4294967008 }
 0x160   : > { %10959 = dma.done.wait (%p12538_p4), [#allocation29], 32   ;;  %p12539_p7 = pmov %p12530_p0 }
 0x161   : > { %p968_p9 = scmp.lt.s32.totalorder %s12521_s22, 1  ;;  %v11006_v0 = vmov 0.0   ;;  %vm999_vm0 = vcmask 1044480   ;;  %s12540_s9 = sld [smem:[#allocation45_spill]]  ;;  %vm989_vm1 = vcmask 302080   ;;  %v1147_v11 = vld [vmem:[#allocation6 + $0x18] sm:$0xff] }
 0x162   : > { %10961 = vsyncadd (%p12539_p7), [#allocation29], 4294967264  ;;  %1223 = vmatprep.mubr.f32.mxu1 %v11006_v0  ;;  %1070 = vmatprep.mubr.f32.mxu0 %v11006_v0  ;;  %v986_v12 = vld [vmem:[#allocation6] sm:$0xff]  ;;  %v1289_v13 = vld [vmem:[#allocation7 + $0x338] sm:$0xff]  ;;  %vm1310_vm2 = vcmask 1043456   ;;  %vm1300_vm3 = vcmask 162816  }
 0x163   : > { %s12550_s22 = smov (!%p968_p9, %s12521_s22), 1  ;;  %v1288_v14 = vld [vmem:[#allocation7 + $0x330] sm:$0xff]  ;;  %v1290_v15 = vld [vmem:[#allocation7 + $0x340] sm:$0xff]  ;;  %v1148_v16 = vld [vmem:[#allocation6 + $0x20] sm:$0xff]  ;;  %vm2736_vm4 = vcmask 1040384   ;;  %vm2732_vm5 = vcmask 138240  }
 0x164   : > { %s10167_s25 = smul.u32 80, %s12550_s22  ;;  %v987_v17 = vld [vmem:[#allocation6 + $0x8] sm:$0xff]  ;;  %v1286_v18 = vld [vmem:[#allocation7 + $0x320] sm:$0xff]  ;;  %v1285_v19 = vld [vmem:[#allocation7 + $0x318] sm:$0xff]  ;;  %vm11007_vm6 = vmmov 0   ;;  %vm3306_vm7 = vcmask 130048  }
 0x165   : > { %v1287_v20 = vld [vmem:[#allocation7 + $0x328] sm:$0xff]  ;;  %v1149_v21 = vld [vmem:[#allocation6 + $0x28] sm:$0x1]  ;;  %v988_v22 = vld [vmem:[#allocation6 + $0x10] sm:$0x1]  ;;  %vm5638_vm8 = vcmask 1046528  }
 0x166   : > { %v1283_v23 = vld [vmem:[#allocation7 + $0x308] sm:$0xff]  ;;  %v1282_v24 = vld [vmem:[#allocation7 + $0x300] sm:$0xff]  ;;  %v1284_v25 = vld [vmem:[#allocation7 + $0x310] sm:$0xff]  ;;  %vm5634_vm9 = vcmask 56320   ;;  %vm6389_vm10 = vcmask 523264   ;;  %vm9005_vm11 = vcmask 64512  }
 0x167   : > { %s11462_s6 = scalar_lea.vmem %s12540_s9, %s10167_s25  ;;  %v1280_v26 = vld [vmem:[#allocation7 + $0x2f0] sm:$0xff]  ;;  %v1279_v27 = vld [vmem:[#allocation7 + $0x2e8] sm:$0xff]  ;;  %v1281_v28 = vld [vmem:[#allocation7 + $0x2f8] sm:$0xff]  ;;  %vm9305_vm12 = vcmask 1045504   ;;  %vm9152_vm13 = vcmask 261120   ;;  %s12541_s23 = sld [smem:[#allocation57_spill]] }
 0x168   : > { %v11465_v1 = vld [vmem:[%s11462_s6 + $0x48] sm:$0x1f]  ;;  %v11468_v2 = vld [vmem:[%s11462_s6 + $0x40] sm:$0x1f]  ;;  %v11471_v3 = vld [vmem:[%s11462_s6 + $0x38] sm:$0xff]  ;;  %vm9301_vm14 = vcmask 48128  }
 0x169   : > { %9884 = vmatprep.subr.msk.mxu1 %vm999_vm0, %v11465_v1  ;;  %v11476_v4 = vld [vmem:[%s11462_s6 + $0x30] sm:$0xff]  ;;  %9879 = vmatprep.subr.msk.mxu0 %vm999_vm0, %v11465_v1  ;;  %v11483_v5 = vld [vmem:[%s11462_s6 + $0x28] sm:$0xff]  ;;  %v11489_v6 = vld [vmem:[%s11462_s6 + $0x20] sm:$0xff]  ;;  %vm8985_vm15 = vcmask 1041408   ;;  %s12542_s4 = sld [smem:[#allocation58_spill]] }
 0x16a   : > { %9885 = vmatpush1.msk.msra.mxu1 %vm999_vm0, %v11468_v2  ;;  %9880 = vmatpush1.msk.msra.mxu0 %vm999_vm0, %v11468_v2  ;;  %v11494_v7 = vld [vmem:[%s11462_s6 + $0x18] sm:$0xff]  ;;  %v11499_v8 = vld [vmem:[%s11462_s6 + $0x10] sm:$0xff]  ;;  %v11504_v9 = vld [vmem:[%s11462_s6 + $0x8] sm:$0xff]  ;;  %s12543_s0 = sld [smem:[#allocation59_spill]] }
 0x16b   : > { %1183 = vmatprep.subr.mxu1 %v11471_v3  ;;  %1030 = vmatprep.subr.mxu0 %v11471_v3  ;;  %v11509_v10 = vld [vmem:[%s11462_s6] sm:$0xff]  ;;  %v1277_v29 = vld [vmem:[#allocation7 + $0x2d8] sm:$0xff]  ;;  %v1276_v30 = vld [vmem:[#allocation7 + $0x2d0] sm:$0xff] }
 0x16c   : > { %1184 = vmatpush1.msra.mxu1 %v11476_v4  ;;  %1031 = vmatpush1.msra.mxu0 %v11476_v4  ;;  %v1278_v31 = vld [vmem:[#allocation7 + $0x2e0] sm:$0xff]  ;;  %v1273_v33 = vld [vmem:[#allocation7 + $0x2b8] sm:$0xff]  ;;  %v1275_v34 = vld [vmem:[#allocation7 + $0x2c8] sm:$0xff] }
 0x16d   : > { %1185 = vmatprep.subr.mxu1 %v11483_v5  ;;  %1032 = vmatprep.subr.mxu0 %v11483_v5  ;;  %v1274_v32 = vld [vmem:[#allocation7 + $0x2c0] sm:$0xff]  ;;  %v1271_v35 = vld [vmem:[#allocation7 + $0x2a8] sm:$0xff]  ;;  %v1272_v37 = vld [vmem:[#allocation7 + $0x2b0] sm:$0xff] }
 0x16e   : > { %1186 = vmatpush1.msra.mxu1 %v11489_v6  ;;  %1033 = vmatpush1.msra.mxu0 %v11489_v6  ;;  %v1270_v36 = vld [vmem:[#allocation7 + $0x2a0] sm:$0xff]  ;;  %v1268_v38 = vld [vmem:[#allocation7 + $0x290] sm:$0xff]  ;;  %v1267_v39 = vld [vmem:[#allocation7 + $0x288] sm:$0xff] }
 0x16f   : > { %1187 = vmatprep.subr.mxu1 %v11494_v7  ;;  %1034 = vmatprep.subr.mxu0 %v11494_v7  ;;  %v1269_v40 = vld [vmem:[#allocation7 + $0x298] sm:$0xff]  ;;  %v1264_v42 = vld [vmem:[#allocation7 + $0x270] sm:$0xff]  ;;  %v1266_v43 = vld [vmem:[#allocation7 + $0x280] sm:$0xff] }
 0x170   : > { %1188 = vmatpush1.msra.mxu1 %v11499_v8  ;;  %1035 = vmatpush1.msra.mxu0 %v11499_v8  ;;  %v1265_v41 = vld [vmem:[#allocation7 + $0x278] sm:$0xff]  ;;  %v1262_v44 = vld [vmem:[#allocation7 + $0x260] sm:$0xff]  ;;  %v1263_v46 = vld [vmem:[#allocation7 + $0x268] sm:$0xff]  ;;  %s975_s8 = scalar_lea.vmem %s12543_s0, %s12550_s22 }
 0x171   : > { %1189 = vmatprep.subr.mxu1 %v11504_v9  ;;  %1036 = vmatprep.subr.mxu0 %v11504_v9  ;;  %v1261_v45 = vld [vmem:[#allocation7 + $0x258] sm:$0xff]  ;;  %v1259_v47 = vld [vmem:[#allocation7 + $0x248] sm:$0xff]  ;;  %v1258_v48 = vld [vmem:[#allocation7 + $0x240] sm:$0xff] }
 0x172   : > { %1190 = vmatpush1.msra.mxu1 %v11509_v10  ;;  %1037 = vmatpush1.msra.mxu0 %v11509_v10  ;;  %v1260_v49 = vld [vmem:[#allocation7 + $0x250] sm:$0xff]  ;;  %v1255_v51 = vld [vmem:[#allocation7 + $0x228] sm:$0xff]  ;;  %v1257_v52 = vld [vmem:[#allocation7 + $0x238] sm:$0xff] }
 0x173   : > { %9886 = vmatmul.mubr.msk.f32.vlgmr.msra.gmra.mxu1 %vm989_vm1, %v1147_v11  ;;  %9881 = vmatmul.mubr.msk.f32.vlgmr.msra.gmra.mxu0 %vm989_vm1, %v986_v12  ;;  %v1256_v50 = vld [vmem:[#allocation7 + $0x230] sm:$0xff]  ;;  %v1253_v53 = vld [vmem:[#allocation7 + $0x218] sm:$0xff]  ;;  %v1254_v55 = vld [vmem:[#allocation7 + $0x220] sm:$0xff] }
 0x174   : > { %1229 = vmatprep.mubr.f32.mxu1 %v11006_v0  ;;  %1076 = vmatprep.mubr.f32.mxu0 %v11006_v0  ;;  %v1252_v54 = vld [vmem:[#allocation7 + $0x210] sm:$0xff]  ;;  %v1250_v56 = vld [vmem:[#allocation7 + $0x200] sm:$0xff]  ;;  %v1249_v57 = vld [vmem:[#allocation7 + $0x1f8] sm:$0xff] }
 0x175   : > { %1320 = vmatprep.subr.mxu0 %v1289_v13  ;;  %1403 = vmatprep.subr.mxu1 %v11006_v0  ;;  %v1251_v58 = vld [vmem:[#allocation7 + $0x208] sm:$0xff]  ;;  %v1246_v60 = vld [vmem:[#allocation7 + $0x1e0] sm:$0xff]  ;;  %v1248_v61 = vld [vmem:[#allocation7 + $0x1f0] sm:$0xff] }
 0x176   : > { %1321 = vmatpush1.msra.mxu0 %v1288_v14  ;;  %1404 = vmatpush1.msra.mxu1 %v1290_v15  ;;  %v1247_v59 = vld [vmem:[#allocation7 + $0x1e8] sm:$0xff]  ;;  %v1244_v62 = vld [vmem:[#allocation7 + $0x1d0] sm:$0xff]  ;;  %v1245_v11 = vld [vmem:[#allocation7 + $0x1d8] sm:$0xff] }
 0x177   : > { %9887 = vmatmul.mubr.msk.f32.gmra.mxu1 %vm989_vm1, %v1148_v16  ;;  %9882 = vmatmul.mubr.msk.f32.gmra.mxu0 %vm989_vm1, %v987_v17  ;;  %v1243_v63 = vld [vmem:[#allocation7 + $0x1c8] sm:$0xff]  ;;  %v1298_v12 = vld [vmem:[#allocation7 + $0x380] sm:$0xf]  ;;  %v1297_v13 = vld [vmem:[#allocation7 + $0x378] sm:$0xf] }
 0x178   : > { %1235 = vmatprep.mubr.f32.mxu1 %v11006_v0  ;;  %1082 = vmatprep.mubr.f32.mxu0 %v11006_v0  ;;  %v1299_v14 = vld [vmem:[#allocation7 + $0x388] sm:$0xf]  ;;  %v1294_v16 = vld [vmem:[#allocation7 + $0x360] sm:$0xff]  ;;  %v1296_v17 = vld [vmem:[#allocation7 + $0x370] sm:$0xff] }
 0x179   : > { %1322 = vmatprep.subr.mxu0 %v1286_v18  ;;  %1405 = vmatprep.subr.mxu1 %v11006_v0  ;;  %v1295_v15 = vld [vmem:[#allocation7 + $0x368] sm:$0xff]  ;;  %v1292_v18 = vld [vmem:[#allocation7 + $0x350] sm:$0xff] }
 0x17a   : > { %1323 = vmatpush1.msra.mxu0 %v1285_v19  ;;  %1406 = vmatpush1.msra.mxu1 %v1287_v20  ;;  %v1291_v19 = vld [vmem:[#allocation7 + $0x348] sm:$0xff]  ;;  %v1293_v20 = vld [vmem:[#allocation7 + $0x358] sm:$0xff] }
 0x17b   : > { %9888 = vmatmul.mubr.msk.f32.gmra.mxu1 %vm989_vm1, %v1149_v21  ;;  %9883 = vmatmul.mubr.msk.f32.gmra.mxu0 %vm989_vm1, %v988_v22  ;;  %v1135_v21 = vld [vmem:[#allocation7 + $0x170] sm:$0xff] }
 0x17c   : > { %1324 = vmatprep.subr.mxu0 %v1283_v23  ;;  %1407 = vmatprep.subr.mxu1 %v11006_v0 }
 0x17d   : > { %1325 = vmatpush1.msra.mxu0 %v1282_v24  ;;  %1408 = vmatpush1.msra.mxu1 %v1284_v25  ;;  %v1134_v24 = vld [vmem:[#allocation7 + $0x168] sm:$0xff]  ;;  %v1136_v25 = vld [vmem:[#allocation7 + $0x178] sm:$0xff] }
 0x17e   : > { %1326 = vmatprep.subr.mxu0 %v1280_v26  ;;  %1409 = vmatprep.subr.mxu1 %v11006_v0  ;;  %v1132_v26 = vld [vmem:[#allocation7 + $0x158] sm:$0xff] }
 0x17f   : > { %1327 = vmatpush1.msra.mxu0 %v1279_v27  ;;  %1410 = vmatpush1.msra.mxu1 %v1281_v28  ;;  %v1131_v27 = vld [vmem:[#allocation7 + $0x150] sm:$0xff]  ;;  %v1133_v28 = vld [vmem:[#allocation7 + $0x160] sm:$0xff] }
 0x180   : > { %1328 = vmatprep.subr.mxu0 %v1277_v29  ;;  %1411 = vmatprep.subr.mxu1 %v11006_v0  ;;  %v1129_v29 = vld [vmem:[#allocation7 + $0x140] sm:$0xff] }
 0x181   : > { %1329 = vmatpush1.msra.mxu0 %v1276_v30  ;;  %1412 = vmatpush1.msra.mxu1 %v1278_v31  ;;  %v1128_v30 = vld [vmem:[#allocation7 + $0x138] sm:$0xff]  ;;  %v1130_v31 = vld [vmem:[#allocation7 + $0x148] sm:$0xff] }
 0x182   : > { %1330 = vmatprep.subr.mxu0 %v1274_v32  ;;  %1413 = vmatprep.subr.mxu1 %v11006_v0  ;;  %v1126_v32 = vld [vmem:[#allocation7 + $0x128] sm:$0xff] }
 0x183   : > { %1331 = vmatpush1.msra.mxu0 %v1273_v33  ;;  %1414 = vmatpush1.msra.mxu1 %v1275_v34  ;;  %v1125_v33 = vld [vmem:[#allocation7 + $0x120] sm:$0xff]  ;;  %v1127_v34 = vld [vmem:[#allocation7 + $0x130] sm:$0xff] }
 0x184   : > { %1332 = vmatprep.subr.mxu0 %v1271_v35  ;;  %1415 = vmatprep.subr.mxu1 %v11006_v0  ;;  %v1123_v35 = vld [vmem:[#allocation7 + $0x110] sm:$0xff] }
 0x185   : > { %1333 = vmatpush1.msra.mxu0 %v1270_v36  ;;  %1416 = vmatpush1.msra.mxu1 %v1272_v37  ;;  %v1122_v36 = vld [vmem:[#allocation7 + $0x108] sm:$0xff]  ;;  %v1124_v37 = vld [vmem:[#allocation7 + $0x118] sm:$0xff] }
 0x186   : > { %1334 = vmatprep.subr.mxu0 %v1268_v38  ;;  %1417 = vmatprep.subr.mxu1 %v11006_v0  ;;  %v1120_v38 = vld [vmem:[#allocation7 + $0xf8] sm:$0xff] }
 0x187   : > { %1335 = vmatpush1.msra.mxu0 %v1267_v39  ;;  %1418 = vmatpush1.msra.mxu1 %v1269_v40  ;;  %v1119_v39 = vld [vmem:[#allocation7 + $0xf0] sm:$0xff]  ;;  %v1121_v40 = vld [vmem:[#allocation7 + $0x100] sm:$0xff] }
 0x188   : > { %1336 = vmatprep.subr.mxu0 %v1265_v41  ;;  %1419 = vmatprep.subr.mxu1 %v11006_v0  ;;  %v1117_v41 = vld [vmem:[#allocation7 + $0xe0] sm:$0xff] }
 0x189   : > { %1337 = vmatpush1.msra.mxu0 %v1264_v42  ;;  %1420 = vmatpush1.msra.mxu1 %v1266_v43  ;;  %v1116_v42 = vld [vmem:[#allocation7 + $0xd8] sm:$0xff]  ;;  %v1118_v43 = vld [vmem:[#allocation7 + $0xe8] sm:$0xff] }
 0x18a   : > { %1338 = vmatprep.subr.mxu0 %v1262_v44  ;;  %1421 = vmatprep.subr.mxu1 %v11006_v0  ;;  %v1114_v44 = vld [vmem:[#allocation7 + $0xc8] sm:$0xff] }
 0x18b   : > { %1339 = vmatpush1.msra.mxu0 %v1261_v45  ;;  %1422 = vmatpush1.msra.mxu1 %v1263_v46  ;;  %v1113_v45 = vld [vmem:[#allocation7 + $0xc0] sm:$0xff]  ;;  %v1115_v46 = vld [vmem:[#allocation7 + $0xd0] sm:$0xff] }
 0x18c   : > { %1340 = vmatprep.subr.mxu0 %v1259_v47  ;;  %1423 = vmatprep.subr.mxu1 %v11006_v0  ;;  %v1111_v47 = vld [vmem:[#allocation7 + $0xb0] sm:$0xff] }
 0x18d   : > { %1341 = vmatpush1.msra.mxu0 %v1258_v48  ;;  %1424 = vmatpush1.msra.mxu1 %v1260_v49  ;;  %v1110_v48 = vld [vmem:[#allocation7 + $0xa8] sm:$0xff]  ;;  %v1112_v49 = vld [vmem:[#allocation7 + $0xb8] sm:$0xff] }
 0x18e   : > { %1342 = vmatprep.subr.mxu0 %v1256_v50  ;;  %1425 = vmatprep.subr.mxu1 %v11006_v0  ;;  %v1108_v50 = vld [vmem:[#allocation7 + $0x98] sm:$0xff] }
 0x18f   : > { %1343 = vmatpush1.msra.mxu0 %v1255_v51  ;;  %1426 = vmatpush1.msra.mxu1 %v1257_v52  ;;  %v1107_v52 = vld [vmem:[#allocation7 + $0x90] sm:$0xff] }
 0x190   : > { %1344 = vmatprep.subr.mxu0 %v1253_v53  ;;  %1427 = vmatprep.subr.mxu1 %v11006_v0  ;;  %v1109_v53 = vld [vmem:[#allocation7 + $0xa0] sm:$0xff] }
 0x191   : > { %1345 = vmatpush1.msra.mxu0 %v1252_v54  ;;  %1428 = vmatpush1.msra.mxu1 %v1254_v55  ;;  %v1105_v54 = vld [vmem:[#allocation7 + $0x80] sm:$0xff]  ;;  %v1104_v55 = vld [vmem:[#allocation7 + $0x78] sm:$0xff] }
 0x192   : > { %1346 = vmatprep.subr.mxu0 %v1250_v56  ;;  %1429 = vmatprep.subr.mxu1 %v11006_v0  ;;  %v1106_v56 = vld [vmem:[#allocation7 + $0x88] sm:$0xff] }
 0x193   : > { %1347 = vmatpush1.msra.mxu0 %v1249_v57  ;;  %1430 = vmatpush1.msra.mxu1 %v1251_v58  ;;  %v1102_v57 = vld [vmem:[#allocation7 + $0x68] sm:$0xff] }
 0x194   : > { %1348 = vmatprep.subr.mxu0 %v1247_v59  ;;  %1431 = vmatprep.subr.mxu1 %v11006_v0  ;;  %v1101_v59 = vld [vmem:[#allocation7 + $0x60] sm:$0xff] }
 0x195   : > { %1349 = vmatpush1.msra.mxu0 %v1246_v60  ;;  %1432 = vmatpush1.msra.mxu1 %v1248_v61  ;;  %v1103_v60 = vld [vmem:[#allocation7 + $0x70] sm:$0xff] }
 0x196   : > { %1350 = vmatprep.subr.mxu0 %v1244_v62  ;;  %1433 = vmatprep.subr.mxu1 %v11006_v0  ;;  %v1099_v61 = vld [vmem:[#allocation7 + $0x50] sm:$0xff] }
 0x197   : > { %1351 = vmatpush1.msra.mxu0 %v1243_v63  ;;  %1434 = vmatpush1.msra.mxu1 %v1245_v11  ;;  %v1098_v63 = vld [vmem:[#allocation7 + $0x48] sm:$0xff]  ;;  %v1100_v11 = vld [vmem:[#allocation7 + $0x58] sm:$0xff] }
 0x198   : > { %9889 = vmatprep.subr.msk.mxu0 %vm1310_vm2, %v1298_v12  ;;  %1461 = vmatprep.subr.mxu1 %v11006_v0  ;;  %v1096_v12 = vld [vmem:[#allocation7 + $0x38] sm:$0xff] }
 0x199   : > { %9890 = vmatpush2.msk.msra.mxu0 %vm1310_vm2, %v1297_v13  ;;  %9894 = vmatpush2.msk.msra.mxu1 %vm1310_vm2, %v1299_v14  ;;  %v1095_v14 = vld [vmem:[#allocation7 + $0x30] sm:$0xff] }
 0x19a   : > { %1380 = vmatprep.subr.mxu0 %v1295_v15  ;;  %1463 = vmatprep.subr.mxu1 %v11006_v0  ;;  %v1097_v15 = vld [vmem:[#allocation7 + $0x40] sm:$0xff] }
 0x19b   : > { %1381 = vmatpush2.msra.mxu0 %v1294_v16  ;;  %1464 = vmatpush2.msra.mxu1 %v1296_v17  ;;  %v1093_v17 = vld [vmem:[#allocation7 + $0x20] sm:$0xff] }
 0x19c   : > { %1382 = vmatprep.subr.mxu0 %v1292_v18  ;;  %1465 = vmatprep.subr.mxu1 %v11006_v0 }
 0x19d   : > { %1383 = vmatpush2.msra.mxu0 %v1291_v19  ;;  %1466 = vmatpush2.msra.mxu1 %v1293_v20  ;;  %v1092_v19 = vld [vmem:[#allocation7 + $0x18] sm:$0xff]  ;;  %v1094_v20 = vld [vmem:[#allocation7 + $0x28] sm:$0xff] }
 0x19e   : > { %1501 = vmatprep.subr.mxu0 %v1135_v21  ;;  %1584 = vmatprep.subr.mxu1 %v11006_v0  ;;  %v1090_v21 = vld [vmem:[#allocation7 + $0x8] sm:$0xff] }
 0x233   : > { %v1225_v22 = vpop.f32.mrf.mxu1  ;;  %v1072_v13 = vpop.f32.mrf.mxu0 }
 0x235   : > { %v1227_v23 = vpop.f32.mrf.mxu1  ;;  %v1074_v18 = vpop.f32.mrf.mxu0 }
 0x236   : > { %9891 = vmatprep.mubr.msk.f32.mxu0 %vm1300_vm3, %v1227_v23  ;;  %9895 = vmatprep.mubr.msk.f32.mxu1 %vm1300_vm3, %v1227_v23  ;;  %v1091_v23 = vld [vmem:[#allocation7 + $0x10] sm:$0xff] }
 0x237   : > { %1385 = vmatmul.mubr.f32.vlgmr.msra.gmra.mxu0 %v1225_v22  ;;  %1468 = vmatmul.mubr.f32.vlgmr.msra.gmra.mxu1 %v1225_v22  ;;  %v1231_v51 = vpop.f32.mrf.mxu1  ;;  %v1089_v22 = vld [vmem:[#allocation7] sm:$0xff] }
 0x238   : > { %1502 = vmatpush1.msra.mxu0 %v1134_v24  ;;  %1585 = vmatpush1.msra.mxu1 %v1136_v25  ;;  %v1144_v24 = vld [vmem:[#allocation7 + $0x1b8] sm:$0xf]  ;;  %v1078_v25 = vpop.f32.mrf.mxu0 }
 0x239   : > { %1503 = vmatprep.subr.mxu0 %v1132_v26  ;;  %1586 = vmatprep.subr.mxu1 %v11006_v0  ;;  %v1233_v58 = vpop.f32.mrf.mxu1  ;;  %v1143_v26 = vld [vmem:[#allocation7 + $0x1b0] sm:$0xf] }
 0x23a   : > { %1504 = vmatpush1.msra.mxu0 %v1131_v27  ;;  %1587 = vmatpush1.msra.mxu1 %v1133_v28  ;;  %v1145_v27 = vld [vmem:[#allocation7 + $0x1c0] sm:$0xf] }
 0x23b   : > { %1505 = vmatprep.subr.mxu0 %v1129_v29  ;;  %1588 = vmatprep.subr.mxu1 %v11006_v0  ;;  %v1237_v62 = vpop.f32.mrf.mxu1  ;;  %v1141_v28 = vld [vmem:[#allocation7 + $0x1a0] sm:$0xff]  ;;  %v1140_v29 = vld [vmem:[#allocation7 + $0x198] sm:$0xff] }
 0x23c   : > { %1506 = vmatpush1.msra.mxu0 %v1128_v30  ;;  %1589 = vmatpush1.msra.mxu1 %v1130_v31  ;;  %v1142_v30 = vld [vmem:[#allocation7 + $0x1a8] sm:$0xff]  ;;  %v1080_v31 = vpop.f32.mrf.mxu0 }
 0x23d   : > { %1507 = vmatprep.subr.mxu0 %v1126_v32  ;;  %1590 = vmatprep.subr.mxu1 %v11006_v0  ;;  %v1239_v16 = vpop.f32.mrf.mxu1  ;;  %v1138_v32 = vld [vmem:[#allocation7 + $0x188] sm:$0xff] }
 0x23e   : > { %1508 = vmatpush1.msra.mxu0 %v1125_v33  ;;  %1591 = vmatpush1.msra.mxu1 %v1127_v34  ;;  %v1137_v33 = vld [vmem:[#allocation7 + $0x180] sm:$0xff]  ;;  %v1139_v34 = vld [vmem:[#allocation7 + $0x190] sm:$0xff] }
 0x23f   : > { %1509 = vmatprep.subr.mxu0 %v1123_v35  ;;  %1592 = vmatprep.subr.mxu1 %v11006_v0  ;;  %v1084_v35 = vpop.f32.mrf.mxu0 }
 0x240   : > { %1510 = vmatpush1.msra.mxu0 %v1122_v36  ;;  %1593 = vmatpush1.msra.mxu1 %v1124_v37  ;;  %v1801_v37 = vld [vmem:[#allocation7 + $0x4d0] sm:$0xff] }
 0x241   : > { %1511 = vmatprep.subr.mxu0 %v1120_v38  ;;  %1594 = vmatprep.subr.mxu1 %v11006_v0  ;;  %v1086_v36 = vpop.f32.mrf.mxu0  ;;  %v1802_v38 = vld [vmem:[#allocation7 + $0x4d8] sm:$0xff] }
 0x242   : > { %1512 = vmatpush1.msra.mxu0 %v1119_v39  ;;  %1595 = vmatpush1.msra.mxu1 %v1121_v40  ;;  %v1800_v39 = vld [vmem:[#allocation7 + $0x4c8] sm:$0xff]  ;;  %v1798_v40 = vld [vmem:[#allocation7 + $0x4b8] sm:$0xff] }
 0x243   : > { %1513 = vmatprep.subr.mxu0 %v1117_v41  ;;  %1596 = vmatprep.subr.mxu1 %v11006_v0  ;;  %v1799_v41 = vld [vmem:[#allocation7 + $0x4c0] sm:$0xff] }
 0x244   : > { %1514 = vmatpush1.msra.mxu0 %v1116_v42  ;;  %1597 = vmatpush1.msra.mxu1 %v1118_v43  ;;  %v1797_v42 = vld [vmem:[#allocation7 + $0x4b0] sm:$0xff]  ;;  %v1795_v43 = vld [vmem:[#allocation7 + $0x4a0] sm:$0xff] }
 0x245   : > { %1515 = vmatprep.subr.mxu0 %v1114_v44  ;;  %1598 = vmatprep.subr.mxu1 %v11006_v0  ;;  %v1794_v44 = vld [vmem:[#allocation7 + $0x498] sm:$0xff] }
 0x246   : > { %1516 = vmatpush1.msra.mxu0 %v1113_v45  ;;  %1599 = vmatpush1.msra.mxu1 %v1115_v46  ;;  %v1796_v45 = vld [vmem:[#allocation7 + $0x4a8] sm:$0xff] }
 0x247   : > { %1517 = vmatprep.subr.mxu0 %v1111_v47  ;;  %1600 = vmatprep.subr.mxu1 %v11006_v0  ;;  %v1792_v46 = vld [vmem:[#allocation7 + $0x488] sm:$0xff]  ;;  %v1791_v47 = vld [vmem:[#allocation7 + $0x480] sm:$0xff] }
 0x248   : > { %1518 = vmatpush1.msra.mxu0 %v1110_v48  ;;  %1601 = vmatpush1.msra.mxu1 %v1112_v49  ;;  %v1793_v48 = vld [vmem:[#allocation7 + $0x490] sm:$0xff] }
 0x249   : > { %1519 = vmatprep.subr.mxu0 %v1108_v50  ;;  %1602 = vmatprep.subr.mxu1 %v11006_v0  ;;  %v1789_v49 = vld [vmem:[#allocation7 + $0x470] sm:$0xff]  ;;  %v1788_v50 = vld [vmem:[#allocation7 + $0x468] sm:$0xff] }
 0x24a   : > { %1520 = vmatpush1.msra.mxu0 %v1107_v52  ;;  %1603 = vmatpush1.msra.mxu1 %v1109_v53  ;;  %v1786_v52 = vld [vmem:[#allocation7 + $0x458] sm:$0xff]  ;;  %v1785_v53 = vld [vmem:[#allocation7 + $0x450] sm:$0xff] }
 0x24b   : > { %1521 = vmatprep.subr.mxu0 %v1105_v54  ;;  %1604 = vmatprep.subr.mxu1 %v11006_v0  ;;  %v1787_v54 = vld [vmem:[#allocation7 + $0x460] sm:$0xff] }
 0x24c   : > { %1522 = vmatpush1.msra.mxu0 %v1104_v55  ;;  %1605 = vmatpush1.msra.mxu1 %v1106_v56  ;;  %v1783_v55 = vld [vmem:[#allocation7 + $0x440] sm:$0xff]  ;;  %v1782_v56 = vld [vmem:[#allocation7 + $0x438] sm:$0xff] }
 0x24d   : > { %1523 = vmatprep.subr.mxu0 %v1102_v57  ;;  %1606 = vmatprep.subr.mxu1 %v11006_v0  ;;  %v1784_v57 = vld [vmem:[#allocation7 + $0x448] sm:$0xff] }
 0x24e   : > { %1524 = vmatpush1.msra.mxu0 %v1101_v59  ;;  %1607 = vmatpush1.msra.mxu1 %v1103_v60  ;;  %v1779_v59 = vld [vmem:[#allocation7 + $0x420] sm:$0xff]  ;;  %v1781_v60 = vld [vmem:[#allocation7 + $0x430] sm:$0xff] }
 0x24f   : > { %9892 = vmatprep.mubr.msk.f32.mxu0 %vm1300_vm3, %v1233_v58  ;;  %9896 = vmatprep.mubr.msk.f32.mxu1 %vm1300_vm3, %v1233_v58  ;;  %v1780_v58 = vld [vmem:[#allocation7 + $0x428] sm:$0xff] }
 0x250   : > { %1525 = vmatprep.subr.mxu0 %v1099_v61  ;;  %1608 = vmatprep.subr.mxu1 %v11006_v0  ;;  %v1777_v61 = vld [vmem:[#allocation7 + $0x410] sm:$0xff] }
 0x251   : > { %1391 = vmatmul.mubr.f32.gmra.mxu0 %v1231_v51  ;;  %1473 = vmatmul.mubr.f32.gmra.mxu1 %v1231_v51  ;;  %v1790_v51 = vld [vmem:[#allocation7 + $0x478] sm:$0xff] }
 0x252   : > { %1526 = vmatpush1.msra.mxu0 %v1098_v63  ;;  %1609 = vmatpush1.msra.mxu1 %v1100_v11  ;;  %v1778_v63 = vld [vmem:[#allocation7 + $0x418] sm:$0xff] }
 0x253   : > { %1527 = vmatprep.subr.mxu0 %v1096_v12  ;;  %1610 = vmatprep.subr.mxu1 %v11006_v0  ;;  %v1774_v11 = vld [vmem:[#allocation7 + $0x3f8] sm:$0xff]  ;;  %v1773_v12 = vld [vmem:[#allocation7 + $0x3f0] sm:$0xff] }
 0x254   : > { %1528 = vmatpush1.msra.mxu0 %v1095_v14  ;;  %1611 = vmatpush1.msra.mxu1 %v1097_v15  ;;  %v1771_v14 = vld [vmem:[#allocation7 + $0x3e0] sm:$0xff]  ;;  %v1770_v15 = vld [vmem:[#allocation7 + $0x3d8] sm:$0xff] }
 0x255   : > { %9893 = vmatprep.mubr.msk.f32.mxu0 %vm1300_vm3, %v1239_v16  ;;  %9897 = vmatprep.mubr.msk.f32.mxu1 %vm1300_vm3, %v1239_v16  ;;  %v1772_v16 = vld [vmem:[#allocation7 + $0x3e8] sm:$0xff] }
 0x256   : > { %1529 = vmatprep.subr.mxu0 %v1093_v17  ;;  %1612 = vmatprep.subr.mxu1 %v11006_v0  ;;  %v1768_v17 = vld [vmem:[#allocation7 + $0x3c8] sm:$0xff] }
 0x257   : > { %1397 = vmatmul.mubr.f32.gmra.mxu0 %v1237_v62  ;;  %1478 = vmatmul.mubr.f32.gmra.mxu1 %v1237_v62  ;;  %v1776_v62 = vld [vmem:[#allocation7 + $0x408] sm:$0xff] }
 0x258   : > { %1530 = vmatpush1.msra.mxu0 %v1092_v19  ;;  %1613 = vmatpush1.msra.mxu1 %v1094_v20  ;;  %v1769_v19 = vld [vmem:[#allocation7 + $0x3d0] sm:$0xff] }
 0x259   : > { %1531 = vmatprep.subr.mxu0 %v1090_v21  ;;  %1614 = vmatprep.subr.mxu1 %v11006_v0  ;;  %v1765_v20 = vld [vmem:[#allocation7 + $0x3b0] sm:$0xff]  ;;  %v1764_v21 = vld [vmem:[#allocation7 + $0x3a8] sm:$0xff] }
 0x25a   : > { %1532 = vmatpush1.msra.mxu0 %v1089_v22  ;;  %1615 = vmatpush1.msra.mxu1 %v1091_v23  ;;  %v1766_v22 = vld [vmem:[#allocation7 + $0x3b8] sm:$0xff] }
 0x25b   : > { %9898 = vmatprep.subr.msk.mxu0 %vm1310_vm2, %v1144_v24  ;;  %1642 = vmatprep.subr.mxu1 %v11006_v0  ;;  %v1762_v23 = vld [vmem:[#allocation7 + $0x398] sm:$0xff]  ;;  %v1761_v24 = vld [vmem:[#allocation7 + $0x390] sm:$0xff] }
 0x25c   : > { %9899 = vmatpush2.msk.msra.mxu0 %vm1310_vm2, %v1143_v26  ;;  %9903 = vmatpush2.msk.msra.mxu1 %vm1310_vm2, %v1145_v27  ;;  %v1816_v26 = vld [vmem:[#allocation7 + $0x548] sm:$0xf]  ;;  %v1815_v27 = vld [vmem:[#allocation7 + $0x540] sm:$0xf] }
 0x25d   : > { %1561 = vmatprep.subr.mxu0 %v1141_v28  ;;  %1644 = vmatprep.subr.mxu1 %v11006_v0  ;;  %v1817_v28 = vld [vmem:[#allocation7 + $0x550] sm:$0xf] }
 0x25e   : > { %1562 = vmatpush2.msra.mxu0 %v1140_v29  ;;  %9900 = vmatprep.mubr.msk.f32.mxu0 %vm1300_vm3, %v1074_v18  ;;  %v1813_v29 = vld [vmem:[#allocation7 + $0x530] sm:$0xff] }
 0x25f   : > { %1645 = vmatpush2.msra.mxu1 %v1142_v30  ;;  %9904 = vmatprep.mubr.msk.f32.mxu1 %vm1300_vm3, %v1074_v18  ;;  %v1767_v18 = vld [vmem:[#allocation7 + $0x3c0] sm:$0xff]  ;;  %v1812_v30 = vld [vmem:[#allocation7 + $0x528] sm:$0xff] }
 0x260   : > { %1563 = vmatprep.subr.mxu0 %v1138_v32  ;;  %1646 = vmatprep.subr.mxu1 %v11006_v0  ;;  %v1810_v32 = vld [vmem:[#allocation7 + $0x518] sm:$0xff] }
 0x261   : > { %1564 = vmatpush2.msra.mxu0 %v1137_v33  ;;  %1647 = vmatpush2.msra.mxu1 %v1139_v34  ;;  %v1809_v33 = vld [vmem:[#allocation7 + $0x510] sm:$0xff]  ;;  %v1811_v34 = vld [vmem:[#allocation7 + $0x520] sm:$0xff] }
 0x262   : > { %1566 = vmatmul.mubr.f32.vlgmr.msra.gmra.mxu0 %v1072_v13  ;;  %1649 = vmatmul.mubr.f32.vlgmr.msra.gmra.mxu1 %v1072_v13  ;;  %v1775_v13 = vld [vmem:[#allocation7 + $0x400] sm:$0xff] }
 0x263   : > { %9901 = vmatprep.mubr.msk.f32.mxu0 %vm1300_vm3, %v1080_v31  ;;  %9905 = vmatprep.mubr.msk.f32.mxu1 %vm1300_vm3, %v1080_v31  ;;  %v1814_v31 = vld [vmem:[#allocation7 + $0x538] sm:$0xff] }
 0x264   : > { %9907 = vmatprep.subr.msk.mxu0 %vm999_vm0, %v11465_v1 }
 0x265   : > { %9908 = vmatpush1.msk.msra.mxu0 %vm999_vm0, %v11468_v2  ;;  %v1665_v2 = vld [vmem:[#allocation6 + $0x30] sm:$0xff] }
 0x266   : > { %1572 = vmatmul.mubr.f32.gmra.mxu0 %v1078_v25  ;;  %1654 = vmatmul.mubr.f32.gmra.mxu1 %v1078_v25  ;;  %v1763_v25 = vld [vmem:[#allocation7 + $0x3a0] sm:$0xff] }
 0x267   : > { %1701 = vmatprep.subr.mxu0 %v11471_v3  ;;  %9902 = vmatprep.mubr.msk.f32.mxu0 %vm1300_vm3, %v1086_v36  ;;  %v1666_v3 = vld [vmem:[#allocation6 + $0x38] sm:$0xff] }
 0x268   : > { %9906 = vmatprep.mubr.msk.f32.mxu1 %vm1300_vm3, %v1086_v36  ;;  %1702 = vmatpush1.msra.mxu0 %v11476_v4  ;;  %v1667_v4 = vld [vmem:[#allocation6 + $0x40] sm:$0x1] }
 0x269   : > { %1703 = vmatprep.subr.mxu0 %v11483_v5  ;;  %v1807_v5 = vld [vmem:[#allocation7 + $0x500] sm:$0xff] }
 0x26a   : > { %1704 = vmatpush1.msra.mxu0 %v11489_v6  ;;  %1659 = vmatmul.mubr.f32.gmra.mxu1 %v1084_v35  ;;  %v1806_v6 = vld [vmem:[#allocation7 + $0x4f8] sm:$0xff] }
 0x26b   : > { %1578 = vmatmul.mubr.f32.gmra.mxu0 %v1084_v35  ;;  %1705 = vmatprep.subr.mxu0 %v11494_v7  ;;  %v1808_v7 = vld [vmem:[#allocation7 + $0x508] sm:$0xff] }
 0x26c   : > { %1706 = vmatpush1.msra.mxu0 %v11499_v8  ;;  %1741 = vmatprep.mubr.f32.mxu0 %v11006_v0  ;;  %v1804_v8 = vld [vmem:[#allocation7 + $0x4e8] sm:$0xff] }
 0x26d   : > { %1707 = vmatprep.subr.mxu0 %v11504_v9  ;;  %1836 = vmatprep.subr.mxu1 %v1807_v5  ;;  %v1803_v9 = vld [vmem:[#allocation7 + $0x4e0] sm:$0xff]  ;;  %v2151_v35 = vld [vmem:[#allocation7 + $0x6c8] sm:$0xff] }
 0x26e   : > { %1708 = vmatpush1.msra.mxu0 %v11509_v10  ;;  %v1805_v10 = vld [vmem:[#allocation7 + $0x4f0] sm:$0xff]  ;;  %1837 = vmatpush1.msra.mxu1 %v1806_v6 }
 0x26f   : > { %9909 = vmatmul.mubr.msk.f32.vlgmr.msra.gmra.mxu0 %vm989_vm1, %v1665_v2  ;;  %1919 = vmatprep.subr.mxu0 %v11006_v0 }
 0x270   : > { %1747 = vmatprep.mubr.f32.mxu0 %v11006_v0  ;;  %1920 = vmatpush1.msra.mxu0 %v1808_v7 }
 0x271   : > { %1921 = vmatprep.subr.mxu0 %v11006_v0  ;;  %1838 = vmatprep.subr.mxu1 %v1804_v8 }
 0x272   : > { %1922 = vmatpush1.msra.mxu0 %v1805_v10  ;;  %1839 = vmatpush1.msra.mxu1 %v1803_v9 }
 0x273   : > { %9910 = vmatmul.mubr.msk.f32.gmra.mxu0 %vm989_vm1, %v1666_v3  ;;  %1923 = vmatprep.subr.mxu0 %v11006_v0 }
 0x274   : > { %1753 = vmatprep.mubr.f32.mxu0 %v11006_v0  ;;  %1840 = vmatprep.subr.mxu1 %v1801_v37 }
 0x275   : > { %1924 = vmatpush1.msra.mxu0 %v1802_v38  ;;  %1841 = vmatpush1.msra.mxu1 %v1800_v39 }
 0x276   : > { %1925 = vmatprep.subr.mxu0 %v11006_v0  ;;  %1842 = vmatprep.subr.mxu1 %v1798_v40 }
 0x277   : > { %9911 = vmatmul.mubr.msk.f32.gmra.mxu0 %vm989_vm1, %v1667_v4  ;;  %1843 = vmatpush1.msra.mxu1 %v1797_v42 }
 0x278   : > { %1926 = vmatpush1.msra.mxu0 %v1799_v41  ;;  %1844 = vmatprep.subr.mxu1 %v1795_v43 }
 0x279   : > { %1927 = vmatprep.subr.mxu0 %v11006_v0  ;;  %1845 = vmatpush1.msra.mxu1 %v1794_v44 }
 0x27a   : > { %1928 = vmatpush1.msra.mxu0 %v1796_v45  ;;  %1846 = vmatprep.subr.mxu1 %v1792_v46 }
 0x27b   : > { %1929 = vmatprep.subr.mxu0 %v11006_v0  ;;  %1847 = vmatpush1.msra.mxu1 %v1791_v47 }
 0x27c   : > { %1930 = vmatpush1.msra.mxu0 %v1793_v48  ;;  %1848 = vmatprep.subr.mxu1 %v1789_v49 }
 0x27d   : > { %1931 = vmatprep.subr.mxu0 %v11006_v0  ;;  %1849 = vmatpush1.msra.mxu1 %v1788_v50 }
 0x27e   : > { %1932 = vmatpush1.msra.mxu0 %v1790_v51  ;;  %1850 = vmatprep.subr.mxu1 %v1786_v52 }
 0x27f   : > { %1933 = vmatprep.subr.mxu0 %v11006_v0  ;;  %1851 = vmatpush1.msra.mxu1 %v1785_v53 }
 0x280   : > { %1934 = vmatpush1.msra.mxu0 %v1787_v54  ;;  %1852 = vmatprep.subr.mxu1 %v1783_v55 }
 0x281   : > { %1935 = vmatprep.subr.mxu0 %v11006_v0  ;;  %1853 = vmatpush1.msra.mxu1 %v1782_v56 }
 0x282   : > { %1936 = vmatpush1.msra.mxu0 %v1784_v57  ;;  %1854 = vmatprep.subr.mxu1 %v1780_v58 }
 0x283   : > { %1937 = vmatprep.subr.mxu0 %v11006_v0  ;;  %1855 = vmatpush1.msra.mxu1 %v1779_v59 }
 0x284   : > { %1938 = vmatpush1.msra.mxu0 %v1781_v60  ;;  %1856 = vmatprep.subr.mxu1 %v1777_v61  ;;  %v2150_v61 = vld [vmem:[#allocation7 + $0x6c0] sm:$0xff] }
 0x285   : > { %1939 = vmatprep.subr.mxu0 %v11006_v0  ;;  %1857 = vmatpush1.msra.mxu1 %v1776_v62  ;;  %v2148_v62 = vld [vmem:[#allocation7 + $0x6b0] sm:$0xff] }
 0x286   : > { %1940 = vmatpush1.msra.mxu0 %v1778_v63  ;;  %1858 = vmatprep.subr.mxu1 %v1774_v11  ;;  %v11647_v11 = vld [vmem:[%s11462_s6 + $0x40] sm:$0x1f] }
 0x287   : > { %1941 = vmatprep.subr.mxu0 %v11006_v0  ;;  %1859 = vmatpush1.msra.mxu1 %v1773_v12 }
 0x288   : > { %1942 = vmatpush1.msra.mxu0 %v1775_v13  ;;  %1860 = vmatprep.subr.mxu1 %v1771_v14  ;;  %v11652_v13 = vld [vmem:[%s11462_s6 + $0x38] sm:$0xff]  ;;  %v2147_v14 = vld [vmem:[#allocation7 + $0x6a8] sm:$0xff] }
 0x289   : > { %1943 = vmatprep.subr.mxu0 %v11006_v0  ;;  %1861 = vmatpush1.msra.mxu1 %v1770_v15  ;;  %v2145_v15 = vld [vmem:[#allocation7 + $0x698] sm:$0xff] }
 0x28a   : > { %1944 = vmatpush1.msra.mxu0 %v1772_v16  ;;  %1862 = vmatprep.subr.mxu1 %v1768_v17  ;;  %v11658_v17 = vld [vmem:[%s11462_s6 + $0x30] sm:$0xff] }
 0x28b   : > { %1945 = vmatprep.subr.mxu0 %v11006_v0  ;;  %1863 = vmatpush1.msra.mxu1 %v1767_v18 }
 0x28c   : > { %1946 = vmatpush1.msra.mxu0 %v1769_v19  ;;  %1864 = vmatprep.subr.mxu1 %v1765_v20  ;;  %v11662_v19 = vld [vmem:[%s11462_s6 + $0x28] sm:$0xff]  ;;  %v11668_v20 = vld [vmem:[%s11462_s6 + $0x20] sm:$0xff] }
 0x28d   : > { %1947 = vmatprep.subr.mxu0 %v11006_v0  ;;  %1865 = vmatpush1.msra.mxu1 %v1764_v21  ;;  %v2144_v21 = vld [vmem:[#allocation7 + $0x690] sm:$0xff] }
 0x28e   : > { %1948 = vmatpush1.msra.mxu0 %v1766_v22  ;;  %1866 = vmatprep.subr.mxu1 %v1762_v23  ;;  %v11672_v22 = vld [vmem:[%s11462_s6 + $0x18] sm:$0xff] }
 0x28f   : > { %1949 = vmatprep.subr.mxu0 %v11006_v0  ;;  %1867 = vmatpush1.msra.mxu1 %v1761_v24  ;;  %v2142_v23 = vld [vmem:[#allocation7 + $0x680] sm:$0xff]  ;;  %v11676_v24 = vld [vmem:[%s11462_s6 + $0x10] sm:$0xff] }
 0x290   : > { %1950 = vmatpush1.msra.mxu0 %v1763_v25  ;;  %9912 = vmatprep.subr.msk.mxu1 %vm1310_vm2, %v1816_v26  ;;  %v2009_v25 = vld [vmem:[#allocation6 + $0x48] sm:$0xff] }
 0x291   : > { %1977 = vmatprep.subr.mxu0 %v11006_v0  ;;  %9913 = vmatpush2.msk.msra.mxu1 %vm1310_vm2, %v1815_v27  ;;  %v11681_v26 = vld [vmem:[%s11462_s6 + $0x8] sm:$0xff] }
 0x292   : > { %9917 = vmatpush2.msk.msra.mxu0 %vm1310_vm2, %v1817_v28  ;;  %1896 = vmatprep.subr.mxu1 %v1813_v29  ;;  %v2152_v27 = vld [vmem:[#allocation7 + $0x6d0] sm:$0xff]  ;;  %v11685_v28 = vld [vmem:[%s11462_s6] sm:$0xff]  ;;  %v2141_v29 = vld [vmem:[#allocation7 + $0x678] sm:$0xff] }
 0x293   : > { %1979 = vmatprep.subr.mxu0 %v11006_v0  ;;  %1897 = vmatpush2.msra.mxu1 %v1812_v30  ;;  %v2149_v30 = vld [vmem:[#allocation7 + $0x6b8] sm:$0xff] }
 0x294   : > { %1980 = vmatpush2.msra.mxu0 %v1814_v31  ;;  %1898 = vmatprep.subr.mxu1 %v1810_v32  ;;  %v2139_v31 = vld [vmem:[#allocation7 + $0x668] sm:$0xff]  ;;  %v2010_v32 = vld [vmem:[#allocation6 + $0x50] sm:$0xff] }
 0x295   : > { %1981 = vmatprep.subr.mxu0 %v11006_v0  ;;  %1899 = vmatpush2.msra.mxu1 %v1809_v33  ;;  %v2146_v33 = vld [vmem:[#allocation7 + $0x6a0] sm:$0xff] }
 0x296   : > { %1982 = vmatpush2.msra.mxu0 %v1811_v34  ;;  %9921 = vmatprep.subr.msk.mxu1 %vm999_vm0, %v11465_v1  ;;  %v2138_v34 = vld [vmem:[#allocation7 + $0x660] sm:$0xff] }
 0x297   : > { %2180 = vmatprep.subr.mxu0 %v2151_v35  ;;  %v2143_v35 = vld [vmem:[#allocation7 + $0x688] sm:$0xff] }
 0x2f7   : > { %v1469_v36 = vpop.f32.mrf.mxu1  ;;  %v1386_v3 = vpop.f32.mrf.mxu0 }
 0x2f9   : > { %v1471_v2 = vpop.f32.mrf.mxu1  ;;  %v1388_v5 = vpop.f32.mrf.mxu0 }
 0x2fa   : > { %v2011_v2 = vld [vmem:[#allocation6 + $0x58] sm:$0x1] }
 0x311   : > { %v1474_v4 = vpop.f32.mrf.mxu1  ;;  %v1392_v7 = vpop.f32.mrf.mxu0 }
 0x313   : > { %v1476_v6 = vpop.f32.mrf.mxu1  ;;  %v1394_v9 = vpop.f32.mrf.mxu0 }
 0x314   : > { %v2137_v6 = vld [vmem:[#allocation7 + $0x658] sm:$0xff] }
 0x317   : > { %v1479_v8 = vpop.f32.mrf.mxu1  ;;  %v1398_v37 = vpop.f32.mrf.mxu0 }
 0x319   : > { %v1481_v10 = vpop.f32.mrf.mxu1  ;;  %v1400_v38 = vpop.f32.mrf.mxu0 }
 0x31a   : > { %v2129_v10 = vld [vmem:[#allocation7 + $0x618] sm:$0xff] }
 0x322   : > { %v1567_v39 = vpop.f32.mrf.mxu0  ;;  %v1650_v40 = vpop.f32.mrf.mxu1 }
 0x323   : > { %v11626_v41 = vadd.f32 %v1567_v39, %v1386_v3  ;;  %v11628_v42 = vadd.f32 %v1650_v40, %v1469_v36  ;;  %v2136_v36 = vld [vmem:[#allocation7 + $0x650] sm:$0xff]  ;;  %v2126_v39 = vld [vmem:[#allocation7 + $0x600] sm:$0xff] }
 0x324   : > { %v1569_v1 = vpop.f32.mrf.mxu0  ;;  %v1652_v43 = vpop.f32.mrf.mxu1  ;;  %v2140_v3 = vld [vmem:[#allocation7 + $0x670] sm:$0xff] }
 0x325   : > { %v11630_v44 = vadd.f32 %v1569_v1, %v1388_v5  ;;  %v2133_v5 = vld [vmem:[#allocation7 + $0x638] sm:$0xff]  ;;  %v2124_v40 = vld [vmem:[#allocation7 + $0x5f0] sm:$0xff]  ;;  %v2123_v43 = vld [vmem:[#allocation7 + $0x5e8] sm:$0xff] }
 0x326   : > { %v1573_v45 = vpop.f32.mrf.mxu0  ;;  %v1655_v46 = vpop.f32.mrf.mxu1  ;;  %v2128_v1 = vld [vmem:[#allocation7 + $0x610] sm:$0xff] }
 0x327   : > { %v11632_v47 = vadd.f32 %v1573_v45, %v1392_v7  ;;  %v11634_v48 = vadd.f32 %v1655_v46, %v1474_v4  ;;  %v2135_v4 = vld [vmem:[#allocation7 + $0x648] sm:$0xff]  ;;  %v2132_v7 = vld [vmem:[#allocation7 + $0x630] sm:$0xff]  ;;  %v2121_v45 = vld [vmem:[#allocation7 + $0x5d8] sm:$0xff] }
 0x328   : > { %v1575_v49 = vpop.f32.mrf.mxu0  ;;  %v1657_v50 = vpop.f32.mrf.mxu1  ;;  %v2125_v46 = vld [vmem:[#allocation7 + $0x5f8] sm:$0xff] }
 0x329   : > { %v11636_v51 = vadd.f32 %v1575_v49, %v1394_v9  ;;  %v2134_v9 = vld [vmem:[#allocation7 + $0x640] sm:$0xff]  ;;  %v2120_v49 = vld [vmem:[#allocation7 + $0x5d0] sm:$0xff] }
 0x32a   : > { %v1660_v52 = vpop.f32.mrf.mxu1  ;;  %v2122_v50 = vld [vmem:[#allocation7 + $0x5e0] sm:$0xff] }
 0x32b   : > { %v1579_v53 = vpop.f32.mrf.mxu0  ;;  %v11638_v54 = vadd.f32 %v1660_v52, %v1479_v8  ;;  %v2130_v8 = vld [vmem:[#allocation7 + $0x620] sm:$0xff] }
 0x32c   : > { %v11640_v55 = vadd.f32 %v1579_v53, %v1398_v37  ;;  %v1662_v56 = vpop.f32.mrf.mxu1  ;;  %v2127_v37 = vld [vmem:[#allocation7 + $0x608] sm:$0xff]  ;;  %v2118_v52 = vld [vmem:[#allocation7 + $0x5c0] sm:$0xff]  ;;  %v2117_v53 = vld [vmem:[#allocation7 + $0x5b8] sm:$0xff] }
 0x32d   : > { %v1581_v57 = vpop.f32.mrf.mxu0  ;;  %v2119_v56 = vld [vmem:[#allocation7 + $0x5c8] sm:$0xff] }
 0x32e   : > { %v11642_v58 = vadd.f32 %v1581_v57, %v1400_v38  ;;  %v2131_v38 = vld [vmem:[#allocation7 + $0x628] sm:$0xff] }
 0x32f   : > { %v1743_v59 = vpop.f32.mrf.mxu0  ;;  %v2115_v57 = vld [vmem:[#allocation7 + $0x5a8] sm:$0xff] }
 0x331   : > { %v1745_v60 = vpop.f32.mrf.mxu0 }
 0x332   : > { %9914 = vmatprep.mubr.msk.f32.mxu1 %vm1300_vm3, %v1745_v60  ;;  %9918 = vmatprep.mubr.msk.f32.mxu0 %vm1300_vm3, %v1745_v60  ;;  %v2116_v60 = vld [vmem:[#allocation7 + $0x5b0] sm:$0xff] }
 0x333   : > { %v1749_v63 = vpop.f32.mrf.mxu0  ;;  %1901 = vmatmul.mubr.f32.vlgmr.msra.gmra.mxu1 %v1743_v59  ;;  %1984 = vmatmul.mubr.f32.vlgmr.msra.gmra.mxu0 %v1743_v59  ;;  %v2114_v59 = vld [vmem:[#allocation7 + $0x5a0] sm:$0xff] }
 0x334   : > { %9922 = vmatpush1.msk.msra.mxu1 %vm999_vm0, %v11647_v11  ;;  %2181 = vmatpush1.msra.mxu0 %v2150_v61  ;;  %v2112_v61 = vld [vmem:[#allocation7 + $0x590] sm:$0xff] }
 0x335   : > { %v1751_v12 = vpop.f32.mrf.mxu0  ;;  %2045 = vmatprep.subr.mxu1 %v11652_v13  ;;  %2182 = vmatprep.subr.mxu0 %v2148_v62  ;;  %v2111_v62 = vld [vmem:[#allocation7 + $0x588] sm:$0xff] }
 0x336   : > { %9915 = vmatprep.mubr.msk.f32.mxu1 %vm1300_vm3, %v1751_v12  ;;  %9919 = vmatprep.mubr.msk.f32.mxu0 %vm1300_vm3, %v1751_v12  ;;  %v2109_v12 = vld [vmem:[#allocation7 + $0x578] sm:$0xff] }
 0x337   : > { %v1755_v16 = vpop.f32.mrf.mxu0  ;;  %1907 = vmatmul.mubr.f32.gmra.mxu1 %v1749_v63  ;;  %1989 = vmatmul.mubr.f32.gmra.mxu0 %v1749_v63  ;;  %v2113_v63 = vld [vmem:[#allocation7 + $0x598] sm:$0xff] }
 0x338   : > { %2046 = vmatpush1.msra.mxu1 %v11658_v17  ;;  %2183 = vmatpush1.msra.mxu0 %v2147_v14  ;;  %v2108_v14 = vld [vmem:[#allocation7 + $0x570] sm:$0xff] }
 0x339   : > { %v1757_v18 = vpop.f32.mrf.mxu0  ;;  %2047 = vmatprep.subr.mxu1 %v11662_v19  ;;  %2184 = vmatprep.subr.mxu0 %v2145_v15  ;;  %v2110_v15 = vld [vmem:[#allocation7 + $0x580] sm:$0xff] }
 0x33a   : > { %9916 = vmatprep.mubr.msk.f32.mxu1 %vm1300_vm3, %v1757_v18  ;;  %9920 = vmatprep.mubr.msk.f32.mxu0 %vm1300_vm3, %v1757_v18  ;;  %v2105_v18 = vld [vmem:[#allocation7 + $0x558] sm:$0xff] }
 0x33b   : > { %2048 = vmatpush1.msra.mxu1 %v11668_v20  ;;  %1994 = vmatmul.mubr.f32.gmra.mxu0 %v1755_v16 }
 0x33c   : > { %1913 = vmatmul.mubr.f32.gmra.mxu1 %v1755_v16  ;;  %2049 = vmatprep.subr.mxu1 %v11672_v22  ;;  %v2106_v16 = vld [vmem:[#allocation7 + $0x560] sm:$0xff] }
 0x33d   : > { %2050 = vmatpush1.msra.mxu1 %v11676_v24  ;;  %2085 = vmatprep.mubr.f32.mxu1 %v11006_v0 }
 0x33e   : > { %2051 = vmatprep.subr.mxu1 %v11681_v26  ;;  %2185 = vmatpush1.msra.mxu0 %v2144_v21  ;;  %v2107_v21 = vld [vmem:[#allocation7 + $0x568] sm:$0xff] }
 0x33f   : > { %2052 = vmatpush1.msra.mxu1 %v11685_v28  ;;  %2186 = vmatprep.subr.mxu0 %v2142_v23  ;;  %v2160_v23 = vld [vmem:[#allocation7 + $0x710] sm:$0xf] }
 0x340   : > { %9923 = vmatmul.mubr.msk.f32.vlgmr.msra.gmra.mxu1 %vm989_vm1, %v2009_v25  ;;  %2263 = vmatprep.subr.mxu1 %v11006_v0  ;;  %v2159_v25 = vld [vmem:[#allocation7 + $0x708] sm:$0xf] }
 0x341   : > { %2091 = vmatprep.mubr.f32.mxu1 %v11006_v0  ;;  %2264 = vmatpush1.msra.mxu1 %v2152_v27  ;;  %v2161_v27 = vld [vmem:[#allocation7 + $0x718] sm:$0xf] }
 0x342   : > { %2265 = vmatprep.subr.mxu1 %v11006_v0  ;;  %2187 = vmatpush1.msra.mxu0 %v2141_v29  ;;  %v2157_v29 = vld [vmem:[#allocation7 + $0x6f8] sm:$0xff] }
 0x343   : > { %2266 = vmatpush1.msra.mxu1 %v2149_v30  ;;  %2188 = vmatprep.subr.mxu0 %v2139_v31  ;;  %v2156_v30 = vld [vmem:[#allocation7 + $0x6f0] sm:$0xff]  ;;  %v2158_v31 = vld [vmem:[#allocation7 + $0x700] sm:$0xff] }
 0x344   : > { %9924 = vmatmul.mubr.msk.f32.gmra.mxu1 %vm989_vm1, %v2010_v32  ;;  %2267 = vmatprep.subr.mxu1 %v11006_v0  ;;  %v2154_v32 = vld [vmem:[#allocation7 + $0x6e0] sm:$0xff] }
 0x345   : > { %2097 = vmatprep.mubr.f32.mxu1 %v11006_v0  ;;  %2268 = vmatpush1.msra.mxu1 %v2146_v33  ;;  %v2153_v33 = vld [vmem:[#allocation7 + $0x6d8] sm:$0xff] }
 0x346   : > { %2269 = vmatprep.subr.mxu1 %v11006_v0  ;;  %2189 = vmatpush1.msra.mxu0 %v2138_v34  ;;  %v2155_v34 = vld [vmem:[#allocation7 + $0x6e8] sm:$0xff] }
 0x347   : > { %2270 = vmatpush1.msra.mxu1 %v2143_v35  ;;  %2190 = vmatprep.subr.mxu0 %v2136_v36  ;;  %v10403_v35 = vld [vmem:[%s11462_s6 + $0x48] sm:$0x1f] }
 0x348   : > { %9925 = vmatmul.mubr.msk.f32.gmra.mxu1 %vm989_vm1, %v2011_v2  ;;  %2271 = vmatprep.subr.mxu1 %v11006_v0  ;;  %v2495_v36 = vld [vmem:[#allocation7 + $0x890] sm:$0xff] }
 0x349   : > { %2272 = vmatpush1.msra.mxu1 %v2140_v3  ;;  %2191 = vmatpush1.msra.mxu0 %v2135_v4 }
 0x34a   : > { %2273 = vmatprep.subr.mxu1 %v11006_v0  ;;  %2192 = vmatprep.subr.mxu0 %v2133_v5 }
 0x34b   : > { %2274 = vmatpush1.msra.mxu1 %v2137_v6  ;;  %2193 = vmatpush1.msra.mxu0 %v2132_v7 }
 0x34c   : > { %2275 = vmatprep.subr.mxu1 %v11006_v0  ;;  %2194 = vmatprep.subr.mxu0 %v2130_v8 }
 0x34d   : > { %2276 = vmatpush1.msra.mxu1 %v2134_v9  ;;  %2195 = vmatpush1.msra.mxu0 %v2129_v10 }
 0x34e   : > { %2277 = vmatprep.subr.mxu1 %v11006_v0  ;;  %2196 = vmatprep.subr.mxu0 %v2127_v37 }
 0x34f   : > { %2278 = vmatpush1.msra.mxu1 %v2131_v38  ;;  %2197 = vmatpush1.msra.mxu0 %v2126_v39 }
 0x350   : > { %2279 = vmatprep.subr.mxu1 %v11006_v0  ;;  %2198 = vmatprep.subr.mxu0 %v2124_v40 }
 0x351   : > { %2280 = vmatpush1.msra.mxu1 %v2128_v1  ;;  %2199 = vmatpush1.msra.mxu0 %v2123_v43 }
 0x352   : > { %2281 = vmatprep.subr.mxu1 %v11006_v0  ;;  %2200 = vmatprep.subr.mxu0 %v2121_v45 }
 0x353   : > { %2282 = vmatpush1.msra.mxu1 %v2125_v46  ;;  %2201 = vmatpush1.msra.mxu0 %v2120_v49 }
 0x354   : > { %2283 = vmatprep.subr.mxu1 %v11006_v0  ;;  %2202 = vmatprep.subr.mxu0 %v2118_v52 }
 0x355   : > { %2284 = vmatpush1.msra.mxu1 %v2122_v50  ;;  %2203 = vmatpush1.msra.mxu0 %v2117_v53  ;;  %v2494_v50 = vld [vmem:[#allocation7 + $0x888] sm:$0xff] }
 0x356   : > { %2285 = vmatprep.subr.mxu1 %v11006_v0  ;;  %2204 = vmatprep.subr.mxu0 %v2115_v57  ;;  %v2485_v57 = vld [vmem:[#allocation7 + $0x840] sm:$0xff] }
 0x357   : > { %2286 = vmatpush1.msra.mxu1 %v2119_v56  ;;  %2205 = vmatpush1.msra.mxu0 %v2114_v59  ;;  %v2490_v59 = vld [vmem:[#allocation7 + $0x868] sm:$0xff] }
 0x358   : > { %2287 = vmatprep.subr.mxu1 %v11006_v0  ;;  %2206 = vmatprep.subr.mxu0 %v2112_v61  ;;  %v2355_v61 = vld [vmem:[#allocation6 + $0x70] sm:$0x1] }
 0x359   : > { %2288 = vmatpush1.msra.mxu1 %v2116_v60  ;;  %2207 = vmatpush1.msra.mxu0 %v2111_v62  ;;  %v2480_v60 = vld [vmem:[#allocation7 + $0x818] sm:$0xff] }
 0x35a   : > { %2289 = vmatprep.subr.mxu1 %v11006_v0  ;;  %2208 = vmatprep.subr.mxu0 %v2109_v12  ;;  %v2484_v62 = vld [vmem:[#allocation7 + $0x838] sm:$0xff]  ;;  %v2477_v12 = vld [vmem:[#allocation7 + $0x800] sm:$0xff] }
 0x35b   : > { %2290 = vmatpush1.msra.mxu1 %v2113_v63  ;;  %2209 = vmatpush1.msra.mxu0 %v2108_v14  ;;  %v2479_v63 = vld [vmem:[#allocation7 + $0x810] sm:$0xff]  ;;  %v2481_v14 = vld [vmem:[#allocation7 + $0x820] sm:$0xff] }
 0x35c   : > { %2291 = vmatprep.subr.mxu1 %v11006_v0  ;;  %2210 = vmatprep.subr.mxu0 %v2106_v16  ;;  %v2474_v16 = vld [vmem:[#allocation7 + $0x7e8] sm:$0xff] }
 0x35d   : > { %2292 = vmatpush1.msra.mxu1 %v2110_v15  ;;  %2211 = vmatpush1.msra.mxu0 %v2105_v18  ;;  %v2476_v15 = vld [vmem:[#allocation7 + $0x7f8] sm:$0xff]  ;;  %v2478_v18 = vld [vmem:[#allocation7 + $0x808] sm:$0xff] }
 0x35e   : > { %2293 = vmatprep.subr.mxu1 %v11006_v0  ;;  %9926 = vmatprep.subr.msk.mxu0 %vm1310_vm2, %v2160_v23  ;;  %v2471_v23 = vld [vmem:[#allocation7 + $0x7d0] sm:$0xff] }
 0x35f   : > { %2294 = vmatpush1.msra.mxu1 %v2107_v21  ;;  %9927 = vmatpush2.msk.msra.mxu0 %vm1310_vm2, %v2159_v25  ;;  %v2473_v21 = vld [vmem:[#allocation7 + $0x7e0] sm:$0xff]  ;;  %v2475_v25 = vld [vmem:[#allocation7 + $0x7f0] sm:$0xff] }
 0x360   : > { %2321 = vmatprep.subr.mxu1 %v11006_v0  ;;  %2240 = vmatprep.subr.mxu0 %v2157_v29  ;;  %v2468_v29 = vld [vmem:[#allocation7 + $0x7b8] sm:$0xff] }
 0x361   : > { %9931 = vmatpush2.msk.msra.mxu1 %vm1310_vm2, %v2161_v27  ;;  %2241 = vmatpush2.msra.mxu0 %v2156_v30  ;;  %v2470_v27 = vld [vmem:[#allocation7 + $0x7c8] sm:$0xff]  ;;  %v2472_v30 = vld [vmem:[#allocation7 + $0x7d8] sm:$0xff] }
 0x362   : > { %2323 = vmatprep.subr.mxu1 %v11006_v0  ;;  %2242 = vmatprep.subr.mxu0 %v2154_v32  ;;  %v2465_v32 = vld [vmem:[#allocation7 + $0x7a0] sm:$0xff] }
 0x363   : > { %2324 = vmatpush2.msra.mxu1 %v2158_v31  ;;  %2243 = vmatpush2.msra.mxu0 %v2153_v33  ;;  %v2467_v31 = vld [vmem:[#allocation7 + $0x7b0] sm:$0xff]  ;;  %v2469_v33 = vld [vmem:[#allocation7 + $0x7c0] sm:$0xff] }
 0x364   : > { %2325 = vmatprep.subr.mxu1 %v11006_v0  ;;  %9935 = vmatprep.subr.msk.mxu0 %vm999_vm0, %v10403_v35  ;;  %v2466_v35 = vld [vmem:[#allocation7 + $0x7a8] sm:$0xff] }
 0x365   : > { %2326 = vmatpush2.msra.mxu1 %v2155_v34  ;;  %v2464_v34 = vld [vmem:[#allocation7 + $0x798] sm:$0xff] }
 0x366   : > { %2524 = vmatprep.subr.mxu1 %v2495_v36  ;;  %v2462_v36 = vld [vmem:[#allocation7 + $0x788] sm:$0xff] }
 0x3f3   : > { %v1902_v2 = vpop.f32.mrf.mxu1  ;;  %v1985_v3 = vpop.f32.mrf.mxu0 }
 0x3f4   : > { %v11718_v4 = vadd.f32 %v1902_v2, %v11626_v41  ;;  %v11721_v5 = vadd.f32 %v1985_v3, %v11628_v42  ;;  %v2461_v2 = vld [vmem:[#allocation7 + $0x780] sm:$0xff]  ;;  %v2463_v3 = vld [vmem:[#allocation7 + $0x790] sm:$0xff] }
 0x3f5   : > { %v1904_v6 = vpop.f32.mrf.mxu1  ;;  %v1987_v7 = vpop.f32.mrf.mxu0 }
 0x3f6   : > { %v11724_v8 = vadd.f32 %v1904_v6, %v11630_v44  ;;  %v2459_v6 = vld [vmem:[#allocation7 + $0x770] sm:$0xff]  ;;  %v2458_v7 = vld [vmem:[#allocation7 + $0x768] sm:$0xff] }
 0x3f7   : > { %v1908_v9 = vpop.f32.mrf.mxu1  ;;  %v1990_v10 = vpop.f32.mrf.mxu0 }
 0x3f8   : > { %v11727_v37 = vadd.f32 %v1908_v9, %v11632_v47  ;;  %v11730_v38 = vadd.f32 %v1990_v10, %v11634_v48  ;;  %v2460_v9 = vld [vmem:[#allocation7 + $0x778] sm:$0xff] }
 0x3f9   : > { %v1910_v39 = vpop.f32.mrf.mxu1  ;;  %v1992_v40 = vpop.f32.mrf.mxu0  ;;  %v2456_v10 = vld [vmem:[#allocation7 + $0x758] sm:$0xff] }
 0x3fa   : > { %v11733_v41 = vadd.f32 %v1910_v39, %v11636_v51  ;;  %v2492_v51 = vld [vmem:[#allocation7 + $0x878] sm:$0xff]  ;;  %v2455_v39 = vld [vmem:[#allocation7 + $0x750] sm:$0xff]  ;;  %v2457_v40 = vld [vmem:[#allocation7 + $0x760] sm:$0xff] }
 0x3fb   : > { %v1995_v42 = vpop.f32.mrf.mxu0 }
 0x3fc   : > { %v1914_v1 = vpop.f32.mrf.mxu1  ;;  %v11736_v43 = vadd.f32 %v1995_v42, %v11638_v54  ;;  %v2453_v42 = vld [vmem:[#allocation7 + $0x740] sm:$0xff] }
 0x3fd   : > { %v11739_v44 = vadd.f32 %v1914_v1, %v11640_v55  ;;  %v1997_v45 = vpop.f32.mrf.mxu0  ;;  %v2491_v55 = vld [vmem:[#allocation7 + $0x870] sm:$0xff]  ;;  %v2452_v1 = vld [vmem:[#allocation7 + $0x738] sm:$0xff] }
 0x3fe   : > { %v1916_v46 = vpop.f32.mrf.mxu1  ;;  %v2454_v45 = vld [vmem:[#allocation7 + $0x748] sm:$0xff] }
 0x3ff   : > { %v11742_v47 = vadd.f32 %v1916_v46, %v11642_v58  ;;  %v2489_v58 = vld [vmem:[#allocation7 + $0x860] sm:$0xff]  ;;  %v2450_v46 = vld [vmem:[#allocation7 + $0x728] sm:$0xff] }
 0x400   : > { %v2087_v48 = vpop.f32.mrf.mxu1 }
 0x402   : > { %v2089_v49 = vpop.f32.mrf.mxu1 }
 0x403   : > { %9928 = vmatprep.mubr.msk.f32.mxu0 %vm1300_vm3, %v2089_v49  ;;  %9932 = vmatprep.mubr.msk.f32.mxu1 %vm1300_vm3, %v2089_v49  ;;  %v2451_v49 = vld [vmem:[#allocation7 + $0x730] sm:$0xff] }
 0x404   : > { %v2093_v52 = vpop.f32.mrf.mxu1  ;;  %2245 = vmatmul.mubr.f32.vlgmr.msra.gmra.mxu0 %v2087_v48  ;;  %2328 = vmatmul.mubr.f32.vlgmr.msra.gmra.mxu1 %v2087_v48  ;;  %v2449_v48 = vld [vmem:[#allocation7 + $0x720] sm:$0xff] }
 0x405   : > { %9936 = vmatpush1.msk.msra.mxu0 %vm999_vm0, %v11647_v11  ;;  %2525 = vmatpush1.msra.mxu1 %v2494_v50  ;;  %v2488_v11 = vld [vmem:[#allocation7 + $0x858] sm:$0xff]  ;;  %vm9587_vm0 = vcmask 90112  }
 0x406   : > { %v2095_v54 = vpop.f32.mrf.mxu1  ;;  %2389 = vmatprep.subr.mxu0 %v11652_v13  ;;  %2526 = vmatprep.subr.mxu1 %v2492_v51  ;;  %v2486_v13 = vld [vmem:[#allocation7 + $0x848] sm:$0xff]  ;;  %v2504_v50 = vld [vmem:[#allocation7 + $0x8d8] sm:$0xf]  ;;  %v2503_v51 = vld [vmem:[#allocation7 + $0x8d0] sm:$0xf] }
 0x407   : > { %9929 = vmatprep.mubr.msk.f32.mxu0 %vm1300_vm3, %v2095_v54  ;;  %9933 = vmatprep.mubr.msk.f32.mxu1 %vm1300_vm3, %v2095_v54  ;;  %v2501_v54 = vld [vmem:[#allocation7 + $0x8c0] sm:$0xff] }
 0x408   : > { %v2099_v53 = vpop.f32.mrf.mxu1  ;;  %2251 = vmatmul.mubr.f32.gmra.mxu0 %v2093_v52  ;;  %2333 = vmatmul.mubr.f32.gmra.mxu1 %v2093_v52  ;;  %v2505_v52 = vld [vmem:[#allocation7 + $0x8e0] sm:$0xf] }
 0x409   : > { %2390 = vmatpush1.msra.mxu0 %v11658_v17  ;;  %2527 = vmatpush1.msra.mxu1 %v2491_v55  ;;  %v2353_v17 = vld [vmem:[#allocation6 + $0x60] sm:$0xff]  ;;  %v2500_v55 = vld [vmem:[#allocation7 + $0x8b8] sm:$0xff] }
 0x40a   : > { %v2101_v56 = vpop.f32.mrf.mxu1  ;;  %2391 = vmatprep.subr.mxu0 %v11662_v19  ;;  %2528 = vmatprep.subr.mxu1 %v2489_v58  ;;  %v2496_v19 = vld [vmem:[#allocation7 + $0x898] sm:$0xff]  ;;  %v2502_v58 = vld [vmem:[#allocation7 + $0x8c8] sm:$0xff] }
 0x40b   : > { %9930 = vmatprep.mubr.msk.f32.mxu0 %vm1300_vm3, %v2101_v56  ;;  %9934 = vmatprep.mubr.msk.f32.mxu1 %vm1300_vm3, %v2101_v56  ;;  %v2497_v56 = vld [vmem:[#allocation7 + $0x8a0] sm:$0xff] }
 0x40c   : > { %2392 = vmatpush1.msra.mxu0 %v11668_v20  ;;  %2338 = vmatmul.mubr.f32.gmra.mxu1 %v2099_v53  ;;  %v2493_v20 = vld [vmem:[#allocation7 + $0x880] sm:$0xff] }
 0x40d   : > { %2257 = vmatmul.mubr.f32.gmra.mxu0 %v2099_v53  ;;  %2393 = vmatprep.subr.mxu0 %v11672_v22  ;;  %v2483_v22 = vld [vmem:[#allocation7 + $0x830] sm:$0xff]  ;;  %v2498_v53 = vld [vmem:[#allocation7 + $0x8a8] sm:$0xff] }
 0x40e   : > { %2394 = vmatpush1.msra.mxu0 %v11676_v24  ;;  %2429 = vmatprep.mubr.f32.mxu0 %v11006_v0  ;;  %v2354_v24 = vld [vmem:[#allocation6 + $0x68] sm:$0xff] }
 0x40f   : > { %2395 = vmatprep.subr.mxu0 %v11681_v26  ;;  %2529 = vmatpush1.msra.mxu1 %v2488_v11  ;;  %v2482_v26 = vld [vmem:[#allocation7 + $0x828] sm:$0xff]  ;;  %v2499_v11 = vld [vmem:[#allocation7 + $0x8b0] sm:$0xff] }
 0x410   : > { %2396 = vmatpush1.msra.mxu0 %v11685_v28  ;;  %2530 = vmatprep.subr.mxu1 %v2486_v13  ;;  %v2487_v28 = vld [vmem:[#allocation7 + $0x850] sm:$0xff] }
 0x411   : > { %9937 = vmatmul.mubr.msk.f32.vlgmr.msra.gmra.mxu0 %vm989_vm1, %v2353_v17  ;;  %2607 = vmatprep.subr.mxu0 %v11006_v0 }
 0x412   : > { %2435 = vmatprep.mubr.f32.mxu0 %v11006_v0  ;;  %2608 = vmatpush1.msra.mxu0 %v2496_v19 }
 0x413   : > { %2609 = vmatprep.subr.mxu0 %v11006_v0  ;;  %2531 = vmatpush1.msra.mxu1 %v2485_v57 }
 0x414   : > { %2610 = vmatpush1.msra.mxu0 %v2493_v20  ;;  %2532 = vmatprep.subr.mxu1 %v2483_v22 }
 0x415   : > { %9938 = vmatmul.mubr.msk.f32.gmra.mxu0 %vm989_vm1, %v2354_v24  ;;  %2611 = vmatprep.subr.mxu0 %v11006_v0 }
 0x416   : > { %2441 = vmatprep.mubr.f32.mxu0 %v11006_v0  ;;  %2612 = vmatpush1.msra.mxu0 %v2490_v59 }
 0x417   : > { %2613 = vmatprep.subr.mxu0 %v11006_v0  ;;  %2533 = vmatpush1.msra.mxu1 %v2482_v26 }
 0x418   : > { %2614 = vmatpush1.msra.mxu0 %v2487_v28  ;;  %2534 = vmatprep.subr.mxu1 %v2480_v60 }
 0x419   : > { %9939 = vmatmul.mubr.msk.f32.gmra.mxu0 %vm989_vm1, %v2355_v61  ;;  %2615 = vmatprep.subr.mxu0 %v11006_v0 }
 0x41a   : > { %2616 = vmatpush1.msra.mxu0 %v2484_v62  ;;  %2535 = vmatpush1.msra.mxu1 %v2479_v63 }
 0x41b   : > { %2617 = vmatprep.subr.mxu0 %v11006_v0  ;;  %2536 = vmatprep.subr.mxu1 %v2477_v12 }
 0x41c   : > { %2618 = vmatpush1.msra.mxu0 %v2481_v14  ;;  %2537 = vmatpush1.msra.mxu1 %v2476_v15 }
 0x41d   : > { %2619 = vmatprep.subr.mxu0 %v11006_v0  ;;  %2538 = vmatprep.subr.mxu1 %v2474_v16 }
 0x41e   : > { %2620 = vmatpush1.msra.mxu0 %v2478_v18  ;;  %2539 = vmatpush1.msra.mxu1 %v2473_v21 }
 0x41f   : > { %2621 = vmatprep.subr.mxu0 %v11006_v0  ;;  %2540 = vmatprep.subr.mxu1 %v2471_v23 }
 0x420   : > { %2622 = vmatpush1.msra.mxu0 %v2475_v25  ;;  %2541 = vmatpush1.msra.mxu1 %v2470_v27 }
 0x421   : > { %2623 = vmatprep.subr.mxu0 %v11006_v0  ;;  %2542 = vmatprep.subr.mxu1 %v2468_v29 }
 0x422   : > { %2624 = vmatpush1.msra.mxu0 %v2472_v30  ;;  %2543 = vmatpush1.msra.mxu1 %v2467_v31 }
 0x423   : > { %2625 = vmatprep.subr.mxu0 %v11006_v0  ;;  %2544 = vmatprep.subr.mxu1 %v2465_v32 }
 0x424   : > { %2626 = vmatpush1.msra.mxu0 %v2469_v33  ;;  %2545 = vmatpush1.msra.mxu1 %v2464_v34 }
 0x425   : > { %2627 = vmatprep.subr.mxu0 %v11006_v0  ;;  %2546 = vmatprep.subr.mxu1 %v2462_v36 }
 0x426   : > { %2628 = vmatpush1.msra.mxu0 %v2466_v35  ;;  %2547 = vmatpush1.msra.mxu1 %v2461_v2  ;;  %v2696_v35 = vld [vmem:[#allocation9] sm:$0x7] }
 0x427   : > { %2629 = vmatprep.subr.mxu0 %v11006_v0  ;;  %2548 = vmatprep.subr.mxu1 %v2459_v6 }
 0x428   : > { %2630 = vmatpush1.msra.mxu0 %v2463_v3  ;;  %2549 = vmatpush1.msra.mxu1 %v2458_v7 }
 0x429   : > { %2631 = vmatprep.subr.mxu0 %v11006_v0  ;;  %2550 = vmatprep.subr.mxu1 %v2456_v10 }
 0x42a   : > { %2632 = vmatpush1.msra.mxu0 %v2460_v9  ;;  %2551 = vmatpush1.msra.mxu1 %v2455_v39 }
 0x42b   : > { %2633 = vmatprep.subr.mxu0 %v11006_v0  ;;  %2552 = vmatprep.subr.mxu1 %v2453_v42 }
 0x42c   : > { %2634 = vmatpush1.msra.mxu0 %v2457_v40  ;;  %2553 = vmatpush1.msra.mxu1 %v2452_v1 }
 0x42d   : > { %2635 = vmatprep.subr.mxu0 %v11006_v0  ;;  %2554 = vmatprep.subr.mxu1 %v2450_v46 }
 0x42e   : > { %2636 = vmatpush1.msra.mxu0 %v2454_v45  ;;  %2555 = vmatpush1.msra.mxu1 %v2449_v48 }
 0x42f   : > { %2637 = vmatprep.subr.mxu0 %v11006_v0  ;;  %9940 = vmatprep.subr.msk.mxu1 %vm1310_vm2, %v2504_v50 }
 0x430   : > { %2638 = vmatpush1.msra.mxu0 %v2451_v49  ;;  %9941 = vmatpush2.msk.msra.mxu1 %vm1310_vm2, %v2503_v51 }
 0x431   : > { %2665 = vmatprep.subr.mxu0 %v11006_v0  ;;  %2584 = vmatprep.subr.mxu1 %v2501_v54 }
 0x432   : > { %9945 = vmatpush2.msk.msra.mxu0 %vm1310_vm2, %v2505_v52  ;;  %2585 = vmatpush2.msra.mxu1 %v2500_v55 }
 0x433   : > { %2667 = vmatprep.subr.mxu0 %v11006_v0  ;;  %2586 = vmatprep.subr.mxu1 %v2498_v53 }
 0x434   : > { %2668 = vmatpush2.msra.mxu0 %v2502_v58  ;;  %2587 = vmatpush2.msra.mxu1 %v2497_v56 }
 0x435   : > { %2669 = vmatprep.subr.mxu0 %v11006_v0 }
 0x436   : > { %2670 = vmatpush2.msra.mxu0 %v2499_v11 }
 0x4c4   : > { %v2246_v13 = vpop.f32.mrf.mxu0  ;;  %v2329_v17 = vpop.f32.mrf.mxu1 }
 0x4c5   : > { %v11789_v19 = vadd.f32 %v2246_v13, %v11718_v4  ;;  %v11792_v57 = vadd.f32 %v2329_v17, %v11721_v5 }
 0x4c6   : > { %v2248_v20 = vpop.f32.mrf.mxu0  ;;  %v2331_v22 = vpop.f32.mrf.mxu1 }
 0x4c7   : > { %v2344_v24 = vadd.f32 %v2248_v20, %v11724_v8 }
 0x4c8   : > { %v2252_v59 = vpop.f32.mrf.mxu0  ;;  %v2334_v26 = vpop.f32.mrf.mxu1 }
 0x4c9   : > { %v2346_v28 = vadd.f32 %v2252_v59, %v11727_v37  ;;  %v11797_v60 = vadd.f32 %v2334_v26, %v11730_v38  ;;  %v3024_v26 = vld [vmem:[#allocation10 + $0x8] sm:$0x7f] }
 0x4ca   : > { %v2254_v61 = vpop.f32.mrf.mxu0  ;;  %v2336_v62 = vpop.f32.mrf.mxu1 }
 0x4cb   : > { %v2347_v63 = vadd.f32 %v2254_v61, %v11733_v41 }
 0x4cc   : > { %v2339_v4 = vpop.f32.mrf.mxu1 }
 0x4cd   : > { %v2258_v12 = vpop.f32.mrf.mxu0  ;;  %v2351_v5 = vadd.f32 %v2339_v4, %v11736_v43  ;;  %v3227_v4 = vld [vmem:[#allocation12 + $0x608] sm:$0xff] }
 0x4ce   : > { %v2349_v14 = vadd.f32 %v2258_v12, %v11739_v44  ;;  %v2341_v15 = vpop.f32.mrf.mxu1  ;;  %v2698_v44 = vlaneseq }
 0x4cf   : > { %v2260_v16 = vpop.f32.mrf.mxu0 }
 0x4d0   : > { %v2350_v8 = vadd.f32 %v2260_v16, %v11742_v47  ;;  %v11811_v25 = vshrl.u32 %v2698_v44, 7  ;;  %v3222_v16 = vld [vmem:[#allocation12 + $0x5e0] sm:$0xff] }
 0x4d1   : > { %v2431_v18 = vpop.f32.mrf.mxu0  ;;  %v3206_v44 = vld [vmem:[#allocation12 + $0x560] sm:$0xff] }
 0x4d2   : > { %v11814_v32 = vsub.s32 0, %v11811_v25  ;;  %v11817_v36 = vsub.s32 1, %v11811_v25  ;;  %v11823_v49 = vsub.s32 2, %v11811_v25 }
 0x4d3   : > { %v2433_v21 = vpop.f32.mrf.mxu0 }
 0x4d4   : > { %9942 = vmatprep.mubr.msk.f32.mxu1 %vm1300_vm3, %v2433_v21  ;;  %9946 = vmatprep.mubr.msk.f32.mxu0 %vm1300_vm3, %v2433_v21  ;;  %v2701_v9 = vrot.slane %v2696_v35, %v11814_v32  ;;  %v2705_v1 = vrot.slane %v2696_v35, %v11817_v36  ;;  %v2709_v11 = vrot.slane %v2696_v35, %v11823_v49  ;;  %v3215_v21 = vld [vmem:[#allocation12 + $0x5a8] sm:$0xff] }
 0x4d5   : > { %v2437_v37 = vpop.f32.mrf.mxu0  ;;  %2589 = vmatmul.mubr.f32.vlgmr.msra.gmra.mxu1 %v2431_v18  ;;  %2672 = vmatmul.mubr.f32.vlgmr.msra.gmra.mxu0 %v2431_v18  ;;  %v3218_v18 = vld [vmem:[#allocation12 + $0x5c0] sm:$0xff]  ;;  %v3187_v35 = vld [vmem:[#allocation12 + $0x4c8] sm:$0xff] }
 0x4d7   : > { %v2439_v38 = vpop.f32.mrf.mxu0 }
 0x4d8   : > { %9943 = vmatprep.mubr.msk.f32.mxu1 %vm1300_vm3, %v2439_v38  ;;  %9947 = vmatprep.mubr.msk.f32.mxu0 %vm1300_vm3, %v2439_v38  ;;  %v3211_v38 = vld [vmem:[#allocation12 + $0x588] sm:$0xff] }
 0x4d9   : > { %v2443_v41 = vpop.f32.mrf.mxu0  ;;  %2595 = vmatmul.mubr.f32.gmra.mxu1 %v2437_v37  ;;  %2677 = vmatmul.mubr.f32.gmra.mxu0 %v2437_v37  ;;  %v3214_v37 = vld [vmem:[#allocation12 + $0x5a0] sm:$0xff] }
 0x4db   : > { %v2445_v43 = vpop.f32.mrf.mxu0 }
 0x4dc   : > { %9944 = vmatprep.mubr.msk.f32.mxu1 %vm1300_vm3, %v2445_v43  ;;  %9948 = vmatprep.mubr.msk.f32.mxu0 %vm1300_vm3, %v2445_v43  ;;  %v3207_v43 = vld [vmem:[#allocation12 + $0x568] sm:$0xff] }
 0x4dd   : > { %2601 = vmatmul.mubr.f32.gmra.mxu1 %v2443_v41  ;;  %2682 = vmatmul.mubr.f32.gmra.mxu0 %v2443_v41  ;;  %v3210_v41 = vld [vmem:[#allocation12 + $0x580] sm:$0xff] }
 0x4de   : > { %3092 = vmatprep.mubr.f32.mxu0 %v11006_v0  ;;  %2810 = vmatprep.mubr.f32.mxu1 %v11006_v0 }
 0x595   : > { %v2590_v47 = vpop.f32.mrf.mxu1  ;;  %v2673_v23 = vpop.f32.mrf.mxu0 }
 0x596   : > { %v2687_v46 = vadd.f32 %v2590_v47, %v11789_v19  ;;  %v2689_v20 = vadd.f32 %v2673_v23, %v11792_v57  ;;  %v2731_v57 = vld [vmem:[#allocation10] sm:$0x7f]  ;;  %v3203_v47 = vld [vmem:[#allocation12 + $0x548] sm:$0xff]  ;;  %v3202_v23 = vld [vmem:[#allocation12 + $0x540] sm:$0xff] }
 0x597   : > { %v2592_v27 = vpop.f32.mrf.mxu1  ;;  %v2675_v29 = vpop.f32.mrf.mxu0 }
 0x598   : > { %v2688_v42 = vadd.f32 %v2592_v27, %v2344_v24  ;;  %v2713_v53 = vadd.f32 %v2701_v9, %v2687_v46  ;;  %v2715_v61 = vadd.f32 %v2709_v11, %v2689_v20  ;;  %v3199_v27 = vld [vmem:[#allocation12 + $0x528] sm:$0xff]  ;;  %v3198_v29 = vld [vmem:[#allocation12 + $0x520] sm:$0xff] }
 0x599   : > { %v2596_v30 = vpop.f32.mrf.mxu1  ;;  %v2678_v31 = vpop.f32.mrf.mxu0  ;;  %v3291_v46 = vld [vmem:[#allocation12 + $0x808] sm:$0xff] }
 0x59a   : > { %v2690_v10 = vadd.f32 %v2596_v30, %v2346_v28  ;;  %v2714_v54 = vadd.f32 %v2705_v1, %v2688_v42  ;;  %v2692_v13 = vadd.f32 %v2678_v31, %v11797_v60  ;;  %v11848_v59 = vmax.f32 %v2713_v53, 0.0  ;;  %v3231_v60 = vld [vmem:[#allocation12 + $0x628] sm:$0xff]  ;;  %v3194_v31 = vld [vmem:[#allocation12 + $0x500] sm:$0xff] }
 0x59b   : > { %v2598_v33 = vpop.f32.mrf.mxu1  ;;  %v2680_v34 = vpop.f32.mrf.mxu0  ;;  %v11868_v15 = vmax.f32 %v2715_v61, 0.0  ;;  %v3195_v30 = vld [vmem:[#allocation12 + $0x508] sm:$0xff]  ;;  %v3170_v42 = vld [vmem:[#allocation12 + $0x440] sm:$0xff] }
 0x59c   : > { %v2691_v6 = vadd.f32 %v2598_v33, %v2347_v63  ;;  %v2716_v52 = vadd.f32 %v2701_v9, %v2690_v10  ;;  %v11844_v22 = vmax.f32 %v2714_v54, 0.0  ;;  %v2718_v28 = vadd.f32 %v2709_v11, %v2692_v13  ;;  %v3230_v63 = vld [vmem:[#allocation12 + $0x620] sm:$0xff]  ;;  %v3191_v33 = vld [vmem:[#allocation12 + $0x4e8] sm:$0xff] }
 0x59d   : > { %v2602_v2 = vpop.f32.mrf.mxu1  ;;  %v2683_v3 = vpop.f32.mrf.mxu0  ;;  %v3190_v34 = vld [vmem:[#allocation12 + $0x4e0] sm:$0xff]  ;;  %v3175_v10 = vld [vmem:[#allocation12 + $0x468] sm:$0xff] }
 0x59e   : > { %v2693_v7 = vadd.f32 %v2602_v2, %v2349_v14  ;;  %v2717_v50 = vadd.f32 %v2705_v1, %v2691_v6  ;;  %v2695_v55 = vadd.f32 %v2683_v3, %v2351_v5  ;;  %v11837_v19 = vmax.f32 %v2716_v52, 0.0  ;;  %v3226_v5 = vld [vmem:[#allocation12 + $0x600] sm:$0xff]  ;;  %v3223_v14 = vld [vmem:[#allocation12 + $0x5e8] sm:$0xff] }
 0x59f   : > { %v2604_v39 = vpop.f32.mrf.mxu1  ;;  %v2685_v40 = vpop.f32.mrf.mxu0  ;;  %v11861_v12 = vmax.f32 %v2718_v28, 0.0  ;;  %v3186_v2 = vld [vmem:[#allocation12 + $0x4c0] sm:$0xff]  ;;  %v3183_v3 = vld [vmem:[#allocation12 + $0x4a8] sm:$0xff] }
 0x5a0   : > { %v2694_v45 = vadd.f32 %v2604_v39, %v2350_v8  ;;  %v2719_v48 = vadd.f32 %v2701_v9, %v2693_v7  ;;  %v11831_v17 = vmax.f32 %v2717_v50, 0.0  ;;  %v2721_v24 = vadd.f32 %v2709_v11, %v2695_v55  ;;  %v3219_v8 = vld [vmem:[#allocation12 + $0x5c8] sm:$0xff]  ;;  %v3182_v6 = vld [vmem:[#allocation12 + $0x4a0] sm:$0xff] }
 0x5a1   : > { %v3179_v7 = vld [vmem:[#allocation12 + $0x488] sm:$0xff]  ;;  %v3178_v9 = vld [vmem:[#allocation12 + $0x480] sm:$0xff] }
 0x5a2   : > { %v2720_v51 = vadd.f32 %v2705_v1, %v2694_v45  ;;  %v11827_v56 = vmax.f32 %v2719_v48, 0.0  ;;  %v11856_v62 = vmax.f32 %v2721_v24, 0.0  ;;  %v3174_v39 = vld [vmem:[#allocation12 + $0x460] sm:$0xff]  ;;  %v3171_v40 = vld [vmem:[#allocation12 + $0x448] sm:$0xff] }
 0x5a3   : > { %v3295_v1 = vld [vmem:[#allocation12 + $0x828] sm:$0xff]  ;;  %v3294_v45 = vld [vmem:[#allocation12 + $0x820] sm:$0xff] }
 0x5a4   : > { %v11825_v58 = vmax.f32 %v2720_v51, 0.0  ;;  %v3290_v48 = vld [vmem:[#allocation12 + $0x800] sm:$0xff]  ;;  %v3287_v50 = vld [vmem:[#allocation12 + $0x7e8] sm:$0xff] }
 0x5a5   : > { %v3286_v51 = vld [vmem:[#allocation12 + $0x7e0] sm:$0xff]  ;;  %v3283_v52 = vld [vmem:[#allocation12 + $0x7c8] sm:$0xff] }
 0x5a6   : > { %9949 = vmatprep.subr.msk.mxu1 %vm2736_vm4, %v11825_v58  ;;  %9954 = vmatprep.subr.msk.mxu0 %vm2736_vm4, %v11825_v58  ;;  %v3282_v54 = vld [vmem:[#allocation12 + $0x7c0] sm:$0xff]  ;;  %v3279_v55 = vld [vmem:[#allocation12 + $0x7a8] sm:$0xff] }
 0x5a7   : > { %9950 = vmatpush1.msk.msra.mxu1 %vm2736_vm4, %v11827_v56  ;;  %9955 = vmatpush1.msk.msra.mxu0 %vm2736_vm4, %v11827_v56  ;;  %v3278_v53 = vld [vmem:[#allocation12 + $0x7a0] sm:$0xff]  ;;  %v3275_v11 = vld [vmem:[#allocation12 + $0x788] sm:$0xff] }
 0x5a8   : > { %2774 = vmatprep.subr.mxu1 %v11831_v17  ;;  %3056 = vmatprep.subr.mxu0 %v11831_v17  ;;  %v3274_v13 = vld [vmem:[#allocation12 + $0x780] sm:$0xff]  ;;  %v3271_v20 = vld [vmem:[#allocation12 + $0x768] sm:$0xff] }
 0x5a9   : > { %2775 = vmatpush1.msra.mxu1 %v11837_v19  ;;  %3057 = vmatpush1.msra.mxu0 %v11837_v19  ;;  %v3270_v24 = vld [vmem:[#allocation12 + $0x760] sm:$0xff]  ;;  %v3259_v61 = vld [vmem:[#allocation12 + $0x708] sm:$0xff] }
 0x5aa   : > { %2776 = vmatprep.subr.mxu1 %v11844_v22  ;;  %3058 = vmatprep.subr.mxu0 %v11844_v22  ;;  %v3266_v28 = vld [vmem:[#allocation12 + $0x740] sm:$0xff] }
 0x5ab   : > { %2777 = vmatpush1.msra.mxu1 %v11848_v59  ;;  %3059 = vmatpush1.msra.mxu0 %v11848_v59 }
 0x5ac   : > { %10098 = vmatprep.subr.mxu1 %v11006_v0  ;;  %9956 = vmatmul.mubr.msk.f32.vlgmr.msra.gmra.mxu0 %vm2732_vm5, %v3024_v26 }
 0x5ad   : > { %9951 = vmatmul.mubr.msk.f32.vlgmr.msra.gmra.mxu1 %vm2732_vm5, %v2731_v57  ;;  %3310 = vmatprep.subr.mxu0 %v3231_v60  ;;  %v3262_v60 = vld [vmem:[#allocation12 + $0x720] sm:$0xff] }
 0x5ae   : > { %10099 = vmatpush3.msk.msra.mxu1 %vm2736_vm4, %v11856_v62  ;;  %10104 = vmatprep.mubr.msk.f32.mxu1 %vm11007_vm6, %v11006_v0 }
 0x5af   : > { %10100 = vmatprep.subr.mxu1 %v11006_v0  ;;  %3311 = vmatpush1.msra.mxu0 %v3230_v63  ;;  %v3258_v63 = vld [vmem:[#allocation12 + $0x700] sm:$0xff] }
 0x5b0   : > { %10101 = vmatpush3.msra.mxu1 %v11861_v12  ;;  %3312 = vmatprep.subr.mxu0 %v3227_v4  ;;  %v3255_v4 = vld [vmem:[#allocation12 + $0x6e8] sm:$0xff] }
 0x5b1   : > { %10102 = vmatprep.subr.mxu1 %v11006_v0  ;;  %3313 = vmatpush1.msra.mxu0 %v3226_v5  ;;  %v3254_v5 = vld [vmem:[#allocation12 + $0x6e0] sm:$0xff] }
 0x5b2   : > { %10103 = vmatpush3.msra.mxu1 %v11868_v15  ;;  %3314 = vmatprep.subr.mxu0 %v3223_v14  ;;  %v3251_v14 = vld [vmem:[#allocation12 + $0x6c8] sm:$0xff] }
 0x5b3   : > { %10107 = vmatprep.subr.mxu1 %v11006_v0  ;;  %10105 = vmatmul.mubr.msk.f32.vlgmr.msra.gmra.mxu1 %vm2732_vm5, %v2731_v57  ;;  %v3263_v57 = vld [vmem:[#allocation12 + $0x728] sm:$0xff] }
 0x5b4   : > { %10108 = vmatpush3.msk.msra.mxu1 %vm2736_vm4, %v11856_v62  ;;  %10113 = vmatprep.mubr.msk.f32.mxu1 %vm11007_vm6, %v11006_v0 }
 0x5b5   : > { %10109 = vmatprep.subr.mxu1 %v11006_v0  ;;  %3315 = vmatpush1.msra.mxu0 %v3222_v16  ;;  %v3250_v16 = vld [vmem:[#allocation12 + $0x6c0] sm:$0xff] }
 0x5b6   : > { %10110 = vmatpush3.msra.mxu1 %v11861_v12  ;;  %3316 = vmatprep.subr.mxu0 %v3219_v8  ;;  %v3247_v8 = vld [vmem:[#allocation12 + $0x6a8] sm:$0xff] }
 0x5b7   : > { %10111 = vmatprep.subr.mxu1 %v11006_v0  ;;  %3317 = vmatpush1.msra.mxu0 %v3218_v18  ;;  %v3246_v18 = vld [vmem:[#allocation12 + $0x6a0] sm:$0xff] }
 0x5b8   : > { %10112 = vmatpush3.msra.mxu1 %v11868_v15  ;;  %3318 = vmatprep.subr.mxu0 %v3215_v21  ;;  %v3243_v21 = vld [vmem:[#allocation12 + $0x688] sm:$0xff] }
 0x5b9   : > { %10114 = vmatmul.mubr.msk.f32.vlgmr.msra.gmra.mxu1 %vm2732_vm5, %v3024_v26  ;;  %3319 = vmatpush1.msra.mxu0 %v3214_v37  ;;  %v3267_v26 = vld [vmem:[#allocation12 + $0x748] sm:$0xff]  ;;  %v3242_v37 = vld [vmem:[#allocation12 + $0x680] sm:$0xff] }
 0x5ba   : > { %3320 = vmatprep.subr.mxu0 %v3211_v38  ;;  %3445 = vmatprep.mubr.f32.mxu1 %v11006_v0  ;;  %v3239_v38 = vld [vmem:[#allocation12 + $0x668] sm:$0xff] }
 0x5bb   : > { %3321 = vmatpush1.msra.mxu0 %v3210_v41  ;;  %v3238_v41 = vld [vmem:[#allocation12 + $0x660] sm:$0xff] }
 0x5bc   : > { %3322 = vmatprep.subr.mxu0 %v3207_v43  ;;  %v3235_v43 = vld [vmem:[#allocation12 + $0x648] sm:$0xff] }
 0x5bd   : > { %3323 = vmatpush1.msra.mxu0 %v3206_v44  ;;  %v3234_v44 = vld [vmem:[#allocation12 + $0x640] sm:$0xff] }
 0x5be   : > { %3324 = vmatprep.subr.mxu0 %v3203_v47  ;;  %v2948_v47 = vld [vmem:[#allocation12 + $0x1e8] sm:$0xff] }
 0x5bf   : > { %3325 = vmatpush1.msra.mxu0 %v3202_v23  ;;  %v3303_v23 = vld [vmem:[#allocation12 + $0x868] sm:$0xff] }
 0x5c0   : > { %3326 = vmatprep.subr.mxu0 %v3199_v27  ;;  %3409 = vmatprep.subr.mxu1 %v3303_v23  ;;  %v3302_v27 = vld [vmem:[#allocation12 + $0x860] sm:$0xff]  ;;  %v2900_v23 = vld [vmem:[#allocation12 + $0x68] sm:$0xff] }
 0x5c1   : > { %3327 = vmatpush1.msra.mxu0 %v3198_v29  ;;  %3410 = vmatpush1.msra.mxu1 %v3302_v27  ;;  %v3299_v29 = vld [vmem:[#allocation12 + $0x848] sm:$0xff]  ;;  %v3204_v27 = vld [vmem:[#allocation12 + $0x550] sm:$0xff] }
 0x5c2   : > { %3328 = vmatprep.subr.mxu0 %v3195_v30  ;;  %3411 = vmatprep.subr.mxu1 %v3299_v29  ;;  %v3298_v30 = vld [vmem:[#allocation12 + $0x840] sm:$0xff] }
 0x5c3   : > { %3329 = vmatpush1.msra.mxu0 %v3194_v31  ;;  %3412 = vmatpush1.msra.mxu1 %v3298_v30  ;;  %v3233_v31 = vld [vmem:[#allocation12 + $0x638] sm:$0xff]  ;;  %v2899_v29 = vld [vmem:[#allocation12 + $0x60] sm:$0xff] }
 0x5c4   : > { %3330 = vmatprep.subr.mxu0 %v3191_v33  ;;  %3452 = vmatprep.subr.mxu1 %v3233_v31  ;;  %v3201_v30 = vld [vmem:[#allocation12 + $0x538] sm:$0xff]  ;;  %v2896_v31 = vld [vmem:[#allocation12 + $0x48] sm:$0xff] }
 0x5c5   : > { %3331 = vmatpush1.msra.mxu0 %v3190_v34 }
 0x5c6   : > { %3332 = vmatprep.subr.mxu0 %v3187_v35 }
 0x5c7   : > { %3333 = vmatpush1.msra.mxu0 %v3186_v2  ;;  %v2947_v2 = vld [vmem:[#allocation12 + $0x1e0] sm:$0xff] }
 0x5c8   : > { %3334 = vmatprep.subr.mxu0 %v3183_v3  ;;  %v2944_v3 = vld [vmem:[#allocation12 + $0x1c8] sm:$0xff] }
 0x5c9   : > { %3335 = vmatpush1.msra.mxu0 %v3182_v6 }
 0x5ca   : > { %3336 = vmatprep.subr.mxu0 %v3179_v7  ;;  %v2943_v7 = vld [vmem:[#allocation12 + $0x1c0] sm:$0xff] }
 0x5cb   : > { %3337 = vmatpush1.msra.mxu0 %v3178_v9  ;;  %v2940_v9 = vld [vmem:[#allocation12 + $0x1a8] sm:$0xff] }
 0x5cc   : > { %3338 = vmatprep.subr.mxu0 %v3175_v10  ;;  %v2939_v10 = vld [vmem:[#allocation12 + $0x1a0] sm:$0xff] }
 0x5cd   : > { %3339 = vmatpush1.msra.mxu0 %v3174_v39 }
 0x5ce   : > { %3340 = vmatprep.subr.mxu0 %v3171_v40  ;;  %v2936_v40 = vld [vmem:[#allocation12 + $0x188] sm:$0xff] }
 0x5cf   : > { %3341 = vmatpush1.msra.mxu0 %v3170_v42  ;;  %v2935_v42 = vld [vmem:[#allocation12 + $0x180] sm:$0xff] }
 0x5d0   : > { %3342 = vmatprep.subr.mxu0 %v3295_v1 }
 0x5d1   : > { %3343 = vmatpush2.msra.mxu0 %v3294_v45  ;;  %v2932_v45 = vld [vmem:[#allocation12 + $0x168] sm:$0xff] }
 0x5d2   : > { %3344 = vmatprep.subr.mxu0 %v3291_v46  ;;  %v2931_v46 = vld [vmem:[#allocation12 + $0x160] sm:$0xff] }
 0x5d3   : > { %3345 = vmatpush2.msra.mxu0 %v3290_v48  ;;  %v2928_v48 = vld [vmem:[#allocation12 + $0x148] sm:$0xff] }
 0x5d4   : > { %3346 = vmatprep.subr.mxu0 %v3287_v50  ;;  %v3232_v50 = vld [vmem:[#allocation12 + $0x630] sm:$0xff] }
 0x5d5   : > { %3347 = vmatpush2.msra.mxu0 %v3286_v51  ;;  %v2927_v51 = vld [vmem:[#allocation12 + $0x140] sm:$0xff] }
 0x5d6   : > { %3348 = vmatprep.subr.mxu0 %v3283_v52 }
 0x5d7   : > { %3349 = vmatpush2.msra.mxu0 %v3282_v54  ;;  %v3229_v54 = vld [vmem:[#allocation12 + $0x618] sm:$0xff] }
 0x5d8   : > { %3350 = vmatprep.subr.mxu0 %v3279_v55  ;;  %v2924_v55 = vld [vmem:[#allocation12 + $0x128] sm:$0xff] }
 0x5d9   : > { %3351 = vmatpush2.msra.mxu0 %v3278_v53  ;;  %v3228_v53 = vld [vmem:[#allocation12 + $0x610] sm:$0xff] }
 0x5da   : > { %3352 = vmatprep.subr.mxu0 %v3275_v11  ;;  %v2923_v11 = vld [vmem:[#allocation12 + $0x120] sm:$0xff] }
 0x5db   : > { %3353 = vmatpush2.msra.mxu0 %v3274_v13 }
 0x5dc   : > { %3354 = vmatprep.subr.mxu0 %v3271_v20  ;;  %v3225_v20 = vld [vmem:[#allocation12 + $0x5f8] sm:$0xff] }
 0x5dd   : > { %3355 = vmatpush2.msra.mxu0 %v3270_v24  ;;  %v2920_v24 = vld [vmem:[#allocation12 + $0x108] sm:$0xff] }
 0x5de   : > { %3356 = vmatprep.subr.mxu0 %v3267_v26  ;;  %v3224_v26 = vld [vmem:[#allocation12 + $0x5f0] sm:$0xff] }
 0x5df   : > { %3357 = vmatpush2.msra.mxu0 %v3266_v28  ;;  %v2919_v28 = vld [vmem:[#allocation12 + $0x100] sm:$0xff] }
 0x5e0   : > { %3358 = vmatprep.subr.mxu0 %v3263_v57  ;;  %v3221_v57 = vld [vmem:[#allocation12 + $0x5d8] sm:$0xff] }
 0x5e1   : > { %3359 = vmatpush2.msra.mxu0 %v3262_v60  ;;  %v2916_v60 = vld [vmem:[#allocation12 + $0xe8] sm:$0xff] }
 0x5e2   : > { %3360 = vmatprep.subr.mxu0 %v3259_v61  ;;  %v3220_v61 = vld [vmem:[#allocation12 + $0x5d0] sm:$0xff] }
 0x5e3   : > { %3361 = vmatpush2.msra.mxu0 %v3258_v63  ;;  %v2915_v63 = vld [vmem:[#allocation12 + $0xe0] sm:$0xff] }
 0x5e4   : > { %3362 = vmatprep.subr.mxu0 %v3255_v4  ;;  %v3217_v4 = vld [vmem:[#allocation12 + $0x5b8] sm:$0xff] }
 0x5e5   : > { %3363 = vmatpush2.msra.mxu0 %v3254_v5  ;;  %v2912_v5 = vld [vmem:[#allocation12 + $0xc8] sm:$0xff] }
 0x5e6   : > { %3364 = vmatprep.subr.mxu0 %v3251_v14  ;;  %v3216_v14 = vld [vmem:[#allocation12 + $0x5b0] sm:$0xff] }
 0x5e7   : > { %3365 = vmatpush2.msra.mxu0 %v3250_v16  ;;  %v2911_v16 = vld [vmem:[#allocation12 + $0xc0] sm:$0xff] }
 0x5e8   : > { %3366 = vmatprep.subr.mxu0 %v3247_v8  ;;  %v3213_v8 = vld [vmem:[#allocation12 + $0x598] sm:$0xff] }
 0x5e9   : > { %3367 = vmatpush2.msra.mxu0 %v3246_v18  ;;  %v2908_v18 = vld [vmem:[#allocation12 + $0xa8] sm:$0xff] }
 0x5ea   : > { %3368 = vmatprep.subr.mxu0 %v3243_v21  ;;  %v3212_v21 = vld [vmem:[#allocation12 + $0x590] sm:$0xff] }
 0x5eb   : > { %3369 = vmatpush2.msra.mxu0 %v3242_v37  ;;  %v2907_v37 = vld [vmem:[#allocation12 + $0xa0] sm:$0xff] }
 0x5ec   : > { %3370 = vmatprep.subr.mxu0 %v3239_v38  ;;  %v3209_v38 = vld [vmem:[#allocation12 + $0x578] sm:$0xff] }
 0x5ed   : > { %3371 = vmatpush2.msra.mxu0 %v3238_v41  ;;  %v2904_v41 = vld [vmem:[#allocation12 + $0x88] sm:$0xff] }
 0x5ee   : > { %3372 = vmatprep.subr.mxu0 %v3235_v43  ;;  %v3208_v43 = vld [vmem:[#allocation12 + $0x570] sm:$0xff] }
 0x5ef   : > { %3373 = vmatpush2.msra.mxu0 %v3234_v44  ;;  %v2903_v44 = vld [vmem:[#allocation12 + $0x80] sm:$0xff] }
 0x5f0   : > { %3597 = vmatprep.subr.mxu0 %v2948_v47  ;;  %v3205_v47 = vld [vmem:[#allocation12 + $0x558] sm:$0xff] }
 0x66c   : > { %v11885_v33 = vpop.f32.mrf.mxu0 }
 0x66d   : > { %v11887_v34 = vpop.f32.mrf.mxu1 }
 0x66e   : > { %v11889_v35 = vpop.f32.mrf.mxu0 }
 0x66f   : > { %3374 = vmatprep.mubr.f32.mxu0 %v11889_v35  ;;  %v11892_v6 = vpop.f32.mrf.mxu1 }
 0x670   : > { %3375 = vmatmul.mubr.f32.vlgmr.msra.gmra.mxu0 %v11885_v33 }
 0x671   : > { %3598 = vmatpush1.msra.mxu0 %v2947_v2  ;;  %3661 = vmatprep.mubr.f32.mxu0 %v11892_v6  ;;  %v3200_v2 = vld [vmem:[#allocation12 + $0x530] sm:$0xff] }
 0x672   : > { %3599 = vmatprep.subr.mxu0 %v2944_v3  ;;  %v2895_v3 = vld [vmem:[#allocation12 + $0x40] sm:$0xff] }
 0x673   : > { %3600 = vmatpush1.msra.mxu0 %v2943_v7  ;;  %v11896_v39 = vpop.f32.mrf.mxu1  ;;  %v3197_v7 = vld [vmem:[#allocation12 + $0x518] sm:$0xff] }
 0x674   : > { %3601 = vmatprep.subr.mxu0 %v2940_v9  ;;  %v2892_v9 = vld [vmem:[#allocation12 + $0x28] sm:$0xff] }
 0x675   : > { %3602 = vmatpush1.msra.mxu0 %v2939_v10  ;;  %v10106_v1 = vpop.f32.mrf.mxu1  ;;  %v3196_v10 = vld [vmem:[#allocation12 + $0x510] sm:$0xff] }
 0x676   : > { %3603 = vmatprep.subr.mxu0 %v2936_v40  ;;  %v2891_v40 = vld [vmem:[#allocation12 + $0x20] sm:$0xff]  ;;  %v2888_v1 = vld [vmem:[#allocation12 + $0x8] sm:$0xff] }
 0x677   : > { %3604 = vmatpush1.msra.mxu0 %v2935_v42  ;;  %v3193_v42 = vld [vmem:[#allocation12 + $0x4f8] sm:$0xff] }
 0x678   : > { %3605 = vmatprep.subr.mxu0 %v2932_v45  ;;  %v3192_v45 = vld [vmem:[#allocation12 + $0x4f0] sm:$0xff] }
 0x679   : > { %v11898_v52 = vpop.f32.mrf.mxu1  ;;  %3606 = vmatpush1.msra.mxu0 %v2931_v46  ;;  %v2887_v46 = vld [vmem:[#allocation12] sm:$0xff] }
 0x67a   : > { %9959 = vmatmul.mubr.msk.f32.vlgmr.msra.gmra.mxu1 %vm3306_vm7, %v11898_v52  ;;  %3607 = vmatprep.subr.mxu0 %v2928_v48  ;;  %v3189_v48 = vld [vmem:[#allocation12 + $0x4d8] sm:$0xff] }
 0x67b   : > { %3453 = vmatpush1.msra.mxu1 %v3232_v50  ;;  %3608 = vmatpush1.msra.mxu0 %v2927_v51  ;;  %v10115_v13 = vpop.f32.mrf.mxu1  ;;  %v3012_v50 = vld [vmem:[#allocation12 + $0x3e8] sm:$0xff]  ;;  %v3188_v51 = vld [vmem:[#allocation12 + $0x4d0] sm:$0xff] }
 0x67c   : > { %3454 = vmatprep.subr.mxu1 %v3229_v54  ;;  %3609 = vmatprep.subr.mxu0 %v2924_v55  ;;  %v3011_v54 = vld [vmem:[#allocation12 + $0x3e0] sm:$0xff]  ;;  %v3185_v55 = vld [vmem:[#allocation12 + $0x4b8] sm:$0xff] }
 0x67d   : > { %3455 = vmatpush1.msra.mxu1 %v3228_v53  ;;  %3610 = vmatpush1.msra.mxu0 %v2923_v11  ;;  %v3008_v53 = vld [vmem:[#allocation12 + $0x3c8] sm:$0xff]  ;;  %v3184_v11 = vld [vmem:[#allocation12 + $0x4b0] sm:$0xff]  ;;  %v3007_v13 = vld [vmem:[#allocation12 + $0x3c0] sm:$0xff] }
 0x67e   : > { %3456 = vmatprep.subr.mxu1 %v3225_v20  ;;  %3611 = vmatprep.subr.mxu0 %v2920_v24  ;;  %v3181_v20 = vld [vmem:[#allocation12 + $0x498] sm:$0xff]  ;;  %v3004_v24 = vld [vmem:[#allocation12 + $0x3a8] sm:$0xff] }
 0x67f   : > { %3457 = vmatpush1.msra.mxu1 %v3224_v26  ;;  %3612 = vmatpush1.msra.mxu0 %v2919_v28  ;;  %v3180_v26 = vld [vmem:[#allocation12 + $0x490] sm:$0xff]  ;;  %v3003_v28 = vld [vmem:[#allocation12 + $0x3a0] sm:$0xff] }
 0x680   : > { %3458 = vmatprep.subr.mxu1 %v3221_v57  ;;  %3613 = vmatprep.subr.mxu0 %v2916_v60  ;;  %v3177_v57 = vld [vmem:[#allocation12 + $0x478] sm:$0xff]  ;;  %v3000_v60 = vld [vmem:[#allocation12 + $0x388] sm:$0xff] }
 0x681   : > { %3459 = vmatpush1.msra.mxu1 %v3220_v61  ;;  %3614 = vmatpush1.msra.mxu0 %v2915_v63  ;;  %v3176_v61 = vld [vmem:[#allocation12 + $0x470] sm:$0xff]  ;;  %v2999_v63 = vld [vmem:[#allocation12 + $0x380] sm:$0xff] }
 0x682   : > { %3460 = vmatprep.subr.mxu1 %v3217_v4  ;;  %3615 = vmatprep.subr.mxu0 %v2912_v5  ;;  %v3173_v4 = vld [vmem:[#allocation12 + $0x458] sm:$0xff]  ;;  %v2996_v5 = vld [vmem:[#allocation12 + $0x368] sm:$0xff] }
 0x683   : > { %3461 = vmatpush1.msra.mxu1 %v3216_v14  ;;  %3616 = vmatpush1.msra.mxu0 %v2911_v16  ;;  %v3172_v14 = vld [vmem:[#allocation12 + $0x450] sm:$0xff]  ;;  %v2995_v16 = vld [vmem:[#allocation12 + $0x360] sm:$0xff] }
 0x684   : > { %3462 = vmatprep.subr.mxu1 %v3213_v8  ;;  %3617 = vmatprep.subr.mxu0 %v2908_v18  ;;  %v3297_v8 = vld [vmem:[#allocation12 + $0x838] sm:$0xff]  ;;  %v2992_v18 = vld [vmem:[#allocation12 + $0x348] sm:$0xff] }
 0x685   : > { %3463 = vmatpush1.msra.mxu1 %v3212_v21  ;;  %3618 = vmatpush1.msra.mxu0 %v2907_v37  ;;  %v3296_v21 = vld [vmem:[#allocation12 + $0x830] sm:$0xff]  ;;  %v2991_v37 = vld [vmem:[#allocation12 + $0x340] sm:$0xff] }
 0x686   : > { %3464 = vmatprep.subr.mxu1 %v3209_v38  ;;  %3619 = vmatprep.subr.mxu0 %v2904_v41  ;;  %v3293_v38 = vld [vmem:[#allocation12 + $0x818] sm:$0xff]  ;;  %v2988_v41 = vld [vmem:[#allocation12 + $0x328] sm:$0xff] }
 0x687   : > { %3465 = vmatpush1.msra.mxu1 %v3208_v43  ;;  %3620 = vmatpush1.msra.mxu0 %v2903_v44  ;;  %v3292_v43 = vld [vmem:[#allocation12 + $0x810] sm:$0xff]  ;;  %v2987_v44 = vld [vmem:[#allocation12 + $0x320] sm:$0xff] }
 0x688   : > { %3466 = vmatprep.subr.mxu1 %v3205_v47  ;;  %3621 = vmatprep.subr.mxu0 %v2900_v23  ;;  %v3289_v47 = vld [vmem:[#allocation12 + $0x7f8] sm:$0xff]  ;;  %v2984_v23 = vld [vmem:[#allocation12 + $0x308] sm:$0xff] }
 0x689   : > { %3467 = vmatpush1.msra.mxu1 %v3204_v27  ;;  %3622 = vmatpush1.msra.mxu0 %v2899_v29  ;;  %v3288_v27 = vld [vmem:[#allocation12 + $0x7f0] sm:$0xff]  ;;  %v2983_v29 = vld [vmem:[#allocation12 + $0x300] sm:$0xff] }
 0x68a   : > { %3468 = vmatprep.subr.mxu1 %v3201_v30  ;;  %3623 = vmatprep.subr.mxu0 %v2896_v31  ;;  %v3285_v30 = vld [vmem:[#allocation12 + $0x7d8] sm:$0xff]  ;;  %v2980_v31 = vld [vmem:[#allocation12 + $0x2e8] sm:$0xff] }
 0x68b   : > { %3469 = vmatpush1.msra.mxu1 %v3200_v2  ;;  %3624 = vmatpush1.msra.mxu0 %v2895_v3  ;;  %v3284_v2 = vld [vmem:[#allocation12 + $0x7d0] sm:$0xff]  ;;  %v2979_v3 = vld [vmem:[#allocation12 + $0x2e0] sm:$0xff] }
 0x68c   : > { %3470 = vmatprep.subr.mxu1 %v3197_v7  ;;  %3625 = vmatprep.subr.mxu0 %v2892_v9  ;;  %v3281_v7 = vld [vmem:[#allocation12 + $0x7b8] sm:$0xff]  ;;  %v2976_v9 = vld [vmem:[#allocation12 + $0x2c8] sm:$0xff] }
 0x68d   : > { %3471 = vmatpush1.msra.mxu1 %v3196_v10  ;;  %3626 = vmatpush1.msra.mxu0 %v2891_v40  ;;  %v3280_v10 = vld [vmem:[#allocation12 + $0x7b0] sm:$0xff]  ;;  %v2975_v40 = vld [vmem:[#allocation12 + $0x2c0] sm:$0xff] }
 0x68e   : > { %3472 = vmatprep.subr.mxu1 %v3193_v42  ;;  %3627 = vmatprep.subr.mxu0 %v2888_v1  ;;  %v3277_v42 = vld [vmem:[#allocation12 + $0x798] sm:$0xff]  ;;  %v2972_v1 = vld [vmem:[#allocation12 + $0x2a8] sm:$0xff] }
 0x68f   : > { %3473 = vmatpush1.msra.mxu1 %v3192_v45  ;;  %3628 = vmatpush1.msra.mxu0 %v2887_v46  ;;  %v3276_v45 = vld [vmem:[#allocation12 + $0x790] sm:$0xff]  ;;  %v2971_v46 = vld [vmem:[#allocation12 + $0x2a0] sm:$0xff] }
 0x690   : > { %3474 = vmatprep.subr.mxu1 %v3189_v48  ;;  %3629 = vmatprep.subr.mxu0 %v3012_v50  ;;  %v3273_v48 = vld [vmem:[#allocation12 + $0x778] sm:$0xff]  ;;  %v2968_v50 = vld [vmem:[#allocation12 + $0x288] sm:$0xff] }
 0x691   : > { %3475 = vmatpush1.msra.mxu1 %v3188_v51  ;;  %3630 = vmatpush2.msra.mxu0 %v3011_v54  ;;  %v3272_v51 = vld [vmem:[#allocation12 + $0x770] sm:$0xff]  ;;  %v2967_v54 = vld [vmem:[#allocation12 + $0x280] sm:$0xff] }
 0x692   : > { %3476 = vmatprep.subr.mxu1 %v3185_v55  ;;  %3631 = vmatprep.subr.mxu0 %v3008_v53  ;;  %v3269_v55 = vld [vmem:[#allocation12 + $0x758] sm:$0xff]  ;;  %v2964_v53 = vld [vmem:[#allocation12 + $0x268] sm:$0xff] }
 0x693   : > { %3477 = vmatpush1.msra.mxu1 %v3184_v11  ;;  %3632 = vmatpush2.msra.mxu0 %v3007_v13  ;;  %v3268_v11 = vld [vmem:[#allocation12 + $0x750] sm:$0xff]  ;;  %v2963_v13 = vld [vmem:[#allocation12 + $0x260] sm:$0xff] }
 0x694   : > { %3478 = vmatprep.subr.mxu1 %v3181_v20  ;;  %3633 = vmatprep.subr.mxu0 %v3004_v24  ;;  %v3265_v20 = vld [vmem:[#allocation12 + $0x738] sm:$0xff]  ;;  %v2960_v24 = vld [vmem:[#allocation12 + $0x248] sm:$0xff] }
 0x695   : > { %3479 = vmatpush1.msra.mxu1 %v3180_v26  ;;  %3634 = vmatpush2.msra.mxu0 %v3003_v28  ;;  %v3264_v26 = vld [vmem:[#allocation12 + $0x730] sm:$0xff]  ;;  %v2959_v28 = vld [vmem:[#allocation12 + $0x240] sm:$0xff] }
 0x696   : > { %3480 = vmatprep.subr.mxu1 %v3177_v57  ;;  %3635 = vmatprep.subr.mxu0 %v3000_v60  ;;  %v3261_v57 = vld [vmem:[#allocation12 + $0x718] sm:$0xff]  ;;  %v2956_v60 = vld [vmem:[#allocation12 + $0x228] sm:$0xff] }
 0x697   : > { %3481 = vmatpush1.msra.mxu1 %v3176_v61  ;;  %3636 = vmatpush2.msra.mxu0 %v2999_v63  ;;  %v3260_v61 = vld [vmem:[#allocation12 + $0x710] sm:$0xff]  ;;  %v2955_v63 = vld [vmem:[#allocation12 + $0x220] sm:$0xff] }
 0x698   : > { %3482 = vmatprep.subr.mxu1 %v3173_v4  ;;  %3637 = vmatprep.subr.mxu0 %v2996_v5  ;;  %v3257_v4 = vld [vmem:[#allocation12 + $0x6f8] sm:$0xff]  ;;  %v2952_v5 = vld [vmem:[#allocation12 + $0x208] sm:$0xff] }
 0x699   : > { %3483 = vmatpush1.msra.mxu1 %v3172_v14  ;;  %3638 = vmatpush2.msra.mxu0 %v2995_v16  ;;  %v3256_v14 = vld [vmem:[#allocation12 + $0x6f0] sm:$0xff]  ;;  %v2951_v16 = vld [vmem:[#allocation12 + $0x200] sm:$0xff] }
 0x69a   : > { %3484 = vmatprep.subr.mxu1 %v3297_v8  ;;  %3639 = vmatprep.subr.mxu0 %v2992_v18  ;;  %v3253_v8 = vld [vmem:[#allocation12 + $0x6d8] sm:$0xff]  ;;  %v3252_v18 = vld [vmem:[#allocation12 + $0x6d0] sm:$0xff] }
 0x69b   : > { %3485 = vmatpush2.msra.mxu1 %v3296_v21  ;;  %3640 = vmatpush2.msra.mxu0 %v2991_v37  ;;  %v3022_v21 = vld [vmem:[#allocation12 + $0x438] sm:$0xff] }
 0x69c   : > { %3486 = vmatprep.subr.mxu1 %v3293_v38  ;;  %3641 = vmatprep.subr.mxu0 %v2988_v41  ;;  %v3249_v37 = vld [vmem:[#allocation12 + $0x6b8] sm:$0xff]  ;;  %v3021_v38 = vld [vmem:[#allocation12 + $0x430] sm:$0xff] }
 0x69d   : > { %3487 = vmatpush2.msra.mxu1 %v3292_v43  ;;  %3642 = vmatpush2.msra.mxu0 %v2987_v44  ;;  %v3248_v41 = vld [vmem:[#allocation12 + $0x6b0] sm:$0xff]  ;;  %v3018_v43 = vld [vmem:[#allocation12 + $0x418] sm:$0xff] }
 0x69e   : > { %3488 = vmatprep.subr.mxu1 %v3289_v47  ;;  %3643 = vmatprep.subr.mxu0 %v2984_v23  ;;  %v3245_v44 = vld [vmem:[#allocation12 + $0x698] sm:$0xff]  ;;  %v3017_v47 = vld [vmem:[#allocation12 + $0x410] sm:$0xff] }
 0x69f   : > { %3489 = vmatpush2.msra.mxu1 %v3288_v27  ;;  %3644 = vmatpush2.msra.mxu0 %v2983_v29  ;;  %v3244_v23 = vld [vmem:[#allocation12 + $0x690] sm:$0xff]  ;;  %v3241_v27 = vld [vmem:[#allocation12 + $0x678] sm:$0xff] }
 0x6a0   : > { %3490 = vmatprep.subr.mxu1 %v3285_v30  ;;  %3645 = vmatprep.subr.mxu0 %v2980_v31  ;;  %v3240_v29 = vld [vmem:[#allocation12 + $0x670] sm:$0xff]  ;;  %v3237_v30 = vld [vmem:[#allocation12 + $0x658] sm:$0xff] }
 0x6a1   : > { %3491 = vmatpush2.msra.mxu1 %v3284_v2  ;;  %3646 = vmatpush2.msra.mxu0 %v2979_v3  ;;  %v3236_v31 = vld [vmem:[#allocation12 + $0x650] sm:$0xff]  ;;  %v3305_v2 = vld [vmem:[#allocation12 + $0x878] sm:$0xff] }
 0x6a2   : > { %3492 = vmatprep.subr.mxu1 %v3281_v7  ;;  %3647 = vmatprep.subr.mxu0 %v2976_v9  ;;  %v3304_v3 = vld [vmem:[#allocation12 + $0x870] sm:$0xff]  ;;  %v11915_v7 = vld [vmem:[#allocation10 + $0x10] sm:$0x7f]  ;;  %v3301_v9 = vld [vmem:[#allocation12 + $0x858] sm:$0xff] }
 0x6a3   : > { %3493 = vmatpush2.msra.mxu1 %v3280_v10  ;;  %3648 = vmatpush2.msra.mxu0 %v2975_v40  ;;  %v3300_v10 = vld [vmem:[#allocation12 + $0x850] sm:$0xff]  ;;  %v3020_v40 = vld [vmem:[#allocation12 + $0x428] sm:$0xff] }
 0x6a4   : > { %3494 = vmatprep.subr.mxu1 %v3277_v42  ;;  %3649 = vmatprep.subr.mxu0 %v2972_v1  ;;  %v4089_v42 = vld [vmem:[#allocation12 + $0xa68] sm:$0xff]  ;;  %v3015_v1 = vld [vmem:[#allocation12 + $0x400] sm:$0xff] }
 0x6a5   : > { %3495 = vmatpush2.msra.mxu1 %v3276_v45  ;;  %3650 = vmatpush2.msra.mxu0 %v2971_v46  ;;  %v4088_v45 = vld [vmem:[#allocation12 + $0xa60] sm:$0xff]  ;;  %v2950_v46 = vld [vmem:[#allocation12 + $0x1f8] sm:$0xff] }
 0x6a6   : > { %3496 = vmatprep.subr.mxu1 %v3273_v48  ;;  %3651 = vmatprep.subr.mxu0 %v2968_v50  ;;  %v2949_v48 = vld [vmem:[#allocation12 + $0x1f0] sm:$0xff]  ;;  %v2946_v50 = vld [vmem:[#allocation12 + $0x1d8] sm:$0xff] }
 0x6a7   : > { %3497 = vmatpush2.msra.mxu1 %v3272_v51  ;;  %3652 = vmatpush2.msra.mxu0 %v2967_v54  ;;  %v4085_v51 = vld [vmem:[#allocation12 + $0xa48] sm:$0xff]  ;;  %v2945_v54 = vld [vmem:[#allocation12 + $0x1d0] sm:$0xff] }
 0x6a8   : > { %3498 = vmatprep.subr.mxu1 %v3269_v55  ;;  %3653 = vmatprep.subr.mxu0 %v2964_v53  ;;  %v2942_v55 = vld [vmem:[#allocation12 + $0x1b8] sm:$0xff]  ;;  %v4081_v53 = vld [vmem:[#allocation12 + $0xa28] sm:$0xff] }
 0x6a9   : > { %3499 = vmatpush2.msra.mxu1 %v3268_v11  ;;  %3654 = vmatpush2.msra.mxu0 %v2963_v13  ;;  %v2941_v11 = vld [vmem:[#allocation12 + $0x1b0] sm:$0xff]  ;;  %v4080_v13 = vld [vmem:[#allocation12 + $0xa20] sm:$0xff] }
 0x6aa   : > { %3500 = vmatprep.subr.mxu1 %v3265_v20  ;;  %3655 = vmatprep.subr.mxu0 %v2960_v24  ;;  %v2938_v20 = vld [vmem:[#allocation12 + $0x198] sm:$0xff]  ;;  %v4077_v24 = vld [vmem:[#allocation12 + $0xa08] sm:$0xff] }
 0x6ab   : > { %3501 = vmatpush2.msra.mxu1 %v3264_v26  ;;  %3656 = vmatpush2.msra.mxu0 %v2959_v28  ;;  %v2937_v26 = vld [vmem:[#allocation12 + $0x190] sm:$0xff]  ;;  %v2934_v28 = vld [vmem:[#allocation12 + $0x178] sm:$0xff] }
 0x6ac   : > { %3502 = vmatprep.subr.mxu1 %v3261_v57  ;;  %3657 = vmatprep.subr.mxu0 %v2956_v60  ;;  %v4073_v57 = vld [vmem:[#allocation12 + $0x9e8] sm:$0xff]  ;;  %v4072_v60 = vld [vmem:[#allocation12 + $0x9e0] sm:$0xff] }
 0x6ad   : > { %3503 = vmatpush2.msra.mxu1 %v3260_v61  ;;  %3658 = vmatpush2.msra.mxu0 %v2955_v63  ;;  %v2930_v61 = vld [vmem:[#allocation12 + $0x158] sm:$0xff]  ;;  %v4069_v63 = vld [vmem:[#allocation12 + $0x9c8] sm:$0xff] }
 0x6ae   : > { %3504 = vmatprep.subr.mxu1 %v3257_v4  ;;  %3659 = vmatprep.subr.mxu0 %v2952_v5  ;;  %v2929_v4 = vld [vmem:[#allocation12 + $0x150] sm:$0xff]  ;;  %v4068_v5 = vld [vmem:[#allocation12 + $0x9c0] sm:$0xff] }
 0x6af   : > { %3505 = vmatpush2.msra.mxu1 %v3256_v14  ;;  %3660 = vmatpush2.msra.mxu0 %v2951_v16  ;;  %v2926_v14 = vld [vmem:[#allocation12 + $0x138] sm:$0xff]  ;;  %v4065_v16 = vld [vmem:[#allocation12 + $0x9a8] sm:$0xff] }
 0x6b0   : > { %3506 = vmatprep.subr.mxu1 %v3253_v8  ;;  %3662 = vmatmul.mubr.f32.vlgmr.msra.gmra.mxu0 %v11887_v34  ;;  %v2925_v8 = vld [vmem:[#allocation12 + $0x130] sm:$0xff] }
 0x6b1   : > { %3507 = vmatpush2.msra.mxu1 %v3252_v18  ;;  %3838 = vmatprep.subr.mxu0 %v3022_v21  ;;  %v4064_v18 = vld [vmem:[#allocation12 + $0x9a0] sm:$0xff]  ;;  %v2922_v21 = vld [vmem:[#allocation12 + $0x118] sm:$0xff] }
 0x6b2   : > { %3508 = vmatprep.subr.mxu1 %v3249_v37  ;;  %3839 = vmatpush1.msra.mxu0 %v3021_v38  ;;  %v4061_v37 = vld [vmem:[#allocation12 + $0x988] sm:$0xff]  ;;  %v2921_v38 = vld [vmem:[#allocation12 + $0x110] sm:$0xff] }
 0x6b3   : > { %3509 = vmatpush2.msra.mxu1 %v3248_v41  ;;  %3840 = vmatprep.subr.mxu0 %v3018_v43  ;;  %v4060_v41 = vld [vmem:[#allocation12 + $0x980] sm:$0xff]  ;;  %v2918_v43 = vld [vmem:[#allocation12 + $0xf8] sm:$0xff] }
 0x6b4   : > { %3510 = vmatprep.subr.mxu1 %v3245_v44  ;;  %3841 = vmatpush1.msra.mxu0 %v3017_v47  ;;  %v4057_v44 = vld [vmem:[#allocation12 + $0x968] sm:$0xff]  ;;  %v2917_v47 = vld [vmem:[#allocation12 + $0xf0] sm:$0xff] }
 0x6b5   : > { %3874 = vmatprep.mubr.f32.mxu0 %v11006_v0  ;;  %3511 = vmatpush2.msra.mxu1 %v3244_v23  ;;  %v4056_v23 = vld [vmem:[#allocation12 + $0x960] sm:$0xff] }
 0x6b6   : > { %9962 = vmatmul.mubr.msk.f32.vlgmr.msra.gmra.mxu0 %vm3306_vm7, %v11896_v39  ;;  %9963 = vmatprep.subr.msk.mxu0 %vm2736_vm4, %v11825_v58 }
 0x6b7   : > { %3512 = vmatprep.subr.mxu1 %v3241_v27  ;;  %9964 = vmatpush1.msk.msra.mxu0 %vm2736_vm4, %v11827_v56  ;;  %v2914_v27 = vld [vmem:[#allocation12 + $0xd8] sm:$0xff] }
 0x6b8   : > { %3513 = vmatpush2.msra.mxu1 %v3240_v29  ;;  %3914 = vmatprep.subr.mxu0 %v11831_v17  ;;  %v4053_v29 = vld [vmem:[#allocation12 + $0x948] sm:$0xff] }
 0x6b9   : > { %3514 = vmatprep.subr.mxu1 %v3237_v30  ;;  %3915 = vmatpush1.msra.mxu0 %v11837_v19  ;;  %v2913_v30 = vld [vmem:[#allocation12 + $0xd0] sm:$0xff] }
 0x6ba   : > { %3515 = vmatpush2.msra.mxu1 %v3236_v31  ;;  %3516 = vmatprep.mubr.f32.mxu1 %v11889_v35  ;;  %v3019_v35 = vld [vmem:[#allocation12 + $0x420] sm:$0xff] }
 0x6bb   : > { %3916 = vmatprep.subr.mxu0 %v11844_v22  ;;  %3517 = vmatmul.mubr.f32.vlgmr.msra.gmra.mxu1 %v11885_v33  ;;  %v3016_v33 = vld [vmem:[#allocation12 + $0x408] sm:$0xff]  ;;  %v4052_v31 = vld [vmem:[#allocation12 + $0x940] sm:$0xff] }
 0x6bc   : > { %3551 = vmatprep.subr.mxu1 %v3305_v2  ;;  %3917 = vmatpush1.msra.mxu0 %v11848_v59  ;;  %v2910_v2 = vld [vmem:[#allocation12 + $0xb8] sm:$0xff] }
 0x6bd   : > { %3950 = vmatprep.mubr.f32.mxu0 %v11006_v0  ;;  %3552 = vmatpush1.msra.mxu1 %v3304_v3  ;;  %v4049_v3 = vld [vmem:[#allocation12 + $0x928] sm:$0xff] }
 0x6be   : > { %9965 = vmatmul.mubr.msk.f32.vlgmr.msra.gmra.mxu0 %vm2732_vm5, %v11915_v7  ;;  %3553 = vmatprep.subr.mxu1 %v3301_v9  ;;  %v2909_v9 = vld [vmem:[#allocation12 + $0xb0] sm:$0xff] }
 0x6bf   : > { %3554 = vmatpush1.msra.mxu1 %v3300_v10  ;;  %3587 = vmatprep.mubr.f32.mxu1 %v11006_v0  ;;  %v4048_v10 = vld [vmem:[#allocation12 + $0x920] sm:$0xff] }
 0x6c0   : > { %9960 = vmatmul.mubr.msk.f32.vlgmr.msra.gmra.mxu1 %vm3306_vm7, %v11898_v52  ;;  %3696 = vmatprep.subr.mxu1 %v3020_v40  ;;  %v4084_v52 = vld [vmem:[#allocation12 + $0xa40] sm:$0xff]  ;;  %v2906_v40 = vld [vmem:[#allocation12 + $0x98] sm:$0xff] }
 0x6c1   : > { %3697 = vmatpush1.msra.mxu1 %v3019_v35  ;;  %3732 = vmatprep.mubr.f32.mxu1 %v11006_v0  ;;  %v4045_v35 = vld [vmem:[#allocation12 + $0x908] sm:$0xff] }
 0x6c2   : > { %3698 = vmatprep.subr.mxu1 %v3016_v33  ;;  %4167 = vmatprep.subr.mxu0 %v4089_v42  ;;  %v2905_v33 = vld [vmem:[#allocation12 + $0x90] sm:$0xff]  ;;  %v4044_v42 = vld [vmem:[#allocation12 + $0x900] sm:$0xff] }
 0x6c3   : > { %3699 = vmatpush1.msra.mxu1 %v3015_v1  ;;  %4168 = vmatpush1.msra.mxu0 %v4088_v45  ;;  %v2902_v1 = vld [vmem:[#allocation12 + $0x78] sm:$0xff]  ;;  %v4041_v45 = vld [vmem:[#allocation12 + $0x8e8] sm:$0xff] }
 0x6c4   : > { %9961 = vmatmul.mubr.msk.f32.vlgmr.msra.gmra.mxu1 %vm3306_vm7, %v11896_v39  ;;  %3739 = vmatprep.subr.mxu1 %v2950_v46  ;;  %v4076_v39 = vld [vmem:[#allocation12 + $0xa00] sm:$0xff]  ;;  %v2901_v46 = vld [vmem:[#allocation12 + $0x70] sm:$0xff] }
 0x6c5   : > { %3740 = vmatpush1.msra.mxu1 %v2949_v48  ;;  %3803 = vmatprep.mubr.f32.mxu1 %v11892_v6  ;;  %v2933_v6 = vld [vmem:[#allocation12 + $0x170] sm:$0xff]  ;;  %v4040_v48 = vld [vmem:[#allocation12 + $0x8e0] sm:$0xff] }
 0x6c6   : > { %3741 = vmatprep.subr.mxu1 %v2946_v50  ;;  %4169 = vmatprep.subr.mxu0 %v4085_v51  ;;  %v2898_v50 = vld [vmem:[#allocation12 + $0x58] sm:$0xff]  ;;  %v4037_v51 = vld [vmem:[#allocation12 + $0x8c8] sm:$0xff] }
 0x6c7   : > { %3742 = vmatpush1.msra.mxu1 %v2945_v54  ;;  %4170 = vmatpush1.msra.mxu0 %v4084_v52  ;;  %v2897_v54 = vld [vmem:[#allocation12 + $0x50] sm:$0xff]  ;;  %v4036_v52 = vld [vmem:[#allocation12 + $0x8c0] sm:$0xff] }
 0x6c8   : > { %3743 = vmatprep.subr.mxu1 %v2942_v55  ;;  %4171 = vmatprep.subr.mxu0 %v4081_v53  ;;  %v2894_v55 = vld [vmem:[#allocation12 + $0x38] sm:$0xff]  ;;  %v4033_v53 = vld [vmem:[#allocation12 + $0x8a8] sm:$0xff] }
 0x6c9   : > { %3744 = vmatpush1.msra.mxu1 %v2941_v11  ;;  %4172 = vmatpush1.msra.mxu0 %v4080_v13  ;;  %v2893_v11 = vld [vmem:[#allocation12 + $0x30] sm:$0xff]  ;;  %v4032_v13 = vld [vmem:[#allocation12 + $0x8a0] sm:$0xff] }
 0x6ca   : > { %3745 = vmatprep.subr.mxu1 %v2938_v20  ;;  %4173 = vmatprep.subr.mxu0 %v4077_v24  ;;  %v2890_v20 = vld [vmem:[#allocation12 + $0x18] sm:$0xff]  ;;  %v4029_v24 = vld [vmem:[#allocation12 + $0x888] sm:$0xff] }
 0x6cb   : > { %3746 = vmatpush1.msra.mxu1 %v2937_v26  ;;  %4174 = vmatpush1.msra.mxu0 %v4076_v39  ;;  %v2889_v26 = vld [vmem:[#allocation12 + $0x10] sm:$0xff]  ;;  %v4028_v39 = vld [vmem:[#allocation12 + $0x880] sm:$0xff] }
 0x6cc   : > { %3747 = vmatprep.subr.mxu1 %v2934_v28  ;;  %4175 = vmatprep.subr.mxu0 %v4073_v57  ;;  %v3014_v28 = vld [vmem:[#allocation12 + $0x3f8] sm:$0xff]  ;;  %v4153_v57 = vld [vmem:[#allocation12 + $0xc68] sm:$0xff] }
 0x6cd   : > { %3748 = vmatpush1.msra.mxu1 %v2933_v6  ;;  %4176 = vmatpush1.msra.mxu0 %v4072_v60  ;;  %v3013_v6 = vld [vmem:[#allocation12 + $0x3f0] sm:$0xff]  ;;  %v4152_v60 = vld [vmem:[#allocation12 + $0xc60] sm:$0xff] }
 0x6ce   : > { %3749 = vmatprep.subr.mxu1 %v2930_v61  ;;  %4177 = vmatprep.subr.mxu0 %v4069_v63  ;;  %v3010_v61 = vld [vmem:[#allocation12 + $0x3d8] sm:$0xff]  ;;  %v4149_v63 = vld [vmem:[#allocation12 + $0xc48] sm:$0xff] }
 0x6cf   : > { %3750 = vmatpush1.msra.mxu1 %v2929_v4  ;;  %4178 = vmatpush1.msra.mxu0 %v4068_v5  ;;  %v3009_v4 = vld [vmem:[#allocation12 + $0x3d0] sm:$0xff]  ;;  %v4148_v5 = vld [vmem:[#allocation12 + $0xc40] sm:$0xff] }
 0x6d0   : > { %3751 = vmatprep.subr.mxu1 %v2926_v14  ;;  %4179 = vmatprep.subr.mxu0 %v4065_v16  ;;  %v3006_v14 = vld [vmem:[#allocation12 + $0x3b8] sm:$0xff]  ;;  %v4145_v16 = vld [vmem:[#allocation12 + $0xc28] sm:$0xff] }
 0x6d1   : > { %3752 = vmatpush1.msra.mxu1 %v2925_v8  ;;  %4180 = vmatpush1.msra.mxu0 %v4064_v18  ;;  %v3005_v8 = vld [vmem:[#allocation12 + $0x3b0] sm:$0xff]  ;;  %v4144_v18 = vld [vmem:[#allocation12 + $0xc20] sm:$0xff] }
 0x6d2   : > { %3753 = vmatprep.subr.mxu1 %v2922_v21  ;;  %4181 = vmatprep.subr.mxu0 %v4061_v37  ;;  %v3002_v21 = vld [vmem:[#allocation12 + $0x398] sm:$0xff]  ;;  %v4141_v37 = vld [vmem:[#allocation12 + $0xc08] sm:$0xff] }
 0x6d3   : > { %3754 = vmatpush1.msra.mxu1 %v2921_v38  ;;  %4182 = vmatpush1.msra.mxu0 %v4060_v41  ;;  %v3001_v38 = vld [vmem:[#allocation12 + $0x390] sm:$0xff]  ;;  %v4140_v41 = vld [vmem:[#allocation12 + $0xc00] sm:$0xff] }
 0x6d4   : > { %3755 = vmatprep.subr.mxu1 %v2918_v43  ;;  %4183 = vmatprep.subr.mxu0 %v4057_v44  ;;  %v2998_v43 = vld [vmem:[#allocation12 + $0x378] sm:$0xff]  ;;  %v4137_v44 = vld [vmem:[#allocation12 + $0xbe8] sm:$0xff] }
 0x6d5   : > { %3756 = vmatpush1.msra.mxu1 %v2917_v47  ;;  %4184 = vmatpush1.msra.mxu0 %v4056_v23  ;;  %v2997_v47 = vld [vmem:[#allocation12 + $0x370] sm:$0xff]  ;;  %v4136_v23 = vld [vmem:[#allocation12 + $0xbe0] sm:$0xff] }
 0x6d6   : > { %3757 = vmatprep.subr.mxu1 %v2914_v27  ;;  %4185 = vmatprep.subr.mxu0 %v4053_v29  ;;  %v2994_v27 = vld [vmem:[#allocation12 + $0x358] sm:$0xff]  ;;  %v4133_v29 = vld [vmem:[#allocation12 + $0xbc8] sm:$0xff] }
 0x6d7   : > { %3758 = vmatpush1.msra.mxu1 %v2913_v30  ;;  %4186 = vmatpush1.msra.mxu0 %v4052_v31  ;;  %v2993_v30 = vld [vmem:[#allocation12 + $0x350] sm:$0xff]  ;;  %v4132_v31 = vld [vmem:[#allocation12 + $0xbc0] sm:$0xff] }
 0x6d8   : > { %3759 = vmatprep.subr.mxu1 %v2910_v2  ;;  %4187 = vmatprep.subr.mxu0 %v4049_v3  ;;  %v2990_v2 = vld [vmem:[#allocation12 + $0x338] sm:$0xff]  ;;  %v4129_v3 = vld [vmem:[#allocation12 + $0xba8] sm:$0xff] }
 0x6d9   : > { %3760 = vmatpush1.msra.mxu1 %v2909_v9  ;;  %4188 = vmatpush1.msra.mxu0 %v4048_v10  ;;  %v2989_v9 = vld [vmem:[#allocation12 + $0x330] sm:$0xff]  ;;  %v4128_v10 = vld [vmem:[#allocation12 + $0xba0] sm:$0xff] }
 0x6da   : > { %3761 = vmatprep.subr.mxu1 %v2906_v40  ;;  %4189 = vmatprep.subr.mxu0 %v4045_v35  ;;  %v2986_v40 = vld [vmem:[#allocation12 + $0x318] sm:$0xff]  ;;  %v4125_v35 = vld [vmem:[#allocation12 + $0xb88] sm:$0xff] }
 0x6db   : > { %3762 = vmatpush1.msra.mxu1 %v2905_v33  ;;  %4190 = vmatpush1.msra.mxu0 %v4044_v42  ;;  %v2985_v33 = vld [vmem:[#allocation12 + $0x310] sm:$0xff]  ;;  %v4124_v42 = vld [vmem:[#allocation12 + $0xb80] sm:$0xff] }
 0x6dc   : > { %3763 = vmatprep.subr.mxu1 %v2902_v1  ;;  %4191 = vmatprep.subr.mxu0 %v4041_v45  ;;  %v2982_v1 = vld [vmem:[#allocation12 + $0x2f8] sm:$0xff]  ;;  %v4121_v45 = vld [vmem:[#allocation12 + $0xb68] sm:$0xff] }
 0x6dd   : > { %3764 = vmatpush1.msra.mxu1 %v2901_v46  ;;  %4192 = vmatpush1.msra.mxu0 %v4040_v48  ;;  %v2981_v46 = vld [vmem:[#allocation12 + $0x2f0] sm:$0xff]  ;;  %v4120_v48 = vld [vmem:[#allocation12 + $0xb60] sm:$0xff] }
 0x6de   : > { %3765 = vmatprep.subr.mxu1 %v2898_v50  ;;  %4193 = vmatprep.subr.mxu0 %v4037_v51  ;;  %v2978_v50 = vld [vmem:[#allocation12 + $0x2d8] sm:$0xff]  ;;  %v4117_v51 = vld [vmem:[#allocation12 + $0xb48] sm:$0xff] }
 0x6df   : > { %3766 = vmatpush1.msra.mxu1 %v2897_v54  ;;  %4194 = vmatpush1.msra.mxu0 %v4036_v52  ;;  %v2977_v54 = vld [vmem:[#allocation12 + $0x2d0] sm:$0xff]  ;;  %v4116_v52 = vld [vmem:[#allocation12 + $0xb40] sm:$0xff] }
 0x6e0   : > { %3767 = vmatprep.subr.mxu1 %v2894_v55  ;;  %4195 = vmatprep.subr.mxu0 %v4033_v53  ;;  %v2974_v55 = vld [vmem:[#allocation12 + $0x2b8] sm:$0xff]  ;;  %v4113_v53 = vld [vmem:[#allocation12 + $0xb28] sm:$0xff] }
 0x6e1   : > { %3768 = vmatpush1.msra.mxu1 %v2893_v11  ;;  %4196 = vmatpush1.msra.mxu0 %v4032_v13  ;;  %v2973_v11 = vld [vmem:[#allocation12 + $0x2b0] sm:$0xff]  ;;  %v4112_v13 = vld [vmem:[#allocation12 + $0xb20] sm:$0xff] }
 0x6e2   : > { %3769 = vmatprep.subr.mxu1 %v2890_v20  ;;  %4197 = vmatprep.subr.mxu0 %v4029_v24  ;;  %v2970_v20 = vld [vmem:[#allocation12 + $0x298] sm:$0xff]  ;;  %v4109_v24 = vld [vmem:[#allocation12 + $0xb08] sm:$0xff] }
 0x6e3   : > { %3770 = vmatpush1.msra.mxu1 %v2889_v26  ;;  %4198 = vmatpush1.msra.mxu0 %v4028_v39  ;;  %v2969_v26 = vld [vmem:[#allocation12 + $0x290] sm:$0xff]  ;;  %v4108_v39 = vld [vmem:[#allocation12 + $0xb00] sm:$0xff] }
 0x6e4   : > { %3771 = vmatprep.subr.mxu1 %v3014_v28  ;;  %4199 = vmatprep.subr.mxu0 %v4153_v57  ;;  %v2966_v28 = vld [vmem:[#allocation12 + $0x278] sm:$0xff]  ;;  %v4105_v57 = vld [vmem:[#allocation12 + $0xae8] sm:$0xff] }
 0x6e5   : > { %3772 = vmatpush2.msra.mxu1 %v3013_v6  ;;  %4200 = vmatpush2.msra.mxu0 %v4152_v60  ;;  %v2965_v6 = vld [vmem:[#allocation12 + $0x270] sm:$0xff]  ;;  %v4104_v60 = vld [vmem:[#allocation12 + $0xae0] sm:$0xff] }
 0x6e6   : > { %3773 = vmatprep.subr.mxu1 %v3010_v61  ;;  %4201 = vmatprep.subr.mxu0 %v4149_v63  ;;  %v2962_v61 = vld [vmem:[#allocation12 + $0x258] sm:$0xff]  ;;  %v4101_v63 = vld [vmem:[#allocation12 + $0xac8] sm:$0xff] }
 0x6e7   : > { %3774 = vmatpush2.msra.mxu1 %v3009_v4  ;;  %4202 = vmatpush2.msra.mxu0 %v4148_v5  ;;  %v2961_v4 = vld [vmem:[#allocation12 + $0x250] sm:$0xff]  ;;  %v4100_v5 = vld [vmem:[#allocation12 + $0xac0] sm:$0xff] }
 0x6e8   : > { %3775 = vmatprep.subr.mxu1 %v3006_v14  ;;  %4203 = vmatprep.subr.mxu0 %v4145_v16  ;;  %v2958_v14 = vld [vmem:[#allocation12 + $0x238] sm:$0xff]  ;;  %v4097_v16 = vld [vmem:[#allocation12 + $0xaa8] sm:$0xff] }
 0x6e9   : > { %3776 = vmatpush2.msra.mxu1 %v3005_v8  ;;  %4204 = vmatpush2.msra.mxu0 %v4144_v18  ;;  %v2957_v8 = vld [vmem:[#allocation12 + $0x230] sm:$0xff]  ;;  %v4096_v18 = vld [vmem:[#allocation12 + $0xaa0] sm:$0xff] }
 0x6ea   : > { %3777 = vmatprep.subr.mxu1 %v3002_v21  ;;  %4205 = vmatprep.subr.mxu0 %v4141_v37  ;;  %v2954_v21 = vld [vmem:[#allocation12 + $0x218] sm:$0xff]  ;;  %v4093_v37 = vld [vmem:[#allocation12 + $0xa88] sm:$0xff] }
 0x6eb   : > { %3778 = vmatpush2.msra.mxu1 %v3001_v38  ;;  %4206 = vmatpush2.msra.mxu0 %v4140_v41  ;;  %v2953_v38 = vld [vmem:[#allocation12 + $0x210] sm:$0xff]  ;;  %v4092_v41 = vld [vmem:[#allocation12 + $0xa80] sm:$0xff] }
 0x6ec   : > { %3779 = vmatprep.subr.mxu1 %v2998_v43  ;;  %4207 = vmatprep.subr.mxu0 %v4137_v44  ;;  %v4163_v43 = vld [vmem:[#allocation12 + $0xcb8] sm:$0xff] }
 0x6ed   : > { %3780 = vmatpush2.msra.mxu1 %v2997_v47  ;;  %4208 = vmatpush2.msra.mxu0 %v4136_v23 }
 0x6ee   : > { %3781 = vmatprep.subr.mxu1 %v2994_v27  ;;  %4209 = vmatprep.subr.mxu0 %v4133_v29 }
 0x6ef   : > { %3782 = vmatpush2.msra.mxu1 %v2993_v30  ;;  %4210 = vmatpush2.msra.mxu0 %v4132_v31  ;;  %v4161_v30 = vld [vmem:[#allocation12 + $0xca8] sm:$0xff]  ;;  %v4160_v31 = vld [vmem:[#allocation12 + $0xca0] sm:$0xff] }
 0x6f0   : > { %3783 = vmatprep.subr.mxu1 %v2990_v2  ;;  %4211 = vmatprep.subr.mxu0 %v4129_v3  ;;  %v4157_v2 = vld [vmem:[#allocation12 + $0xc88] sm:$0xff]  ;;  %v4156_v3 = vld [vmem:[#allocation12 + $0xc80] sm:$0xff] }
 0x6f1   : > { %3784 = vmatpush2.msra.mxu1 %v2989_v9  ;;  %4212 = vmatpush2.msra.mxu0 %v4128_v10  ;;  %v4091_v9 = vld [vmem:[#allocation12 + $0xa78] sm:$0xff] }
 0x6f2   : > { %3785 = vmatprep.subr.mxu1 %v2986_v40  ;;  %4213 = vmatprep.subr.mxu0 %v4125_v35 }
 0x6f3   : > { %3786 = vmatpush2.msra.mxu1 %v2985_v33  ;;  %4214 = vmatpush2.msra.mxu0 %v4124_v42 }
 0x6f4   : > { %3787 = vmatprep.subr.mxu1 %v2982_v1  ;;  %4215 = vmatprep.subr.mxu0 %v4121_v45 }
 0x6f5   : > { %3788 = vmatpush2.msra.mxu1 %v2981_v46  ;;  %4216 = vmatpush2.msra.mxu0 %v4120_v48 }
 0x6f6   : > { %3789 = vmatprep.subr.mxu1 %v2978_v50  ;;  %4217 = vmatprep.subr.mxu0 %v4117_v51  ;;  %v4162_v51 = vld [vmem:[#allocation12 + $0xcb0] sm:$0xff] }
 0x6f7   : > { %3790 = vmatpush2.msra.mxu1 %v2977_v54  ;;  %4218 = vmatpush2.msra.mxu0 %v4116_v52  ;;  %v4159_v52 = vld [vmem:[#allocation12 + $0xc98] sm:$0xff] }
 0x6f8   : > { %3791 = vmatprep.subr.mxu1 %v2974_v55  ;;  %4219 = vmatprep.subr.mxu0 %v4113_v53  ;;  %v4158_v53 = vld [vmem:[#allocation12 + $0xc90] sm:$0xff] }
 0x6f9   : > { %3792 = vmatpush2.msra.mxu1 %v2973_v11  ;;  %4220 = vmatpush2.msra.mxu0 %v4112_v13 }
 0x6fa   : > { %3793 = vmatprep.subr.mxu1 %v2970_v20  ;;  %4221 = vmatprep.subr.mxu0 %v4109_v24 }
 0x6fb   : > { %3794 = vmatpush2.msra.mxu1 %v2969_v26  ;;  %4222 = vmatpush2.msra.mxu0 %v4108_v39 }
 0x6fc   : > { %3795 = vmatprep.subr.mxu1 %v2966_v28  ;;  %4223 = vmatprep.subr.mxu0 %v4105_v57 }
 0x6fd   : > { %3796 = vmatpush2.msra.mxu1 %v2965_v6  ;;  %4224 = vmatpush2.msra.mxu0 %v4104_v60  ;;  %v4090_v60 = vld [vmem:[#allocation12 + $0xa70] sm:$0xff] }
 0x6fe   : > { %3797 = vmatprep.subr.mxu1 %v2962_v61  ;;  %4225 = vmatprep.subr.mxu0 %v4101_v63  ;;  %v4087_v63 = vld [vmem:[#allocation12 + $0xa58] sm:$0xff] }
 0x6ff   : > { %3798 = vmatpush2.msra.mxu1 %v2961_v4  ;;  %4226 = vmatpush2.msra.mxu0 %v4100_v5  ;;  %v4086_v4 = vld [vmem:[#allocation12 + $0xa50] sm:$0xff] }
 0x700   : > { %3799 = vmatprep.subr.mxu1 %v2958_v14  ;;  %4227 = vmatprep.subr.mxu0 %v4097_v16  ;;  %v4083_v14 = vld [vmem:[#allocation12 + $0xa38] sm:$0xff]  ;;  %v4082_v16 = vld [vmem:[#allocation12 + $0xa30] sm:$0xff] }
 0x701   : > { %3800 = vmatpush2.msra.mxu1 %v2957_v8  ;;  %4228 = vmatpush2.msra.mxu0 %v4096_v18  ;;  %v4079_v8 = vld [vmem:[#allocation12 + $0xa18] sm:$0xff]  ;;  %v11966_v18 = vld [vmem:[#allocation10 + $0x18] sm:$0x7f] }
 0x702   : > { %3801 = vmatprep.subr.mxu1 %v2954_v21  ;;  %4229 = vmatprep.subr.mxu0 %v4093_v37  ;;  %v4078_v21 = vld [vmem:[#allocation12 + $0xa10] sm:$0xff]  ;;  %v4075_v37 = vld [vmem:[#allocation12 + $0x9f8] sm:$0xff] }
 0x703   : > { %3802 = vmatpush2.msra.mxu1 %v2953_v38  ;;  %4230 = vmatpush2.msra.mxu0 %v4092_v41  ;;  %v4074_v38 = vld [vmem:[#allocation12 + $0x9f0] sm:$0xff]  ;;  %v4663_v41 = vld [vmem:[#allocation12 + $0xea8] sm:$0xff] }
 0x704   : > { %3804 = vmatmul.mubr.f32.vlgmr.msra.gmra.mxu1 %v11887_v34  ;;  %10116 = vmatprep.subr.mxu1 %v11006_v0 }
 0x705   : > { %10117 = vmatpush3.msk.msra.mxu1 %vm2736_vm4, %v11856_v62  ;;  %10122 = vmatprep.mubr.msk.f32.mxu1 %vm11007_vm6, %v11006_v0 }
 0x706   : > { %10118 = vmatprep.subr.mxu1 %v11006_v0  ;;  %4408 = vmatprep.subr.mxu0 %v4163_v43  ;;  %v4071_v43 = vld [vmem:[#allocation12 + $0x9d8] sm:$0xff] }
 0x707   : > { %10119 = vmatpush3.msra.mxu1 %v11861_v12 }
 0x708   : > { %10120 = vmatprep.subr.mxu1 %v11006_v0 }
 0x709   : > { %10121 = vmatpush3.msra.mxu1 %v11868_v15 }
 0x70a   : > { %10123 = vmatmul.mubr.msk.f32.vlgmr.msra.gmra.mxu1 %vm2732_vm5, %v11915_v7  ;;  %4266 = vmatprep.subr.mxu1 %v4161_v30  ;;  %v4655_v30 = vld [vmem:[#allocation12 + $0xe68] sm:$0xff] }
 0x70b   : > { %4302 = vmatprep.mubr.f32.mxu1 %v11006_v0  ;;  %4267 = vmatpush1.msra.mxu1 %v4160_v31  ;;  %v4063_v31 = vld [vmem:[#allocation12 + $0x998] sm:$0xff] }
 0x70c   : > { %4268 = vmatprep.subr.mxu1 %v4157_v2  ;;  %v4654_v2 = vld [vmem:[#allocation12 + $0xe60] sm:$0xff] }
 0x70d   : > { %4269 = vmatpush1.msra.mxu1 %v4156_v3  ;;  %v4062_v3 = vld [vmem:[#allocation12 + $0x990] sm:$0xff] }
 0x70e   : > { %4309 = vmatprep.subr.mxu1 %v4091_v9  ;;  %v4651_v9 = vld [vmem:[#allocation12 + $0xe48] sm:$0xff] }
 0x730   : > { %v3376_v34 = vpop.f32.mrf.mxu0 }
 0x732   : > { %v3378_v47 = vpop.f32.mrf.mxu0 }
 0x73a   : > { %v3447_v44 = vpop.f32.mrf.mxu1 }
 0x73b   : > { %v3448_v23 = vadd.f32 %v3447_v44, %v3376_v34  ;;  %v4662_v34 = vld [vmem:[#allocation12 + $0xea0] sm:$0xff]  ;;  %v4070_v44 = vld [vmem:[#allocation12 + $0x9d0] sm:$0xff] }
 0x73c   : > { %v3449_v27 = vpop.f32.mrf.mxu1 }
 0x73d   : > { %v3450_v29 = vadd.f32 %v3449_v27, %v3378_v47  ;;  %v4659_v47 = vld [vmem:[#allocation12 + $0xe88] sm:$0xff]  ;;  %v4658_v27 = vld [vmem:[#allocation12 + $0xe80] sm:$0xff] }
 0x770   : > { %v3663_v10 = vpop.f32.mrf.mxu0 }
 0x771   : > { %v3664_v7 = vadd.f32 %v3663_v10, %v3448_v23  ;;  %v4067_v23 = vld [vmem:[#allocation12 + $0x9b8] sm:$0xff] }
 0x772   : > { %v3665_v40 = vpop.f32.mrf.mxu0  ;;  %v4059_v10 = vld [vmem:[#allocation12 + $0x978] sm:$0xff] }
 0x773   : > { %v3666_v35 = vadd.f32 %v3665_v40, %v3450_v29  ;;  %v4066_v29 = vld [vmem:[#allocation12 + $0x9b0] sm:$0xff] }
 0x774   : > { %v4058_v40 = vld [vmem:[#allocation12 + $0x970] sm:$0xff] }
 0x776   : > { %v11941_v33 = vpop.f32.mrf.mxu0 }
 0x778   : > { %v11943_v1 = vpop.f32.mrf.mxu0 }
 0x77b   : > { %v3518_v42 = vpop.f32.mrf.mxu1 }
 0x77d   : > { %v3520_v45 = vpop.f32.mrf.mxu1 }
 0x77e   : > { %v11945_v46 = vpop.f32.mrf.mxu0 }
 0x780   : > { %v3954_v48 = vpop.f32.mrf.mxu0  ;;  %v3589_v50 = vpop.f32.mrf.mxu1 }
 0x781   : > { %v3590_v54 = vadd.f32 %v3589_v50, %v3518_v42  ;;  %4231 = vmatprep.mubr.f32.mxu0 %v3954_v48  ;;  %v4055_v42 = vld [vmem:[#allocation12 + $0x958] sm:$0xff]  ;;  %v4643_v50 = vld [vmem:[#allocation12 + $0xe08] sm:$0xff] }
 0x782   : > { %4232 = vmatmul.mubr.f32.vlgmr.msra.gmra.mxu0 %v11945_v46  ;;  %v3591_v55 = vpop.f32.mrf.mxu1 }
 0x783   : > { %4409 = vmatpush1.msra.mxu0 %v4162_v51  ;;  %v3592_v11 = vadd.f32 %v3591_v55, %v3520_v45  ;;  %4444 = vmatprep.mubr.f32.mxu0 %v11006_v0  ;;  %v4646_v45 = vld [vmem:[#allocation12 + $0xe20] sm:$0xff]  ;;  %v4051_v51 = vld [vmem:[#allocation12 + $0x938] sm:$0xff]  ;;  %v4639_v55 = vld [vmem:[#allocation12 + $0xde8] sm:$0xff] }
 0x784   : > { %4410 = vmatprep.subr.mxu0 %v4159_v52  ;;  %v3734_v13 = vpop.f32.mrf.mxu1  ;;  %v4050_v52 = vld [vmem:[#allocation12 + $0x930] sm:$0xff] }
 0x785   : > { %4411 = vmatpush1.msra.mxu0 %v4158_v53  ;;  %v11949_v20 = vadd.f32 %v3734_v13, %v3664_v7  ;;  %v4650_v7 = vld [vmem:[#allocation12 + $0xe40] sm:$0xff]  ;;  %v4047_v53 = vld [vmem:[#allocation12 + $0x918] sm:$0xff]  ;;  %v4046_v13 = vld [vmem:[#allocation12 + $0x910] sm:$0xff] }
 0x786   : > { %9970 = vmatprep.subr.msk.mxu0 %vm2736_vm4, %v11825_v58  ;;  %v3736_v24 = vpop.f32.mrf.mxu1 }
 0x787   : > { %v11953_v26 = vadd.f32 %v3736_v24, %v3666_v35  ;;  %v4647_v35 = vld [vmem:[#allocation12 + $0xe28] sm:$0xff] }
 0x788   : > { %v4635_v24 = vld [vmem:[#allocation12 + $0xdc8] sm:$0xff] }
 0x7c4   : > { %v3805_v39 = vpop.f32.mrf.mxu1 }
 0x7c5   : > { %v11955_v28 = vadd.f32 %v3805_v39, %v3590_v54  ;;  %v4642_v54 = vld [vmem:[#allocation12 + $0xe00] sm:$0xff]  ;;  %v4043_v39 = vld [vmem:[#allocation12 + $0x8f8] sm:$0xff] }
 0x7c6   : > { %v3807_v57 = vpop.f32.mrf.mxu1 }
 0x7c7   : > { %v11957_v6 = vadd.f32 %v3807_v57, %v3592_v11  ;;  %v4638_v11 = vld [vmem:[#allocation12 + $0xde0] sm:$0xff] }
 0x7c8   : > { %v4634_v57 = vld [vmem:[#allocation12 + $0xdc0] sm:$0xff] }
 0x7ca   : > { %v4023_v61 = vpop.f32.mrf.mxu1 }
 0x7cb   : > { %9968 = vmatmul.mubr.msk.f32.vlgmr.msra.gmra.mxu1 %vm3306_vm7, %v4023_v61  ;;  %9969 = vmatmul.mubr.msk.f32.vlgmr.msra.gmra.mxu0 %vm3306_vm7, %v4023_v61  ;;  %v4631_v61 = vld [vmem:[#allocation12 + $0xda8] sm:$0xff] }
 0x7cc   : > { %4310 = vmatpush1.msra.mxu1 %v4090_v60  ;;  %9971 = vmatpush1.msk.msra.mxu0 %vm2736_vm4, %v11827_v56  ;;  %v10124_v5 = vpop.f32.mrf.mxu1  ;;  %v4042_v60 = vld [vmem:[#allocation12 + $0x8f0] sm:$0xff] }
 0x7cd   : > { %4311 = vmatprep.subr.mxu1 %v4087_v63  ;;  %4488 = vmatprep.subr.mxu0 %v11831_v17  ;;  %v4039_v63 = vld [vmem:[#allocation12 + $0x8d8] sm:$0xff]  ;;  %v4038_v5 = vld [vmem:[#allocation12 + $0x8d0] sm:$0xff] }
 0x7ce   : > { %4312 = vmatpush1.msra.mxu1 %v4086_v4  ;;  %4489 = vmatpush1.msra.mxu0 %v11837_v19  ;;  %v4630_v4 = vld [vmem:[#allocation12 + $0xda0] sm:$0xff] }
 0x7cf   : > { %4313 = vmatprep.subr.mxu1 %v4083_v14  ;;  %4490 = vmatprep.subr.mxu0 %v11844_v22  ;;  %v4627_v14 = vld [vmem:[#allocation12 + $0xd88] sm:$0xff] }
 0x7d0   : > { %4314 = vmatpush1.msra.mxu1 %v4082_v16  ;;  %4491 = vmatpush1.msra.mxu0 %v11848_v59  ;;  %v4035_v16 = vld [vmem:[#allocation12 + $0x8b8] sm:$0xff] }
 0x7d1   : > { %4524 = vmatprep.mubr.f32.mxu0 %v11006_v0  ;;  %4315 = vmatprep.subr.mxu1 %v4079_v8  ;;  %v4626_v8 = vld [vmem:[#allocation12 + $0xd80] sm:$0xff] }
 0x7d2   : > { %9972 = vmatmul.mubr.msk.f32.vlgmr.msra.gmra.mxu0 %vm2732_vm5, %v11966_v18  ;;  %4316 = vmatpush1.msra.mxu1 %v4078_v21  ;;  %v4034_v21 = vld [vmem:[#allocation12 + $0x8b0] sm:$0xff] }
 0x7d3   : > { %4317 = vmatprep.subr.mxu1 %v4075_v37  ;;  %4373 = vmatprep.mubr.f32.mxu1 %v3954_v48  ;;  %v4054_v48 = vld [vmem:[#allocation12 + $0x950] sm:$0xff]  ;;  %v4623_v37 = vld [vmem:[#allocation12 + $0xd68] sm:$0xff] }
 0x7d4   : > { %4318 = vmatpush1.msra.mxu1 %v4074_v38  ;;  %4741 = vmatprep.subr.mxu0 %v4663_v41  ;;  %v4031_v38 = vld [vmem:[#allocation12 + $0x898] sm:$0xff]  ;;  %v4622_v41 = vld [vmem:[#allocation12 + $0xd60] sm:$0xff] }
 0x7d5   : > { %4319 = vmatprep.subr.mxu1 %v4071_v43  ;;  %4742 = vmatpush1.msra.mxu0 %v4662_v34  ;;  %v4030_v43 = vld [vmem:[#allocation12 + $0x890] sm:$0xff]  ;;  %v4619_v34 = vld [vmem:[#allocation12 + $0xd48] sm:$0xff] }
 0x7d6   : > { %4320 = vmatpush1.msra.mxu1 %v4070_v44  ;;  %4743 = vmatprep.subr.mxu0 %v4659_v47  ;;  %v4155_v44 = vld [vmem:[#allocation12 + $0xc78] sm:$0xff]  ;;  %v4618_v47 = vld [vmem:[#allocation12 + $0xd40] sm:$0xff] }
 0x7d7   : > { %4321 = vmatprep.subr.mxu1 %v4067_v23  ;;  %4744 = vmatpush1.msra.mxu0 %v4658_v27  ;;  %v4154_v23 = vld [vmem:[#allocation12 + $0xc70] sm:$0xff]  ;;  %v4615_v27 = vld [vmem:[#allocation12 + $0xd28] sm:$0xff] }
 0x7d8   : > { %4322 = vmatpush1.msra.mxu1 %v4066_v29  ;;  %4745 = vmatprep.subr.mxu0 %v4655_v30  ;;  %v4151_v29 = vld [vmem:[#allocation12 + $0xc58] sm:$0xff]  ;;  %v4614_v30 = vld [vmem:[#allocation12 + $0xd20] sm:$0xff] }
 0x7d9   : > { %4323 = vmatprep.subr.mxu1 %v4063_v31  ;;  %4746 = vmatpush1.msra.mxu0 %v4654_v2  ;;  %v4150_v31 = vld [vmem:[#allocation12 + $0xc50] sm:$0xff]  ;;  %v4611_v2 = vld [vmem:[#allocation12 + $0xd08] sm:$0xff] }
 0x7da   : > { %4324 = vmatpush1.msra.mxu1 %v4062_v3  ;;  %4747 = vmatprep.subr.mxu0 %v4651_v9  ;;  %v4147_v3 = vld [vmem:[#allocation12 + $0xc38] sm:$0xff]  ;;  %v4610_v9 = vld [vmem:[#allocation12 + $0xd00] sm:$0xff] }
 0x7db   : > { %4325 = vmatprep.subr.mxu1 %v4059_v10  ;;  %4748 = vmatpush1.msra.mxu0 %v4650_v7  ;;  %v4146_v10 = vld [vmem:[#allocation12 + $0xc30] sm:$0xff]  ;;  %v4607_v7 = vld [vmem:[#allocation12 + $0xce8] sm:$0xff] }
 0x7dc   : > { %4326 = vmatpush1.msra.mxu1 %v4058_v40  ;;  %4749 = vmatprep.subr.mxu0 %v4647_v35  ;;  %v4143_v40 = vld [vmem:[#allocation12 + $0xc18] sm:$0xff]  ;;  %v4606_v35 = vld [vmem:[#allocation12 + $0xce0] sm:$0xff] }
 0x7dd   : > { %4327 = vmatprep.subr.mxu1 %v4055_v42  ;;  %4750 = vmatpush1.msra.mxu0 %v4646_v45  ;;  %v4142_v42 = vld [vmem:[#allocation12 + $0xc10] sm:$0xff]  ;;  %v4603_v45 = vld [vmem:[#allocation12 + $0xcc8] sm:$0xff] }
 0x7de   : > { %4328 = vmatpush1.msra.mxu1 %v4054_v48  ;;  %4751 = vmatprep.subr.mxu0 %v4643_v50  ;;  %v4139_v48 = vld [vmem:[#allocation12 + $0xbf8] sm:$0xff]  ;;  %v4602_v50 = vld [vmem:[#allocation12 + $0xcc0] sm:$0xff] }
 0x7df   : > { %4329 = vmatprep.subr.mxu1 %v4051_v51  ;;  %4752 = vmatpush1.msra.mxu0 %v4642_v54  ;;  %v4138_v51 = vld [vmem:[#allocation12 + $0xbf0] sm:$0xff]  ;;  %v4727_v54 = vld [vmem:[#allocation12 + $0x10a8] sm:$0xff] }
 0x7e0   : > { %4330 = vmatpush1.msra.mxu1 %v4050_v52  ;;  %4753 = vmatprep.subr.mxu0 %v4639_v55  ;;  %v4135_v52 = vld [vmem:[#allocation12 + $0xbd8] sm:$0xff]  ;;  %v4726_v55 = vld [vmem:[#allocation12 + $0x10a0] sm:$0xff] }
 0x7e1   : > { %4331 = vmatprep.subr.mxu1 %v4047_v53  ;;  %4754 = vmatpush1.msra.mxu0 %v4638_v11  ;;  %v4134_v53 = vld [vmem:[#allocation12 + $0xbd0] sm:$0xff]  ;;  %v4723_v11 = vld [vmem:[#allocation12 + $0x1088] sm:$0xff] }
 0x7e2   : > { %4332 = vmatpush1.msra.mxu1 %v4046_v13  ;;  %4755 = vmatprep.subr.mxu0 %v4635_v24  ;;  %v4131_v13 = vld [vmem:[#allocation12 + $0xbb8] sm:$0xff]  ;;  %v4722_v24 = vld [vmem:[#allocation12 + $0x1080] sm:$0xff] }
 0x7e3   : > { %4333 = vmatprep.subr.mxu1 %v4043_v39  ;;  %4756 = vmatpush1.msra.mxu0 %v4634_v57  ;;  %v4130_v39 = vld [vmem:[#allocation12 + $0xbb0] sm:$0xff]  ;;  %v4719_v57 = vld [vmem:[#allocation12 + $0x1068] sm:$0xff] }
 0x7e4   : > { %4334 = vmatpush1.msra.mxu1 %v4042_v60  ;;  %4757 = vmatprep.subr.mxu0 %v4631_v61  ;;  %v4127_v60 = vld [vmem:[#allocation12 + $0xb98] sm:$0xff]  ;;  %v4718_v61 = vld [vmem:[#allocation12 + $0x1060] sm:$0xff] }
 0x7e5   : > { %4335 = vmatprep.subr.mxu1 %v4039_v63  ;;  %4758 = vmatpush1.msra.mxu0 %v4630_v4  ;;  %v4126_v63 = vld [vmem:[#allocation12 + $0xb90] sm:$0xff]  ;;  %v4715_v4 = vld [vmem:[#allocation12 + $0x1048] sm:$0xff] }
 0x7e6   : > { %4336 = vmatpush1.msra.mxu1 %v4038_v5  ;;  %4759 = vmatprep.subr.mxu0 %v4627_v14  ;;  %v4123_v5 = vld [vmem:[#allocation12 + $0xb78] sm:$0xff]  ;;  %v4714_v14 = vld [vmem:[#allocation12 + $0x1040] sm:$0xff] }
 0x7e7   : > { %4337 = vmatprep.subr.mxu1 %v4035_v16  ;;  %4760 = vmatpush1.msra.mxu0 %v4626_v8  ;;  %v4122_v16 = vld [vmem:[#allocation12 + $0xb70] sm:$0xff]  ;;  %v4711_v8 = vld [vmem:[#allocation12 + $0x1028] sm:$0xff] }
 0x7e8   : > { %4338 = vmatpush1.msra.mxu1 %v4034_v21  ;;  %4761 = vmatprep.subr.mxu0 %v4623_v37  ;;  %v4119_v21 = vld [vmem:[#allocation12 + $0xb58] sm:$0xff]  ;;  %v4710_v37 = vld [vmem:[#allocation12 + $0x1020] sm:$0xff] }
 0x7e9   : > { %4339 = vmatprep.subr.mxu1 %v4031_v38  ;;  %4762 = vmatpush1.msra.mxu0 %v4622_v41  ;;  %v4118_v38 = vld [vmem:[#allocation12 + $0xb50] sm:$0xff]  ;;  %v4707_v41 = vld [vmem:[#allocation12 + $0x1008] sm:$0xff] }
 0x7ea   : > { %4340 = vmatpush1.msra.mxu1 %v4030_v43  ;;  %4763 = vmatprep.subr.mxu0 %v4619_v34  ;;  %v4115_v43 = vld [vmem:[#allocation12 + $0xb38] sm:$0xff]  ;;  %v4706_v34 = vld [vmem:[#allocation12 + $0x1000] sm:$0xff] }
 0x7eb   : > { %4341 = vmatprep.subr.mxu1 %v4155_v44  ;;  %4764 = vmatpush1.msra.mxu0 %v4618_v47  ;;  %v4114_v44 = vld [vmem:[#allocation12 + $0xb30] sm:$0xff]  ;;  %v4703_v47 = vld [vmem:[#allocation12 + $0xfe8] sm:$0xff] }
 0x7ec   : > { %4342 = vmatpush2.msra.mxu1 %v4154_v23  ;;  %4765 = vmatprep.subr.mxu0 %v4615_v27  ;;  %v4111_v23 = vld [vmem:[#allocation12 + $0xb18] sm:$0xff]  ;;  %v4702_v27 = vld [vmem:[#allocation12 + $0xfe0] sm:$0xff] }
 0x7ed   : > { %4343 = vmatprep.subr.mxu1 %v4151_v29  ;;  %4766 = vmatpush1.msra.mxu0 %v4614_v30  ;;  %v4110_v29 = vld [vmem:[#allocation12 + $0xb10] sm:$0xff]  ;;  %v4699_v30 = vld [vmem:[#allocation12 + $0xfc8] sm:$0xff] }
 0x7ee   : > { %4344 = vmatpush2.msra.mxu1 %v4150_v31  ;;  %4767 = vmatprep.subr.mxu0 %v4611_v2  ;;  %v4107_v31 = vld [vmem:[#allocation12 + $0xaf8] sm:$0xff]  ;;  %v4698_v2 = vld [vmem:[#allocation12 + $0xfc0] sm:$0xff] }
 0x7ef   : > { %4345 = vmatprep.subr.mxu1 %v4147_v3  ;;  %4768 = vmatpush1.msra.mxu0 %v4610_v9  ;;  %v4106_v3 = vld [vmem:[#allocation12 + $0xaf0] sm:$0xff]  ;;  %v4695_v9 = vld [vmem:[#allocation12 + $0xfa8] sm:$0xff] }
 0x7f0   : > { %4346 = vmatpush2.msra.mxu1 %v4146_v10  ;;  %4769 = vmatprep.subr.mxu0 %v4607_v7  ;;  %v4103_v10 = vld [vmem:[#allocation12 + $0xad8] sm:$0xff]  ;;  %v4694_v7 = vld [vmem:[#allocation12 + $0xfa0] sm:$0xff] }
 0x7f1   : > { %4347 = vmatprep.subr.mxu1 %v4143_v40  ;;  %4770 = vmatpush1.msra.mxu0 %v4606_v35  ;;  %v4102_v40 = vld [vmem:[#allocation12 + $0xad0] sm:$0xff]  ;;  %v4691_v35 = vld [vmem:[#allocation12 + $0xf88] sm:$0xff] }
 0x7f2   : > { %4348 = vmatpush2.msra.mxu1 %v4142_v42  ;;  %4771 = vmatprep.subr.mxu0 %v4603_v45  ;;  %v4099_v42 = vld [vmem:[#allocation12 + $0xab8] sm:$0xff]  ;;  %v4690_v45 = vld [vmem:[#allocation12 + $0xf80] sm:$0xff] }
 0x7f3   : > { %4349 = vmatprep.subr.mxu1 %v4139_v48  ;;  %4772 = vmatpush1.msra.mxu0 %v4602_v50  ;;  %v4098_v48 = vld [vmem:[#allocation12 + $0xab0] sm:$0xff]  ;;  %v4687_v50 = vld [vmem:[#allocation12 + $0xf68] sm:$0xff] }
 0x7f4   : > { %4350 = vmatpush2.msra.mxu1 %v4138_v51  ;;  %4773 = vmatprep.subr.mxu0 %v4727_v54  ;;  %v4095_v51 = vld [vmem:[#allocation12 + $0xa98] sm:$0xff]  ;;  %v4686_v54 = vld [vmem:[#allocation12 + $0xf60] sm:$0xff] }
 0x7f5   : > { %4351 = vmatprep.subr.mxu1 %v4135_v52  ;;  %4774 = vmatpush2.msra.mxu0 %v4726_v55  ;;  %v4094_v52 = vld [vmem:[#allocation12 + $0xa90] sm:$0xff]  ;;  %v4683_v55 = vld [vmem:[#allocation12 + $0xf48] sm:$0xff] }
 0x7f6   : > { %4352 = vmatpush2.msra.mxu1 %v4134_v53  ;;  %4775 = vmatprep.subr.mxu0 %v4723_v11  ;;  %v4682_v53 = vld [vmem:[#allocation12 + $0xf40] sm:$0xff]  ;;  %v4679_v11 = vld [vmem:[#allocation12 + $0xf28] sm:$0xff] }
 0x7f7   : > { %4353 = vmatprep.subr.mxu1 %v4131_v13  ;;  %4776 = vmatpush2.msra.mxu0 %v4722_v24  ;;  %v4678_v13 = vld [vmem:[#allocation12 + $0xf20] sm:$0xff]  ;;  %v4675_v24 = vld [vmem:[#allocation12 + $0xf08] sm:$0xff] }
 0x7f8   : > { %4354 = vmatpush2.msra.mxu1 %v4130_v39  ;;  %4777 = vmatprep.subr.mxu0 %v4719_v57  ;;  %v4671_v39 = vld [vmem:[#allocation12 + $0xee8] sm:$0xff]  ;;  %v4670_v57 = vld [vmem:[#allocation12 + $0xee0] sm:$0xff] }
 0x7f9   : > { %4355 = vmatprep.subr.mxu1 %v4127_v60  ;;  %4778 = vmatpush2.msra.mxu0 %v4718_v61  ;;  %v4667_v60 = vld [vmem:[#allocation12 + $0xec8] sm:$0xff]  ;;  %v4666_v61 = vld [vmem:[#allocation12 + $0xec0] sm:$0xff] }
 0x7fa   : > { %4356 = vmatpush2.msra.mxu1 %v4126_v63  ;;  %4779 = vmatprep.subr.mxu0 %v4715_v4  ;;  %v4737_v63 = vld [vmem:[#allocation12 + $0x10f8] sm:$0xff]  ;;  %v4735_v4 = vld [vmem:[#allocation12 + $0x10e8] sm:$0xff] }
 0x7fb   : > { %4357 = vmatprep.subr.mxu1 %v4123_v5  ;;  %4780 = vmatpush2.msra.mxu0 %v4714_v14  ;;  %v4734_v5 = vld [vmem:[#allocation12 + $0x10e0] sm:$0xff]  ;;  %v4731_v14 = vld [vmem:[#allocation12 + $0x10c8] sm:$0xff] }
 0x7fc   : > { %4358 = vmatpush2.msra.mxu1 %v4122_v16  ;;  %4781 = vmatprep.subr.mxu0 %v4711_v8  ;;  %v4730_v16 = vld [vmem:[#allocation12 + $0x10c0] sm:$0xff] }
 0x7fd   : > { %4359 = vmatprep.subr.mxu1 %v4119_v21  ;;  %4782 = vmatpush2.msra.mxu0 %v4710_v37 }
 0x7fe   : > { %4360 = vmatpush2.msra.mxu1 %v4118_v38  ;;  %4783 = vmatprep.subr.mxu0 %v4707_v41 }
 0x7ff   : > { %4361 = vmatprep.subr.mxu1 %v4115_v43  ;;  %4784 = vmatpush2.msra.mxu0 %v4706_v34 }
 0x800   : > { %4362 = vmatpush2.msra.mxu1 %v4114_v44  ;;  %4785 = vmatprep.subr.mxu0 %v4703_v47 }
 0x801   : > { %4363 = vmatprep.subr.mxu1 %v4111_v23  ;;  %4786 = vmatpush2.msra.mxu0 %v4702_v27 }
 0x802   : > { %4364 = vmatpush2.msra.mxu1 %v4110_v29  ;;  %4787 = vmatprep.subr.mxu0 %v4699_v30  ;;  %v4736_v30 = vld [vmem:[#allocation12 + $0x10f0] sm:$0xff] }
 0x803   : > { %4365 = vmatprep.subr.mxu1 %v4107_v31  ;;  %4788 = vmatpush2.msra.mxu0 %v4698_v2  ;;  %v4733_v31 = vld [vmem:[#allocation12 + $0x10d8] sm:$0xff]  ;;  %v4732_v2 = vld [vmem:[#allocation12 + $0x10d0] sm:$0xff] }
 0x804   : > { %4366 = vmatpush2.msra.mxu1 %v4106_v3  ;;  %4789 = vmatprep.subr.mxu0 %v4695_v9 }
 0x805   : > { %4367 = vmatprep.subr.mxu1 %v4103_v10  ;;  %4790 = vmatpush2.msra.mxu0 %v4694_v7  ;;  %v3879_v10 = vadd.f32 %v11943_v1, %v11957_v6  ;;  %v4656_v1 = vld [vmem:[#allocation12 + $0xe70] sm:$0xff]  ;;  %v4653_v6 = vld [vmem:[#allocation12 + $0xe58] sm:$0xff] }
 0x806   : > { %4368 = vmatpush2.msra.mxu1 %v4102_v40  ;;  %4791 = vmatprep.subr.mxu0 %v4691_v35 }
 0x807   : > { %4369 = vmatprep.subr.mxu1 %v4099_v42  ;;  %4792 = vmatpush2.msra.mxu0 %v4690_v45  ;;  %v4664_v42 = vld [vmem:[#allocation12 + $0xeb0] sm:$0xff] }
 0x808   : > { %4370 = vmatpush2.msra.mxu1 %v4098_v48  ;;  %4793 = vmatprep.subr.mxu0 %v4687_v50  ;;  %v4661_v48 = vld [vmem:[#allocation12 + $0xe98] sm:$0xff]  ;;  %v4652_v50 = vld [vmem:[#allocation12 + $0xe50] sm:$0xff] }
 0x809   : > { %4371 = vmatprep.subr.mxu1 %v4095_v51  ;;  %4794 = vmatpush2.msra.mxu0 %v4686_v54  ;;  %v4649_v51 = vld [vmem:[#allocation12 + $0xe38] sm:$0xff] }
 0x80a   : > { %4372 = vmatpush2.msra.mxu1 %v4094_v52  ;;  %4795 = vmatprep.subr.mxu0 %v4683_v55  ;;  %v12013_v54 = vld [vmem:[#allocation10 + $0x20] sm:$0x7f]  ;;  %v4640_v52 = vld [vmem:[#allocation12 + $0xdf0] sm:$0xff] }
 0x80b   : > { %4374 = vmatmul.mubr.f32.vlgmr.msra.gmra.mxu1 %v11945_v46  ;;  %10125 = vmatprep.subr.mxu1 %v11006_v0  ;;  %v4674_v46 = vld [vmem:[#allocation12 + $0xf00] sm:$0xff]  ;;  %v4636_v55 = vld [vmem:[#allocation12 + $0xdd0] sm:$0xff] }
 0x80c   : > { %10126 = vmatpush3.msk.msra.mxu1 %vm2736_vm4, %v11856_v62  ;;  %10131 = vmatprep.mubr.msk.f32.mxu1 %vm11007_vm6, %v11006_v0 }
 0x80d   : > { %10127 = vmatprep.subr.mxu1 %v11006_v0  ;;  %4796 = vmatpush2.msra.mxu0 %v4682_v53  ;;  %v4633_v53 = vld [vmem:[#allocation12 + $0xdb8] sm:$0xff] }
 0x80e   : > { %10128 = vmatpush3.msra.mxu1 %v11861_v12  ;;  %4797 = vmatprep.subr.mxu0 %v4679_v11  ;;  %v4632_v11 = vld [vmem:[#allocation12 + $0xdb0] sm:$0xff] }
 0x80f   : > { %10129 = vmatprep.subr.mxu1 %v11006_v0  ;;  %4798 = vmatpush2.msra.mxu0 %v4678_v13  ;;  %v4629_v13 = vld [vmem:[#allocation12 + $0xd98] sm:$0xff] }
 0x810   : > { %10130 = vmatpush3.msra.mxu1 %v11868_v15  ;;  %4799 = vmatprep.subr.mxu0 %v4675_v24  ;;  %v4628_v24 = vld [vmem:[#allocation12 + $0xd90] sm:$0xff] }
 0x811   : > { %10132 = vmatmul.mubr.msk.f32.vlgmr.msra.gmra.mxu1 %vm2732_vm5, %v11966_v18  ;;  %4800 = vmatpush2.msra.mxu0 %v4674_v46  ;;  %v4665_v18 = vld [vmem:[#allocation12 + $0xeb8] sm:$0xff] }
 0x812   : > { %4801 = vmatprep.subr.mxu0 %v4671_v39  ;;  %4876 = vmatprep.mubr.f32.mxu1 %v11006_v0  ;;  %v4625_v46 = vld [vmem:[#allocation12 + $0xd78] sm:$0xff]  ;;  %v4624_v39 = vld [vmem:[#allocation12 + $0xd70] sm:$0xff] }
 0x813   : > { %4802 = vmatpush2.msra.mxu0 %v4670_v57  ;;  %4840 = vmatprep.subr.mxu1 %v4735_v4  ;;  %v4621_v57 = vld [vmem:[#allocation12 + $0xd58] sm:$0xff] }
 0x814   : > { %4803 = vmatprep.subr.mxu0 %v4667_v60  ;;  %4841 = vmatpush1.msra.mxu1 %v4734_v5  ;;  %v4620_v60 = vld [vmem:[#allocation12 + $0xd50] sm:$0xff]  ;;  %v4613_v4 = vld [vmem:[#allocation12 + $0xd18] sm:$0xff] }
 0x815   : > { %4804 = vmatpush2.msra.mxu0 %v4666_v61  ;;  %4842 = vmatprep.subr.mxu1 %v4731_v14  ;;  %v4617_v61 = vld [vmem:[#allocation12 + $0xd38] sm:$0xff]  ;;  %v4612_v5 = vld [vmem:[#allocation12 + $0xd10] sm:$0xff] }
 0x816   : > { %4982 = vmatprep.subr.mxu0 %v4737_v63  ;;  %4843 = vmatpush1.msra.mxu1 %v4730_v16  ;;  %v4616_v63 = vld [vmem:[#allocation12 + $0xd30] sm:$0xff]  ;;  %v4609_v14 = vld [vmem:[#allocation12 + $0xcf8] sm:$0xff] }
 0x817   : > { %4883 = vmatprep.subr.mxu1 %v4665_v18  ;;  %v4608_v16 = vld [vmem:[#allocation12 + $0xcf0] sm:$0xff]  ;;  %v4605_v18 = vld [vmem:[#allocation12 + $0xcd8] sm:$0xff] }
 0x842   : > { %v4233_v8 = vpop.f32.mrf.mxu0 }
 0x844   : > { %v4235_v21 = vpop.f32.mrf.mxu0 }
 0x88b   : > { %v4304_v37 = vpop.f32.mrf.mxu1  ;;  %v4446_v38 = vpop.f32.mrf.mxu0 }
 0x88c   : > { %v4305_v41 = vadd.f32 %v4304_v37, %v4233_v8  ;;  %v4604_v8 = vld [vmem:[#allocation12 + $0xcd0] sm:$0xff] }
 0x88d   : > { %v4306_v43 = vpop.f32.mrf.mxu1  ;;  %v4448_v47 = vpop.f32.mrf.mxu0  ;;  %v4728_v37 = vld [vmem:[#allocation12 + $0x10b0] sm:$0xff] }
 0x88e   : > { %v11986_v34 = vadd.f32 %v4305_v41, %v11949_v20  ;;  %v4307_v44 = vadd.f32 %v4306_v43, %v4235_v21  ;;  %v4729_v21 = vld [vmem:[#allocation12 + $0x10b8] sm:$0xff]  ;;  %v4724_v41 = vld [vmem:[#allocation12 + $0x1090] sm:$0xff] }
 0x88f   : > { %v4721_v43 = vld [vmem:[#allocation12 + $0x1078] sm:$0xff] }
 0x890   : > { %v11989_v23 = vadd.f32 %v4307_v44, %v11953_v26  ;;  %v3877_v26 = vadd.f32 %v11941_v33, %v11955_v28  ;;  %v4657_v28 = vld [vmem:[#allocation12 + $0xe78] sm:$0xff]  ;;  %v4720_v44 = vld [vmem:[#allocation12 + $0x1070] sm:$0xff] }
 0x892   : > { %v11991_v27 = vpop.f32.mrf.mxu0 }
 0x894   : > { %v4528_v29 = vpop.f32.mrf.mxu0 }
 0x895   : > { %4805 = vmatprep.mubr.f32.mxu0 %v4528_v29 }
 0x896   : > { %4806 = vmatmul.mubr.f32.vlgmr.msra.gmra.mxu0 %v11991_v27 }
 0x897   : > { %4983 = vmatpush1.msra.mxu0 %v4736_v30  ;;  %5018 = vmatprep.mubr.f32.mxu0 %v11006_v0  ;;  %v4713_v30 = vld [vmem:[#allocation12 + $0x1038] sm:$0xff] }
 0x898   : > { %4984 = vmatprep.subr.mxu0 %v4733_v31  ;;  %v4712_v31 = vld [vmem:[#allocation12 + $0x1030] sm:$0xff] }
 0x899   : > { %4985 = vmatpush1.msra.mxu0 %v4732_v2  ;;  %v4709_v2 = vld [vmem:[#allocation12 + $0x1018] sm:$0xff] }
 0x89a   : > { %9977 = vmatprep.subr.msk.mxu0 %vm2736_vm4, %v11825_v58  ;;  %v4660_v58 = vld [vmem:[#allocation12 + $0xe90] sm:$0xff] }
 0x8cb   : > { %v4375_v20 = vpop.f32.mrf.mxu1 }
 0x8cc   : > { %v4447_v3 = vadd.f32 %v4446_v38, %v4375_v20  ;;  %v4725_v38 = vld [vmem:[#allocation12 + $0x1098] sm:$0xff]  ;;  %v4708_v20 = vld [vmem:[#allocation12 + $0x1010] sm:$0xff] }
 0x8cd   : > { %v4377_v9 = vpop.f32.mrf.mxu1 }
 0x8ce   : > { %v12001_v7 = vadd.f32 %v4447_v3, %v3877_v26  ;;  %v4449_v40 = vadd.f32 %v4448_v47, %v4377_v9  ;;  %v4717_v47 = vld [vmem:[#allocation12 + $0x1058] sm:$0xff]  ;;  %v4704_v3 = vld [vmem:[#allocation12 + $0xff0] sm:$0xff] }
 0x8cf   : > { %v4705_v26 = vld [vmem:[#allocation12 + $0xff8] sm:$0xff] }
 0x8d0   : > { %v12003_v35 = vadd.f32 %v4449_v40, %v3879_v10  ;;  %v4701_v9 = vld [vmem:[#allocation12 + $0xfd8] sm:$0xff]  ;;  %v4700_v10 = vld [vmem:[#allocation12 + $0xfd0] sm:$0xff] }
 0x8d1   : > { %v4597_v45 = vpop.f32.mrf.mxu1  ;;  %v4697_v40 = vld [vmem:[#allocation12 + $0xfb8] sm:$0xff] }
 0x8d2   : > { %9975 = vmatmul.mubr.msk.f32.vlgmr.msra.gmra.mxu1 %vm3306_vm7, %v4597_v45  ;;  %9976 = vmatmul.mubr.msk.f32.vlgmr.msra.gmra.mxu0 %vm3306_vm7, %v4597_v45  ;;  %v4693_v45 = vld [vmem:[#allocation12 + $0xf98] sm:$0xff] }
 0x8d3   : > { %4884 = vmatpush1.msra.mxu1 %v4664_v42  ;;  %9978 = vmatpush1.msk.msra.mxu0 %vm2736_vm4, %v11827_v56  ;;  %v10133_v33 = vpop.f32.mrf.mxu1  ;;  %v4648_v56 = vld [vmem:[#allocation12 + $0xe30] sm:$0xff] }
 0x8d4   : > { %4885 = vmatprep.subr.mxu1 %v4661_v48  ;;  %5062 = vmatprep.subr.mxu0 %v11831_v17  ;;  %v4645_v17 = vld [vmem:[#allocation12 + $0xe18] sm:$0xff]  ;;  %v4696_v42 = vld [vmem:[#allocation12 + $0xfb0] sm:$0xff] }
 0x8d5   : > { %4886 = vmatpush1.msra.mxu1 %v4660_v58  ;;  %5063 = vmatpush1.msra.mxu0 %v11837_v19  ;;  %v4644_v19 = vld [vmem:[#allocation12 + $0xe10] sm:$0xff]  ;;  %v4689_v58 = vld [vmem:[#allocation12 + $0xf78] sm:$0xff] }
 0x8d6   : > { %4887 = vmatprep.subr.mxu1 %v4657_v28  ;;  %5064 = vmatprep.subr.mxu0 %v11844_v22  ;;  %v4641_v22 = vld [vmem:[#allocation12 + $0xdf8] sm:$0xff]  ;;  %v4692_v48 = vld [vmem:[#allocation12 + $0xf90] sm:$0xff] }
 0x8d7   : > { %4888 = vmatpush1.msra.mxu1 %v4656_v1  ;;  %5065 = vmatpush1.msra.mxu0 %v11848_v59  ;;  %v4637_v59 = vld [vmem:[#allocation12 + $0xdd8] sm:$0xff]  ;;  %v4688_v33 = vld [vmem:[#allocation12 + $0xf70] sm:$0xff] }
 0x8d8   : > { %4889 = vmatprep.subr.mxu1 %v4653_v6  ;;  %4947 = vmatprep.mubr.f32.mxu1 %v4528_v29  ;;  %v4716_v29 = vld [vmem:[#allocation12 + $0x1050] sm:$0xff]  ;;  %v4685_v28 = vld [vmem:[#allocation12 + $0xf58] sm:$0xff] }
 0x8d9   : > { %4890 = vmatpush1.msra.mxu1 %v4652_v50  ;;  %5098 = vmatprep.mubr.f32.mxu0 %v11006_v0  ;;  %v4684_v1 = vld [vmem:[#allocation12 + $0xf50] sm:$0xff]  ;;  %v4681_v6 = vld [vmem:[#allocation12 + $0xf38] sm:$0xff] }
 0x8da   : > { %4891 = vmatprep.subr.mxu1 %v4649_v51  ;;  %9979 = vmatmul.mubr.msk.f32.vlgmr.msra.gmra.mxu0 %vm2732_vm5, %v12013_v54  ;;  %v4680_v50 = vld [vmem:[#allocation12 + $0xf30] sm:$0xff]  ;;  %v4677_v51 = vld [vmem:[#allocation12 + $0xf18] sm:$0xff] }
 0x8db   : > { %4892 = vmatpush1.msra.mxu1 %v4648_v56  ;;  %v4676_v56 = vld [vmem:[#allocation12 + $0xf10] sm:$0xff] }
 0x8dc   : > { %4893 = vmatprep.subr.mxu1 %v4645_v17  ;;  %v4673_v17 = vld [vmem:[#allocation12 + $0xef8] sm:$0xff] }
 0x8dd   : > { %4894 = vmatpush1.msra.mxu1 %v4644_v19  ;;  %v4672_v19 = vld [vmem:[#allocation12 + $0xef0] sm:$0xff] }
 0x8de   : > { %4895 = vmatprep.subr.mxu1 %v4641_v22  ;;  %v4669_v22 = vld [vmem:[#allocation12 + $0xed8] sm:$0xff] }
 0x8df   : > { %4896 = vmatpush1.msra.mxu1 %v4640_v52  ;;  %v4668_v52 = vld [vmem:[#allocation12 + $0xed0] sm:$0xff] }
 0x8e0   : > { %4897 = vmatprep.subr.mxu1 %v4637_v59  ;;  %v5237_v59 = vld [vmem:[#allocation12 + $0x12e8] sm:$0xff] }
 0x8e1   : > { %4898 = vmatpush1.msra.mxu1 %v4636_v55  ;;  %5315 = vmatprep.subr.mxu0 %v5237_v59  ;;  %v5236_v55 = vld [vmem:[#allocation12 + $0x12e0] sm:$0xff] }
 0x8e2   : > { %4899 = vmatprep.subr.mxu1 %v4633_v53  ;;  %5316 = vmatpush1.msra.mxu0 %v5236_v55  ;;  %v5232_v53 = vld [vmem:[#allocation12 + $0x12c0] sm:$0xff]  ;;  %v5253_v55 = vld [vmem:[#allocation12 + $0x1368] sm:$0xff] }
 0x8e3   : > { %4900 = vmatpush1.msra.mxu1 %v4632_v11  ;;  %v5229_v11 = vld [vmem:[#allocation12 + $0x12a8] sm:$0xff]  ;;  %v5256_v59 = vld [vmem:[#allocation12 + $0x1380] sm:$0xff] }
 0x8e4   : > { %4901 = vmatprep.subr.mxu1 %v4629_v13  ;;  %v5225_v13 = vld [vmem:[#allocation12 + $0x1288] sm:$0xff] }
 0x8e5   : > { %4902 = vmatpush1.msra.mxu1 %v4628_v24  ;;  %v5221_v24 = vld [vmem:[#allocation12 + $0x1268] sm:$0xff] }
 0x8e6   : > { %4903 = vmatprep.subr.mxu1 %v4625_v46  ;;  %v5220_v46 = vld [vmem:[#allocation12 + $0x1260] sm:$0xff] }
 0x8e7   : > { %4904 = vmatpush1.msra.mxu1 %v4624_v39  ;;  %v5216_v39 = vld [vmem:[#allocation12 + $0x1240] sm:$0xff] }
 0x8e8   : > { %4905 = vmatprep.subr.mxu1 %v4621_v57  ;;  %v5213_v57 = vld [vmem:[#allocation12 + $0x1228] sm:$0xff] }
 0x8e9   : > { %4906 = vmatpush1.msra.mxu1 %v4620_v60  ;;  %v5209_v60 = vld [vmem:[#allocation12 + $0x1208] sm:$0xff] }
 0x8ea   : > { %4907 = vmatprep.subr.mxu1 %v4617_v61  ;;  %v5208_v61 = vld [vmem:[#allocation12 + $0x1200] sm:$0xff] }
 0x8eb   : > { %4908 = vmatpush1.msra.mxu1 %v4616_v63  ;;  %v5205_v63 = vld [vmem:[#allocation12 + $0x11e8] sm:$0xff] }
 0x8ec   : > { %4909 = vmatprep.subr.mxu1 %v4613_v4  ;;  %v5204_v4 = vld [vmem:[#allocation12 + $0x11e0] sm:$0xff] }
 0x8ed   : > { %4910 = vmatpush1.msra.mxu1 %v4612_v5  ;;  %v5201_v5 = vld [vmem:[#allocation12 + $0x11c8] sm:$0xff] }
 0x8ee   : > { %4911 = vmatprep.subr.mxu1 %v4609_v14  ;;  %v5200_v14 = vld [vmem:[#allocation12 + $0x11c0] sm:$0xff] }
 0x8ef   : > { %4912 = vmatpush1.msra.mxu1 %v4608_v16  ;;  %v5197_v16 = vld [vmem:[#allocation12 + $0x11a8] sm:$0xff] }
 0x8f0   : > { %4913 = vmatprep.subr.mxu1 %v4605_v18  ;;  %v5196_v18 = vld [vmem:[#allocation12 + $0x11a0] sm:$0xff] }
 0x8f1   : > { %4914 = vmatpush1.msra.mxu1 %v4604_v8  ;;  %v5193_v8 = vld [vmem:[#allocation12 + $0x1188] sm:$0xff] }
 0x8f2   : > { %4915 = vmatprep.subr.mxu1 %v4729_v21  ;;  %v5192_v21 = vld [vmem:[#allocation12 + $0x1180] sm:$0xff] }
 0x8f3   : > { %4916 = vmatpush2.msra.mxu1 %v4728_v37  ;;  %v5189_v37 = vld [vmem:[#allocation12 + $0x1168] sm:$0xff] }
 0x8f4   : > { %4917 = vmatprep.subr.mxu1 %v4725_v38  ;;  %v5188_v38 = vld [vmem:[#allocation12 + $0x1160] sm:$0xff] }
 0x8f5   : > { %4918 = vmatpush2.msra.mxu1 %v4724_v41  ;;  %v5185_v41 = vld [vmem:[#allocation12 + $0x1148] sm:$0xff] }
 0x8f6   : > { %4919 = vmatprep.subr.mxu1 %v4721_v43  ;;  %v5184_v43 = vld [vmem:[#allocation12 + $0x1140] sm:$0xff] }
 0x8f7   : > { %4920 = vmatpush2.msra.mxu1 %v4720_v44  ;;  %v5181_v44 = vld [vmem:[#allocation12 + $0x1128] sm:$0xff] }
 0x8f8   : > { %4921 = vmatprep.subr.mxu1 %v4717_v47  ;;  %v5180_v47 = vld [vmem:[#allocation12 + $0x1120] sm:$0xff] }
 0x8f9   : > { %4922 = vmatpush2.msra.mxu1 %v4716_v29  ;;  %v5177_v29 = vld [vmem:[#allocation12 + $0x1108] sm:$0xff] }
 0x8fa   : > { %4923 = vmatprep.subr.mxu1 %v4713_v30  ;;  %v5176_v30 = vld [vmem:[#allocation12 + $0x1100] sm:$0xff] }
 0x8fb   : > { %4924 = vmatpush2.msra.mxu1 %v4712_v31  ;;  %v5301_v31 = vld [vmem:[#allocation12 + $0x14e8] sm:$0xff] }
 0x8fc   : > { %4925 = vmatprep.subr.mxu1 %v4709_v2  ;;  %v5300_v2 = vld [vmem:[#allocation12 + $0x14e0] sm:$0xff] }
 0x8fd   : > { %4926 = vmatpush2.msra.mxu1 %v4708_v20  ;;  %v5297_v20 = vld [vmem:[#allocation12 + $0x14c8] sm:$0xff] }
 0x8fe   : > { %4927 = vmatprep.subr.mxu1 %v4705_v26  ;;  %v5296_v26 = vld [vmem:[#allocation12 + $0x14c0] sm:$0xff] }
 0x8ff   : > { %4928 = vmatpush2.msra.mxu1 %v4704_v3  ;;  %v5293_v3 = vld [vmem:[#allocation12 + $0x14a8] sm:$0xff] }
 0x900   : > { %4929 = vmatprep.subr.mxu1 %v4701_v9  ;;  %v5292_v9 = vld [vmem:[#allocation12 + $0x14a0] sm:$0xff] }
 0x901   : > { %4930 = vmatpush2.msra.mxu1 %v4700_v10  ;;  %v5289_v10 = vld [vmem:[#allocation12 + $0x1488] sm:$0xff] }
 0x902   : > { %4931 = vmatprep.subr.mxu1 %v4697_v40  ;;  %v5288_v40 = vld [vmem:[#allocation12 + $0x1480] sm:$0xff] }
 0x903   : > { %4932 = vmatpush2.msra.mxu1 %v4696_v42  ;;  %v5285_v42 = vld [vmem:[#allocation12 + $0x1468] sm:$0xff] }
 0x904   : > { %4933 = vmatprep.subr.mxu1 %v4693_v45  ;;  %v5284_v45 = vld [vmem:[#allocation12 + $0x1460] sm:$0xff] }
 0x905   : > { %4934 = vmatpush2.msra.mxu1 %v4692_v48  ;;  %v5281_v48 = vld [vmem:[#allocation12 + $0x1448] sm:$0xff] }
 0x906   : > { %4935 = vmatprep.subr.mxu1 %v4689_v58  ;;  %v5280_v58 = vld [vmem:[#allocation12 + $0x1440] sm:$0xff] }
 0x907   : > { %4936 = vmatpush2.msra.mxu1 %v4688_v33  ;;  %v5277_v33 = vld [vmem:[#allocation12 + $0x1428] sm:$0xff] }
 0x908   : > { %4937 = vmatprep.subr.mxu1 %v4685_v28  ;;  %v5276_v28 = vld [vmem:[#allocation12 + $0x1420] sm:$0xff] }
 0x909   : > { %4938 = vmatpush2.msra.mxu1 %v4684_v1  ;;  %v5273_v1 = vld [vmem:[#allocation12 + $0x1408] sm:$0xff] }
 0x90a   : > { %4939 = vmatprep.subr.mxu1 %v4681_v6  ;;  %v5272_v6 = vld [vmem:[#allocation12 + $0x1400] sm:$0xff] }
 0x90b   : > { %4940 = vmatpush2.msra.mxu1 %v4680_v50  ;;  %v5269_v50 = vld [vmem:[#allocation12 + $0x13e8] sm:$0xff] }
 0x90c   : > { %4941 = vmatprep.subr.mxu1 %v4677_v51  ;;  %v5268_v51 = vld [vmem:[#allocation12 + $0x13e0] sm:$0xff] }
 0x90d   : > { %4942 = vmatpush2.msra.mxu1 %v4676_v56  ;;  %v5265_v56 = vld [vmem:[#allocation12 + $0x13c8] sm:$0xff] }
 0x90e   : > { %4943 = vmatprep.subr.mxu1 %v4673_v17  ;;  %v5264_v17 = vld [vmem:[#allocation12 + $0x13c0] sm:$0xff] }
 0x90f   : > { %4944 = vmatpush2.msra.mxu1 %v4672_v19  ;;  %v5261_v19 = vld [vmem:[#allocation12 + $0x13a8] sm:$0xff] }
 0x910   : > { %4945 = vmatprep.subr.mxu1 %v4669_v22  ;;  %v5260_v22 = vld [vmem:[#allocation12 + $0x13a0] sm:$0xff] }
 0x911   : > { %4946 = vmatpush2.msra.mxu1 %v4668_v52  ;;  %v5257_v52 = vld [vmem:[#allocation12 + $0x1388] sm:$0xff] }
 0x912   : > { %4948 = vmatmul.mubr.f32.vlgmr.msra.gmra.mxu1 %v11991_v27  ;;  %10134 = vmatprep.subr.mxu1 %v11006_v0  ;;  %v5233_v27 = vld [vmem:[#allocation12 + $0x12c8] sm:$0xff] }
 0x913   : > { %10135 = vmatpush3.msk.msra.mxu1 %vm2736_vm4, %v11856_v62  ;;  %10140 = vmatprep.mubr.msk.f32.mxu1 %vm11007_vm6, %v11006_v0  ;;  %v5228_v62 = vld [vmem:[#allocation12 + $0x12a0] sm:$0xff] }
 0x914   : > { %10136 = vmatprep.subr.mxu1 %v11006_v0  ;;  %5317 = vmatprep.subr.mxu0 %v5233_v27  ;;  %v5252_v27 = vld [vmem:[#allocation12 + $0x1360] sm:$0xff] }
 0x915   : > { %10137 = vmatpush3.msra.mxu1 %v11861_v12  ;;  %5318 = vmatpush1.msra.mxu0 %v5232_v53  ;;  %v5224_v12 = vld [vmem:[#allocation12 + $0x1280] sm:$0xff]  ;;  %v5249_v53 = vld [vmem:[#allocation12 + $0x1348] sm:$0xff] }
 0x916   : > { %10138 = vmatprep.subr.mxu1 %v11006_v0  ;;  %5319 = vmatprep.subr.mxu0 %v5229_v11  ;;  %v5248_v11 = vld [vmem:[#allocation12 + $0x1340] sm:$0xff] }
 0x917   : > { %10139 = vmatpush3.msra.mxu1 %v11868_v15  ;;  %5320 = vmatpush1.msra.mxu0 %v5228_v62  ;;  %v5217_v15 = vld [vmem:[#allocation12 + $0x1248] sm:$0xff] }
 0x918   : > { %10141 = vmatmul.mubr.msk.f32.vlgmr.msra.gmra.mxu1 %vm2732_vm5, %v12013_v54  ;;  %5321 = vmatprep.subr.mxu0 %v5225_v13  ;;  %v5212_v54 = vld [vmem:[#allocation12 + $0x1220] sm:$0xff]  ;;  %v5245_v62 = vld [vmem:[#allocation12 + $0x1328] sm:$0xff] }
 0x919   : > { %5450 = vmatprep.mubr.f32.mxu1 %v11006_v0  ;;  %5322 = vmatpush1.msra.mxu0 %v5224_v12  ;;  %v5244_v13 = vld [vmem:[#allocation12 + $0x1320] sm:$0xff]  ;;  %v5241_v12 = vld [vmem:[#allocation12 + $0x1308] sm:$0xff] }
 0x91a   : > { %5323 = vmatprep.subr.mxu0 %v5221_v24  ;;  %v5309_v24 = vld [vmem:[#allocation12 + $0x1528] sm:$0xff] }
 0x91b   : > { %5324 = vmatpush1.msra.mxu0 %v5220_v46  ;;  %v5240_v46 = vld [vmem:[#allocation12 + $0x1300] sm:$0xff]  ;;  %5414 = vmatprep.subr.mxu1 %v5309_v24  ;;  %v5179_v24 = vld [vmem:[#allocation12 + $0x1118] sm:$0xff] }
 0x91c   : > { %5325 = vmatprep.subr.mxu0 %v5217_v15  ;;  %v5308_v15 = vld [vmem:[#allocation12 + $0x1520] sm:$0xff] }
 0x91d   : > { %5326 = vmatpush1.msra.mxu0 %v5216_v39  ;;  %v5311_v39 = vld [vmem:[#allocation12 + $0x1538] sm:$0xff]  ;;  %5415 = vmatpush1.msra.mxu1 %v5308_v15 }
 0x91e   : > { %5327 = vmatprep.subr.mxu0 %v5213_v57  ;;  %v5305_v57 = vld [vmem:[#allocation12 + $0x1508] sm:$0xff]  ;;  %v5303_v15 = vld [vmem:[#allocation12 + $0x14f8] sm:$0xff] }
 0x91f   : > { %5328 = vmatpush1.msra.mxu0 %v5212_v54  ;;  %5416 = vmatprep.subr.mxu1 %v5305_v57  ;;  %v5304_v54 = vld [vmem:[#allocation12 + $0x1500] sm:$0xff]  ;;  %v5299_v57 = vld [vmem:[#allocation12 + $0x14d8] sm:$0xff] }
 0x920   : > { %5329 = vmatprep.subr.mxu0 %v5209_v60  ;;  %5417 = vmatpush1.msra.mxu1 %v5304_v54  ;;  %v5239_v60 = vld [vmem:[#allocation12 + $0x12f8] sm:$0xff]  ;;  %v5298_v54 = vld [vmem:[#allocation12 + $0x14d0] sm:$0xff] }
 0x921   : > { %5330 = vmatpush1.msra.mxu0 %v5208_v61  ;;  %5457 = vmatprep.subr.mxu1 %v5239_v60  ;;  %v5295_v60 = vld [vmem:[#allocation12 + $0x14b8] sm:$0xff] }
 0x922   : > { %5331 = vmatprep.subr.mxu0 %v5205_v63 }
 0x923   : > { %5332 = vmatpush1.msra.mxu0 %v5204_v4 }
 0x924   : > { %5333 = vmatprep.subr.mxu0 %v5201_v5 }
 0x925   : > { %5334 = vmatpush1.msra.mxu0 %v5200_v14 }
 0x926   : > { %5335 = vmatprep.subr.mxu0 %v5197_v16 }
 0x927   : > { %5336 = vmatpush1.msra.mxu0 %v5196_v18 }
 0x928   : > { %5337 = vmatprep.subr.mxu0 %v5193_v8 }
 0x929   : > { %5338 = vmatpush1.msra.mxu0 %v5192_v21 }
 0x92a   : > { %5339 = vmatprep.subr.mxu0 %v5189_v37 }
 0x92b   : > { %5340 = vmatpush1.msra.mxu0 %v5188_v38 }
 0x92c   : > { %5341 = vmatprep.subr.mxu0 %v5185_v41 }
 0x92d   : > { %5342 = vmatpush1.msra.mxu0 %v5184_v43  ;;  %v5310_v43 = vld [vmem:[#allocation12 + $0x1530] sm:$0xff] }
 0x92e   : > { %5343 = vmatprep.subr.mxu0 %v5181_v44  ;;  %v5307_v44 = vld [vmem:[#allocation12 + $0x1518] sm:$0xff] }
 0x92f   : > { %5344 = vmatpush1.msra.mxu0 %v5180_v47  ;;  %v5306_v47 = vld [vmem:[#allocation12 + $0x1510] sm:$0xff] }
 0x930   : > { %5345 = vmatprep.subr.mxu0 %v5177_v29 }
 0x931   : > { %5346 = vmatpush1.msra.mxu0 %v5176_v30 }
 0x932   : > { %5347 = vmatprep.subr.mxu0 %v5301_v31 }
 0x933   : > { %5348 = vmatpush2.msra.mxu0 %v5300_v2 }
 0x934   : > { %5349 = vmatprep.subr.mxu0 %v5297_v20  ;;  %v5238_v20 = vld [vmem:[#allocation12 + $0x12f0] sm:$0xff] }
 0x935   : > { %5350 = vmatpush2.msra.mxu0 %v5296_v26 }
 0x936   : > { %5351 = vmatprep.subr.mxu0 %v5293_v3  ;;  %v5235_v3 = vld [vmem:[#allocation12 + $0x12d8] sm:$0xff] }
 0x937   : > { %5352 = vmatpush2.msra.mxu0 %v5292_v9  ;;  %v5234_v9 = vld [vmem:[#allocation12 + $0x12d0] sm:$0xff] }
 0x938   : > { %5353 = vmatprep.subr.mxu0 %v5289_v10 }
 0x939   : > { %5354 = vmatpush2.msra.mxu0 %v5288_v40  ;;  %v5231_v40 = vld [vmem:[#allocation12 + $0x12b8] sm:$0xff] }
 0x93a   : > { %5355 = vmatprep.subr.mxu0 %v5285_v42  ;;  %v5230_v42 = vld [vmem:[#allocation12 + $0x12b0] sm:$0xff] }
 0x93b   : > { %5356 = vmatpush2.msra.mxu0 %v5284_v45  ;;  %v5223_v45 = vld [vmem:[#allocation12 + $0x1278] sm:$0xff] }
 0x93c   : > { %5357 = vmatprep.subr.mxu0 %v5281_v48  ;;  %v5222_v48 = vld [vmem:[#allocation12 + $0x1270] sm:$0xff] }
 0x93d   : > { %5358 = vmatpush2.msra.mxu0 %v5280_v58  ;;  %v5219_v58 = vld [vmem:[#allocation12 + $0x1258] sm:$0xff] }
 0x93e   : > { %5359 = vmatprep.subr.mxu0 %v5277_v33  ;;  %v5218_v33 = vld [vmem:[#allocation12 + $0x1250] sm:$0xff] }
 0x93f   : > { %5360 = vmatpush2.msra.mxu0 %v5276_v28  ;;  %v5215_v28 = vld [vmem:[#allocation12 + $0x1238] sm:$0xff] }
 0x940   : > { %5361 = vmatprep.subr.mxu0 %v5273_v1  ;;  %v5214_v1 = vld [vmem:[#allocation12 + $0x1230] sm:$0xff] }
 0x941   : > { %5362 = vmatpush2.msra.mxu0 %v5272_v6  ;;  %v5211_v6 = vld [vmem:[#allocation12 + $0x1218] sm:$0xff] }
 0x942   : > { %5363 = vmatprep.subr.mxu0 %v5269_v50  ;;  %v5210_v50 = vld [vmem:[#allocation12 + $0x1210] sm:$0xff] }
 0x943   : > { %5364 = vmatpush2.msra.mxu0 %v5268_v51  ;;  %v5207_v51 = vld [vmem:[#allocation12 + $0x11f8] sm:$0xff] }
 0x944   : > { %5365 = vmatprep.subr.mxu0 %v5265_v56  ;;  %v5206_v56 = vld [vmem:[#allocation12 + $0x11f0] sm:$0xff] }
 0x945   : > { %5366 = vmatpush2.msra.mxu0 %v5264_v17  ;;  %v5203_v17 = vld [vmem:[#allocation12 + $0x11d8] sm:$0xff] }
 0x946   : > { %5367 = vmatprep.subr.mxu0 %v5261_v19  ;;  %v5202_v19 = vld [vmem:[#allocation12 + $0x11d0] sm:$0xff] }
 0x947   : > { %5368 = vmatpush2.msra.mxu0 %v5260_v22  ;;  %v5199_v22 = vld [vmem:[#allocation12 + $0x11b8] sm:$0xff] }
 0x948   : > { %5369 = vmatprep.subr.mxu0 %v5257_v52  ;;  %v5198_v52 = vld [vmem:[#allocation12 + $0x11b0] sm:$0xff] }
 0x949   : > { %5370 = vmatpush2.msra.mxu0 %v5256_v59  ;;  %v5195_v59 = vld [vmem:[#allocation12 + $0x1198] sm:$0xff] }
 0x94a   : > { %5371 = vmatprep.subr.mxu0 %v5253_v55  ;;  %v5194_v55 = vld [vmem:[#allocation12 + $0x1190] sm:$0xff] }
 0x94b   : > { %5372 = vmatpush2.msra.mxu0 %v5252_v27  ;;  %v5191_v27 = vld [vmem:[#allocation12 + $0x1178] sm:$0xff] }
 0x94c   : > { %5373 = vmatprep.subr.mxu0 %v5249_v53  ;;  %v5190_v53 = vld [vmem:[#allocation12 + $0x1170] sm:$0xff] }
 0x94d   : > { %5374 = vmatpush2.msra.mxu0 %v5248_v11  ;;  %v5187_v11 = vld [vmem:[#allocation12 + $0x1158] sm:$0xff] }
 0x94e   : > { %5375 = vmatprep.subr.mxu0 %v5245_v62  ;;  %v5186_v62 = vld [vmem:[#allocation12 + $0x1150] sm:$0xff] }
 0x94f   : > { %5376 = vmatpush2.msra.mxu0 %v5244_v13  ;;  %v5183_v13 = vld [vmem:[#allocation12 + $0x1138] sm:$0xff] }
 0x950   : > { %5377 = vmatprep.subr.mxu0 %v5241_v12  ;;  %v5182_v12 = vld [vmem:[#allocation12 + $0x1130] sm:$0xff] }
 0x951   : > { %5378 = vmatpush2.msra.mxu0 %v5240_v46  ;;  %v5178_v46 = vld [vmem:[#allocation12 + $0x1110] sm:$0xff] }
 0x952   : > { %5556 = vmatprep.subr.mxu0 %v5311_v39  ;;  %v5302_v39 = vld [vmem:[#allocation12 + $0x14f0] sm:$0xff] }
 0x956   : > { %v4807_v61 = vpop.f32.mrf.mxu0 }
 0x958   : > { %v4809_v63 = vpop.f32.mrf.mxu0 }
 0x992   : > { %v4878_v4 = vpop.f32.mrf.mxu1  ;;  %v5020_v14 = vpop.f32.mrf.mxu0 }
 0x993   : > { %v4879_v5 = vadd.f32 %v4878_v4, %v4807_v61  ;;  %v5294_v61 = vld [vmem:[#allocation12 + $0x14b0] sm:$0xff] }
 0x994   : > { %v4880_v16 = vpop.f32.mrf.mxu1  ;;  %v5022_v37 = vpop.f32.mrf.mxu0  ;;  %v5290_v4 = vld [vmem:[#allocation12 + $0x1490] sm:$0xff] }
 0x995   : > { %v12032_v18 = vadd.f32 %v4879_v5, %v11986_v34  ;;  %v4881_v8 = vadd.f32 %v4880_v16, %v4809_v63  ;;  %v5291_v63 = vld [vmem:[#allocation12 + $0x1498] sm:$0xff] }
 0x996   : > { %v5287_v5 = vld [vmem:[#allocation12 + $0x1478] sm:$0xff] }
 0x997   : > { %v12035_v21 = vadd.f32 %v4881_v8, %v11989_v23  ;;  %v5283_v16 = vld [vmem:[#allocation12 + $0x1458] sm:$0xff]  ;;  %v5282_v8 = vld [vmem:[#allocation12 + $0x1450] sm:$0xff] }
 0x99a   : > { %v12037_v38 = vpop.f32.mrf.mxu0 }
 0x99c   : > { %v5102_v41 = vpop.f32.mrf.mxu0 }
 0x99d   : > { %5379 = vmatprep.mubr.f32.mxu0 %v5102_v41 }
 0x99e   : > { %5380 = vmatmul.mubr.f32.vlgmr.msra.gmra.mxu0 %v12037_v38 }
 0x99f   : > { %5557 = vmatpush1.msra.mxu0 %v5310_v43  ;;  %5592 = vmatprep.mubr.f32.mxu0 %v11006_v0  ;;  %v5275_v43 = vld [vmem:[#allocation12 + $0x1418] sm:$0xff] }
 0x9a0   : > { %5558 = vmatprep.subr.mxu0 %v5307_v44  ;;  %v5274_v44 = vld [vmem:[#allocation12 + $0x1410] sm:$0xff] }
 0x9a1   : > { %5559 = vmatpush1.msra.mxu0 %v5306_v47  ;;  %v5271_v47 = vld [vmem:[#allocation12 + $0x13f8] sm:$0xff] }
 0x9d2   : > { %v4949_v34 = vpop.f32.mrf.mxu1 }
 0x9d3   : > { %v5021_v29 = vadd.f32 %v5020_v14, %v4949_v34  ;;  %v5286_v14 = vld [vmem:[#allocation12 + $0x1470] sm:$0xff] }
 0x9d4   : > { %v4951_v30 = vpop.f32.mrf.mxu1  ;;  %v5270_v34 = vld [vmem:[#allocation12 + $0x13f0] sm:$0xff] }
 0x9d5   : > { %v12042_v23 = vadd.f32 %v5021_v29, %v12001_v7  ;;  %v5023_v31 = vadd.f32 %v5022_v37, %v4951_v30  ;;  %v5227_v7 = vld [vmem:[#allocation12 + $0x1298] sm:$0xff]  ;;  %v5266_v30 = vld [vmem:[#allocation12 + $0x13d0] sm:$0xff] }
 0x9d6   : > { %v5279_v37 = vld [vmem:[#allocation12 + $0x1438] sm:$0xff] }
 0x9d7   : > { %v12045_v2 = vadd.f32 %v5023_v31, %v12003_v35  ;;  %v5226_v35 = vld [vmem:[#allocation12 + $0x1290] sm:$0xff]  ;;  %v5267_v29 = vld [vmem:[#allocation12 + $0x13d8] sm:$0xff] }
 0x9d8   : > { %v5171_v26 = vpop.f32.mrf.mxu1  ;;  %v5263_v31 = vld [vmem:[#allocation12 + $0x13b8] sm:$0xff] }
 0x9d9   : > { %9982 = vmatmul.mubr.msk.f32.vlgmr.msra.gmra.mxu1 %vm3306_vm7, %v5171_v26  ;;  %9983 = vmatmul.mubr.msk.f32.vlgmr.msra.gmra.mxu0 %vm3306_vm7, %v5171_v26  ;;  %v5259_v26 = vld [vmem:[#allocation12 + $0x1398] sm:$0xff] }
 0x9da   : > { %5458 = vmatpush1.msra.mxu1 %v5238_v20  ;;  %v10142_v10 = vpop.f32.mrf.mxu1  ;;  %5521 = vmatprep.mubr.f32.mxu1 %v5102_v41  ;;  %v5278_v41 = vld [vmem:[#allocation12 + $0x1430] sm:$0xff] }
 0x9db   : > { %5459 = vmatprep.subr.mxu1 %v5235_v3  ;;  %5715 = vmatprep.mubr.f32.mxu0 %v11006_v0  ;;  %v5262_v20 = vld [vmem:[#allocation12 + $0x13b0] sm:$0xff] }
 0x9dc   : > { %5460 = vmatpush1.msra.mxu1 %v5234_v9  ;;  %v5258_v3 = vld [vmem:[#allocation12 + $0x1390] sm:$0xff]  ;;  %v5255_v9 = vld [vmem:[#allocation12 + $0x1378] sm:$0xff] }
 0x9dd   : > { %5461 = vmatprep.subr.mxu1 %v5231_v40  ;;  %v5254_v10 = vld [vmem:[#allocation12 + $0x1370] sm:$0xff]  ;;  %v5251_v40 = vld [vmem:[#allocation12 + $0x1358] sm:$0xff] }
 0x9de   : > { %5462 = vmatpush1.msra.mxu1 %v5230_v42  ;;  %v5250_v42 = vld [vmem:[#allocation12 + $0x1350] sm:$0xff] }
 0x9df   : > { %5463 = vmatprep.subr.mxu1 %v5227_v7  ;;  %v5247_v7 = vld [vmem:[#allocation12 + $0x1338] sm:$0xff] }
 0x9e0   : > { %5464 = vmatpush1.msra.mxu1 %v5226_v35  ;;  %v5246_v35 = vld [vmem:[#allocation12 + $0x1330] sm:$0xff] }
 0x9e1   : > { %5465 = vmatprep.subr.mxu1 %v5223_v45  ;;  %v5243_v45 = vld [vmem:[#allocation12 + $0x1318] sm:$0xff] }
 0x9e2   : > { %5466 = vmatpush1.msra.mxu1 %v5222_v48  ;;  %v5242_v48 = vld [vmem:[#allocation12 + $0x1310] sm:$0xff] }
 0x9e3   : > { %5467 = vmatprep.subr.mxu1 %v5219_v58 }
 0x9e4   : > { %5468 = vmatpush1.msra.mxu1 %v5218_v33  ;;  %v12052_v33 = vld [vmem:[#allocation13] sm:$0xf] }
 0x9e5   : > { %5469 = vmatprep.subr.mxu1 %v5215_v28 }
 0x9e6   : > { %5470 = vmatpush1.msra.mxu1 %v5214_v1 }
 0x9e7   : > { %5471 = vmatprep.subr.mxu1 %v5211_v6 }
 0x9e8   : > { %5472 = vmatpush1.msra.mxu1 %v5210_v50  ;;  %v5608_v50 = vrot.slane %v12052_v33, %v11814_v32 }
 0x9e9   : > { %5473 = vmatprep.subr.mxu1 %v5207_v51 }
 0x9ea   : > { %5474 = vmatpush1.msra.mxu1 %v5206_v56 }
 0x9eb   : > { %5475 = vmatprep.subr.mxu1 %v5203_v17 }
 0x9ec   : > { %5476 = vmatpush1.msra.mxu1 %v5202_v19  ;;  %v5612_v19 = vrot.slane %v12052_v33, %v11817_v36 }
 0x9ed   : > { %5477 = vmatprep.subr.mxu1 %v5199_v22 }
 0x9ee   : > { %5478 = vmatpush1.msra.mxu1 %v5198_v52 }
 0x9ef   : > { %5479 = vmatprep.subr.mxu1 %v5195_v59 }
 0x9f0   : > { %5480 = vmatpush1.msra.mxu1 %v5194_v55 }
 0x9f1   : > { %5481 = vmatprep.subr.mxu1 %v5191_v27  ;;  %v12064_v27 = vld [vmem:[#allocation15] sm:$0x3] }
 0x9f2   : > { %5482 = vmatpush1.msra.mxu1 %v5190_v53  ;;  %v6225_v53 = vld [vmem:[#allocation16 + $0x8e0] sm:$0xff] }
 0x9f3   : > { %5483 = vmatprep.subr.mxu1 %v5187_v11  ;;  %v6222_v11 = vld [vmem:[#allocation16 + $0x8c8] sm:$0xff] }
 0x9f4   : > { %5484 = vmatpush1.msra.mxu1 %v5186_v62  ;;  %v6221_v62 = vld [vmem:[#allocation16 + $0x8c0] sm:$0xff] }
 0x9f5   : > { %5485 = vmatprep.subr.mxu1 %v5183_v13  ;;  %v6218_v13 = vld [vmem:[#allocation16 + $0x8a8] sm:$0xff] }
 0x9f6   : > { %5486 = vmatpush1.msra.mxu1 %v5182_v12  ;;  %v6217_v12 = vld [vmem:[#allocation16 + $0x8a0] sm:$0xff] }
 0x9f7   : > { %5487 = vmatprep.subr.mxu1 %v5179_v24  ;;  %v6214_v24 = vld [vmem:[#allocation16 + $0x888] sm:$0xff] }
 0x9f8   : > { %5488 = vmatpush1.msra.mxu1 %v5178_v46  ;;  %v6213_v46 = vld [vmem:[#allocation16 + $0x880] sm:$0xff] }
 0x9f9   : > { %5489 = vmatprep.subr.mxu1 %v5303_v15  ;;  %v6210_v15 = vld [vmem:[#allocation16 + $0x868] sm:$0xff] }
 0x9fa   : > { %5490 = vmatpush2.msra.mxu1 %v5302_v39  ;;  %v6209_v39 = vld [vmem:[#allocation16 + $0x860] sm:$0xff] }
 0x9fb   : > { %5491 = vmatprep.subr.mxu1 %v5299_v57  ;;  %v6206_v57 = vld [vmem:[#allocation16 + $0x848] sm:$0xff] }
 0x9fc   : > { %5492 = vmatpush2.msra.mxu1 %v5298_v54  ;;  %v6205_v54 = vld [vmem:[#allocation16 + $0x840] sm:$0xff] }
 0x9fd   : > { %5493 = vmatprep.subr.mxu1 %v5295_v60  ;;  %v6202_v60 = vld [vmem:[#allocation16 + $0x828] sm:$0xff] }
 0x9fe   : > { %5494 = vmatpush2.msra.mxu1 %v5294_v61  ;;  %v6201_v61 = vld [vmem:[#allocation16 + $0x820] sm:$0xff] }
 0x9ff   : > { %5495 = vmatprep.subr.mxu1 %v5291_v63  ;;  %v6198_v63 = vld [vmem:[#allocation16 + $0x808] sm:$0xff] }
 0xa00   : > { %5496 = vmatpush2.msra.mxu1 %v5290_v4  ;;  %v6197_v4 = vld [vmem:[#allocation16 + $0x800] sm:$0xff] }
 0xa01   : > { %5497 = vmatprep.subr.mxu1 %v5287_v5  ;;  %v6194_v5 = vld [vmem:[#allocation16 + $0x7e8] sm:$0xff] }
 0xa02   : > { %5498 = vmatpush2.msra.mxu1 %v5286_v14  ;;  %v6193_v14 = vld [vmem:[#allocation16 + $0x7e0] sm:$0xff] }
 0xa03   : > { %5499 = vmatprep.subr.mxu1 %v5283_v16  ;;  %v6190_v16 = vld [vmem:[#allocation16 + $0x7c8] sm:$0xff] }
 0xa04   : > { %5500 = vmatpush2.msra.mxu1 %v5282_v8  ;;  %v6189_v8 = vld [vmem:[#allocation16 + $0x7c0] sm:$0xff] }
 0xa05   : > { %5501 = vmatprep.subr.mxu1 %v5279_v37  ;;  %v6186_v37 = vld [vmem:[#allocation16 + $0x7a8] sm:$0xff] }
 0xa06   : > { %5502 = vmatpush2.msra.mxu1 %v5278_v41  ;;  %v6185_v41 = vld [vmem:[#allocation16 + $0x7a0] sm:$0xff] }
 0xa07   : > { %5503 = vmatprep.subr.mxu1 %v5275_v43  ;;  %v6182_v43 = vld [vmem:[#allocation16 + $0x788] sm:$0xff] }
 0xa08   : > { %5504 = vmatpush2.msra.mxu1 %v5274_v44  ;;  %v6181_v44 = vld [vmem:[#allocation16 + $0x780] sm:$0xff] }
 0xa09   : > { %5505 = vmatprep.subr.mxu1 %v5271_v47  ;;  %v6178_v47 = vld [vmem:[#allocation16 + $0x768] sm:$0xff] }
 0xa0a   : > { %5506 = vmatpush2.msra.mxu1 %v5270_v34  ;;  %v6177_v34 = vld [vmem:[#allocation16 + $0x760] sm:$0xff] }
 0xa0b   : > { %5507 = vmatprep.subr.mxu1 %v5267_v29  ;;  %v6174_v29 = vld [vmem:[#allocation16 + $0x748] sm:$0xff] }
 0xa0c   : > { %5508 = vmatpush2.msra.mxu1 %v5266_v30  ;;  %v6173_v30 = vld [vmem:[#allocation16 + $0x740] sm:$0xff] }
 0xa0d   : > { %5509 = vmatprep.subr.mxu1 %v5263_v31  ;;  %v6170_v31 = vld [vmem:[#allocation16 + $0x728] sm:$0xff] }
 0xa0e   : > { %5510 = vmatpush2.msra.mxu1 %v5262_v20  ;;  %v6169_v20 = vld [vmem:[#allocation16 + $0x720] sm:$0xff] }
 0xa0f   : > { %5511 = vmatprep.subr.mxu1 %v5259_v26  ;;  %v6166_v26 = vld [vmem:[#allocation16 + $0x708] sm:$0xff] }
 0xa10   : > { %5512 = vmatpush2.msra.mxu1 %v5258_v3  ;;  %v6165_v3 = vld [vmem:[#allocation16 + $0x700] sm:$0xff] }
 0xa11   : > { %5513 = vmatprep.subr.mxu1 %v5255_v9  ;;  %v6290_v9 = vld [vmem:[#allocation16 + $0xae8] sm:$0xff] }
 0xa12   : > { %5514 = vmatpush2.msra.mxu1 %v5254_v10  ;;  %v6289_v10 = vld [vmem:[#allocation16 + $0xae0] sm:$0xff] }
 0xa13   : > { %5515 = vmatprep.subr.mxu1 %v5251_v40  ;;  %v6286_v40 = vld [vmem:[#allocation16 + $0xac8] sm:$0xff] }
 0xa14   : > { %5516 = vmatpush2.msra.mxu1 %v5250_v42  ;;  %v6285_v42 = vld [vmem:[#allocation16 + $0xac0] sm:$0xff] }
 0xa15   : > { %5517 = vmatprep.subr.mxu1 %v5247_v7  ;;  %v6282_v7 = vld [vmem:[#allocation16 + $0xaa8] sm:$0xff] }
 0xa16   : > { %5518 = vmatpush2.msra.mxu1 %v5246_v35  ;;  %v6281_v35 = vld [vmem:[#allocation16 + $0xaa0] sm:$0xff] }
 0xa17   : > { %5519 = vmatprep.subr.mxu1 %v5243_v45  ;;  %v6278_v45 = vld [vmem:[#allocation16 + $0xa88] sm:$0xff] }
 0xa18   : > { %5520 = vmatpush2.msra.mxu1 %v5242_v48  ;;  %v6277_v48 = vld [vmem:[#allocation16 + $0xa80] sm:$0xff] }
 0xa19   : > { %5522 = vmatmul.mubr.f32.vlgmr.msra.gmra.mxu1 %v12037_v38 }
 0xa1a   : > { %5786 = vmatprep.mubr.f32.mxu1 %v11006_v0 }
 0xa5e   : > { %v5381_v58 = vpop.f32.mrf.mxu0 }
 0xa60   : > { %v5383_v6 = vpop.f32.mrf.mxu0 }
 0xa99   : > { %v5452_v28 = vpop.f32.mrf.mxu1 }
 0xa9a   : > { %v5453_v1 = vadd.f32 %v5452_v28, %v5381_v58  ;;  %v6274_v58 = vld [vmem:[#allocation16 + $0xa68] sm:$0xff]  ;;  %v6273_v28 = vld [vmem:[#allocation16 + $0xa60] sm:$0xff] }
 0xa9b   : > { %v5454_v51 = vpop.f32.mrf.mxu1 }
 0xa9c   : > { %v5599_v56 = vadd.f32 %v5453_v1, %v12032_v18  ;;  %v5455_v17 = vadd.f32 %v5454_v51, %v5383_v6  ;;  %v6226_v18 = vld [vmem:[#allocation16 + $0x8e8] sm:$0xff]  ;;  %v6269_v6 = vld [vmem:[#allocation16 + $0xa40] sm:$0xff] }
 0xa9d   : > { %v6270_v1 = vld [vmem:[#allocation16 + $0xa48] sm:$0xff]  ;;  %v6265_v51 = vld [vmem:[#allocation16 + $0xa20] sm:$0xff] }
 0xa9e   : > { %v5600_v38 = vadd.f32 %v5455_v17, %v12035_v21  ;;  %v5625_v22 = vadd.f32 %v5608_v50, %v5599_v56  ;;  %v12077_v21 = vld [vmem:[#allocation15 + $0x2] sm:$0x3]  ;;  %v6266_v50 = vld [vmem:[#allocation16 + $0xa28] sm:$0xff]  ;;  %v6261_v17 = vld [vmem:[#allocation16 + $0xa00] sm:$0xff] }
 0xa9f   : > { %v6262_v56 = vld [vmem:[#allocation16 + $0xa08] sm:$0xff] }
 0xaa0   : > { %v5626_v52 = vadd.f32 %v5612_v19, %v5600_v38  ;;  %v12062_v55 = vmax.f32 %v5625_v22, 0.0  ;;  %v5594_v19 = vpop.f32.mrf.mxu0  ;;  %v6258_v38 = vld [vmem:[#allocation16 + $0x9e8] sm:$0xff]  ;;  %v5619_v22 = vsub.s32 3, %v11811_v25  ;;  %v9407_v25 = vld [vmem:[%s12541_s23 + $0x30] sm:$0xff] }
 0xaa2   : > { %v12060_v59 = vmax.f32 %v5626_v52, 0.0  ;;  %v6257_v52 = vld [vmem:[#allocation16 + $0x9e0] sm:$0xff] }
 0xaa4   : > { %9984 = vmatprep.subr.msk.mxu0 %vm5638_vm8, %v12060_v59 }
 0xaa5   : > { %9985 = vmatpush1.msk.msra.mxu0 %vm5638_vm8, %v12062_v55 }
 0xaa6   : > { %9990 = vmatprep.subr.msk.mxu0 %vm5638_vm8, %v12060_v59  ;;  %9986 = vmatmul.mubr.msk.f32.vlgmr.msra.gmra.mxu0 %vm5634_vm9, %v12064_v27 }
 0xaa7   : > { %9991 = vmatpush1.msk.msra.mxu0 %vm5638_vm8, %v12062_v55  ;;  %6086 = vmatprep.mubr.f32.mxu0 %v11006_v0 }
 0xaa8   : > { %6393 = vmatprep.subr.mxu0 %v6226_v18 }
 0xaaa   : > { %9992 = vmatmul.mubr.msk.f32.vlgmr.msra.gmra.mxu0 %vm5634_vm9, %v12077_v21 }
 0xaab   : > { %6394 = vmatpush1.msra.mxu0 %v6225_v53  ;;  %v6254_v53 = vld [vmem:[#allocation16 + $0x9c8] sm:$0xff] }
 0xaac   : > { %6395 = vmatprep.subr.mxu0 %v6222_v11 }
 0xaad   : > { %6396 = vmatpush1.msra.mxu0 %v6221_v62  ;;  %v6253_v62 = vld [vmem:[#allocation16 + $0x9c0] sm:$0xff] }
 0xaae   : > { %6397 = vmatprep.subr.mxu0 %v6218_v13  ;;  %v5596_v13 = vpop.f32.mrf.mxu0 }
 0xaaf   : > { %6398 = vmatpush1.msra.mxu0 %v6217_v12  ;;  %v5616_v12 = vrot.slane %v12052_v33, %v11823_v49 }
 0xab0   : > { %6399 = vmatprep.subr.mxu0 %v6214_v24 }
 0xab1   : > { %6400 = vmatpush1.msra.mxu0 %v6213_v46  ;;  %v6250_v46 = vld [vmem:[#allocation16 + $0x9a8] sm:$0xff] }
 0xab2   : > { %6401 = vmatprep.subr.mxu0 %v6210_v15 }
 0xab3   : > { %6402 = vmatpush1.msra.mxu0 %v6209_v39 }
 0xab4   : > { %6403 = vmatprep.subr.mxu0 %v6206_v57  ;;  %v5620_v57 = vrot.slane %v12052_v33, %v5619_v22  ;;  %v6238_v33 = vld [vmem:[#allocation16 + $0x948] sm:$0xff] }
 0xab5   : > { %6404 = vmatpush1.msra.mxu0 %v6205_v54  ;;  %v6249_v54 = vld [vmem:[#allocation16 + $0x9a0] sm:$0xff] }
 0xab6   : > { %6405 = vmatprep.subr.mxu0 %v6202_v60  ;;  %v6246_v60 = vld [vmem:[#allocation16 + $0x988] sm:$0xff] }
 0xab7   : > { %6406 = vmatpush1.msra.mxu0 %v6201_v61 }
 0xab8   : > { %6407 = vmatprep.subr.mxu0 %v6198_v63  ;;  %v6245_v63 = vld [vmem:[#allocation16 + $0x980] sm:$0xff] }
 0xab9   : > { %6408 = vmatpush1.msra.mxu0 %v6197_v4 }
 0xaba   : > { %6409 = vmatprep.subr.mxu0 %v6194_v5  ;;  %v6242_v5 = vld [vmem:[#allocation16 + $0x968] sm:$0xff] }
 0xabb   : > { %6410 = vmatpush1.msra.mxu0 %v6193_v14 }
 0xabc   : > { %6411 = vmatprep.subr.mxu0 %v6190_v16 }
 0xabd   : > { %6412 = vmatpush1.msra.mxu0 %v6189_v8  ;;  %v6237_v8 = vld [vmem:[#allocation16 + $0x940] sm:$0xff] }
 0xabe   : > { %6413 = vmatprep.subr.mxu0 %v6186_v37  ;;  %v6234_v37 = vld [vmem:[#allocation16 + $0x928] sm:$0xff] }
 0xabf   : > { %6414 = vmatpush1.msra.mxu0 %v6185_v41  ;;  %v6233_v41 = vld [vmem:[#allocation16 + $0x920] sm:$0xff] }
 0xac0   : > { %6415 = vmatprep.subr.mxu0 %v6182_v43  ;;  %v6229_v43 = vld [vmem:[#allocation16 + $0x900] sm:$0xff] }
 0xac1   : > { %6416 = vmatpush1.msra.mxu0 %v6181_v44  ;;  %v6354_v44 = vld [vmem:[#allocation16 + $0xce8] sm:$0xff] }
 0xac2   : > { %6417 = vmatprep.subr.mxu0 %v6178_v47  ;;  %v6356_v47 = vld [vmem:[#allocation16 + $0xcf8] sm:$0xff] }
 0xac3   : > { %6418 = vmatpush1.msra.mxu0 %v6177_v34  ;;  %v6353_v34 = vld [vmem:[#allocation16 + $0xce0] sm:$0xff] }
 0xac4   : > { %6419 = vmatprep.subr.mxu0 %v6174_v29  ;;  %v6350_v29 = vld [vmem:[#allocation16 + $0xcc8] sm:$0xff] }
 0xac5   : > { %6420 = vmatpush1.msra.mxu0 %v6173_v30  ;;  %v6349_v30 = vld [vmem:[#allocation16 + $0xcc0] sm:$0xff] }
 0xac6   : > { %6421 = vmatprep.subr.mxu0 %v6170_v31  ;;  %v6346_v31 = vld [vmem:[#allocation16 + $0xca8] sm:$0xff] }
 0xac7   : > { %6422 = vmatpush1.msra.mxu0 %v6169_v20  ;;  %v6342_v20 = vld [vmem:[#allocation16 + $0xc88] sm:$0xff] }
 0xac8   : > { %6423 = vmatprep.subr.mxu0 %v6166_v26  ;;  %v6341_v26 = vld [vmem:[#allocation16 + $0xc80] sm:$0xff] }
 0xac9   : > { %6424 = vmatpush1.msra.mxu0 %v6165_v3  ;;  %v6338_v3 = vld [vmem:[#allocation16 + $0xc68] sm:$0xff] }
 0xaca   : > { %6425 = vmatprep.subr.mxu0 %v6290_v9  ;;  %v6337_v9 = vld [vmem:[#allocation16 + $0xc60] sm:$0xff] }
 0xacb   : > { %6426 = vmatpush2.msra.mxu0 %v6289_v10  ;;  %v6334_v10 = vld [vmem:[#allocation16 + $0xc48] sm:$0xff] }
 0xacc   : > { %6427 = vmatprep.subr.mxu0 %v6286_v40  ;;  %v6333_v40 = vld [vmem:[#allocation16 + $0xc40] sm:$0xff] }
 0xacd   : > { %6428 = vmatpush2.msra.mxu0 %v6285_v42  ;;  %v6330_v42 = vld [vmem:[#allocation16 + $0xc28] sm:$0xff] }
 0xace   : > { %6429 = vmatprep.subr.mxu0 %v6282_v7  ;;  %v6329_v7 = vld [vmem:[#allocation16 + $0xc20] sm:$0xff] }
 0xacf   : > { %6430 = vmatpush2.msra.mxu0 %v6281_v35  ;;  %v6326_v35 = vld [vmem:[#allocation16 + $0xc08] sm:$0xff] }
 0xad0   : > { %6431 = vmatprep.subr.mxu0 %v6278_v45  ;;  %v6325_v45 = vld [vmem:[#allocation16 + $0xc00] sm:$0xff] }
 0xad1   : > { %6432 = vmatpush2.msra.mxu0 %v6277_v48  ;;  %v6322_v48 = vld [vmem:[#allocation16 + $0xbe8] sm:$0xff] }
 0xad2   : > { %6433 = vmatprep.subr.mxu0 %v6274_v58  ;;  %v6321_v58 = vld [vmem:[#allocation16 + $0xbe0] sm:$0xff] }
 0xad3   : > { %6434 = vmatpush2.msra.mxu0 %v6273_v28  ;;  %v6318_v28 = vld [vmem:[#allocation16 + $0xbc8] sm:$0xff] }
 0xad4   : > { %6435 = vmatprep.subr.mxu0 %v6270_v1  ;;  %v6317_v1 = vld [vmem:[#allocation16 + $0xbc0] sm:$0xff] }
 0xad5   : > { %6436 = vmatpush2.msra.mxu0 %v6269_v6  ;;  %v6314_v6 = vld [vmem:[#allocation16 + $0xba8] sm:$0xff] }
 0xad6   : > { %6437 = vmatprep.subr.mxu0 %v6266_v50  ;;  %v6313_v50 = vld [vmem:[#allocation16 + $0xba0] sm:$0xff] }
 0xad7   : > { %6438 = vmatpush2.msra.mxu0 %v6265_v51  ;;  %v6310_v51 = vld [vmem:[#allocation16 + $0xb88] sm:$0xff] }
 0xad8   : > { %6439 = vmatprep.subr.mxu0 %v6262_v56  ;;  %v6309_v56 = vld [vmem:[#allocation16 + $0xb80] sm:$0xff] }
 0xad9   : > { %v5523_v18 = vpop.f32.mrf.mxu1  ;;  %6440 = vmatpush2.msra.mxu0 %v6261_v17  ;;  %v6306_v17 = vld [vmem:[#allocation16 + $0xb68] sm:$0xff] }
 0xada   : > { %v5595_v11 = vadd.f32 %v5594_v19, %v5523_v18  ;;  %6441 = vmatprep.subr.mxu0 %v6258_v38  ;;  %v6305_v19 = vld [vmem:[#allocation16 + $0xb60] sm:$0xff]  ;;  %v6302_v38 = vld [vmem:[#allocation16 + $0xb48] sm:$0xff] }
 0xadb   : > { %v5525_v24 = vpop.f32.mrf.mxu1  ;;  %6442 = vmatpush2.msra.mxu0 %v6257_v52  ;;  %v6301_v52 = vld [vmem:[#allocation16 + $0xb40] sm:$0xff]  ;;  %v6298_v18 = vld [vmem:[#allocation16 + $0xb28] sm:$0xff] }
 0xadc   : > { %v5601_v15 = vadd.f32 %v5595_v11, %v12042_v23  ;;  %v5597_v39 = vadd.f32 %v5596_v13, %v5525_v24  ;;  %6443 = vmatprep.subr.mxu0 %v6254_v53  ;;  %v6297_v53 = vld [vmem:[#allocation16 + $0xb20] sm:$0xff]  ;;  %v6294_v11 = vld [vmem:[#allocation16 + $0xb08] sm:$0xff] }
 0xadd   : > { %6444 = vmatpush2.msra.mxu0 %v6253_v62  ;;  %v6293_v62 = vld [vmem:[#allocation16 + $0xb00] sm:$0xff]  ;;  %v6386_v13 = vld [vmem:[#allocation16 + $0xde8] sm:$0xff] }
 0xade   : > { %v5602_v61 = vadd.f32 %v5597_v39, %v12045_v2  ;;  %6445 = vmatprep.subr.mxu0 %v6250_v46  ;;  %v5627_v4 = vadd.f32 %v5616_v12, %v5601_v15  ;;  %v6241_v2 = vld [vmem:[#allocation16 + $0x960] sm:$0xff]  ;;  %v6382_v24 = vld [vmem:[#allocation16 + $0xdc8] sm:$0xff] }
 0xadf   : > { %6446 = vmatpush2.msra.mxu0 %v6249_v54  ;;  %v6385_v12 = vld [vmem:[#allocation16 + $0xde0] sm:$0xff]  ;;  %v6378_v15 = vld [vmem:[#allocation16 + $0xda8] sm:$0xff] }
 0xae0   : > { %v5628_v14 = vadd.f32 %v5620_v57, %v5602_v61  ;;  %6447 = vmatprep.subr.mxu0 %v6246_v60  ;;  %v12091_v16 = vmax.f32 %v5627_v4, 0.0  ;;  %v6381_v46 = vld [vmem:[#allocation16 + $0xdc0] sm:$0xff]  ;;  %v6374_v57 = vld [vmem:[#allocation16 + $0xd88] sm:$0xff] }
 0xae1   : > { %6448 = vmatpush2.msra.mxu0 %v6245_v63  ;;  %v6377_v39 = vld [vmem:[#allocation16 + $0xda0] sm:$0xff]  ;;  %v6370_v60 = vld [vmem:[#allocation16 + $0xd68] sm:$0xff] }
 0xae2   : > { %v12089_v23 = vmax.f32 %v5628_v14, 0.0  ;;  %6449 = vmatprep.subr.mxu0 %v6242_v5  ;;  %v6373_v54 = vld [vmem:[#allocation16 + $0xd80] sm:$0xff]  ;;  %v6366_v63 = vld [vmem:[#allocation16 + $0xd48] sm:$0xff] }
 0xae3   : > { %6450 = vmatpush2.msra.mxu0 %v6241_v2  ;;  %v6369_v61 = vld [vmem:[#allocation16 + $0xd60] sm:$0xff]  ;;  %v6362_v5 = vld [vmem:[#allocation16 + $0xd28] sm:$0xff] }
 0xae4   : > { %9987 = vmatprep.subr.msk.mxu1 %vm5638_vm8, %v12089_v23  ;;  %6451 = vmatprep.subr.mxu0 %v6238_v33  ;;  %v6365_v4 = vld [vmem:[#allocation16 + $0xd40] sm:$0xff]  ;;  %v6358_v2 = vld [vmem:[#allocation16 + $0xd08] sm:$0xff] }
 0xae5   : > { %9988 = vmatpush1.msk.msra.mxu1 %vm5638_vm8, %v12091_v16  ;;  %6452 = vmatpush2.msra.mxu0 %v6237_v8  ;;  %v6361_v14 = vld [vmem:[#allocation16 + $0xd20] sm:$0xff]  ;;  %v6228_v8 = vld [vmem:[#allocation16 + $0x8f8] sm:$0xff] }
 0xae6   : > { %9989 = vmatmul.mubr.msk.f32.vlgmr.msra.gmra.mxu1 %vm5634_vm9, %v12064_v27  ;;  %9993 = vmatprep.subr.msk.mxu1 %vm5638_vm8, %v12089_v23  ;;  %v6230_v27 = vld [vmem:[#allocation16 + $0x908] sm:$0xff]  ;;  %v6357_v33 = vld [vmem:[#allocation16 + $0xd00] sm:$0xff] }
 0xae7   : > { %9994 = vmatpush1.msk.msra.mxu1 %vm5638_vm8, %v12091_v16  ;;  %6157 = vmatprep.mubr.f32.mxu1 %v11006_v0 }
 0xae8   : > { %6453 = vmatprep.subr.mxu0 %v6234_v37  ;;  %6464 = vmatprep.subr.mxu1 %v6354_v44  ;;  %v6355_v44 = vld [vmem:[#allocation16 + $0xcf0] sm:$0xff] }
 0xae9   : > { %6454 = vmatpush2.msra.mxu0 %v6233_v41 }
 0xaea   : > { %9995 = vmatmul.mubr.msk.f32.vlgmr.msra.gmra.mxu1 %vm5634_vm9, %v12077_v21  ;;  %6455 = vmatprep.subr.mxu0 %v6230_v27  ;;  %v6345_v21 = vld [vmem:[#allocation16 + $0xca0] sm:$0xff] }
 0xaeb   : > { %6456 = vmatpush2.msra.mxu0 %v6229_v43  ;;  %6465 = vmatpush1.msra.mxu1 %v6353_v34  ;;  %v6351_v34 = vld [vmem:[#allocation16 + $0xcd0] sm:$0xff] }
 0xaec   : > { %6606 = vmatprep.subr.mxu0 %v6356_v47  ;;  %6466 = vmatprep.subr.mxu1 %v6350_v29  ;;  %v6352_v47 = vld [vmem:[#allocation16 + $0xcd8] sm:$0xff] }
 0xaed   : > { %6467 = vmatpush1.msra.mxu1 %v6349_v30  ;;  %v6348_v29 = vld [vmem:[#allocation16 + $0xcb8] sm:$0xff]  ;;  %v6347_v30 = vld [vmem:[#allocation16 + $0xcb0] sm:$0xff] }
 0xaee   : > { %6468 = vmatprep.subr.mxu1 %v6346_v31  ;;  %v6344_v31 = vld [vmem:[#allocation16 + $0xc98] sm:$0xff] }
 0xaef   : > { %6469 = vmatpush1.msra.mxu1 %v6345_v21  ;;  %v6343_v21 = vld [vmem:[#allocation16 + $0xc90] sm:$0xff] }
 0xaf0   : > { %6470 = vmatprep.subr.mxu1 %v6342_v20  ;;  %v6340_v20 = vld [vmem:[#allocation16 + $0xc78] sm:$0xff] }
 0xaf1   : > { %6471 = vmatpush1.msra.mxu1 %v6341_v26  ;;  %v6339_v26 = vld [vmem:[#allocation16 + $0xc70] sm:$0xff] }
 0xaf2   : > { %6472 = vmatprep.subr.mxu1 %v6338_v3  ;;  %v6336_v3 = vld [vmem:[#allocation16 + $0xc58] sm:$0xff] }
 0xaf3   : > { %6473 = vmatpush1.msra.mxu1 %v6337_v9  ;;  %v6335_v9 = vld [vmem:[#allocation16 + $0xc50] sm:$0xff] }
 0xaf4   : > { %6474 = vmatprep.subr.mxu1 %v6334_v10  ;;  %v6332_v10 = vld [vmem:[#allocation16 + $0xc38] sm:$0xff] }
 0xaf5   : > { %6475 = vmatpush1.msra.mxu1 %v6333_v40  ;;  %v6331_v40 = vld [vmem:[#allocation16 + $0xc30] sm:$0xff] }
 0xaf6   : > { %6476 = vmatprep.subr.mxu1 %v6330_v42  ;;  %v6328_v42 = vld [vmem:[#allocation16 + $0xc18] sm:$0xff] }
 0xaf7   : > { %6477 = vmatpush1.msra.mxu1 %v6329_v7  ;;  %v6327_v7 = vld [vmem:[#allocation16 + $0xc10] sm:$0xff] }
 0xaf8   : > { %6478 = vmatprep.subr.mxu1 %v6326_v35  ;;  %v6324_v35 = vld [vmem:[#allocation16 + $0xbf8] sm:$0xff] }
 0xaf9   : > { %6479 = vmatpush1.msra.mxu1 %v6325_v45  ;;  %v6323_v45 = vld [vmem:[#allocation16 + $0xbf0] sm:$0xff] }
 0xafa   : > { %6480 = vmatprep.subr.mxu1 %v6322_v48  ;;  %v6320_v48 = vld [vmem:[#allocation16 + $0xbd8] sm:$0xff] }
 0xafb   : > { %6481 = vmatpush1.msra.mxu1 %v6321_v58  ;;  %v6319_v58 = vld [vmem:[#allocation16 + $0xbd0] sm:$0xff] }
 0xafc   : > { %6482 = vmatprep.subr.mxu1 %v6318_v28  ;;  %v6316_v28 = vld [vmem:[#allocation16 + $0xbb8] sm:$0xff] }
 0xafd   : > { %6483 = vmatpush1.msra.mxu1 %v6317_v1  ;;  %v6315_v1 = vld [vmem:[#allocation16 + $0xbb0] sm:$0xff] }
 0xafe   : > { %6484 = vmatprep.subr.mxu1 %v6314_v6  ;;  %v6312_v6 = vld [vmem:[#allocation16 + $0xb98] sm:$0xff] }
 0xaff   : > { %6485 = vmatpush1.msra.mxu1 %v6313_v50  ;;  %v6311_v50 = vld [vmem:[#allocation16 + $0xb90] sm:$0xff] }
 0xb00   : > { %6486 = vmatprep.subr.mxu1 %v6310_v51  ;;  %v6308_v51 = vld [vmem:[#allocation16 + $0xb78] sm:$0xff] }
 0xb01   : > { %6487 = vmatpush1.msra.mxu1 %v6309_v56  ;;  %v6307_v56 = vld [vmem:[#allocation16 + $0xb70] sm:$0xff] }
 0xb02   : > { %6488 = vmatprep.subr.mxu1 %v6306_v17  ;;  %v6304_v17 = vld [vmem:[#allocation16 + $0xb58] sm:$0xff] }
 0xb03   : > { %6489 = vmatpush1.msra.mxu1 %v6305_v19  ;;  %v6303_v19 = vld [vmem:[#allocation16 + $0xb50] sm:$0xff] }
 0xb04   : > { %6490 = vmatprep.subr.mxu1 %v6302_v38  ;;  %v6300_v38 = vld [vmem:[#allocation16 + $0xb38] sm:$0xff] }
 0xb05   : > { %6491 = vmatpush1.msra.mxu1 %v6301_v52  ;;  %v6299_v52 = vld [vmem:[#allocation16 + $0xb30] sm:$0xff] }
 0xb06   : > { %6492 = vmatprep.subr.mxu1 %v6298_v18  ;;  %v6296_v18 = vld [vmem:[#allocation16 + $0xb18] sm:$0xff] }
 0xb07   : > { %6493 = vmatpush1.msra.mxu1 %v6297_v53  ;;  %v6295_v53 = vld [vmem:[#allocation16 + $0xb10] sm:$0xff] }
 0xb08   : > { %6494 = vmatprep.subr.mxu1 %v6294_v11  ;;  %v6388_v11 = vld [vmem:[#allocation16 + $0xdf8] sm:$0xff] }
 0xb09   : > { %6495 = vmatpush1.msra.mxu1 %v6293_v62  ;;  %v6387_v62 = vld [vmem:[#allocation16 + $0xdf0] sm:$0xff] }
 0xb0a   : > { %6512 = vmatprep.subr.mxu1 %v6386_v13  ;;  %v6384_v13 = vld [vmem:[#allocation16 + $0xdd8] sm:$0xff] }
 0xb0b   : > { %6513 = vmatpush2.msra.mxu1 %v6385_v12  ;;  %v6383_v12 = vld [vmem:[#allocation16 + $0xdd0] sm:$0xff] }
 0xb0c   : > { %6514 = vmatprep.subr.mxu1 %v6382_v24  ;;  %v6380_v24 = vld [vmem:[#allocation16 + $0xdb8] sm:$0xff] }
 0xb0d   : > { %6515 = vmatpush2.msra.mxu1 %v6381_v46  ;;  %v6379_v46 = vld [vmem:[#allocation16 + $0xdb0] sm:$0xff] }
 0xb0e   : > { %6516 = vmatprep.subr.mxu1 %v6378_v15  ;;  %v6376_v15 = vld [vmem:[#allocation16 + $0xd98] sm:$0xff] }
 0xb0f   : > { %6517 = vmatpush2.msra.mxu1 %v6377_v39  ;;  %v6375_v39 = vld [vmem:[#allocation16 + $0xd90] sm:$0xff] }
 0xb10   : > { %6518 = vmatprep.subr.mxu1 %v6374_v57  ;;  %v6372_v57 = vld [vmem:[#allocation16 + $0xd78] sm:$0xff] }
 0xb11   : > { %6519 = vmatpush2.msra.mxu1 %v6373_v54  ;;  %v6371_v54 = vld [vmem:[#allocation16 + $0xd70] sm:$0xff] }
 0xb12   : > { %6520 = vmatprep.subr.mxu1 %v6370_v60  ;;  %v6368_v60 = vld [vmem:[#allocation16 + $0xd58] sm:$0xff] }
 0xb13   : > { %6521 = vmatpush2.msra.mxu1 %v6369_v61  ;;  %v6367_v61 = vld [vmem:[#allocation16 + $0xd50] sm:$0xff] }
 0xb14   : > { %6522 = vmatprep.subr.mxu1 %v6366_v63  ;;  %v6364_v63 = vld [vmem:[#allocation16 + $0xd38] sm:$0xff] }
 0xb15   : > { %6523 = vmatpush2.msra.mxu1 %v6365_v4  ;;  %v6363_v4 = vld [vmem:[#allocation16 + $0xd30] sm:$0xff] }
 0xb16   : > { %6524 = vmatprep.subr.mxu1 %v6362_v5  ;;  %v6360_v5 = vld [vmem:[#allocation16 + $0xd18] sm:$0xff] }
 0xb17   : > { %6525 = vmatpush2.msra.mxu1 %v6361_v14  ;;  %v6359_v14 = vld [vmem:[#allocation16 + $0xd10] sm:$0xff] }
 0xb18   : > { %6526 = vmatprep.subr.mxu1 %v6358_v2  ;;  %v5854_v2 = vld [vmem:[#allocation16 + $0x1e8] sm:$0xff] }
 0xb19   : > { %6527 = vmatpush2.msra.mxu1 %v6357_v33 }
 0xb1a   : > { %6535 = vmatprep.subr.mxu1 %v6228_v8 }
 0xb66   : > { %v12106_v37 = vpop.f32.mrf.mxu0 }
 0xb68   : > { %v12108_v41 = vpop.f32.mrf.mxu0 }
 0xb6a   : > { %v12110_v27 = vpop.f32.mrf.mxu0 }
 0xb6c   : > { %v12112_v43 = vpop.f32.mrf.mxu0 }
 0xb6d   : > { %6457 = vmatprep.mubr.f32.mxu0 %v12112_v43 }
 0xb6e   : > { %6458 = vmatmul.mubr.f32.vlgmr.msra.gmra.mxu0 %v12110_v27 }
 0xb6f   : > { %6607 = vmatpush1.msra.mxu0 %v6355_v44 }
 0xb70   : > { %6608 = vmatprep.subr.mxu0 %v6352_v47 }
 0xb71   : > { %6609 = vmatpush1.msra.mxu0 %v6351_v34  ;;  %v6227_v34 = vld [vmem:[#allocation16 + $0x8f0] sm:$0xff] }
 0xb72   : > { %6610 = vmatprep.subr.mxu0 %v6348_v29  ;;  %v5853_v29 = vld [vmem:[#allocation16 + $0x1e0] sm:$0xff] }
 0xb73   : > { %6611 = vmatpush1.msra.mxu0 %v6347_v30  ;;  %v6224_v30 = vld [vmem:[#allocation16 + $0x8d8] sm:$0xff] }
 0xb74   : > { %6612 = vmatprep.subr.mxu0 %v6344_v31  ;;  %v5850_v31 = vld [vmem:[#allocation16 + $0x1c8] sm:$0xff] }
 0xb75   : > { %6613 = vmatpush1.msra.mxu0 %v6343_v21  ;;  %v6223_v21 = vld [vmem:[#allocation16 + $0x8d0] sm:$0xff] }
 0xb76   : > { %6614 = vmatprep.subr.mxu0 %v6340_v20  ;;  %v5849_v20 = vld [vmem:[#allocation16 + $0x1c0] sm:$0xff] }
 0xb77   : > { %6615 = vmatpush1.msra.mxu0 %v6339_v26  ;;  %v6220_v26 = vld [vmem:[#allocation16 + $0x8b8] sm:$0xff] }
 0xb78   : > { %6616 = vmatprep.subr.mxu0 %v6336_v3  ;;  %v5846_v3 = vld [vmem:[#allocation16 + $0x1a8] sm:$0xff] }
 0xb79   : > { %6617 = vmatpush1.msra.mxu0 %v6335_v9  ;;  %v6219_v9 = vld [vmem:[#allocation16 + $0x8b0] sm:$0xff] }
 0xb7a   : > { %6618 = vmatprep.subr.mxu0 %v6332_v10  ;;  %v5845_v10 = vld [vmem:[#allocation16 + $0x1a0] sm:$0xff] }
 0xb7b   : > { %6619 = vmatpush1.msra.mxu0 %v6331_v40  ;;  %v6216_v40 = vld [vmem:[#allocation16 + $0x898] sm:$0xff] }
 0xb7c   : > { %6620 = vmatprep.subr.mxu0 %v6328_v42  ;;  %v5842_v42 = vld [vmem:[#allocation16 + $0x188] sm:$0xff] }
 0xb7d   : > { %6621 = vmatpush1.msra.mxu0 %v6327_v7  ;;  %v6215_v7 = vld [vmem:[#allocation16 + $0x890] sm:$0xff] }
 0xb7e   : > { %6622 = vmatprep.subr.mxu0 %v6324_v35  ;;  %v5841_v35 = vld [vmem:[#allocation16 + $0x180] sm:$0xff] }
 0xb7f   : > { %6623 = vmatpush1.msra.mxu0 %v6323_v45  ;;  %v6212_v45 = vld [vmem:[#allocation16 + $0x878] sm:$0xff] }
 0xb80   : > { %6624 = vmatprep.subr.mxu0 %v6320_v48  ;;  %v5838_v48 = vld [vmem:[#allocation16 + $0x168] sm:$0xff] }
 0xb81   : > { %6625 = vmatpush1.msra.mxu0 %v6319_v58  ;;  %v6211_v58 = vld [vmem:[#allocation16 + $0x870] sm:$0xff] }
 0xb82   : > { %6626 = vmatprep.subr.mxu0 %v6316_v28  ;;  %v5837_v28 = vld [vmem:[#allocation16 + $0x160] sm:$0xff] }
 0xb83   : > { %6627 = vmatpush1.msra.mxu0 %v6315_v1  ;;  %v6208_v1 = vld [vmem:[#allocation16 + $0x858] sm:$0xff] }
 0xb84   : > { %6628 = vmatprep.subr.mxu0 %v6312_v6  ;;  %v5834_v6 = vld [vmem:[#allocation16 + $0x148] sm:$0xff] }
 0xb85   : > { %6629 = vmatpush1.msra.mxu0 %v6311_v50  ;;  %v6207_v50 = vld [vmem:[#allocation16 + $0x850] sm:$0xff] }
 0xb86   : > { %6630 = vmatprep.subr.mxu0 %v6308_v51  ;;  %v5833_v51 = vld [vmem:[#allocation16 + $0x140] sm:$0xff] }
 0xb87   : > { %6631 = vmatpush1.msra.mxu0 %v6307_v56  ;;  %v6204_v56 = vld [vmem:[#allocation16 + $0x838] sm:$0xff] }
 0xb88   : > { %6632 = vmatprep.subr.mxu0 %v6304_v17  ;;  %v5830_v17 = vld [vmem:[#allocation16 + $0x128] sm:$0xff] }
 0xb89   : > { %6633 = vmatpush1.msra.mxu0 %v6303_v19  ;;  %v6203_v19 = vld [vmem:[#allocation16 + $0x830] sm:$0xff] }
 0xb8a   : > { %6634 = vmatprep.subr.mxu0 %v6300_v38  ;;  %v5829_v38 = vld [vmem:[#allocation16 + $0x120] sm:$0xff] }
 0xb8b   : > { %6635 = vmatpush1.msra.mxu0 %v6299_v52  ;;  %v6200_v52 = vld [vmem:[#allocation16 + $0x818] sm:$0xff] }
 0xb8c   : > { %6636 = vmatprep.subr.mxu0 %v6296_v18  ;;  %v5826_v18 = vld [vmem:[#allocation16 + $0x108] sm:$0xff] }
 0xb8d   : > { %6637 = vmatpush1.msra.mxu0 %v6295_v53  ;;  %v6199_v53 = vld [vmem:[#allocation16 + $0x810] sm:$0xff] }
 0xb8e   : > { %6654 = vmatprep.subr.mxu0 %v6388_v11  ;;  %v5825_v11 = vld [vmem:[#allocation16 + $0x100] sm:$0xff] }
 0xb8f   : > { %6655 = vmatpush2.msra.mxu0 %v6387_v62  ;;  %v6196_v62 = vld [vmem:[#allocation16 + $0x7f8] sm:$0xff] }
 0xb90   : > { %6656 = vmatprep.subr.mxu0 %v6384_v13  ;;  %v5822_v13 = vld [vmem:[#allocation16 + $0xe8] sm:$0xff] }
 0xb91   : > { %6657 = vmatpush2.msra.mxu0 %v6383_v12  ;;  %v6195_v12 = vld [vmem:[#allocation16 + $0x7f0] sm:$0xff] }
 0xb92   : > { %6658 = vmatprep.subr.mxu0 %v6380_v24  ;;  %v5821_v24 = vld [vmem:[#allocation16 + $0xe0] sm:$0xff] }
 0xb93   : > { %6659 = vmatpush2.msra.mxu0 %v6379_v46  ;;  %v6192_v46 = vld [vmem:[#allocation16 + $0x7d8] sm:$0xff] }
 0xb94   : > { %6660 = vmatprep.subr.mxu0 %v6376_v15  ;;  %v5818_v15 = vld [vmem:[#allocation16 + $0xc8] sm:$0xff] }
 0xb95   : > { %6661 = vmatpush2.msra.mxu0 %v6375_v39  ;;  %v6191_v39 = vld [vmem:[#allocation16 + $0x7d0] sm:$0xff] }
 0xb96   : > { %6662 = vmatprep.subr.mxu0 %v6372_v57  ;;  %v5817_v57 = vld [vmem:[#allocation16 + $0xc0] sm:$0xff] }
 0xb97   : > { %6663 = vmatpush2.msra.mxu0 %v6371_v54  ;;  %v6188_v54 = vld [vmem:[#allocation16 + $0x7b8] sm:$0xff] }
 0xb98   : > { %6664 = vmatprep.subr.mxu0 %v6368_v60  ;;  %v5814_v60 = vld [vmem:[#allocation16 + $0xa8] sm:$0xff] }
 0xb99   : > { %6665 = vmatpush2.msra.mxu0 %v6367_v61  ;;  %v6187_v61 = vld [vmem:[#allocation16 + $0x7b0] sm:$0xff] }
 0xb9a   : > { %6666 = vmatprep.subr.mxu0 %v6364_v63  ;;  %v5813_v63 = vld [vmem:[#allocation16 + $0xa0] sm:$0xff] }
 0xb9b   : > { %6667 = vmatpush2.msra.mxu0 %v6363_v4  ;;  %v6184_v4 = vld [vmem:[#allocation16 + $0x798] sm:$0xff] }
 0xb9c   : > { %6668 = vmatprep.subr.mxu0 %v6360_v5  ;;  %v5810_v5 = vld [vmem:[#allocation16 + $0x88] sm:$0xff] }
 0xb9d   : > { %6669 = vmatpush2.msra.mxu0 %v6359_v14  ;;  %v6183_v14 = vld [vmem:[#allocation16 + $0x790] sm:$0xff] }
 0xb9e   : > { %6680 = vmatprep.subr.mxu0 %v5854_v2  ;;  %v5809_v2 = vld [vmem:[#allocation16 + $0x80] sm:$0xff] }
 0xba6   : > { %v12116_v33 = vpop.f32.mrf.mxu1 }
 0xba8   : > { %v12118_v8 = vpop.f32.mrf.mxu1 }
 0xbaa   : > { %v6159_v44 = vpop.f32.mrf.mxu1 }
 0xbac   : > { %v6161_v47 = vpop.f32.mrf.mxu1 }
 0xbad   : > { %9996 = vmatprep.mubr.msk.f32.mxu1 %vm6389_vm10, %v6161_v47  ;;  %9997 = vmatprep.mubr.msk.f32.mxu0 %vm6389_vm10, %v6161_v47  ;;  %v5806_v47 = vld [vmem:[#allocation16 + $0x68] sm:$0xff] }
 0xbae   : > { %6529 = vmatmul.mubr.f32.vlgmr.msra.gmra.mxu1 %v6159_v44  ;;  %6671 = vmatmul.mubr.f32.vlgmr.msra.gmra.mxu0 %v6159_v44  ;;  %v6180_v44 = vld [vmem:[#allocation16 + $0x778] sm:$0xff] }
 0xbaf   : > { %6536 = vmatpush1.msra.mxu1 %v6227_v34  ;;  %6681 = vmatpush1.msra.mxu0 %v5853_v29  ;;  %v6179_v34 = vld [vmem:[#allocation16 + $0x770] sm:$0xff]  ;;  %v5805_v29 = vld [vmem:[#allocation16 + $0x60] sm:$0xff] }
 0xbb0   : > { %6537 = vmatprep.subr.mxu1 %v6224_v30  ;;  %6682 = vmatprep.subr.mxu0 %v5850_v31  ;;  %v6176_v30 = vld [vmem:[#allocation16 + $0x758] sm:$0xff]  ;;  %v5802_v31 = vld [vmem:[#allocation16 + $0x48] sm:$0xff] }
 0xbb1   : > { %6538 = vmatpush1.msra.mxu1 %v6223_v21  ;;  %6683 = vmatpush1.msra.mxu0 %v5849_v20  ;;  %v6175_v21 = vld [vmem:[#allocation16 + $0x750] sm:$0xff]  ;;  %v5801_v20 = vld [vmem:[#allocation16 + $0x40] sm:$0xff] }
 0xbb2   : > { %6539 = vmatprep.subr.mxu1 %v6220_v26  ;;  %6684 = vmatprep.subr.mxu0 %v5846_v3  ;;  %v6172_v26 = vld [vmem:[#allocation16 + $0x738] sm:$0xff]  ;;  %v5798_v3 = vld [vmem:[#allocation16 + $0x28] sm:$0xff] }
 0xbb3   : > { %6540 = vmatpush1.msra.mxu1 %v6219_v9  ;;  %6685 = vmatpush1.msra.mxu0 %v5845_v10  ;;  %v6171_v9 = vld [vmem:[#allocation16 + $0x730] sm:$0xff]  ;;  %v5797_v10 = vld [vmem:[#allocation16 + $0x20] sm:$0xff] }
 0xbb4   : > { %6541 = vmatprep.subr.mxu1 %v6216_v40  ;;  %6686 = vmatprep.subr.mxu0 %v5842_v42  ;;  %v6168_v40 = vld [vmem:[#allocation16 + $0x718] sm:$0xff]  ;;  %v5794_v42 = vld [vmem:[#allocation16 + $0x8] sm:$0xff] }
 0xbb5   : > { %6542 = vmatpush1.msra.mxu1 %v6215_v7  ;;  %6687 = vmatpush1.msra.mxu0 %v5841_v35  ;;  %v6167_v7 = vld [vmem:[#allocation16 + $0x710] sm:$0xff]  ;;  %v5793_v35 = vld [vmem:[#allocation16] sm:$0xff] }
 0xbb6   : > { %6543 = vmatprep.subr.mxu1 %v6212_v45  ;;  %6688 = vmatprep.subr.mxu0 %v5838_v48  ;;  %v6292_v45 = vld [vmem:[#allocation16 + $0xaf8] sm:$0xff]  ;;  %v5918_v48 = vld [vmem:[#allocation16 + $0x3e8] sm:$0xff] }
 0xbb7   : > { %6544 = vmatpush1.msra.mxu1 %v6211_v58  ;;  %6689 = vmatpush1.msra.mxu0 %v5837_v28  ;;  %v6291_v58 = vld [vmem:[#allocation16 + $0xaf0] sm:$0xff]  ;;  %v5917_v28 = vld [vmem:[#allocation16 + $0x3e0] sm:$0xff] }
 0xbb8   : > { %6545 = vmatprep.subr.mxu1 %v6208_v1  ;;  %6690 = vmatprep.subr.mxu0 %v5834_v6  ;;  %v6288_v1 = vld [vmem:[#allocation16 + $0xad8] sm:$0xff]  ;;  %v5914_v6 = vld [vmem:[#allocation16 + $0x3c8] sm:$0xff] }
 0xbb9   : > { %6546 = vmatpush1.msra.mxu1 %v6207_v50  ;;  %6691 = vmatpush1.msra.mxu0 %v5833_v51  ;;  %v6287_v50 = vld [vmem:[#allocation16 + $0xad0] sm:$0xff]  ;;  %v5913_v51 = vld [vmem:[#allocation16 + $0x3c0] sm:$0xff] }
 0xbba   : > { %6547 = vmatprep.subr.mxu1 %v6204_v56  ;;  %6692 = vmatprep.subr.mxu0 %v5830_v17  ;;  %v6284_v56 = vld [vmem:[#allocation16 + $0xab8] sm:$0xff]  ;;  %v5910_v17 = vld [vmem:[#allocation16 + $0x3a8] sm:$0xff] }
 0xbbb   : > { %6548 = vmatpush1.msra.mxu1 %v6203_v19  ;;  %6693 = vmatpush1.msra.mxu0 %v5829_v38  ;;  %v6283_v19 = vld [vmem:[#allocation16 + $0xab0] sm:$0xff]  ;;  %v5909_v38 = vld [vmem:[#allocation16 + $0x3a0] sm:$0xff] }
 0xbbc   : > { %6549 = vmatprep.subr.mxu1 %v6200_v52  ;;  %6694 = vmatprep.subr.mxu0 %v5826_v18  ;;  %v6280_v52 = vld [vmem:[#allocation16 + $0xa98] sm:$0xff]  ;;  %v5906_v18 = vld [vmem:[#allocation16 + $0x388] sm:$0xff] }
 0xbbd   : > { %6550 = vmatpush1.msra.mxu1 %v6199_v53  ;;  %6695 = vmatpush1.msra.mxu0 %v5825_v11  ;;  %v6279_v53 = vld [vmem:[#allocation16 + $0xa90] sm:$0xff]  ;;  %v5905_v11 = vld [vmem:[#allocation16 + $0x380] sm:$0xff] }
 0xbbe   : > { %6551 = vmatprep.subr.mxu1 %v6196_v62  ;;  %6696 = vmatprep.subr.mxu0 %v5822_v13  ;;  %v6276_v62 = vld [vmem:[#allocation16 + $0xa78] sm:$0xff]  ;;  %v5902_v13 = vld [vmem:[#allocation16 + $0x368] sm:$0xff] }
 0xbbf   : > { %6552 = vmatpush1.msra.mxu1 %v6195_v12  ;;  %6697 = vmatpush1.msra.mxu0 %v5821_v24  ;;  %v6275_v12 = vld [vmem:[#allocation16 + $0xa70] sm:$0xff]  ;;  %v5901_v24 = vld [vmem:[#allocation16 + $0x360] sm:$0xff] }
 0xbc0   : > { %6553 = vmatprep.subr.mxu1 %v6192_v46  ;;  %6698 = vmatprep.subr.mxu0 %v5818_v15  ;;  %v6272_v46 = vld [vmem:[#allocation16 + $0xa58] sm:$0xff]  ;;  %v5898_v15 = vld [vmem:[#allocation16 + $0x348] sm:$0xff] }
 0xbc1   : > { %6554 = vmatpush1.msra.mxu1 %v6191_v39  ;;  %6699 = vmatpush1.msra.mxu0 %v5817_v57  ;;  %v6271_v39 = vld [vmem:[#allocation16 + $0xa50] sm:$0xff]  ;;  %v5897_v57 = vld [vmem:[#allocation16 + $0x340] sm:$0xff] }
 0xbc2   : > { %6555 = vmatprep.subr.mxu1 %v6188_v54  ;;  %6700 = vmatprep.subr.mxu0 %v5814_v60  ;;  %v6268_v54 = vld [vmem:[#allocation16 + $0xa38] sm:$0xff]  ;;  %v5894_v60 = vld [vmem:[#allocation16 + $0x328] sm:$0xff] }
 0xbc3   : > { %6556 = vmatpush1.msra.mxu1 %v6187_v61  ;;  %6701 = vmatpush1.msra.mxu0 %v5813_v63  ;;  %v6267_v61 = vld [vmem:[#allocation16 + $0xa30] sm:$0xff]  ;;  %v5893_v63 = vld [vmem:[#allocation16 + $0x320] sm:$0xff] }
 0xbc4   : > { %6557 = vmatprep.subr.mxu1 %v6184_v4  ;;  %6702 = vmatprep.subr.mxu0 %v5810_v5  ;;  %v6264_v4 = vld [vmem:[#allocation16 + $0xa18] sm:$0xff]  ;;  %v5890_v5 = vld [vmem:[#allocation16 + $0x308] sm:$0xff] }
 0xbc5   : > { %6558 = vmatpush1.msra.mxu1 %v6183_v14  ;;  %6703 = vmatpush1.msra.mxu0 %v5809_v2  ;;  %v6263_v14 = vld [vmem:[#allocation16 + $0xa10] sm:$0xff]  ;;  %v5889_v2 = vld [vmem:[#allocation16 + $0x300] sm:$0xff] }
 0xbc6   : > { %6559 = vmatprep.subr.mxu1 %v6180_v44  ;;  %6704 = vmatprep.subr.mxu0 %v5806_v47  ;;  %v6260_v44 = vld [vmem:[#allocation16 + $0x9f8] sm:$0xff]  ;;  %v5886_v47 = vld [vmem:[#allocation16 + $0x2e8] sm:$0xff] }
 0xbc7   : > { %6560 = vmatpush1.msra.mxu1 %v6179_v34  ;;  %6705 = vmatpush1.msra.mxu0 %v5805_v29  ;;  %v6259_v34 = vld [vmem:[#allocation16 + $0x9f0] sm:$0xff]  ;;  %v5885_v29 = vld [vmem:[#allocation16 + $0x2e0] sm:$0xff] }
 0xbc8   : > { %6561 = vmatprep.subr.mxu1 %v6176_v30  ;;  %6706 = vmatprep.subr.mxu0 %v5802_v31  ;;  %v6256_v30 = vld [vmem:[#allocation16 + $0x9d8] sm:$0xff]  ;;  %v5882_v31 = vld [vmem:[#allocation16 + $0x2c8] sm:$0xff] }
 0xbc9   : > { %6562 = vmatpush1.msra.mxu1 %v6175_v21  ;;  %6707 = vmatpush1.msra.mxu0 %v5801_v20  ;;  %v6255_v21 = vld [vmem:[#allocation16 + $0x9d0] sm:$0xff]  ;;  %v5881_v20 = vld [vmem:[#allocation16 + $0x2c0] sm:$0xff] }
 0xbca   : > { %6563 = vmatprep.subr.mxu1 %v6172_v26  ;;  %6708 = vmatprep.subr.mxu0 %v5798_v3  ;;  %v6252_v26 = vld [vmem:[#allocation16 + $0x9b8] sm:$0xff]  ;;  %v5878_v3 = vld [vmem:[#allocation16 + $0x2a8] sm:$0xff] }
 0xbcb   : > { %6564 = vmatpush1.msra.mxu1 %v6171_v9  ;;  %6709 = vmatpush1.msra.mxu0 %v5797_v10  ;;  %v6251_v9 = vld [vmem:[#allocation16 + $0x9b0] sm:$0xff]  ;;  %v5877_v10 = vld [vmem:[#allocation16 + $0x2a0] sm:$0xff] }
 0xbcc   : > { %6565 = vmatprep.subr.mxu1 %v6168_v40  ;;  %6710 = vmatprep.subr.mxu0 %v5794_v42  ;;  %v6248_v40 = vld [vmem:[#allocation16 + $0x998] sm:$0xff]  ;;  %v5874_v42 = vld [vmem:[#allocation16 + $0x288] sm:$0xff] }
 0xbcd   : > { %6566 = vmatpush1.msra.mxu1 %v6167_v7  ;;  %6711 = vmatpush1.msra.mxu0 %v5793_v35  ;;  %v6247_v7 = vld [vmem:[#allocation16 + $0x990] sm:$0xff]  ;;  %v5873_v35 = vld [vmem:[#allocation16 + $0x280] sm:$0xff] }
 0xbce   : > { %6567 = vmatprep.subr.mxu1 %v6292_v45  ;;  %6712 = vmatprep.subr.mxu0 %v5918_v48  ;;  %v6244_v45 = vld [vmem:[#allocation16 + $0x978] sm:$0xff]  ;;  %v5870_v48 = vld [vmem:[#allocation16 + $0x268] sm:$0xff] }
 0xbcf   : > { %6568 = vmatpush2.msra.mxu1 %v6291_v58  ;;  %6713 = vmatpush2.msra.mxu0 %v5917_v28  ;;  %v6243_v58 = vld [vmem:[#allocation16 + $0x970] sm:$0xff]  ;;  %v5869_v28 = vld [vmem:[#allocation16 + $0x260] sm:$0xff] }
 0xbd0   : > { %6569 = vmatprep.subr.mxu1 %v6288_v1  ;;  %6714 = vmatprep.subr.mxu0 %v5914_v6  ;;  %v6240_v1 = vld [vmem:[#allocation16 + $0x958] sm:$0xff]  ;;  %v5866_v6 = vld [vmem:[#allocation16 + $0x248] sm:$0xff] }
 0xbd1   : > { %6570 = vmatpush2.msra.mxu1 %v6287_v50  ;;  %6715 = vmatpush2.msra.mxu0 %v5913_v51  ;;  %v6239_v50 = vld [vmem:[#allocation16 + $0x950] sm:$0xff]  ;;  %v5865_v51 = vld [vmem:[#allocation16 + $0x240] sm:$0xff] }
 0xbd2   : > { %6571 = vmatprep.subr.mxu1 %v6284_v56  ;;  %6716 = vmatprep.subr.mxu0 %v5910_v17  ;;  %v6236_v56 = vld [vmem:[#allocation16 + $0x938] sm:$0xff]  ;;  %v5862_v17 = vld [vmem:[#allocation16 + $0x228] sm:$0xff] }
 0xbd3   : > { %6572 = vmatpush2.msra.mxu1 %v6283_v19  ;;  %6717 = vmatpush2.msra.mxu0 %v5909_v38  ;;  %v6235_v19 = vld [vmem:[#allocation16 + $0x930] sm:$0xff]  ;;  %v5861_v38 = vld [vmem:[#allocation16 + $0x220] sm:$0xff] }
 0xbd4   : > { %6573 = vmatprep.subr.mxu1 %v6280_v52  ;;  %6718 = vmatprep.subr.mxu0 %v5906_v18  ;;  %v6232_v52 = vld [vmem:[#allocation16 + $0x918] sm:$0xff]  ;;  %v5858_v18 = vld [vmem:[#allocation16 + $0x208] sm:$0xff] }
 0xbd5   : > { %6574 = vmatpush2.msra.mxu1 %v6279_v53  ;;  %6719 = vmatpush2.msra.mxu0 %v5905_v11  ;;  %v6231_v53 = vld [vmem:[#allocation16 + $0x910] sm:$0xff]  ;;  %v5857_v11 = vld [vmem:[#allocation16 + $0x200] sm:$0xff] }
 0xbd6   : > { %6575 = vmatprep.subr.mxu1 %v6276_v62  ;;  %6720 = vmatprep.subr.mxu0 %v5902_v13  ;;  %v5982_v62 = vld [vmem:[#allocation16 + $0x5e8] sm:$0xff]  ;;  %v5984_v13 = vld [vmem:[#allocation16 + $0x5f8] sm:$0xff] }
 0xbd7   : > { %6576 = vmatpush2.msra.mxu1 %v6275_v12  ;;  %6721 = vmatpush2.msra.mxu0 %v5901_v24  ;;  %v5981_v12 = vld [vmem:[#allocation16 + $0x5e0] sm:$0xff]  ;;  %v5983_v24 = vld [vmem:[#allocation16 + $0x5f0] sm:$0xff] }
 0xbd8   : > { %6577 = vmatprep.subr.mxu1 %v6272_v46  ;;  %6722 = vmatprep.subr.mxu0 %v5898_v15  ;;  %v5978_v46 = vld [vmem:[#allocation16 + $0x5c8] sm:$0xff]  ;;  %v5980_v15 = vld [vmem:[#allocation16 + $0x5d8] sm:$0xff] }
 0xbd9   : > { %6578 = vmatpush2.msra.mxu1 %v6271_v39  ;;  %6723 = vmatpush2.msra.mxu0 %v5897_v57  ;;  %v5979_v39 = vld [vmem:[#allocation16 + $0x5d0] sm:$0xff]  ;;  %v5974_v57 = vld [vmem:[#allocation16 + $0x5a8] sm:$0xff] }
 0xbda   : > { %6579 = vmatprep.subr.mxu1 %v6268_v54  ;;  %6724 = vmatprep.subr.mxu0 %v5894_v60  ;;  %v5976_v54 = vld [vmem:[#allocation16 + $0x5b8] sm:$0xff]  ;;  %v5975_v60 = vld [vmem:[#allocation16 + $0x5b0] sm:$0xff] }
 0xbdb   : > { %6580 = vmatpush2.msra.mxu1 %v6267_v61  ;;  %6725 = vmatpush2.msra.mxu0 %v5893_v63  ;;  %v5970_v61 = vld [vmem:[#allocation16 + $0x588] sm:$0xff]  ;;  %v5972_v63 = vld [vmem:[#allocation16 + $0x598] sm:$0xff] }
 0xbdc   : > { %6581 = vmatprep.subr.mxu1 %v6264_v4  ;;  %6726 = vmatprep.subr.mxu0 %v5890_v5  ;;  %v5969_v4 = vld [vmem:[#allocation16 + $0x580] sm:$0xff]  ;;  %v5971_v5 = vld [vmem:[#allocation16 + $0x590] sm:$0xff] }
 0xbdd   : > { %6582 = vmatpush2.msra.mxu1 %v6263_v14  ;;  %6727 = vmatpush2.msra.mxu0 %v5889_v2  ;;  %v5966_v14 = vld [vmem:[#allocation16 + $0x568] sm:$0xff]  ;;  %v5968_v2 = vld [vmem:[#allocation16 + $0x578] sm:$0xff] }
 0xbde   : > { %6583 = vmatprep.subr.mxu1 %v6260_v44  ;;  %6728 = vmatprep.subr.mxu0 %v5886_v47  ;;  %v5967_v44 = vld [vmem:[#allocation16 + $0x570] sm:$0xff]  ;;  %v5962_v47 = vld [vmem:[#allocation16 + $0x548] sm:$0xff] }
 0xbdf   : > { %6584 = vmatpush2.msra.mxu1 %v6259_v34  ;;  %6729 = vmatpush2.msra.mxu0 %v5885_v29  ;;  %v5964_v34 = vld [vmem:[#allocation16 + $0x558] sm:$0xff]  ;;  %v5961_v29 = vld [vmem:[#allocation16 + $0x540] sm:$0xff] }
 0xbe0   : > { %6585 = vmatprep.subr.mxu1 %v6256_v30  ;;  %6730 = vmatprep.subr.mxu0 %v5882_v31  ;;  %v5963_v30 = vld [vmem:[#allocation16 + $0x550] sm:$0xff]  ;;  %v5958_v31 = vld [vmem:[#allocation16 + $0x528] sm:$0xff] }
 0xbe1   : > { %6586 = vmatpush2.msra.mxu1 %v6255_v21  ;;  %6731 = vmatpush2.msra.mxu0 %v5881_v20  ;;  %v5960_v21 = vld [vmem:[#allocation16 + $0x538] sm:$0xff]  ;;  %v5957_v20 = vld [vmem:[#allocation16 + $0x520] sm:$0xff] }
 0xbe2   : > { %6587 = vmatprep.subr.mxu1 %v6252_v26  ;;  %6732 = vmatprep.subr.mxu0 %v5878_v3  ;;  %v5959_v26 = vld [vmem:[#allocation16 + $0x530] sm:$0xff]  ;;  %v5954_v3 = vld [vmem:[#allocation16 + $0x508] sm:$0xff] }
 0xbe3   : > { %6588 = vmatpush2.msra.mxu1 %v6251_v9  ;;  %6733 = vmatpush2.msra.mxu0 %v5877_v10  ;;  %v5956_v9 = vld [vmem:[#allocation16 + $0x518] sm:$0xff]  ;;  %v5953_v10 = vld [vmem:[#allocation16 + $0x500] sm:$0xff] }
 0xbe4   : > { %6589 = vmatprep.subr.mxu1 %v6248_v40  ;;  %6734 = vmatprep.subr.mxu0 %v5874_v42  ;;  %v5955_v40 = vld [vmem:[#allocation16 + $0x510] sm:$0xff]  ;;  %v5950_v42 = vld [vmem:[#allocation16 + $0x4e8] sm:$0xff] }
 0xbe5   : > { %6590 = vmatpush2.msra.mxu1 %v6247_v7  ;;  %6735 = vmatpush2.msra.mxu0 %v5873_v35  ;;  %v5952_v7 = vld [vmem:[#allocation16 + $0x4f8] sm:$0xff]  ;;  %v5949_v35 = vld [vmem:[#allocation16 + $0x4e0] sm:$0xff] }
 0xbe6   : > { %6591 = vmatprep.subr.mxu1 %v6244_v45  ;;  %6736 = vmatprep.subr.mxu0 %v5870_v48  ;;  %v5951_v45 = vld [vmem:[#allocation16 + $0x4f0] sm:$0xff]  ;;  %v5946_v48 = vld [vmem:[#allocation16 + $0x4c8] sm:$0xff] }
 0xbe7   : > { %6592 = vmatpush2.msra.mxu1 %v6243_v58  ;;  %6737 = vmatpush2.msra.mxu0 %v5869_v28  ;;  %v5948_v58 = vld [vmem:[#allocation16 + $0x4d8] sm:$0xff]  ;;  %v5945_v28 = vld [vmem:[#allocation16 + $0x4c0] sm:$0xff] }
 0xbe8   : > { %6593 = vmatprep.subr.mxu1 %v6240_v1  ;;  %6738 = vmatprep.subr.mxu0 %v5866_v6  ;;  %v5947_v1 = vld [vmem:[#allocation16 + $0x4d0] sm:$0xff]  ;;  %v5942_v6 = vld [vmem:[#allocation16 + $0x4a8] sm:$0xff] }
 0xbe9   : > { %6594 = vmatpush2.msra.mxu1 %v6239_v50  ;;  %6739 = vmatpush2.msra.mxu0 %v5865_v51  ;;  %v5944_v50 = vld [vmem:[#allocation16 + $0x4b8] sm:$0xff]  ;;  %v5941_v51 = vld [vmem:[#allocation16 + $0x4a0] sm:$0xff] }
 0xbea   : > { %6595 = vmatprep.subr.mxu1 %v6236_v56  ;;  %6740 = vmatprep.subr.mxu0 %v5862_v17  ;;  %v5943_v56 = vld [vmem:[#allocation16 + $0x4b0] sm:$0xff]  ;;  %v5938_v17 = vld [vmem:[#allocation16 + $0x488] sm:$0xff] }
 0xbeb   : > { %6596 = vmatpush2.msra.mxu1 %v6235_v19  ;;  %6741 = vmatpush2.msra.mxu0 %v5861_v38  ;;  %v5940_v19 = vld [vmem:[#allocation16 + $0x498] sm:$0xff]  ;;  %v5937_v38 = vld [vmem:[#allocation16 + $0x480] sm:$0xff] }
 0xbec   : > { %6597 = vmatprep.subr.mxu1 %v6232_v52  ;;  %6742 = vmatprep.subr.mxu0 %v5858_v18  ;;  %v5939_v52 = vld [vmem:[#allocation16 + $0x490] sm:$0xff]  ;;  %v5934_v18 = vld [vmem:[#allocation16 + $0x468] sm:$0xff] }
 0xbed   : > { %6598 = vmatpush2.msra.mxu1 %v6231_v53  ;;  %6599 = vmatprep.mubr.f32.mxu1 %v12112_v43  ;;  %v5977_v43 = vld [vmem:[#allocation16 + $0x5c0] sm:$0xff]  ;;  %v5936_v53 = vld [vmem:[#allocation16 + $0x478] sm:$0xff] }
 0xbee   : > { %6743 = vmatpush2.msra.mxu0 %v5857_v11  ;;  %6744 = vmatprep.mubr.f32.mxu0 %v12108_v41  ;;  %v5933_v11 = vld [vmem:[#allocation16 + $0x460] sm:$0xff] }
 0xbef   : > { %6600 = vmatmul.mubr.f32.vlgmr.msra.gmra.mxu1 %v12110_v27  ;;  %6745 = vmatmul.mubr.f32.vlgmr.msra.gmra.mxu0 %v12106_v37  ;;  %v5973_v27 = vld [vmem:[#allocation16 + $0x5a0] sm:$0xff] }
 0xbf0   : > { %6751 = vmatprep.subr.mxu1 %v5982_v62  ;;  %6893 = vmatprep.subr.mxu0 %v5984_v13  ;;  %v5935_v62 = vld [vmem:[#allocation16 + $0x470] sm:$0xff]  ;;  %v5930_v13 = vld [vmem:[#allocation16 + $0x448] sm:$0xff] }
 0xbf1   : > { %6752 = vmatpush1.msra.mxu1 %v5981_v12  ;;  %9998 = vmatprep.mubr.msk.f32.mxu1 %vm6389_vm10, %v12118_v8  ;;  %v5932_v12 = vld [vmem:[#allocation16 + $0x458] sm:$0xff] }
 0xbf2   : > { %6894 = vmatpush1.msra.mxu0 %v5983_v24  ;;  %9999 = vmatprep.mubr.msk.f32.mxu0 %vm6389_vm10, %v12118_v8  ;;  %v5965_v8 = vld [vmem:[#allocation16 + $0x560] sm:$0xff] }
 0xbf3   : > { %6753 = vmatprep.subr.mxu1 %v5978_v46  ;;  %6895 = vmatprep.subr.mxu0 %v5980_v15  ;;  %v5929_v24 = vld [vmem:[#allocation16 + $0x440] sm:$0xff]  ;;  %v5931_v46 = vld [vmem:[#allocation16 + $0x450] sm:$0xff]  ;;  %v5926_v15 = vld [vmem:[#allocation16 + $0x428] sm:$0xff] }
 0xbf4   : > { %6754 = vmatpush1.msra.mxu1 %v5977_v43  ;;  %6896 = vmatpush1.msra.mxu0 %v5979_v39  ;;  %v5928_v43 = vld [vmem:[#allocation16 + $0x438] sm:$0xff]  ;;  %v5925_v39 = vld [vmem:[#allocation16 + $0x420] sm:$0xff] }
 0xbf5   : > { %6755 = vmatprep.subr.mxu1 %v5974_v57  ;;  %6897 = vmatprep.subr.mxu0 %v5976_v54  ;;  %v5927_v57 = vld [vmem:[#allocation16 + $0x430] sm:$0xff]  ;;  %v5922_v54 = vld [vmem:[#allocation16 + $0x408] sm:$0xff] }
 0xbf6   : > { %6756 = vmatpush1.msra.mxu1 %v5973_v27  ;;  %6898 = vmatpush1.msra.mxu0 %v5975_v60  ;;  %v5924_v27 = vld [vmem:[#allocation16 + $0x418] sm:$0xff]  ;;  %v5921_v60 = vld [vmem:[#allocation16 + $0x400] sm:$0xff] }
 0xbf7   : > { %6757 = vmatprep.subr.mxu1 %v5970_v61  ;;  %6899 = vmatprep.subr.mxu0 %v5972_v63  ;;  %v5923_v61 = vld [vmem:[#allocation16 + $0x410] sm:$0xff]  ;;  %v6014_v63 = vld [vmem:[#allocation16 + $0x6e8] sm:$0xff] }
 0xbf8   : > { %6758 = vmatpush1.msra.mxu1 %v5969_v4  ;;  %6900 = vmatpush1.msra.mxu0 %v5971_v5  ;;  %v6016_v4 = vld [vmem:[#allocation16 + $0x6f8] sm:$0xff]  ;;  %v6013_v5 = vld [vmem:[#allocation16 + $0x6e0] sm:$0xff] }
 0xbf9   : > { %6759 = vmatprep.subr.mxu1 %v5966_v14  ;;  %6901 = vmatprep.subr.mxu0 %v5968_v2  ;;  %v6015_v14 = vld [vmem:[#allocation16 + $0x6f0] sm:$0xff]  ;;  %v6010_v2 = vld [vmem:[#allocation16 + $0x6c8] sm:$0xff] }
 0xbfa   : > { %6760 = vmatpush1.msra.mxu1 %v5965_v8  ;;  %6902 = vmatpush1.msra.mxu0 %v5967_v44  ;;  %v6012_v8 = vld [vmem:[#allocation16 + $0x6d8] sm:$0xff]  ;;  %v6009_v44 = vld [vmem:[#allocation16 + $0x6c0] sm:$0xff] }
 0xbfb   : > { %6761 = vmatprep.subr.mxu1 %v5962_v47  ;;  %6903 = vmatprep.subr.mxu0 %v5964_v34  ;;  %v6011_v47 = vld [vmem:[#allocation16 + $0x6d0] sm:$0xff]  ;;  %v6006_v34 = vld [vmem:[#allocation16 + $0x6a8] sm:$0xff] }
 0xbfc   : > { %6762 = vmatpush1.msra.mxu1 %v5961_v29  ;;  %6904 = vmatpush1.msra.mxu0 %v5963_v30  ;;  %v6008_v29 = vld [vmem:[#allocation16 + $0x6b8] sm:$0xff]  ;;  %v6005_v30 = vld [vmem:[#allocation16 + $0x6a0] sm:$0xff] }
 0xbfd   : > { %6763 = vmatprep.subr.mxu1 %v5958_v31  ;;  %6905 = vmatprep.subr.mxu0 %v5960_v21  ;;  %v6007_v31 = vld [vmem:[#allocation16 + $0x6b0] sm:$0xff]  ;;  %v6002_v21 = vld [vmem:[#allocation16 + $0x688] sm:$0xff] }
 0xbfe   : > { %6764 = vmatpush1.msra.mxu1 %v5957_v20  ;;  %6906 = vmatpush1.msra.mxu0 %v5959_v26  ;;  %v6004_v20 = vld [vmem:[#allocation16 + $0x698] sm:$0xff]  ;;  %v6001_v26 = vld [vmem:[#allocation16 + $0x680] sm:$0xff] }
 0xbff   : > { %6765 = vmatprep.subr.mxu1 %v5954_v3  ;;  %6907 = vmatprep.subr.mxu0 %v5956_v9  ;;  %v6003_v3 = vld [vmem:[#allocation16 + $0x690] sm:$0xff]  ;;  %v5998_v9 = vld [vmem:[#allocation16 + $0x668] sm:$0xff] }
 0xc00   : > { %6766 = vmatpush1.msra.mxu1 %v5953_v10  ;;  %6908 = vmatpush1.msra.mxu0 %v5955_v40  ;;  %v6000_v10 = vld [vmem:[#allocation16 + $0x678] sm:$0xff]  ;;  %v5997_v40 = vld [vmem:[#allocation16 + $0x660] sm:$0xff] }
 0xc01   : > { %6767 = vmatprep.subr.mxu1 %v5950_v42  ;;  %6909 = vmatprep.subr.mxu0 %v5952_v7  ;;  %v5999_v42 = vld [vmem:[#allocation16 + $0x670] sm:$0xff]  ;;  %v5994_v7 = vld [vmem:[#allocation16 + $0x648] sm:$0xff] }
 0xc02   : > { %6768 = vmatpush1.msra.mxu1 %v5949_v35  ;;  %6910 = vmatpush1.msra.mxu0 %v5951_v45  ;;  %v5996_v35 = vld [vmem:[#allocation16 + $0x658] sm:$0xff]  ;;  %v5993_v45 = vld [vmem:[#allocation16 + $0x640] sm:$0xff] }
 0xc03   : > { %6769 = vmatprep.subr.mxu1 %v5946_v48  ;;  %6911 = vmatprep.subr.mxu0 %v5948_v58  ;;  %v5995_v48 = vld [vmem:[#allocation16 + $0x650] sm:$0xff]  ;;  %v5990_v58 = vld [vmem:[#allocation16 + $0x628] sm:$0xff] }
 0xc04   : > { %6770 = vmatpush1.msra.mxu1 %v5945_v28  ;;  %6912 = vmatpush1.msra.mxu0 %v5947_v1  ;;  %v5992_v28 = vld [vmem:[#allocation16 + $0x638] sm:$0xff]  ;;  %v5989_v1 = vld [vmem:[#allocation16 + $0x620] sm:$0xff] }
 0xc05   : > { %6771 = vmatprep.subr.mxu1 %v5942_v6  ;;  %6913 = vmatprep.subr.mxu0 %v5944_v50  ;;  %v5991_v6 = vld [vmem:[#allocation16 + $0x630] sm:$0xff]  ;;  %v5986_v50 = vld [vmem:[#allocation16 + $0x608] sm:$0xff] }
 0xc06   : > { %6772 = vmatpush1.msra.mxu1 %v5941_v51  ;;  %6914 = vmatpush1.msra.mxu0 %v5943_v56  ;;  %v5988_v51 = vld [vmem:[#allocation16 + $0x618] sm:$0xff]  ;;  %v5985_v56 = vld [vmem:[#allocation16 + $0x600] sm:$0xff] }
 0xc07   : > { %6773 = vmatprep.subr.mxu1 %v5938_v17  ;;  %6915 = vmatprep.subr.mxu0 %v5940_v19  ;;  %v5987_v17 = vld [vmem:[#allocation16 + $0x610] sm:$0xff]  ;;  %v5856_v19 = vld [vmem:[#allocation16 + $0x1f8] sm:$0xff] }
 0xc08   : > { %6774 = vmatpush1.msra.mxu1 %v5937_v38  ;;  %6916 = vmatpush1.msra.mxu0 %v5939_v52  ;;  %v5855_v38 = vld [vmem:[#allocation16 + $0x1f0] sm:$0xff]  ;;  %v5852_v52 = vld [vmem:[#allocation16 + $0x1d8] sm:$0xff] }
 0xc09   : > { %6775 = vmatprep.subr.mxu1 %v5934_v18  ;;  %6917 = vmatprep.subr.mxu0 %v5936_v53  ;;  %v5851_v18 = vld [vmem:[#allocation16 + $0x1d0] sm:$0xff]  ;;  %v5848_v53 = vld [vmem:[#allocation16 + $0x1b8] sm:$0xff] }
 0xc0a   : > { %6776 = vmatpush1.msra.mxu1 %v5933_v11  ;;  %6918 = vmatpush1.msra.mxu0 %v5935_v62  ;;  %v12135_v11 = vld [vmem:[#allocation15 + $0x4] sm:$0x3]  ;;  %v5847_v62 = vld [vmem:[#allocation16 + $0x1b0] sm:$0xff] }
 0xc0b   : > { %6777 = vmatprep.subr.mxu1 %v5930_v13  ;;  %6919 = vmatprep.subr.mxu0 %v5932_v12  ;;  %v7173_v13 = vld [vmem:[#allocation16 + $0xfe8] sm:$0xff]  ;;  %v7172_v12 = vld [vmem:[#allocation16 + $0xfe0] sm:$0xff] }
 0xc0c   : > { %6778 = vmatpush1.msra.mxu1 %v5929_v24  ;;  %6920 = vmatpush1.msra.mxu0 %v5931_v46  ;;  %v5843_v24 = vld [vmem:[#allocation16 + $0x190] sm:$0xff]  ;;  %v5840_v46 = vld [vmem:[#allocation16 + $0x178] sm:$0xff] }
 0xc0d   : > { %6779 = vmatprep.subr.mxu1 %v5926_v15  ;;  %6921 = vmatprep.subr.mxu0 %v5928_v43  ;;  %v7168_v15 = vld [vmem:[#allocation16 + $0xfc0] sm:$0xff]  ;;  %v5839_v43 = vld [vmem:[#allocation16 + $0x170] sm:$0xff] }
 0xc0e   : > { %6780 = vmatpush1.msra.mxu1 %v5925_v39  ;;  %6922 = vmatpush1.msra.mxu0 %v5927_v57  ;;  %v7165_v39 = vld [vmem:[#allocation16 + $0xfa8] sm:$0xff]  ;;  %v5836_v57 = vld [vmem:[#allocation16 + $0x158] sm:$0xff] }
 0xc0f   : > { %6781 = vmatprep.subr.mxu1 %v5922_v54  ;;  %6923 = vmatprep.subr.mxu0 %v5924_v27  ;;  %v7164_v54 = vld [vmem:[#allocation16 + $0xfa0] sm:$0xff]  ;;  %v5835_v27 = vld [vmem:[#allocation16 + $0x150] sm:$0xff] }
 0xc10   : > { %6782 = vmatpush1.msra.mxu1 %v5921_v60  ;;  %6924 = vmatpush1.msra.mxu0 %v5923_v61  ;;  %v7161_v60 = vld [vmem:[#allocation16 + $0xf88] sm:$0xff]  ;;  %v5832_v61 = vld [vmem:[#allocation16 + $0x138] sm:$0xff] }
 0xc11   : > { %6799 = vmatprep.subr.mxu1 %v6014_v63  ;;  %6941 = vmatprep.subr.mxu0 %v6016_v4  ;;  %v7160_v63 = vld [vmem:[#allocation16 + $0xf80] sm:$0xff]  ;;  %v5831_v4 = vld [vmem:[#allocation16 + $0x130] sm:$0xff] }
 0xc12   : > { %6800 = vmatpush2.msra.mxu1 %v6013_v5  ;;  %6942 = vmatpush2.msra.mxu0 %v6015_v14  ;;  %v7157_v5 = vld [vmem:[#allocation16 + $0xf68] sm:$0xff]  ;;  %v5828_v14 = vld [vmem:[#allocation16 + $0x118] sm:$0xff] }
 0xc13   : > { %6801 = vmatprep.subr.mxu1 %v6010_v2  ;;  %6943 = vmatprep.subr.mxu0 %v6012_v8  ;;  %v5827_v2 = vld [vmem:[#allocation16 + $0x110] sm:$0xff]  ;;  %v5824_v8 = vld [vmem:[#allocation16 + $0xf8] sm:$0xff] }
 0xc14   : > { %6802 = vmatpush2.msra.mxu1 %v6009_v44  ;;  %6944 = vmatpush2.msra.mxu0 %v6011_v47  ;;  %v5823_v44 = vld [vmem:[#allocation16 + $0xf0] sm:$0xff]  ;;  %v7156_v47 = vld [vmem:[#allocation16 + $0xf60] sm:$0xff] }
 0xc15   : > { %6803 = vmatprep.subr.mxu1 %v6006_v34  ;;  %6945 = vmatprep.subr.mxu0 %v6008_v29  ;;  %v7153_v34 = vld [vmem:[#allocation16 + $0xf48] sm:$0xff]  ;;  %v5820_v29 = vld [vmem:[#allocation16 + $0xd8] sm:$0xff] }
 0xc16   : > { %6804 = vmatpush2.msra.mxu1 %v6005_v30  ;;  %6946 = vmatpush2.msra.mxu0 %v6007_v31  ;;  %v5819_v30 = vld [vmem:[#allocation16 + $0xd0] sm:$0xff]  ;;  %v7152_v31 = vld [vmem:[#allocation16 + $0xf40] sm:$0xff] }
 0xc17   : > { %6805 = vmatprep.subr.mxu1 %v6002_v21  ;;  %6947 = vmatprep.subr.mxu0 %v6004_v20  ;;  %v7149_v21 = vld [vmem:[#allocation16 + $0xf28] sm:$0xff]  ;;  %v7148_v20 = vld [vmem:[#allocation16 + $0xf20] sm:$0xff] }
 0xc18   : > { %6806 = vmatpush2.msra.mxu1 %v6001_v26  ;;  %6948 = vmatpush2.msra.mxu0 %v6003_v3  ;;  %v5816_v26 = vld [vmem:[#allocation16 + $0xb8] sm:$0xff]  ;;  %v7145_v3 = vld [vmem:[#allocation16 + $0xf08] sm:$0xff] }
 0xc19   : > { %6807 = vmatprep.subr.mxu1 %v5998_v9  ;;  %6949 = vmatprep.subr.mxu0 %v6000_v10  ;;  %v5815_v9 = vld [vmem:[#allocation16 + $0xb0] sm:$0xff]  ;;  %v7144_v10 = vld [vmem:[#allocation16 + $0xf00] sm:$0xff] }
 0xc1a   : > { %6808 = vmatpush2.msra.mxu1 %v5997_v40  ;;  %6950 = vmatpush2.msra.mxu0 %v5999_v42  ;;  %v5812_v40 = vld [vmem:[#allocation16 + $0x98] sm:$0xff]  ;;  %v7141_v42 = vld [vmem:[#allocation16 + $0xee8] sm:$0xff] }
 0xc1b   : > { %6809 = vmatprep.subr.mxu1 %v5994_v7  ;;  %6951 = vmatprep.subr.mxu0 %v5996_v35  ;;  %v5811_v7 = vld [vmem:[#allocation16 + $0x90] sm:$0xff]  ;;  %v7140_v35 = vld [vmem:[#allocation16 + $0xee0] sm:$0xff] }
 0xc1c   : > { %6810 = vmatpush2.msra.mxu1 %v5993_v45  ;;  %6952 = vmatpush2.msra.mxu0 %v5995_v48  ;;  %v5808_v45 = vld [vmem:[#allocation16 + $0x78] sm:$0xff]  ;;  %v7137_v48 = vld [vmem:[#allocation16 + $0xec8] sm:$0xff] }
 0xc1d   : > { %6811 = vmatprep.subr.mxu1 %v5990_v58  ;;  %6953 = vmatprep.subr.mxu0 %v5992_v28  ;;  %v5807_v58 = vld [vmem:[#allocation16 + $0x70] sm:$0xff]  ;;  %v7136_v28 = vld [vmem:[#allocation16 + $0xec0] sm:$0xff] }
 0xc1e   : > { %6812 = vmatpush2.msra.mxu1 %v5989_v1  ;;  %6954 = vmatpush2.msra.mxu0 %v5991_v6  ;;  %v5804_v1 = vld [vmem:[#allocation16 + $0x58] sm:$0xff]  ;;  %v7133_v6 = vld [vmem:[#allocation16 + $0xea8] sm:$0xff] }
 0xc1f   : > { %6813 = vmatprep.subr.mxu1 %v5986_v50  ;;  %6955 = vmatprep.subr.mxu0 %v5988_v51  ;;  %v5803_v50 = vld [vmem:[#allocation16 + $0x50] sm:$0xff]  ;;  %v7132_v51 = vld [vmem:[#allocation16 + $0xea0] sm:$0xff] }
 0xc20   : > { %6814 = vmatpush2.msra.mxu1 %v5985_v56  ;;  %6956 = vmatpush2.msra.mxu0 %v5987_v17  ;;  %v5800_v56 = vld [vmem:[#allocation16 + $0x38] sm:$0xff]  ;;  %v7129_v17 = vld [vmem:[#allocation16 + $0xe88] sm:$0xff] }
 0xc21   : > { %6816 = vmatmul.mubr.f32.vlgmr.msra.gmra.mxu1 %v12116_v33  ;;  %6822 = vmatprep.subr.mxu1 %v5856_v19  ;;  %v5799_v19 = vld [vmem:[#allocation16 + $0x30] sm:$0xff] }
 0xc22   : > { %6958 = vmatmul.mubr.f32.vlgmr.msra.gmra.mxu0 %v12116_v33  ;;  %10000 = vmatprep.subr.msk.mxu0 %vm5638_vm8, %v12060_v59  ;;  %v5844_v33 = vld [vmem:[#allocation16 + $0x198] sm:$0xff] }
 0xc23   : > { %6823 = vmatpush1.msra.mxu1 %v5855_v38  ;;  %6886 = vmatprep.mubr.f32.mxu1 %v12108_v41  ;;  %v7169_v41 = vld [vmem:[#allocation16 + $0xfc8] sm:$0xff]  ;;  %v7128_v38 = vld [vmem:[#allocation16 + $0xe80] sm:$0xff] }
 0xc24   : > { %10001 = vmatpush1.msk.msra.mxu0 %vm5638_vm8, %v12062_v55  ;;  %6824 = vmatprep.subr.mxu1 %v5852_v52  ;;  %v5796_v52 = vld [vmem:[#allocation16 + $0x18] sm:$0xff] }
 0xc25   : > { %6825 = vmatpush1.msra.mxu1 %v5851_v18  ;;  %7033 = vmatprep.mubr.f32.mxu0 %v11006_v0  ;;  %v7125_v18 = vld [vmem:[#allocation16 + $0xe68] sm:$0xff] }
 0xc26   : > { %6826 = vmatprep.subr.mxu1 %v5848_v53  ;;  %10002 = vmatmul.mubr.msk.f32.vlgmr.msra.gmra.mxu0 %vm5634_vm9, %v12135_v11  ;;  %v5795_v53 = vld [vmem:[#allocation16 + $0x10] sm:$0xff] }
 0xc27   : > { %6827 = vmatpush1.msra.mxu1 %v5847_v62  ;;  %7339 = vmatprep.subr.mxu0 %v7173_v13  ;;  %v7124_v62 = vld [vmem:[#allocation16 + $0xe60] sm:$0xff]  ;;  %v5920_v13 = vld [vmem:[#allocation16 + $0x3f8] sm:$0xff] }
 0xc28   : > { %6828 = vmatprep.subr.mxu1 %v5844_v33  ;;  %7340 = vmatpush1.msra.mxu0 %v7172_v12  ;;  %v7121_v33 = vld [vmem:[#allocation16 + $0xe48] sm:$0xff]  ;;  %v5919_v12 = vld [vmem:[#allocation16 + $0x3f0] sm:$0xff] }
 0xc29   : > { %6829 = vmatpush1.msra.mxu1 %v5843_v24  ;;  %7341 = vmatprep.subr.mxu0 %v7169_v41  ;;  %v7120_v24 = vld [vmem:[#allocation16 + $0xe40] sm:$0xff]  ;;  %v5916_v41 = vld [vmem:[#allocation16 + $0x3d8] sm:$0xff] }
 0xc2a   : > { %6830 = vmatprep.subr.mxu1 %v5840_v46  ;;  %7342 = vmatpush1.msra.mxu0 %v7168_v15  ;;  %v7117_v46 = vld [vmem:[#allocation16 + $0xe28] sm:$0xff]  ;;  %v5915_v15 = vld [vmem:[#allocation16 + $0x3d0] sm:$0xff] }
 0xc2b   : > { %6831 = vmatpush1.msra.mxu1 %v5839_v43  ;;  %7343 = vmatprep.subr.mxu0 %v7165_v39  ;;  %v7116_v43 = vld [vmem:[#allocation16 + $0xe20] sm:$0xff]  ;;  %v5912_v39 = vld [vmem:[#allocation16 + $0x3b8] sm:$0xff] }
 0xc2c   : > { %6832 = vmatprep.subr.mxu1 %v5836_v57  ;;  %7344 = vmatpush1.msra.mxu0 %v7164_v54  ;;  %v7113_v57 = vld [vmem:[#allocation16 + $0xe08] sm:$0xff]  ;;  %v5911_v54 = vld [vmem:[#allocation16 + $0x3b0] sm:$0xff] }
 0xc2d   : > { %6833 = vmatpush1.msra.mxu1 %v5835_v27  ;;  %7345 = vmatprep.subr.mxu0 %v7161_v60  ;;  %v7112_v27 = vld [vmem:[#allocation16 + $0xe00] sm:$0xff]  ;;  %v5908_v60 = vld [vmem:[#allocation16 + $0x398] sm:$0xff] }
 0xc2e   : > { %6834 = vmatprep.subr.mxu1 %v5832_v61  ;;  %7346 = vmatpush1.msra.mxu0 %v7160_v63  ;;  %v7237_v61 = vld [vmem:[#allocation16 + $0x11e8] sm:$0xff]  ;;  %v5907_v63 = vld [vmem:[#allocation16 + $0x390] sm:$0xff] }
 0xc2f   : > { %6835 = vmatpush1.msra.mxu1 %v5831_v4  ;;  %7347 = vmatprep.subr.mxu0 %v7157_v5  ;;  %v7236_v4 = vld [vmem:[#allocation16 + $0x11e0] sm:$0xff]  ;;  %v5904_v5 = vld [vmem:[#allocation16 + $0x378] sm:$0xff] }
 0xc30   : > { %6836 = vmatprep.subr.mxu1 %v5828_v14  ;;  %7348 = vmatpush1.msra.mxu0 %v7156_v47  ;;  %v7233_v14 = vld [vmem:[#allocation16 + $0x11c8] sm:$0xff] }
 0xc31   : > { %6837 = vmatpush1.msra.mxu1 %v5827_v2  ;;  %7349 = vmatprep.subr.mxu0 %v7153_v34  ;;  %v5903_v2 = vld [vmem:[#allocation16 + $0x370] sm:$0xff]  ;;  %v7229_v47 = vld [vmem:[#allocation16 + $0x11a8] sm:$0xff] }
 0xc32   : > { %6838 = vmatprep.subr.mxu1 %v5824_v8  ;;  %7350 = vmatpush1.msra.mxu0 %v7152_v31  ;;  %v7232_v8 = vld [vmem:[#allocation16 + $0x11c0] sm:$0xff]  ;;  %v5899_v34 = vld [vmem:[#allocation16 + $0x350] sm:$0xff]  ;;  %v7225_v31 = vld [vmem:[#allocation16 + $0x1188] sm:$0xff] }
 0xc33   : > { %6839 = vmatpush1.msra.mxu1 %v5823_v44  ;;  %7351 = vmatprep.subr.mxu0 %v7149_v21  ;;  %v5900_v44 = vld [vmem:[#allocation16 + $0x358] sm:$0xff]  ;;  %v5895_v21 = vld [vmem:[#allocation16 + $0x330] sm:$0xff] }
 0xc34   : > { %6840 = vmatprep.subr.mxu1 %v5820_v29  ;;  %7352 = vmatpush1.msra.mxu0 %v7148_v20  ;;  %v7228_v29 = vld [vmem:[#allocation16 + $0x11a0] sm:$0xff] }
 0xc35   : > { %6841 = vmatpush1.msra.mxu1 %v5819_v30  ;;  %7353 = vmatprep.subr.mxu0 %v7145_v3  ;;  %v5896_v30 = vld [vmem:[#allocation16 + $0x338] sm:$0xff]  ;;  %v7224_v20 = vld [vmem:[#allocation16 + $0x1180] sm:$0xff]  ;;  %v7221_v3 = vld [vmem:[#allocation16 + $0x1168] sm:$0xff] }
 0xc36   : > { %6842 = vmatprep.subr.mxu1 %v5816_v26  ;;  %7354 = vmatpush1.msra.mxu0 %v7144_v10  ;;  %v5892_v26 = vld [vmem:[#allocation16 + $0x318] sm:$0xff]  ;;  %v7220_v10 = vld [vmem:[#allocation16 + $0x1160] sm:$0xff] }
 0xc37   : > { %6843 = vmatpush1.msra.mxu1 %v5815_v9  ;;  %7355 = vmatprep.subr.mxu0 %v7141_v42  ;;  %v5891_v9 = vld [vmem:[#allocation16 + $0x310] sm:$0xff]  ;;  %v7217_v42 = vld [vmem:[#allocation16 + $0x1148] sm:$0xff] }
 0xc38   : > { %6844 = vmatprep.subr.mxu1 %v5812_v40  ;;  %7356 = vmatpush1.msra.mxu0 %v7140_v35  ;;  %v5888_v40 = vld [vmem:[#allocation16 + $0x2f8] sm:$0xff]  ;;  %v7216_v35 = vld [vmem:[#allocation16 + $0x1140] sm:$0xff] }
 0xc39   : > { %6845 = vmatpush1.msra.mxu1 %v5811_v7  ;;  %7357 = vmatprep.subr.mxu0 %v7137_v48  ;;  %v5887_v7 = vld [vmem:[#allocation16 + $0x2f0] sm:$0xff]  ;;  %v7213_v48 = vld [vmem:[#allocation16 + $0x1128] sm:$0xff] }
 0xc3a   : > { %6846 = vmatprep.subr.mxu1 %v5808_v45  ;;  %7358 = vmatpush1.msra.mxu0 %v7136_v28  ;;  %v5884_v45 = vld [vmem:[#allocation16 + $0x2d8] sm:$0xff]  ;;  %v7212_v28 = vld [vmem:[#allocation16 + $0x1120] sm:$0xff] }
 0xc3b   : > { %6847 = vmatpush1.msra.mxu1 %v5807_v58  ;;  %7359 = vmatprep.subr.mxu0 %v7133_v6  ;;  %v5883_v58 = vld [vmem:[#allocation16 + $0x2d0] sm:$0xff]  ;;  %v7209_v6 = vld [vmem:[#allocation16 + $0x1108] sm:$0xff] }
 0xc3c   : > { %6848 = vmatprep.subr.mxu1 %v5804_v1  ;;  %7360 = vmatpush1.msra.mxu0 %v7132_v51  ;;  %v5880_v1 = vld [vmem:[#allocation16 + $0x2b8] sm:$0xff]  ;;  %v7208_v51 = vld [vmem:[#allocation16 + $0x1100] sm:$0xff] }
 0xc3d   : > { %6849 = vmatpush1.msra.mxu1 %v5803_v50  ;;  %7361 = vmatprep.subr.mxu0 %v7129_v17  ;;  %v5879_v50 = vld [vmem:[#allocation16 + $0x2b0] sm:$0xff]  ;;  %v7205_v17 = vld [vmem:[#allocation16 + $0x10e8] sm:$0xff] }
 0xc3e   : > { %6850 = vmatprep.subr.mxu1 %v5800_v56  ;;  %7362 = vmatpush1.msra.mxu0 %v7128_v38  ;;  %v5876_v56 = vld [vmem:[#allocation16 + $0x298] sm:$0xff]  ;;  %v7204_v38 = vld [vmem:[#allocation16 + $0x10e0] sm:$0xff] }
 0xc3f   : > { %6851 = vmatpush1.msra.mxu1 %v5799_v19  ;;  %7363 = vmatprep.subr.mxu0 %v7125_v18  ;;  %v5875_v19 = vld [vmem:[#allocation16 + $0x290] sm:$0xff]  ;;  %v7201_v18 = vld [vmem:[#allocation16 + $0x10c8] sm:$0xff] }
 0xc40   : > { %6852 = vmatprep.subr.mxu1 %v5796_v52  ;;  %7364 = vmatpush1.msra.mxu0 %v7124_v62  ;;  %v5872_v52 = vld [vmem:[#allocation16 + $0x278] sm:$0xff]  ;;  %v7200_v62 = vld [vmem:[#allocation16 + $0x10c0] sm:$0xff] }
 0xc41   : > { %6853 = vmatpush1.msra.mxu1 %v5795_v53  ;;  %7365 = vmatprep.subr.mxu0 %v7121_v33  ;;  %v5871_v53 = vld [vmem:[#allocation16 + $0x270] sm:$0xff]  ;;  %v7197_v33 = vld [vmem:[#allocation16 + $0x10a8] sm:$0xff] }
 0xc42   : > { %6854 = vmatprep.subr.mxu1 %v5920_v13  ;;  %7366 = vmatpush1.msra.mxu0 %v7120_v24  ;;  %v5868_v13 = vld [vmem:[#allocation16 + $0x258] sm:$0xff]  ;;  %v7196_v24 = vld [vmem:[#allocation16 + $0x10a0] sm:$0xff] }
 0xc43   : > { %6855 = vmatpush2.msra.mxu1 %v5919_v12  ;;  %7367 = vmatprep.subr.mxu0 %v7117_v46  ;;  %v5867_v12 = vld [vmem:[#allocation16 + $0x250] sm:$0xff]  ;;  %v7193_v46 = vld [vmem:[#allocation16 + $0x1088] sm:$0xff] }
 0xc44   : > { %6856 = vmatprep.subr.mxu1 %v5916_v41  ;;  %7368 = vmatpush1.msra.mxu0 %v7116_v43  ;;  %v5864_v41 = vld [vmem:[#allocation16 + $0x238] sm:$0xff]  ;;  %v7192_v43 = vld [vmem:[#allocation16 + $0x1080] sm:$0xff] }
 0xc45   : > { %6857 = vmatpush2.msra.mxu1 %v5915_v15  ;;  %7369 = vmatprep.subr.mxu0 %v7113_v57  ;;  %v5863_v15 = vld [vmem:[#allocation16 + $0x230] sm:$0xff]  ;;  %v7189_v57 = vld [vmem:[#allocation16 + $0x1068] sm:$0xff] }
 0xc46   : > { %6858 = vmatprep.subr.mxu1 %v5912_v39  ;;  %7370 = vmatpush1.msra.mxu0 %v7112_v27  ;;  %v5860_v39 = vld [vmem:[#allocation16 + $0x218] sm:$0xff]  ;;  %v7188_v27 = vld [vmem:[#allocation16 + $0x1060] sm:$0xff] }
 0xc47   : > { %6859 = vmatpush2.msra.mxu1 %v5911_v54  ;;  %7371 = vmatprep.subr.mxu0 %v7237_v61  ;;  %v5859_v54 = vld [vmem:[#allocation16 + $0x210] sm:$0xff]  ;;  %v7184_v61 = vld [vmem:[#allocation16 + $0x1040] sm:$0xff] }
 0xc48   : > { %6860 = vmatprep.subr.mxu1 %v5908_v60  ;;  %7372 = vmatpush2.msra.mxu0 %v7236_v4  ;;  %v7185_v60 = vld [vmem:[#allocation16 + $0x1048] sm:$0xff]  ;;  %v7180_v4 = vld [vmem:[#allocation16 + $0x1020] sm:$0xff] }
 0xc49   : > { %6861 = vmatpush2.msra.mxu1 %v5907_v63  ;;  %7373 = vmatprep.subr.mxu0 %v7233_v14  ;;  %v7181_v63 = vld [vmem:[#allocation16 + $0x1028] sm:$0xff]  ;;  %v7303_v14 = vld [vmem:[#allocation16 + $0x13f8] sm:$0xff] }
 0xc4a   : > { %6862 = vmatprep.subr.mxu1 %v5904_v5  ;;  %7374 = vmatpush2.msra.mxu0 %v7232_v8  ;;  %v7176_v5 = vld [vmem:[#allocation16 + $0x1000] sm:$0xff] }
 0xc4b   : > { %6863 = vmatpush2.msra.mxu1 %v5903_v2  ;;  %7375 = vmatprep.subr.mxu0 %v7229_v47  ;;  %v6459_v2 = vpop.f32.mrf.mxu0 }
 0xc4c   : > { %6864 = vmatprep.subr.mxu1 %v5900_v44  ;;  %7376 = vmatpush2.msra.mxu0 %v7228_v29 }
 0xc4d   : > { %6865 = vmatpush2.msra.mxu1 %v5899_v34  ;;  %7377 = vmatprep.subr.mxu0 %v7225_v31  ;;  %v6461_v47 = vpop.f32.mrf.mxu0  ;;  %v7297_v31 = vld [vmem:[#allocation16 + $0x13c8] sm:$0xff] }
 0xc4e   : > { %6866 = vmatprep.subr.mxu1 %v5896_v30  ;;  %7378 = vmatpush2.msra.mxu0 %v7224_v20  ;;  %v7301_v30 = vld [vmem:[#allocation16 + $0x13e8] sm:$0xff] }
 0xc4f   : > { %6867 = vmatpush2.msra.mxu1 %v5895_v21  ;;  %7379 = vmatprep.subr.mxu0 %v7221_v3  ;;  %v7296_v21 = vld [vmem:[#allocation16 + $0x13c0] sm:$0xff]  ;;  %v7293_v20 = vld [vmem:[#allocation16 + $0x13a8] sm:$0xff] }
 0xc50   : > { %6868 = vmatprep.subr.mxu1 %v5892_v26  ;;  %7380 = vmatpush2.msra.mxu0 %v7220_v10  ;;  %v7292_v26 = vld [vmem:[#allocation16 + $0x13a0] sm:$0xff]  ;;  %v7289_v3 = vld [vmem:[#allocation16 + $0x1388] sm:$0xff] }
 0xc51   : > { %6869 = vmatpush2.msra.mxu1 %v5891_v9  ;;  %7381 = vmatprep.subr.mxu0 %v7217_v42  ;;  %v7288_v9 = vld [vmem:[#allocation16 + $0x1380] sm:$0xff]  ;;  %v7285_v10 = vld [vmem:[#allocation16 + $0x1368] sm:$0xff] }
 0xc52   : > { %6870 = vmatprep.subr.mxu1 %v5888_v40  ;;  %7382 = vmatpush2.msra.mxu0 %v7216_v35  ;;  %v7284_v40 = vld [vmem:[#allocation16 + $0x1360] sm:$0xff]  ;;  %v7281_v42 = vld [vmem:[#allocation16 + $0x1348] sm:$0xff] }
 0xc53   : > { %6871 = vmatpush2.msra.mxu1 %v5887_v7  ;;  %7383 = vmatprep.subr.mxu0 %v7213_v48  ;;  %v7280_v7 = vld [vmem:[#allocation16 + $0x1340] sm:$0xff]  ;;  %v7277_v35 = vld [vmem:[#allocation16 + $0x1328] sm:$0xff] }
 0xc54   : > { %6872 = vmatprep.subr.mxu1 %v5884_v45  ;;  %7384 = vmatpush2.msra.mxu0 %v7212_v28  ;;  %v7276_v45 = vld [vmem:[#allocation16 + $0x1320] sm:$0xff]  ;;  %v7273_v48 = vld [vmem:[#allocation16 + $0x1308] sm:$0xff] }
 0xc55   : > { %6873 = vmatpush2.msra.mxu1 %v5883_v58  ;;  %7385 = vmatprep.subr.mxu0 %v7209_v6  ;;  %v7272_v58 = vld [vmem:[#allocation16 + $0x1300] sm:$0xff]  ;;  %v7269_v28 = vld [vmem:[#allocation16 + $0x12e8] sm:$0xff] }
 0xc56   : > { %6874 = vmatprep.subr.mxu1 %v5880_v1  ;;  %7386 = vmatpush2.msra.mxu0 %v7208_v51  ;;  %v7268_v1 = vld [vmem:[#allocation16 + $0x12e0] sm:$0xff]  ;;  %v7265_v6 = vld [vmem:[#allocation16 + $0x12c8] sm:$0xff] }
 0xc57   : > { %6875 = vmatpush2.msra.mxu1 %v5879_v50  ;;  %7387 = vmatprep.subr.mxu0 %v7205_v17  ;;  %v7264_v50 = vld [vmem:[#allocation16 + $0x12c0] sm:$0xff]  ;;  %v7261_v51 = vld [vmem:[#allocation16 + $0x12a8] sm:$0xff] }
 0xc58   : > { %6876 = vmatprep.subr.mxu1 %v5876_v56  ;;  %7388 = vmatpush2.msra.mxu0 %v7204_v38  ;;  %v7260_v56 = vld [vmem:[#allocation16 + $0x12a0] sm:$0xff]  ;;  %v7257_v17 = vld [vmem:[#allocation16 + $0x1288] sm:$0xff] }
 0xc59   : > { %6877 = vmatpush2.msra.mxu1 %v5875_v19  ;;  %7389 = vmatprep.subr.mxu0 %v7201_v18  ;;  %v7256_v19 = vld [vmem:[#allocation16 + $0x1280] sm:$0xff]  ;;  %v7253_v38 = vld [vmem:[#allocation16 + $0x1268] sm:$0xff] }
 0xc5a   : > { %6878 = vmatprep.subr.mxu1 %v5872_v52  ;;  %7390 = vmatpush2.msra.mxu0 %v7200_v62  ;;  %v7252_v52 = vld [vmem:[#allocation16 + $0x1260] sm:$0xff]  ;;  %v7249_v18 = vld [vmem:[#allocation16 + $0x1248] sm:$0xff] }
 0xc5b   : > { %6879 = vmatpush2.msra.mxu1 %v5871_v53  ;;  %7391 = vmatprep.subr.mxu0 %v7197_v33  ;;  %v7248_v53 = vld [vmem:[#allocation16 + $0x1240] sm:$0xff]  ;;  %v7245_v62 = vld [vmem:[#allocation16 + $0x1228] sm:$0xff] }
 0xc5c   : > { %6880 = vmatprep.subr.mxu1 %v5868_v13  ;;  %7392 = vmatpush2.msra.mxu0 %v7196_v24  ;;  %v7244_v13 = vld [vmem:[#allocation16 + $0x1220] sm:$0xff]  ;;  %v7241_v33 = vld [vmem:[#allocation16 + $0x1208] sm:$0xff] }
 0xc5d   : > { %6881 = vmatpush2.msra.mxu1 %v5867_v12  ;;  %7393 = vmatprep.subr.mxu0 %v7193_v46  ;;  %v7240_v12 = vld [vmem:[#allocation16 + $0x1200] sm:$0xff]  ;;  %v7333_v24 = vld [vmem:[#allocation16 + $0x14e8] sm:$0xff] }
 0xc5e   : > { %6882 = vmatprep.subr.mxu1 %v5864_v41  ;;  %7394 = vmatpush2.msra.mxu0 %v7192_v43  ;;  %v7332_v41 = vld [vmem:[#allocation16 + $0x14e0] sm:$0xff]  ;;  %v7329_v46 = vld [vmem:[#allocation16 + $0x14c8] sm:$0xff] }
 0xc5f   : > { %6883 = vmatpush2.msra.mxu1 %v5863_v15  ;;  %7395 = vmatprep.subr.mxu0 %v7189_v57  ;;  %v7328_v15 = vld [vmem:[#allocation16 + $0x14c0] sm:$0xff]  ;;  %v7325_v43 = vld [vmem:[#allocation16 + $0x14a8] sm:$0xff] }
 0xc60   : > { %6884 = vmatprep.subr.mxu1 %v5860_v39  ;;  %7396 = vmatpush2.msra.mxu0 %v7188_v27  ;;  %v7324_v39 = vld [vmem:[#allocation16 + $0x14a0] sm:$0xff]  ;;  %v7321_v57 = vld [vmem:[#allocation16 + $0x1488] sm:$0xff] }
 0xc61   : > { %6885 = vmatpush2.msra.mxu1 %v5859_v54  ;;  %7397 = vmatprep.subr.mxu0 %v7185_v60  ;;  %v7320_v54 = vld [vmem:[#allocation16 + $0x1480] sm:$0xff]  ;;  %v7317_v27 = vld [vmem:[#allocation16 + $0x1468] sm:$0xff] }
 0xc62   : > { %6887 = vmatmul.mubr.f32.vlgmr.msra.gmra.mxu1 %v12106_v37  ;;  %10003 = vmatprep.subr.msk.mxu1 %vm5638_vm8, %v12089_v23  ;;  %v7177_v37 = vld [vmem:[#allocation16 + $0x1008] sm:$0xff]  ;;  %v7316_v60 = vld [vmem:[#allocation16 + $0x1460] sm:$0xff] }
 0xc63   : > { %10004 = vmatpush1.msk.msra.mxu1 %vm5638_vm8, %v12091_v16  ;;  %7104 = vmatprep.mubr.f32.mxu1 %v11006_v0 }
 0xc64   : > { %7398 = vmatpush2.msra.mxu0 %v7184_v61  ;;  %7410 = vmatprep.subr.mxu1 %v7301_v30  ;;  %v7313_v61 = vld [vmem:[#allocation16 + $0x1448] sm:$0xff] }
 0xc65   : > { %7399 = vmatprep.subr.mxu0 %v7181_v63  ;;  %v7312_v63 = vld [vmem:[#allocation16 + $0x1440] sm:$0xff] }
 0xc66   : > { %10005 = vmatmul.mubr.msk.f32.vlgmr.msra.gmra.mxu1 %vm5634_vm9, %v12135_v11  ;;  %7400 = vmatpush2.msra.mxu0 %v7180_v4  ;;  %v7300_v11 = vld [vmem:[#allocation16 + $0x13e0] sm:$0xff]  ;;  %v7309_v4 = vld [vmem:[#allocation16 + $0x1428] sm:$0xff] }
 0xc67   : > { %7401 = vmatprep.subr.mxu0 %v7177_v37  ;;  %7411 = vmatpush1.msra.mxu1 %v7300_v11  ;;  %v7308_v37 = vld [vmem:[#allocation16 + $0x1420] sm:$0xff] }
 0xc68   : > { %7402 = vmatpush2.msra.mxu0 %v7176_v5  ;;  %7412 = vmatprep.subr.mxu1 %v7297_v31  ;;  %v7305_v5 = vld [vmem:[#allocation16 + $0x1408] sm:$0xff] }
 0xc69   : > { %7552 = vmatprep.subr.mxu0 %v7303_v14  ;;  %7413 = vmatpush1.msra.mxu1 %v7296_v21  ;;  %v7304_v14 = vld [vmem:[#allocation16 + $0x1400] sm:$0xff] }
 0xc6a   : > { %7414 = vmatprep.subr.mxu1 %v7293_v20 }
 0xc6b   : > { %7415 = vmatpush1.msra.mxu1 %v7292_v26 }
 0xc6c   : > { %7416 = vmatprep.subr.mxu1 %v7289_v3 }
 0xc6d   : > { %7417 = vmatpush1.msra.mxu1 %v7288_v9 }
 0xc6e   : > { %v6530_v8 = vpop.f32.mrf.mxu1  ;;  %7418 = vmatprep.subr.mxu1 %v7285_v10 }
 0xc6f   : > { %v12150_v44 = vadd.f32 %v6530_v8, %v6459_v2  ;;  %7419 = vmatpush1.msra.mxu1 %v7284_v40  ;;  %v6672_v2 = vpop.f32.mrf.mxu0  ;;  %v7175_v8 = vld [vmem:[#allocation16 + $0xff8] sm:$0xff] }
 0xc70   : > { %v6532_v34 = vpop.f32.mrf.mxu1  ;;  %7420 = vmatprep.subr.mxu1 %v7281_v42 }
 0xc71   : > { %v12152_v29 = vadd.f32 %v6532_v34, %v6461_v47  ;;  %7421 = vmatpush1.msra.mxu1 %v7280_v7  ;;  %v6674_v47 = vpop.f32.mrf.mxu0 }
 0xc72   : > { %7422 = vmatprep.subr.mxu1 %v7277_v35 }
 0xc73   : > { %7423 = vmatpush1.msra.mxu1 %v7276_v45 }
 0xc74   : > { %7424 = vmatprep.subr.mxu1 %v7273_v48 }
 0xc75   : > { %7425 = vmatpush1.msra.mxu1 %v7272_v58  ;;  %v7299_v58 = vld [vmem:[#allocation16 + $0x13d8] sm:$0xff] }
 0xc76   : > { %7426 = vmatprep.subr.mxu1 %v7269_v28  ;;  %v7295_v28 = vld [vmem:[#allocation16 + $0x13b8] sm:$0xff] }
 0xc77   : > { %7427 = vmatpush1.msra.mxu1 %v7268_v1  ;;  %v7294_v1 = vld [vmem:[#allocation16 + $0x13b0] sm:$0xff] }
 0xc78   : > { %7428 = vmatprep.subr.mxu1 %v7265_v6  ;;  %v7291_v6 = vld [vmem:[#allocation16 + $0x1398] sm:$0xff] }
 0xc79   : > { %7429 = vmatpush1.msra.mxu1 %v7264_v50  ;;  %v7290_v50 = vld [vmem:[#allocation16 + $0x1390] sm:$0xff] }
 0xc7a   : > { %7430 = vmatprep.subr.mxu1 %v7261_v51  ;;  %v7287_v51 = vld [vmem:[#allocation16 + $0x1378] sm:$0xff] }
 0xc7b   : > { %7431 = vmatpush1.msra.mxu1 %v7260_v56  ;;  %v7286_v56 = vld [vmem:[#allocation16 + $0x1370] sm:$0xff] }
 0xc7c   : > { %7432 = vmatprep.subr.mxu1 %v7257_v17  ;;  %v7283_v17 = vld [vmem:[#allocation16 + $0x1358] sm:$0xff] }
 0xc7d   : > { %7433 = vmatpush1.msra.mxu1 %v7256_v19  ;;  %v7282_v19 = vld [vmem:[#allocation16 + $0x1350] sm:$0xff] }
 0xc7e   : > { %7434 = vmatprep.subr.mxu1 %v7253_v38  ;;  %v7279_v38 = vld [vmem:[#allocation16 + $0x1338] sm:$0xff] }
 0xc7f   : > { %7435 = vmatpush1.msra.mxu1 %v7252_v52  ;;  %v7278_v52 = vld [vmem:[#allocation16 + $0x1330] sm:$0xff] }
 0xc80   : > { %7436 = vmatprep.subr.mxu1 %v7249_v18  ;;  %v7275_v18 = vld [vmem:[#allocation16 + $0x1318] sm:$0xff] }
 0xc81   : > { %7437 = vmatpush1.msra.mxu1 %v7248_v53  ;;  %v7274_v53 = vld [vmem:[#allocation16 + $0x1310] sm:$0xff] }
 0xc82   : > { %7438 = vmatprep.subr.mxu1 %v7245_v62  ;;  %v7271_v62 = vld [vmem:[#allocation16 + $0x12f8] sm:$0xff] }
 0xc83   : > { %7439 = vmatpush1.msra.mxu1 %v7244_v13  ;;  %v7270_v13 = vld [vmem:[#allocation16 + $0x12f0] sm:$0xff] }
 0xc84   : > { %7440 = vmatprep.subr.mxu1 %v7241_v33  ;;  %v7267_v33 = vld [vmem:[#allocation16 + $0x12d8] sm:$0xff] }
 0xc85   : > { %7441 = vmatpush1.msra.mxu1 %v7240_v12  ;;  %v7266_v12 = vld [vmem:[#allocation16 + $0x12d0] sm:$0xff] }
 0xc86   : > { %7458 = vmatprep.subr.mxu1 %v7333_v24  ;;  %v7263_v24 = vld [vmem:[#allocation16 + $0x12b8] sm:$0xff] }
 0xc87   : > { %7459 = vmatpush2.msra.mxu1 %v7332_v41  ;;  %v7262_v41 = vld [vmem:[#allocation16 + $0x12b0] sm:$0xff] }
 0xc88   : > { %7460 = vmatprep.subr.mxu1 %v7329_v46  ;;  %v7259_v46 = vld [vmem:[#allocation16 + $0x1298] sm:$0xff] }
 0xc89   : > { %7461 = vmatpush2.msra.mxu1 %v7328_v15  ;;  %v7258_v15 = vld [vmem:[#allocation16 + $0x1290] sm:$0xff] }
 0xc8a   : > { %7462 = vmatprep.subr.mxu1 %v7325_v43  ;;  %v7255_v43 = vld [vmem:[#allocation16 + $0x1278] sm:$0xff] }
 0xc8b   : > { %7463 = vmatpush2.msra.mxu1 %v7324_v39  ;;  %v7254_v39 = vld [vmem:[#allocation16 + $0x1270] sm:$0xff] }
 0xc8c   : > { %7464 = vmatprep.subr.mxu1 %v7321_v57  ;;  %v7251_v57 = vld [vmem:[#allocation16 + $0x1258] sm:$0xff] }
 0xc8d   : > { %7465 = vmatpush2.msra.mxu1 %v7320_v54  ;;  %v7250_v54 = vld [vmem:[#allocation16 + $0x1250] sm:$0xff] }
 0xc8e   : > { %7466 = vmatprep.subr.mxu1 %v7317_v27  ;;  %v7247_v27 = vld [vmem:[#allocation16 + $0x1238] sm:$0xff] }
 0xc8f   : > { %7467 = vmatpush2.msra.mxu1 %v7316_v60  ;;  %v7246_v60 = vld [vmem:[#allocation16 + $0x1230] sm:$0xff] }
 0xc90   : > { %7468 = vmatprep.subr.mxu1 %v7313_v61  ;;  %v7243_v61 = vld [vmem:[#allocation16 + $0x1218] sm:$0xff] }
 0xc91   : > { %7469 = vmatpush2.msra.mxu1 %v7312_v63  ;;  %v7242_v63 = vld [vmem:[#allocation16 + $0x1210] sm:$0xff] }
 0xc92   : > { %7470 = vmatprep.subr.mxu1 %v7309_v4  ;;  %v7335_v4 = vld [vmem:[#allocation16 + $0x14f8] sm:$0xff] }
 0xc93   : > { %7471 = vmatpush2.msra.mxu1 %v7308_v37  ;;  %v7334_v37 = vld [vmem:[#allocation16 + $0x14f0] sm:$0xff] }
 0xc94   : > { %7472 = vmatprep.subr.mxu1 %v7305_v5  ;;  %v7331_v5 = vld [vmem:[#allocation16 + $0x14d8] sm:$0xff] }
 0xc95   : > { %7473 = vmatpush2.msra.mxu1 %v7304_v14  ;;  %v7330_v14 = vld [vmem:[#allocation16 + $0x14d0] sm:$0xff] }
 0xc96   : > { %7481 = vmatprep.subr.mxu1 %v7175_v8  ;;  %v7326_v8 = vld [vmem:[#allocation16 + $0x14b0] sm:$0xff] }
 0xcaf   : > { %v6601_v34 = vpop.f32.mrf.mxu1  ;;  %v6746_v30 = vpop.f32.mrf.mxu0 }
 0xcb0   : > { %v12154_v11 = vadd.f32 %v6672_v2, %v6601_v34  ;;  %v6747_v31 = vadd.f32 %v6746_v30, %v12150_v44  ;;  %v7302_v44 = vld [vmem:[#allocation16 + $0x13f0] sm:$0xff]  ;;  %v7327_v2 = vld [vmem:[#allocation16 + $0x14b8] sm:$0xff] }
 0xcb1   : > { %v6603_v21 = vpop.f32.mrf.mxu1  ;;  %v6748_v20 = vpop.f32.mrf.mxu0  ;;  %v7322_v34 = vld [vmem:[#allocation16 + $0x1490] sm:$0xff]  ;;  %v7319_v30 = vld [vmem:[#allocation16 + $0x1478] sm:$0xff] }
 0xcb2   : > { %v12157_v26 = vadd.f32 %v6674_v47, %v6603_v21  ;;  %v6749_v3 = vadd.f32 %v6748_v20, %v12152_v29  ;;  %v7298_v29 = vld [vmem:[#allocation16 + $0x13d0] sm:$0xff]  ;;  %v7323_v47 = vld [vmem:[#allocation16 + $0x1498] sm:$0xff] }
 0xcb3   : > { %v7315_v21 = vld [vmem:[#allocation16 + $0x1458] sm:$0xff]  ;;  %v7314_v20 = vld [vmem:[#allocation16 + $0x1450] sm:$0xff] }
 0xce1   : > { %v6817_v9 = vpop.f32.mrf.mxu1 }
 0xce2   : > { %v12160_v10 = vadd.f32 %v6817_v9, %v6747_v31  ;;  %v12162_v40 = vpop.f32.mrf.mxu0  ;;  %v7318_v31 = vld [vmem:[#allocation16 + $0x1470] sm:$0xff] }
 0xce3   : > { %v6819_v42 = vpop.f32.mrf.mxu1  ;;  %v7310_v9 = vld [vmem:[#allocation16 + $0x1430] sm:$0xff] }
 0xce4   : > { %v12164_v7 = vadd.f32 %v6819_v42, %v6749_v3  ;;  %v12166_v35 = vpop.f32.mrf.mxu0  ;;  %v7311_v3 = vld [vmem:[#allocation16 + $0x1438] sm:$0xff] }
 0xce5   : > { %v7307_v42 = vld [vmem:[#allocation16 + $0x1418] sm:$0xff] }
 0xce6   : > { %v12168_v45 = vpop.f32.mrf.mxu0 }
 0xce8   : > { %v12170_v48 = vpop.f32.mrf.mxu0 }
 0xce9   : > { %7403 = vmatprep.mubr.f32.mxu0 %v12170_v48 }
 0xcea   : > { %7404 = vmatmul.mubr.f32.vlgmr.msra.gmra.mxu0 %v12168_v45 }
 0xceb   : > { %7553 = vmatpush1.msra.mxu0 %v7302_v44  ;;  %v7306_v44 = vld [vmem:[#allocation16 + $0x1410] sm:$0xff] }
 0xcec   : > { %7554 = vmatprep.subr.mxu0 %v7299_v58 }
 0xced   : > { %7555 = vmatpush1.msra.mxu0 %v7298_v29 }
 0xcee   : > { %7556 = vmatprep.subr.mxu0 %v7295_v28 }
 0xcef   : > { %7557 = vmatpush1.msra.mxu0 %v7294_v1 }
 0xcf0   : > { %7558 = vmatprep.subr.mxu0 %v7291_v6 }
 0xcf1   : > { %7559 = vmatpush1.msra.mxu0 %v7290_v50 }
 0xcf2   : > { %7560 = vmatprep.subr.mxu0 %v7287_v51  ;;  %v7174_v51 = vld [vmem:[#allocation16 + $0xff0] sm:$0xff] }
 0xcf3   : > { %7561 = vmatpush1.msra.mxu0 %v7286_v56  ;;  %v7171_v56 = vld [vmem:[#allocation16 + $0xfd8] sm:$0xff] }
 0xcf4   : > { %7562 = vmatprep.subr.mxu0 %v7283_v17  ;;  %v7170_v17 = vld [vmem:[#allocation16 + $0xfd0] sm:$0xff] }
 0xcf5   : > { %7563 = vmatpush1.msra.mxu0 %v7282_v19  ;;  %v12186_v19 = vld [vmem:[#allocation15 + $0x6] sm:$0x3] }
 0xcf6   : > { %7564 = vmatprep.subr.mxu0 %v7279_v38  ;;  %v7836_v38 = vld [vmem:[#allocation16 + $0x16e8] sm:$0xff] }
 0xcf7   : > { %7565 = vmatpush1.msra.mxu0 %v7278_v52  ;;  %v7163_v52 = vld [vmem:[#allocation16 + $0xf98] sm:$0xff] }
 0xcf8   : > { %7566 = vmatprep.subr.mxu0 %v7275_v18  ;;  %v7835_v18 = vld [vmem:[#allocation16 + $0x16e0] sm:$0xff] }
 0xcf9   : > { %7567 = vmatpush1.msra.mxu0 %v7274_v53  ;;  %v7162_v53 = vld [vmem:[#allocation16 + $0xf90] sm:$0xff] }
 0xcfa   : > { %7568 = vmatprep.subr.mxu0 %v7271_v62  ;;  %v7832_v62 = vld [vmem:[#allocation16 + $0x16c8] sm:$0xff] }
 0xcfb   : > { %7569 = vmatpush1.msra.mxu0 %v7270_v13  ;;  %v7159_v13 = vld [vmem:[#allocation16 + $0xf78] sm:$0xff] }
 0xcfc   : > { %7570 = vmatprep.subr.mxu0 %v7267_v33  ;;  %v7831_v33 = vld [vmem:[#allocation16 + $0x16c0] sm:$0xff] }
 0xcfd   : > { %7571 = vmatpush1.msra.mxu0 %v7266_v12  ;;  %v7158_v12 = vld [vmem:[#allocation16 + $0xf70] sm:$0xff] }
 0xcfe   : > { %7572 = vmatprep.subr.mxu0 %v7263_v24  ;;  %v7828_v24 = vld [vmem:[#allocation16 + $0x16a8] sm:$0xff] }
 0xcff   : > { %7573 = vmatpush1.msra.mxu0 %v7262_v41  ;;  %v7155_v41 = vld [vmem:[#allocation16 + $0xf58] sm:$0xff] }
 0xd00   : > { %7574 = vmatprep.subr.mxu0 %v7259_v46  ;;  %v7827_v46 = vld [vmem:[#allocation16 + $0x16a0] sm:$0xff] }
 0xd01   : > { %7575 = vmatpush1.msra.mxu0 %v7258_v15  ;;  %v7824_v15 = vld [vmem:[#allocation16 + $0x1688] sm:$0xff] }
 0xd02   : > { %7576 = vmatprep.subr.mxu0 %v7255_v43  ;;  %v7151_v43 = vld [vmem:[#allocation16 + $0xf38] sm:$0xff] }
 0xd03   : > { %7577 = vmatpush1.msra.mxu0 %v7254_v39  ;;  %v7823_v39 = vld [vmem:[#allocation16 + $0x1680] sm:$0xff] }
 0xd04   : > { %7578 = vmatprep.subr.mxu0 %v7251_v57  ;;  %v7150_v57 = vld [vmem:[#allocation16 + $0xf30] sm:$0xff] }
 0xd05   : > { %7579 = vmatpush1.msra.mxu0 %v7250_v54  ;;  %v7820_v54 = vld [vmem:[#allocation16 + $0x1668] sm:$0xff] }
 0xd06   : > { %7580 = vmatprep.subr.mxu0 %v7247_v27  ;;  %v7147_v27 = vld [vmem:[#allocation16 + $0xf18] sm:$0xff] }
 0xd07   : > { %7581 = vmatpush1.msra.mxu0 %v7246_v60  ;;  %v7819_v60 = vld [vmem:[#allocation16 + $0x1660] sm:$0xff] }
 0xd08   : > { %7582 = vmatprep.subr.mxu0 %v7243_v61  ;;  %v7146_v61 = vld [vmem:[#allocation16 + $0xf10] sm:$0xff] }
 0xd09   : > { %7583 = vmatpush1.msra.mxu0 %v7242_v63  ;;  %v7816_v63 = vld [vmem:[#allocation16 + $0x1648] sm:$0xff] }
 0xd0a   : > { %7600 = vmatprep.subr.mxu0 %v7335_v4  ;;  %v7143_v4 = vld [vmem:[#allocation16 + $0xef8] sm:$0xff] }
 0xd0b   : > { %7601 = vmatpush2.msra.mxu0 %v7334_v37  ;;  %v7815_v37 = vld [vmem:[#allocation16 + $0x1640] sm:$0xff] }
 0xd0c   : > { %7602 = vmatprep.subr.mxu0 %v7331_v5  ;;  %v7142_v5 = vld [vmem:[#allocation16 + $0xef0] sm:$0xff] }
 0xd0d   : > { %7603 = vmatpush2.msra.mxu0 %v7330_v14  ;;  %v7812_v14 = vld [vmem:[#allocation16 + $0x1628] sm:$0xff] }
 0xd0e   : > { %7604 = vmatprep.subr.mxu0 %v7327_v2  ;;  %v7139_v2 = vld [vmem:[#allocation16 + $0xed8] sm:$0xff] }
 0xd0f   : > { %7605 = vmatpush2.msra.mxu0 %v7326_v8  ;;  %v7811_v8 = vld [vmem:[#allocation16 + $0x1620] sm:$0xff] }
 0xd10   : > { %7606 = vmatprep.subr.mxu0 %v7323_v47  ;;  %v7138_v47 = vld [vmem:[#allocation16 + $0xed0] sm:$0xff] }
 0xd11   : > { %7607 = vmatpush2.msra.mxu0 %v7322_v34  ;;  %v7808_v34 = vld [vmem:[#allocation16 + $0x1608] sm:$0xff] }
 0xd12   : > { %7608 = vmatprep.subr.mxu0 %v7319_v30  ;;  %v7135_v30 = vld [vmem:[#allocation16 + $0xeb8] sm:$0xff] }
 0xd13   : > { %7609 = vmatpush2.msra.mxu0 %v7318_v31  ;;  %v7807_v31 = vld [vmem:[#allocation16 + $0x1600] sm:$0xff] }
 0xd14   : > { %7610 = vmatprep.subr.mxu0 %v7315_v21  ;;  %v7134_v21 = vld [vmem:[#allocation16 + $0xeb0] sm:$0xff] }
 0xd15   : > { %7611 = vmatpush2.msra.mxu0 %v7314_v20  ;;  %v7804_v20 = vld [vmem:[#allocation16 + $0x15e8] sm:$0xff] }
 0xd16   : > { %7612 = vmatprep.subr.mxu0 %v7311_v3  ;;  %v7131_v3 = vld [vmem:[#allocation16 + $0xe98] sm:$0xff] }
 0xd17   : > { %7613 = vmatpush2.msra.mxu0 %v7310_v9  ;;  %v7803_v9 = vld [vmem:[#allocation16 + $0x15e0] sm:$0xff] }
 0xd18   : > { %7614 = vmatprep.subr.mxu0 %v7307_v42  ;;  %v7130_v42 = vld [vmem:[#allocation16 + $0xe90] sm:$0xff] }
 0xd19   : > { %7615 = vmatpush2.msra.mxu0 %v7306_v44  ;;  %v7800_v44 = vld [vmem:[#allocation16 + $0x15c8] sm:$0xff] }
 0xd1a   : > { %10008 = vmatprep.subr.msk.mxu0 %vm5638_vm8, %v12060_v59 }
 0xd22   : > { %v6888_v58 = vpop.f32.mrf.mxu1 }
 0xd23   : > { %v12177_v29 = vadd.f32 %v6888_v58, %v12154_v11  ;;  %v7167_v11 = vld [vmem:[#allocation16 + $0xfb8] sm:$0xff] }
 0xd24   : > { %v6890_v28 = vpop.f32.mrf.mxu1  ;;  %v7127_v58 = vld [vmem:[#allocation16 + $0xe78] sm:$0xff] }
 0xd25   : > { %v12180_v1 = vadd.f32 %v6890_v28, %v12157_v26  ;;  %v7166_v26 = vld [vmem:[#allocation16 + $0xfb0] sm:$0xff]  ;;  %v7799_v28 = vld [vmem:[#allocation16 + $0x15c0] sm:$0xff] }
 0xd26   : > { %v7106_v6 = vpop.f32.mrf.mxu1 }
 0xd28   : > { %v7108_v50 = vpop.f32.mrf.mxu1 }
 0xd29   : > { %10006 = vmatprep.mubr.msk.f32.mxu1 %vm6389_vm10, %v7108_v50  ;;  %10007 = vmatprep.mubr.msk.f32.mxu0 %vm6389_vm10, %v7108_v50  ;;  %v7796_v50 = vld [vmem:[#allocation16 + $0x15a8] sm:$0xff] }
 0xd2a   : > { %7475 = vmatmul.mubr.f32.vlgmr.msra.gmra.mxu1 %v7106_v6  ;;  %7617 = vmatmul.mubr.f32.vlgmr.msra.gmra.mxu0 %v7106_v6  ;;  %v7126_v6 = vld [vmem:[#allocation16 + $0xe70] sm:$0xff] }
 0xd2b   : > { %7482 = vmatpush1.msra.mxu1 %v7174_v51  ;;  %10009 = vmatpush1.msk.msra.mxu0 %vm5638_vm8, %v12062_v55  ;;  %v7123_v51 = vld [vmem:[#allocation16 + $0xe58] sm:$0xff] }
 0xd2c   : > { %7483 = vmatprep.subr.mxu1 %v7171_v56  ;;  %7696 = vmatprep.mubr.f32.mxu0 %v11006_v0  ;;  %v7795_v56 = vld [vmem:[#allocation16 + $0x15a0] sm:$0xff] }
 0xd2d   : > { %7484 = vmatpush1.msra.mxu1 %v7170_v17  ;;  %7545 = vmatprep.mubr.f32.mxu1 %v12170_v48  ;;  %v7154_v48 = vld [vmem:[#allocation16 + $0xf50] sm:$0xff] }
 0xd2e   : > { %7485 = vmatprep.subr.mxu1 %v7167_v11  ;;  %10010 = vmatmul.mubr.msk.f32.vlgmr.msra.gmra.mxu0 %vm5634_vm9, %v12186_v19  ;;  %v7122_v17 = vld [vmem:[#allocation16 + $0xe50] sm:$0xff]  ;;  %v7792_v11 = vld [vmem:[#allocation16 + $0x1588] sm:$0xff] }
 0xd2f   : > { %7486 = vmatpush1.msra.mxu1 %v7166_v26  ;;  %8002 = vmatprep.subr.mxu0 %v7836_v38  ;;  %v7119_v26 = vld [vmem:[#allocation16 + $0xe38] sm:$0xff]  ;;  %v7791_v38 = vld [vmem:[#allocation16 + $0x1580] sm:$0xff] }
 0xd30   : > { %7487 = vmatprep.subr.mxu1 %v7163_v52  ;;  %8003 = vmatpush1.msra.mxu0 %v7835_v18  ;;  %v7118_v52 = vld [vmem:[#allocation16 + $0xe30] sm:$0xff]  ;;  %v7788_v18 = vld [vmem:[#allocation16 + $0x1568] sm:$0xff] }
 0xd31   : > { %7488 = vmatpush1.msra.mxu1 %v7162_v53  ;;  %8004 = vmatprep.subr.mxu0 %v7832_v62  ;;  %v7115_v53 = vld [vmem:[#allocation16 + $0xe18] sm:$0xff]  ;;  %v7787_v62 = vld [vmem:[#allocation16 + $0x1560] sm:$0xff] }
 0xd32   : > { %7489 = vmatprep.subr.mxu1 %v7159_v13  ;;  %8005 = vmatpush1.msra.mxu0 %v7831_v33  ;;  %v7114_v13 = vld [vmem:[#allocation16 + $0xe10] sm:$0xff]  ;;  %v7784_v33 = vld [vmem:[#allocation16 + $0x1548] sm:$0xff] }
 0xd33   : > { %7490 = vmatpush1.msra.mxu1 %v7158_v12  ;;  %8006 = vmatprep.subr.mxu0 %v7828_v24  ;;  %v7239_v12 = vld [vmem:[#allocation16 + $0x11f8] sm:$0xff]  ;;  %v7783_v24 = vld [vmem:[#allocation16 + $0x1540] sm:$0xff] }
 0xd34   : > { %7491 = vmatprep.subr.mxu1 %v7155_v41  ;;  %8007 = vmatpush1.msra.mxu0 %v7827_v46  ;;  %v7238_v41 = vld [vmem:[#allocation16 + $0x11f0] sm:$0xff]  ;;  %v7780_v46 = vld [vmem:[#allocation16 + $0x1528] sm:$0xff] }
 0xd35   : > { %7492 = vmatpush1.msra.mxu1 %v7154_v48  ;;  %8008 = vmatprep.subr.mxu0 %v7824_v15  ;;  %v7235_v48 = vld [vmem:[#allocation16 + $0x11d8] sm:$0xff]  ;;  %v7779_v15 = vld [vmem:[#allocation16 + $0x1520] sm:$0xff] }
 0xd36   : > { %7493 = vmatprep.subr.mxu1 %v7151_v43  ;;  %8009 = vmatpush1.msra.mxu0 %v7823_v39  ;;  %v7234_v43 = vld [vmem:[#allocation16 + $0x11d0] sm:$0xff]  ;;  %v7776_v39 = vld [vmem:[#allocation16 + $0x1508] sm:$0xff] }
 0xd37   : > { %7494 = vmatpush1.msra.mxu1 %v7150_v57  ;;  %8010 = vmatprep.subr.mxu0 %v7820_v54  ;;  %v7231_v57 = vld [vmem:[#allocation16 + $0x11b8] sm:$0xff]  ;;  %v7775_v54 = vld [vmem:[#allocation16 + $0x1500] sm:$0xff] }
 0xd38   : > { %7495 = vmatprep.subr.mxu1 %v7147_v27  ;;  %8011 = vmatpush1.msra.mxu0 %v7819_v60  ;;  %v7230_v27 = vld [vmem:[#allocation16 + $0x11b0] sm:$0xff]  ;;  %v7900_v60 = vld [vmem:[#allocation16 + $0x18e8] sm:$0xff] }
 0xd39   : > { %7496 = vmatpush1.msra.mxu1 %v7146_v61  ;;  %8012 = vmatprep.subr.mxu0 %v7816_v63  ;;  %v7227_v61 = vld [vmem:[#allocation16 + $0x1198] sm:$0xff]  ;;  %v7899_v63 = vld [vmem:[#allocation16 + $0x18e0] sm:$0xff] }
 0xd3a   : > { %7497 = vmatprep.subr.mxu1 %v7143_v4  ;;  %8013 = vmatpush1.msra.mxu0 %v7815_v37  ;;  %v7226_v4 = vld [vmem:[#allocation16 + $0x1190] sm:$0xff]  ;;  %v7896_v37 = vld [vmem:[#allocation16 + $0x18c8] sm:$0xff] }
 0xd3b   : > { %7498 = vmatpush1.msra.mxu1 %v7142_v5  ;;  %8014 = vmatprep.subr.mxu0 %v7812_v14  ;;  %v7223_v5 = vld [vmem:[#allocation16 + $0x1178] sm:$0xff]  ;;  %v7895_v14 = vld [vmem:[#allocation16 + $0x18c0] sm:$0xff] }
 0xd3c   : > { %7499 = vmatprep.subr.mxu1 %v7139_v2  ;;  %8015 = vmatpush1.msra.mxu0 %v7811_v8  ;;  %v7222_v2 = vld [vmem:[#allocation16 + $0x1170] sm:$0xff]  ;;  %v7892_v8 = vld [vmem:[#allocation16 + $0x18a8] sm:$0xff] }
 0xd3d   : > { %7500 = vmatpush1.msra.mxu1 %v7138_v47  ;;  %8016 = vmatprep.subr.mxu0 %v7808_v34  ;;  %v7219_v47 = vld [vmem:[#allocation16 + $0x1158] sm:$0xff]  ;;  %v7891_v34 = vld [vmem:[#allocation16 + $0x18a0] sm:$0xff] }
 0xd3e   : > { %7501 = vmatprep.subr.mxu1 %v7135_v30  ;;  %8017 = vmatpush1.msra.mxu0 %v7807_v31  ;;  %v7218_v30 = vld [vmem:[#allocation16 + $0x1150] sm:$0xff]  ;;  %v7888_v31 = vld [vmem:[#allocation16 + $0x1888] sm:$0xff] }
 0xd3f   : > { %7502 = vmatpush1.msra.mxu1 %v7134_v21  ;;  %8018 = vmatprep.subr.mxu0 %v7804_v20  ;;  %v7215_v21 = vld [vmem:[#allocation16 + $0x1138] sm:$0xff]  ;;  %v7887_v20 = vld [vmem:[#allocation16 + $0x1880] sm:$0xff] }
 0xd40   : > { %7503 = vmatprep.subr.mxu1 %v7131_v3  ;;  %8019 = vmatpush1.msra.mxu0 %v7803_v9  ;;  %v7214_v3 = vld [vmem:[#allocation16 + $0x1130] sm:$0xff]  ;;  %v7884_v9 = vld [vmem:[#allocation16 + $0x1868] sm:$0xff] }
 0xd41   : > { %7504 = vmatpush1.msra.mxu1 %v7130_v42  ;;  %8020 = vmatprep.subr.mxu0 %v7800_v44  ;;  %v7211_v42 = vld [vmem:[#allocation16 + $0x1118] sm:$0xff]  ;;  %v7883_v44 = vld [vmem:[#allocation16 + $0x1860] sm:$0xff] }
 0xd42   : > { %7505 = vmatprep.subr.mxu1 %v7127_v58  ;;  %8021 = vmatpush1.msra.mxu0 %v7799_v28  ;;  %v7210_v58 = vld [vmem:[#allocation16 + $0x1110] sm:$0xff]  ;;  %v7880_v28 = vld [vmem:[#allocation16 + $0x1848] sm:$0xff] }
 0xd43   : > { %7506 = vmatpush1.msra.mxu1 %v7126_v6  ;;  %8022 = vmatprep.subr.mxu0 %v7796_v50  ;;  %v7207_v6 = vld [vmem:[#allocation16 + $0x10f8] sm:$0xff]  ;;  %v7879_v50 = vld [vmem:[#allocation16 + $0x1840] sm:$0xff] }
 0xd44   : > { %7507 = vmatprep.subr.mxu1 %v7123_v51  ;;  %8023 = vmatpush1.msra.mxu0 %v7795_v56  ;;  %v7206_v51 = vld [vmem:[#allocation16 + $0x10f0] sm:$0xff]  ;;  %v7876_v56 = vld [vmem:[#allocation16 + $0x1828] sm:$0xff] }
 0xd45   : > { %7508 = vmatpush1.msra.mxu1 %v7122_v17  ;;  %8024 = vmatprep.subr.mxu0 %v7792_v11  ;;  %v7203_v17 = vld [vmem:[#allocation16 + $0x10d8] sm:$0xff]  ;;  %v7875_v11 = vld [vmem:[#allocation16 + $0x1820] sm:$0xff] }
 0xd46   : > { %7509 = vmatprep.subr.mxu1 %v7119_v26  ;;  %8025 = vmatpush1.msra.mxu0 %v7791_v38  ;;  %v7202_v26 = vld [vmem:[#allocation16 + $0x10d0] sm:$0xff]  ;;  %v7872_v38 = vld [vmem:[#allocation16 + $0x1808] sm:$0xff] }
 0xd47   : > { %7510 = vmatpush1.msra.mxu1 %v7118_v52  ;;  %8026 = vmatprep.subr.mxu0 %v7788_v18  ;;  %v7199_v52 = vld [vmem:[#allocation16 + $0x10b8] sm:$0xff]  ;;  %v7871_v18 = vld [vmem:[#allocation16 + $0x1800] sm:$0xff] }
 0xd48   : > { %7511 = vmatprep.subr.mxu1 %v7115_v53  ;;  %8027 = vmatpush1.msra.mxu0 %v7787_v62  ;;  %v7198_v53 = vld [vmem:[#allocation16 + $0x10b0] sm:$0xff]  ;;  %v7868_v62 = vld [vmem:[#allocation16 + $0x17e8] sm:$0xff] }
 0xd49   : > { %7512 = vmatpush1.msra.mxu1 %v7114_v13  ;;  %8028 = vmatprep.subr.mxu0 %v7784_v33  ;;  %v7195_v13 = vld [vmem:[#allocation16 + $0x1098] sm:$0xff]  ;;  %v7867_v33 = vld [vmem:[#allocation16 + $0x17e0] sm:$0xff] }
 0xd4a   : > { %7513 = vmatprep.subr.mxu1 %v7239_v12  ;;  %8029 = vmatpush1.msra.mxu0 %v7783_v24  ;;  %v7194_v12 = vld [vmem:[#allocation16 + $0x1090] sm:$0xff]  ;;  %v7864_v24 = vld [vmem:[#allocation16 + $0x17c8] sm:$0xff] }
 0xd4b   : > { %7514 = vmatpush2.msra.mxu1 %v7238_v41  ;;  %8030 = vmatprep.subr.mxu0 %v7780_v46  ;;  %v7191_v41 = vld [vmem:[#allocation16 + $0x1078] sm:$0xff]  ;;  %v7863_v46 = vld [vmem:[#allocation16 + $0x17c0] sm:$0xff] }
 0xd4c   : > { %7515 = vmatprep.subr.mxu1 %v7235_v48  ;;  %8031 = vmatpush1.msra.mxu0 %v7779_v15  ;;  %v7190_v48 = vld [vmem:[#allocation16 + $0x1070] sm:$0xff]  ;;  %v7860_v15 = vld [vmem:[#allocation16 + $0x17a8] sm:$0xff] }
 0xd4d   : > { %7516 = vmatpush2.msra.mxu1 %v7234_v43  ;;  %8032 = vmatprep.subr.mxu0 %v7776_v39  ;;  %v7187_v43 = vld [vmem:[#allocation16 + $0x1058] sm:$0xff]  ;;  %v7859_v39 = vld [vmem:[#allocation16 + $0x17a0] sm:$0xff] }
 0xd4e   : > { %7517 = vmatprep.subr.mxu1 %v7231_v57  ;;  %8033 = vmatpush1.msra.mxu0 %v7775_v54  ;;  %v7186_v57 = vld [vmem:[#allocation16 + $0x1050] sm:$0xff]  ;;  %v7856_v54 = vld [vmem:[#allocation16 + $0x1788] sm:$0xff] }
 0xd4f   : > { %7518 = vmatpush2.msra.mxu1 %v7230_v27  ;;  %8034 = vmatprep.subr.mxu0 %v7900_v60  ;;  %v7183_v27 = vld [vmem:[#allocation16 + $0x1038] sm:$0xff]  ;;  %v7855_v60 = vld [vmem:[#allocation16 + $0x1780] sm:$0xff] }
 0xd50   : > { %7519 = vmatprep.subr.mxu1 %v7227_v61  ;;  %8035 = vmatpush2.msra.mxu0 %v7899_v63  ;;  %v7182_v61 = vld [vmem:[#allocation16 + $0x1030] sm:$0xff]  ;;  %v7852_v63 = vld [vmem:[#allocation16 + $0x1768] sm:$0xff] }
 0xd51   : > { %7520 = vmatpush2.msra.mxu1 %v7226_v4  ;;  %8036 = vmatprep.subr.mxu0 %v7896_v37  ;;  %v7179_v4 = vld [vmem:[#allocation16 + $0x1018] sm:$0xff]  ;;  %v7178_v37 = vld [vmem:[#allocation16 + $0x1010] sm:$0xff] }
 0xd52   : > { %7521 = vmatprep.subr.mxu1 %v7223_v5  ;;  %8037 = vmatpush2.msra.mxu0 %v7895_v14  ;;  %v7851_v5 = vld [vmem:[#allocation16 + $0x1760] sm:$0xff]  ;;  %v7848_v14 = vld [vmem:[#allocation16 + $0x1748] sm:$0xff] }
 0xd53   : > { %7522 = vmatpush2.msra.mxu1 %v7222_v2  ;;  %8038 = vmatprep.subr.mxu0 %v7892_v8  ;;  %v7847_v2 = vld [vmem:[#allocation16 + $0x1740] sm:$0xff]  ;;  %v7844_v8 = vld [vmem:[#allocation16 + $0x1728] sm:$0xff] }
 0xd54   : > { %7523 = vmatprep.subr.mxu1 %v7219_v47  ;;  %8039 = vmatpush2.msra.mxu0 %v7891_v34  ;;  %v7840_v47 = vld [vmem:[#allocation16 + $0x1708] sm:$0xff]  ;;  %v7839_v34 = vld [vmem:[#allocation16 + $0x1700] sm:$0xff] }
 0xd55   : > { %7524 = vmatpush2.msra.mxu1 %v7218_v30  ;;  %8040 = vmatprep.subr.mxu0 %v7888_v31  ;;  %v7966_v30 = vld [vmem:[#allocation16 + $0x1af8] sm:$0xff]  ;;  %v7964_v31 = vld [vmem:[#allocation16 + $0x1ae8] sm:$0xff] }
 0xd56   : > { %7525 = vmatprep.subr.mxu1 %v7215_v21  ;;  %8041 = vmatpush2.msra.mxu0 %v7887_v20  ;;  %v7963_v21 = vld [vmem:[#allocation16 + $0x1ae0] sm:$0xff]  ;;  %v7960_v20 = vld [vmem:[#allocation16 + $0x1ac8] sm:$0xff] }
 0xd57   : > { %7526 = vmatpush2.msra.mxu1 %v7214_v3  ;;  %8042 = vmatprep.subr.mxu0 %v7884_v9  ;;  %v7959_v3 = vld [vmem:[#allocation16 + $0x1ac0] sm:$0xff] }
 0xd58   : > { %7527 = vmatprep.subr.mxu1 %v7211_v42  ;;  %8043 = vmatpush2.msra.mxu0 %v7883_v44  ;;  %v7955_v9 = vld [vmem:[#allocation16 + $0x1aa0] sm:$0xff]  ;;  %v7952_v42 = vld [vmem:[#allocation16 + $0x1a88] sm:$0xff] }
 0xd59   : > { %7528 = vmatpush2.msra.mxu1 %v7210_v58  ;;  %8044 = vmatprep.subr.mxu0 %v7880_v28  ;;  %v7951_v44 = vld [vmem:[#allocation16 + $0x1a80] sm:$0xff]  ;;  %v7948_v58 = vld [vmem:[#allocation16 + $0x1a68] sm:$0xff] }
 0xd5a   : > { %7529 = vmatprep.subr.mxu1 %v7207_v6  ;;  %8045 = vmatpush2.msra.mxu0 %v7879_v50  ;;  %v7947_v28 = vld [vmem:[#allocation16 + $0x1a60] sm:$0xff]  ;;  %v7944_v6 = vld [vmem:[#allocation16 + $0x1a48] sm:$0xff] }
 0xd5b   : > { %7530 = vmatpush2.msra.mxu1 %v7206_v51  ;;  %8046 = vmatprep.subr.mxu0 %v7876_v56  ;;  %v7943_v50 = vld [vmem:[#allocation16 + $0x1a40] sm:$0xff]  ;;  %v7940_v51 = vld [vmem:[#allocation16 + $0x1a28] sm:$0xff] }
 0xd5c   : > { %7531 = vmatprep.subr.mxu1 %v7203_v17  ;;  %8047 = vmatpush2.msra.mxu0 %v7875_v11  ;;  %v7939_v56 = vld [vmem:[#allocation16 + $0x1a20] sm:$0xff]  ;;  %v7936_v17 = vld [vmem:[#allocation16 + $0x1a08] sm:$0xff] }
 0xd5d   : > { %7532 = vmatpush2.msra.mxu1 %v7202_v26  ;;  %8048 = vmatprep.subr.mxu0 %v7872_v38  ;;  %v7935_v11 = vld [vmem:[#allocation16 + $0x1a00] sm:$0xff]  ;;  %v7932_v26 = vld [vmem:[#allocation16 + $0x19e8] sm:$0xff] }
 0xd5e   : > { %7533 = vmatprep.subr.mxu1 %v7199_v52  ;;  %8049 = vmatpush2.msra.mxu0 %v7871_v18  ;;  %v7931_v38 = vld [vmem:[#allocation16 + $0x19e0] sm:$0xff]  ;;  %v7928_v52 = vld [vmem:[#allocation16 + $0x19c8] sm:$0xff] }
 0xd5f   : > { %7534 = vmatpush2.msra.mxu1 %v7198_v53  ;;  %8050 = vmatprep.subr.mxu0 %v7868_v62  ;;  %v7927_v18 = vld [vmem:[#allocation16 + $0x19c0] sm:$0xff]  ;;  %v7924_v53 = vld [vmem:[#allocation16 + $0x19a8] sm:$0xff] }
 0xd60   : > { %7535 = vmatprep.subr.mxu1 %v7195_v13  ;;  %8051 = vmatpush2.msra.mxu0 %v7867_v33  ;;  %v7923_v62 = vld [vmem:[#allocation16 + $0x19a0] sm:$0xff]  ;;  %v7920_v13 = vld [vmem:[#allocation16 + $0x1988] sm:$0xff] }
 0xd61   : > { %7536 = vmatpush2.msra.mxu1 %v7194_v12  ;;  %8052 = vmatprep.subr.mxu0 %v7864_v24  ;;  %v7919_v33 = vld [vmem:[#allocation16 + $0x1980] sm:$0xff]  ;;  %v7916_v12 = vld [vmem:[#allocation16 + $0x1968] sm:$0xff] }
 0xd62   : > { %7537 = vmatprep.subr.mxu1 %v7191_v41  ;;  %8053 = vmatpush2.msra.mxu0 %v7863_v46  ;;  %v7915_v24 = vld [vmem:[#allocation16 + $0x1960] sm:$0xff]  ;;  %v7912_v41 = vld [vmem:[#allocation16 + $0x1948] sm:$0xff] }
 0xd63   : > { %7538 = vmatpush2.msra.mxu1 %v7190_v48  ;;  %8054 = vmatprep.subr.mxu0 %v7860_v15  ;;  %v7911_v46 = vld [vmem:[#allocation16 + $0x1940] sm:$0xff]  ;;  %v7908_v48 = vld [vmem:[#allocation16 + $0x1928] sm:$0xff] }
 0xd64   : > { %7539 = vmatprep.subr.mxu1 %v7187_v43  ;;  %8055 = vmatpush2.msra.mxu0 %v7859_v39  ;;  %v7907_v15 = vld [vmem:[#allocation16 + $0x1920] sm:$0xff]  ;;  %v7904_v43 = vld [vmem:[#allocation16 + $0x1908] sm:$0xff] }
 0xd65   : > { %7540 = vmatpush2.msra.mxu1 %v7186_v57  ;;  %8056 = vmatprep.subr.mxu0 %v7856_v54  ;;  %v7903_v39 = vld [vmem:[#allocation16 + $0x1900] sm:$0xff]  ;;  %v7996_v57 = vld [vmem:[#allocation16 + $0x1be8] sm:$0xff] }
 0xd66   : > { %7541 = vmatprep.subr.mxu1 %v7183_v27  ;;  %8057 = vmatpush2.msra.mxu0 %v7855_v60  ;;  %v7995_v54 = vld [vmem:[#allocation16 + $0x1be0] sm:$0xff]  ;;  %v7992_v27 = vld [vmem:[#allocation16 + $0x1bc8] sm:$0xff] }
 0xd67   : > { %7542 = vmatpush2.msra.mxu1 %v7182_v61  ;;  %8058 = vmatprep.subr.mxu0 %v7852_v63  ;;  %v7991_v60 = vld [vmem:[#allocation16 + $0x1bc0] sm:$0xff]  ;;  %v7988_v61 = vld [vmem:[#allocation16 + $0x1ba8] sm:$0xff] }
 0xd68   : > { %7543 = vmatprep.subr.mxu1 %v7179_v4  ;;  %8059 = vmatpush2.msra.mxu0 %v7851_v5  ;;  %v7987_v63 = vld [vmem:[#allocation16 + $0x1ba0] sm:$0xff]  ;;  %v7984_v4 = vld [vmem:[#allocation16 + $0x1b88] sm:$0xff] }
 0xd69   : > { %7544 = vmatpush2.msra.mxu1 %v7178_v37  ;;  %8060 = vmatprep.subr.mxu0 %v7848_v14  ;;  %v7983_v37 = vld [vmem:[#allocation16 + $0x1b80] sm:$0xff]  ;;  %v7980_v5 = vld [vmem:[#allocation16 + $0x1b68] sm:$0xff] }
 0xd6a   : > { %7546 = vmatmul.mubr.f32.vlgmr.msra.gmra.mxu1 %v12168_v45  ;;  %10011 = vmatprep.subr.msk.mxu1 %vm5638_vm8, %v12089_v23  ;;  %v7843_v45 = vld [vmem:[#allocation16 + $0x1720] sm:$0xff] }
 0xd6b   : > { %10012 = vmatpush1.msk.msra.mxu1 %vm5638_vm8, %v12091_v16  ;;  %7767 = vmatprep.mubr.f32.mxu1 %v11006_v0  ;;  %v7979_v14 = vld [vmem:[#allocation16 + $0x1b60] sm:$0xff] }
 0xd6c   : > { %8061 = vmatpush2.msra.mxu0 %v7847_v2  ;;  %8073 = vmatprep.subr.mxu1 %v7964_v31  ;;  %v7976_v2 = vld [vmem:[#allocation16 + $0x1b48] sm:$0xff]  ;;  %v7838_v31 = vld [vmem:[#allocation16 + $0x16f8] sm:$0xff] }
 0xd6d   : > { %8062 = vmatprep.subr.mxu0 %v7844_v8  ;;  %v7975_v8 = vld [vmem:[#allocation16 + $0x1b40] sm:$0xff] }
 0xd6e   : > { %10013 = vmatmul.mubr.msk.f32.vlgmr.msra.gmra.mxu1 %vm5634_vm9, %v12186_v19  ;;  %8063 = vmatpush2.msra.mxu0 %v7843_v45  ;;  %v7956_v19 = vld [vmem:[#allocation16 + $0x1aa8] sm:$0xff] }
 0xd6f   : > { %8064 = vmatprep.subr.mxu0 %v7840_v47  ;;  %8074 = vmatpush1.msra.mxu1 %v7963_v21  ;;  %v7972_v45 = vld [vmem:[#allocation16 + $0x1b28] sm:$0xff]  ;;  %v7971_v47 = vld [vmem:[#allocation16 + $0x1b20] sm:$0xff] }
 0xd70   : > { %8065 = vmatpush2.msra.mxu0 %v7839_v34  ;;  %8075 = vmatprep.subr.mxu1 %v7960_v20  ;;  %v7968_v34 = vld [vmem:[#allocation16 + $0x1b08] sm:$0xff] }
 0xd71   : > { %8215 = vmatprep.subr.mxu0 %v7966_v30  ;;  %8076 = vmatpush1.msra.mxu1 %v7959_v3  ;;  %v7967_v30 = vld [vmem:[#allocation16 + $0x1b00] sm:$0xff] }
 0xd72   : > { %8077 = vmatprep.subr.mxu1 %v7956_v19 }
 0xd73   : > { %8078 = vmatpush1.msra.mxu1 %v7955_v9 }
 0xd74   : > { %8079 = vmatprep.subr.mxu1 %v7952_v42 }
 0xd75   : > { %8080 = vmatpush1.msra.mxu1 %v7951_v44 }
 0xd76   : > { %8081 = vmatprep.subr.mxu1 %v7948_v58 }
 0xd77   : > { %8082 = vmatpush1.msra.mxu1 %v7947_v28 }
 0xd78   : > { %8083 = vmatprep.subr.mxu1 %v7944_v6 }
 0xd79   : > { %8084 = vmatpush1.msra.mxu1 %v7943_v50 }
 0xd7a   : > { %8085 = vmatprep.subr.mxu1 %v7940_v51 }
 0xd7b   : > { %8086 = vmatpush1.msra.mxu1 %v7939_v56  ;;  %v7965_v56 = vld [vmem:[#allocation16 + $0x1af0] sm:$0xff] }
 0xd7c   : > { %8087 = vmatprep.subr.mxu1 %v7936_v17  ;;  %v7962_v17 = vld [vmem:[#allocation16 + $0x1ad8] sm:$0xff] }
 0xd7d   : > { %8088 = vmatpush1.msra.mxu1 %v7935_v11  ;;  %v7961_v11 = vld [vmem:[#allocation16 + $0x1ad0] sm:$0xff] }
 0xd7e   : > { %8089 = vmatprep.subr.mxu1 %v7932_v26  ;;  %v7958_v26 = vld [vmem:[#allocation16 + $0x1ab8] sm:$0xff] }
 0xd7f   : > { %8090 = vmatpush1.msra.mxu1 %v7931_v38  ;;  %v7954_v38 = vld [vmem:[#allocation16 + $0x1a98] sm:$0xff] }
 0xd80   : > { %8091 = vmatprep.subr.mxu1 %v7928_v52  ;;  %v7953_v52 = vld [vmem:[#allocation16 + $0x1a90] sm:$0xff] }
 0xd81   : > { %8092 = vmatpush1.msra.mxu1 %v7927_v18  ;;  %v7949_v18 = vld [vmem:[#allocation16 + $0x1a70] sm:$0xff] }
 0xd82   : > { %8093 = vmatprep.subr.mxu1 %v7924_v53  ;;  %v7946_v53 = vld [vmem:[#allocation16 + $0x1a58] sm:$0xff] }
 0xd83   : > { %8094 = vmatpush1.msra.mxu1 %v7923_v62  ;;  %v7945_v62 = vld [vmem:[#allocation16 + $0x1a50] sm:$0xff] }
 0xd84   : > { %8095 = vmatprep.subr.mxu1 %v7920_v13  ;;  %v7942_v13 = vld [vmem:[#allocation16 + $0x1a38] sm:$0xff] }
 0xd85   : > { %8096 = vmatpush1.msra.mxu1 %v7919_v33  ;;  %v7941_v33 = vld [vmem:[#allocation16 + $0x1a30] sm:$0xff] }
 0xd86   : > { %8097 = vmatprep.subr.mxu1 %v7916_v12  ;;  %v7938_v12 = vld [vmem:[#allocation16 + $0x1a18] sm:$0xff] }
 0xd87   : > { %8098 = vmatpush1.msra.mxu1 %v7915_v24  ;;  %v7937_v24 = vld [vmem:[#allocation16 + $0x1a10] sm:$0xff] }
 0xd88   : > { %8099 = vmatprep.subr.mxu1 %v7912_v41  ;;  %v7934_v41 = vld [vmem:[#allocation16 + $0x19f8] sm:$0xff] }
 0xd89   : > { %8100 = vmatpush1.msra.mxu1 %v7911_v46  ;;  %v7933_v46 = vld [vmem:[#allocation16 + $0x19f0] sm:$0xff] }
 0xd8a   : > { %8101 = vmatprep.subr.mxu1 %v7908_v48  ;;  %v7930_v48 = vld [vmem:[#allocation16 + $0x19d8] sm:$0xff] }
 0xd8b   : > { %8102 = vmatpush1.msra.mxu1 %v7907_v15  ;;  %v7929_v15 = vld [vmem:[#allocation16 + $0x19d0] sm:$0xff] }
 0xd8c   : > { %8103 = vmatprep.subr.mxu1 %v7904_v43  ;;  %v7926_v43 = vld [vmem:[#allocation16 + $0x19b8] sm:$0xff] }
 0xd8d   : > { %8104 = vmatpush1.msra.mxu1 %v7903_v39  ;;  %v7925_v39 = vld [vmem:[#allocation16 + $0x19b0] sm:$0xff] }
 0xd8e   : > { %8121 = vmatprep.subr.mxu1 %v7996_v57  ;;  %v7922_v57 = vld [vmem:[#allocation16 + $0x1998] sm:$0xff] }
 0xd8f   : > { %8122 = vmatpush2.msra.mxu1 %v7995_v54  ;;  %v7921_v54 = vld [vmem:[#allocation16 + $0x1990] sm:$0xff] }
 0xd90   : > { %8123 = vmatprep.subr.mxu1 %v7992_v27  ;;  %v7918_v27 = vld [vmem:[#allocation16 + $0x1978] sm:$0xff] }
 0xd91   : > { %8124 = vmatpush2.msra.mxu1 %v7991_v60  ;;  %v7917_v60 = vld [vmem:[#allocation16 + $0x1970] sm:$0xff] }
 0xd92   : > { %8125 = vmatprep.subr.mxu1 %v7988_v61  ;;  %v7914_v61 = vld [vmem:[#allocation16 + $0x1958] sm:$0xff] }
 0xd93   : > { %8126 = vmatpush2.msra.mxu1 %v7987_v63  ;;  %v7913_v63 = vld [vmem:[#allocation16 + $0x1950] sm:$0xff] }
 0xd94   : > { %8127 = vmatprep.subr.mxu1 %v7984_v4  ;;  %v7910_v4 = vld [vmem:[#allocation16 + $0x1938] sm:$0xff] }
 0xd95   : > { %8128 = vmatpush2.msra.mxu1 %v7983_v37  ;;  %v7909_v37 = vld [vmem:[#allocation16 + $0x1930] sm:$0xff] }
 0xd96   : > { %8129 = vmatprep.subr.mxu1 %v7980_v5  ;;  %v7906_v5 = vld [vmem:[#allocation16 + $0x1918] sm:$0xff] }
 0xd97   : > { %8130 = vmatpush2.msra.mxu1 %v7979_v14  ;;  %v7905_v14 = vld [vmem:[#allocation16 + $0x1910] sm:$0xff] }
 0xd98   : > { %8131 = vmatprep.subr.mxu1 %v7976_v2  ;;  %v7998_v2 = vld [vmem:[#allocation16 + $0x1bf8] sm:$0xff] }
 0xd99   : > { %8132 = vmatpush2.msra.mxu1 %v7975_v8  ;;  %v7997_v8 = vld [vmem:[#allocation16 + $0x1bf0] sm:$0xff] }
 0xd9a   : > { %8133 = vmatprep.subr.mxu1 %v7972_v45  ;;  %v7994_v45 = vld [vmem:[#allocation16 + $0x1bd8] sm:$0xff] }
 0xd9b   : > { %8134 = vmatpush2.msra.mxu1 %v7971_v47  ;;  %v7993_v47 = vld [vmem:[#allocation16 + $0x1bd0] sm:$0xff] }
 0xd9c   : > { %8135 = vmatprep.subr.mxu1 %v7968_v34  ;;  %v7990_v34 = vld [vmem:[#allocation16 + $0x1bb8] sm:$0xff] }
 0xd9d   : > { %8136 = vmatpush2.msra.mxu1 %v7967_v30  ;;  %v7989_v30 = vld [vmem:[#allocation16 + $0x1bb0] sm:$0xff] }
 0xd9e   : > { %8144 = vmatprep.subr.mxu1 %v7838_v31  ;;  %v7986_v31 = vld [vmem:[#allocation16 + $0x1b98] sm:$0xff] }
 0xdaa   : > { %v7405_v21 = vpop.f32.mrf.mxu0 }
 0xdac   : > { %v7407_v20 = vpop.f32.mrf.mxu0 }
 0xdea   : > { %v7476_v3 = vpop.f32.mrf.mxu1  ;;  %v12200_v19 = vpop.f32.mrf.mxu0 }
 0xdeb   : > { %v7477_v9 = vadd.f32 %v7476_v3, %v7405_v21  ;;  %v7985_v21 = vld [vmem:[#allocation16 + $0x1b90] sm:$0xff] }
 0xdec   : > { %v7478_v42 = vpop.f32.mrf.mxu1  ;;  %v12202_v44 = vpop.f32.mrf.mxu0  ;;  %v7981_v3 = vld [vmem:[#allocation16 + $0x1b70] sm:$0xff] }
 0xded   : > { %v12205_v58 = vadd.f32 %v7477_v9, %v12160_v10  ;;  %v7479_v28 = vadd.f32 %v7478_v42, %v7407_v20  ;;  %v7957_v10 = vld [vmem:[#allocation16 + $0x1ab0] sm:$0xff]  ;;  %v7982_v20 = vld [vmem:[#allocation16 + $0x1b78] sm:$0xff] }
 0xdee   : > { %v12207_v6 = vpop.f32.mrf.mxu0  ;;  %v7978_v9 = vld [vmem:[#allocation16 + $0x1b58] sm:$0xff]  ;;  %v7977_v42 = vld [vmem:[#allocation16 + $0x1b50] sm:$0xff] }
 0xdef   : > { %v12210_v50 = vadd.f32 %v7479_v28, %v12164_v7  ;;  %v7950_v7 = vld [vmem:[#allocation16 + $0x1a78] sm:$0xff] }
 0xdf0   : > { %v12212_v51 = vpop.f32.mrf.mxu0  ;;  %v7974_v28 = vld [vmem:[#allocation16 + $0x1b38] sm:$0xff] }
 0xdf1   : > { %8066 = vmatprep.mubr.f32.mxu0 %v12212_v51 }
 0xdf2   : > { %8067 = vmatmul.mubr.f32.vlgmr.msra.gmra.mxu0 %v12207_v6 }
 0xdf3   : > { %8216 = vmatpush1.msra.mxu0 %v7965_v56  ;;  %v7973_v56 = vld [vmem:[#allocation16 + $0x1b30] sm:$0xff] }
 0xdf4   : > { %8217 = vmatprep.subr.mxu0 %v7962_v17  ;;  %v7970_v17 = vld [vmem:[#allocation16 + $0x1b18] sm:$0xff] }
 0xdf5   : > { %8218 = vmatpush1.msra.mxu0 %v7961_v11  ;;  %v7969_v11 = vld [vmem:[#allocation16 + $0x1b10] sm:$0xff] }
 0xdf6   : > { %8219 = vmatprep.subr.mxu0 %v7958_v26 }
 0xdf7   : > { %8220 = vmatpush1.msra.mxu0 %v7957_v10  ;;  %v6960_v10 = vadd.f32 %v12162_v40, %v12177_v29  ;;  %v7833_v40 = vld [vmem:[#allocation16 + $0x16d0] sm:$0xff]  ;;  %v12232_v29 = vld [vmem:[#allocation15 + $0x8] sm:$0x3] }
 0xdf8   : > { %8221 = vmatprep.subr.mxu0 %v7954_v38 }
 0xdf9   : > { %8222 = vmatpush1.msra.mxu0 %v7953_v52 }
 0xdfa   : > { %8223 = vmatprep.subr.mxu0 %v7950_v7  ;;  %v6962_v7 = vadd.f32 %v12166_v35, %v12180_v1  ;;  %v7830_v35 = vld [vmem:[#allocation16 + $0x16b8] sm:$0xff]  ;;  %v7829_v1 = vld [vmem:[#allocation16 + $0x16b0] sm:$0xff] }
 0xdfb   : > { %8224 = vmatpush1.msra.mxu0 %v7949_v18 }
 0xdfc   : > { %8225 = vmatprep.subr.mxu0 %v7946_v53 }
 0xdfd   : > { %8226 = vmatpush1.msra.mxu0 %v7945_v62 }
 0xdfe   : > { %8227 = vmatprep.subr.mxu0 %v7942_v13 }
 0xdff   : > { %8228 = vmatpush1.msra.mxu0 %v7941_v33 }
 0xe00   : > { %8229 = vmatprep.subr.mxu0 %v7938_v12  ;;  %v7837_v12 = vld [vmem:[#allocation16 + $0x16f0] sm:$0xff] }
 0xe01   : > { %8230 = vmatpush1.msra.mxu0 %v7937_v24  ;;  %v8498_v24 = vld [vmem:[#allocation16 + $0x1de0] sm:$0xff] }
 0xe02   : > { %8231 = vmatprep.subr.mxu0 %v7934_v41  ;;  %v7825_v41 = vld [vmem:[#allocation16 + $0x1690] sm:$0xff] }
 0xe03   : > { %8232 = vmatpush1.msra.mxu0 %v7933_v46  ;;  %v8495_v46 = vld [vmem:[#allocation16 + $0x1dc8] sm:$0xff] }
 0xe04   : > { %8233 = vmatprep.subr.mxu0 %v7930_v48  ;;  %v8494_v48 = vld [vmem:[#allocation16 + $0x1dc0] sm:$0xff] }
 0xe05   : > { %8234 = vmatpush1.msra.mxu0 %v7929_v15  ;;  %v7821_v15 = vld [vmem:[#allocation16 + $0x1670] sm:$0xff] }
 0xe06   : > { %8235 = vmatprep.subr.mxu0 %v7926_v43  ;;  %v8491_v43 = vld [vmem:[#allocation16 + $0x1da8] sm:$0xff] }
 0xe07   : > { %8236 = vmatpush1.msra.mxu0 %v7925_v39  ;;  %v7818_v39 = vld [vmem:[#allocation16 + $0x1658] sm:$0xff] }
 0xe08   : > { %8237 = vmatprep.subr.mxu0 %v7922_v57  ;;  %v8490_v57 = vld [vmem:[#allocation16 + $0x1da0] sm:$0xff] }
 0xe09   : > { %8238 = vmatpush1.msra.mxu0 %v7921_v54  ;;  %v8487_v54 = vld [vmem:[#allocation16 + $0x1d88] sm:$0xff] }
 0xe0a   : > { %8239 = vmatprep.subr.mxu0 %v7918_v27  ;;  %v7814_v27 = vld [vmem:[#allocation16 + $0x1638] sm:$0xff] }
 0xe0b   : > { %8240 = vmatpush1.msra.mxu0 %v7917_v60  ;;  %v8486_v60 = vld [vmem:[#allocation16 + $0x1d80] sm:$0xff] }
 0xe0c   : > { %8241 = vmatprep.subr.mxu0 %v7914_v61  ;;  %v7813_v61 = vld [vmem:[#allocation16 + $0x1630] sm:$0xff] }
 0xe0d   : > { %8242 = vmatpush1.msra.mxu0 %v7913_v63  ;;  %v8483_v63 = vld [vmem:[#allocation16 + $0x1d68] sm:$0xff] }
 0xe0e   : > { %8243 = vmatprep.subr.mxu0 %v7910_v4  ;;  %v7810_v4 = vld [vmem:[#allocation16 + $0x1618] sm:$0xff] }
 0xe0f   : > { %8244 = vmatpush1.msra.mxu0 %v7909_v37  ;;  %v8482_v37 = vld [vmem:[#allocation16 + $0x1d60] sm:$0xff] }
 0xe10   : > { %8245 = vmatprep.subr.mxu0 %v7906_v5  ;;  %v7809_v5 = vld [vmem:[#allocation16 + $0x1610] sm:$0xff] }
 0xe11   : > { %8246 = vmatpush1.msra.mxu0 %v7905_v14  ;;  %v8479_v14 = vld [vmem:[#allocation16 + $0x1d48] sm:$0xff] }
 0xe12   : > { %8263 = vmatprep.subr.mxu0 %v7998_v2  ;;  %v7806_v2 = vld [vmem:[#allocation16 + $0x15f8] sm:$0xff] }
 0xe13   : > { %8264 = vmatpush2.msra.mxu0 %v7997_v8  ;;  %v8478_v8 = vld [vmem:[#allocation16 + $0x1d40] sm:$0xff] }
 0xe14   : > { %8265 = vmatprep.subr.mxu0 %v7994_v45  ;;  %v7805_v45 = vld [vmem:[#allocation16 + $0x15f0] sm:$0xff] }
 0xe15   : > { %8266 = vmatpush2.msra.mxu0 %v7993_v47  ;;  %v8475_v47 = vld [vmem:[#allocation16 + $0x1d28] sm:$0xff] }
 0xe16   : > { %8267 = vmatprep.subr.mxu0 %v7990_v34  ;;  %v7802_v34 = vld [vmem:[#allocation16 + $0x15d8] sm:$0xff] }
 0xe17   : > { %8268 = vmatpush2.msra.mxu0 %v7989_v30  ;;  %v8474_v30 = vld [vmem:[#allocation16 + $0x1d20] sm:$0xff] }
 0xe18   : > { %8269 = vmatprep.subr.mxu0 %v7986_v31  ;;  %v7801_v31 = vld [vmem:[#allocation16 + $0x15d0] sm:$0xff] }
 0xe19   : > { %8270 = vmatpush2.msra.mxu0 %v7985_v21  ;;  %v8471_v21 = vld [vmem:[#allocation16 + $0x1d08] sm:$0xff] }
 0xe1a   : > { %8271 = vmatprep.subr.mxu0 %v7982_v20  ;;  %v7798_v20 = vld [vmem:[#allocation16 + $0x15b8] sm:$0xff] }
 0xe1b   : > { %8272 = vmatpush2.msra.mxu0 %v7981_v3  ;;  %v8470_v3 = vld [vmem:[#allocation16 + $0x1d00] sm:$0xff] }
 0xe1c   : > { %8273 = vmatprep.subr.mxu0 %v7978_v9  ;;  %v7797_v9 = vld [vmem:[#allocation16 + $0x15b0] sm:$0xff] }
 0xe1d   : > { %8274 = vmatpush2.msra.mxu0 %v7977_v42  ;;  %v8467_v42 = vld [vmem:[#allocation16 + $0x1ce8] sm:$0xff] }
 0xe1e   : > { %8275 = vmatprep.subr.mxu0 %v7974_v28  ;;  %v7794_v28 = vld [vmem:[#allocation16 + $0x1598] sm:$0xff] }
 0xe1f   : > { %8276 = vmatpush2.msra.mxu0 %v7973_v56  ;;  %v8466_v56 = vld [vmem:[#allocation16 + $0x1ce0] sm:$0xff] }
 0xe20   : > { %8277 = vmatprep.subr.mxu0 %v7970_v17  ;;  %v7793_v17 = vld [vmem:[#allocation16 + $0x1590] sm:$0xff] }
 0xe21   : > { %8278 = vmatpush2.msra.mxu0 %v7969_v11  ;;  %v8463_v11 = vld [vmem:[#allocation16 + $0x1cc8] sm:$0xff] }
 0xe22   : > { %10016 = vmatprep.subr.msk.mxu0 %vm5638_vm8, %v12060_v59  ;;  %v7834_v59 = vld [vmem:[#allocation16 + $0x16d8] sm:$0xff] }
 0xe2a   : > { %v7547_v26 = vpop.f32.mrf.mxu1 }
 0xe2b   : > { %v7619_v38 = vadd.f32 %v12200_v19, %v7547_v26  ;;  %v8499_v19 = vld [vmem:[#allocation16 + $0x1de8] sm:$0xff]  ;;  %v7790_v26 = vld [vmem:[#allocation16 + $0x1578] sm:$0xff] }
 0xe2c   : > { %v7549_v52 = vpop.f32.mrf.mxu1 }
 0xe2d   : > { %v12223_v18 = vadd.f32 %v7619_v38, %v6960_v10  ;;  %v7621_v53 = vadd.f32 %v12202_v44, %v7549_v52  ;;  %v7826_v44 = vld [vmem:[#allocation16 + $0x1698] sm:$0xff]  ;;  %v8462_v10 = vld [vmem:[#allocation16 + $0x1cc0] sm:$0xff]  ;;  %v7789_v38 = vld [vmem:[#allocation16 + $0x1570] sm:$0xff] }
 0xe2e   : > { %v7769_v62 = vpop.f32.mrf.mxu1  ;;  %v8459_v52 = vld [vmem:[#allocation16 + $0x1ca8] sm:$0xff] }
 0xe2f   : > { %v12226_v13 = vadd.f32 %v7621_v53, %v6962_v7  ;;  %v7786_v7 = vld [vmem:[#allocation16 + $0x1558] sm:$0xff]  ;;  %v8458_v53 = vld [vmem:[#allocation16 + $0x1ca0] sm:$0xff] }
 0xe30   : > { %v7771_v33 = vpop.f32.mrf.mxu1 }
 0xe31   : > { %10014 = vmatprep.mubr.msk.f32.mxu1 %vm6389_vm10, %v7771_v33  ;;  %10015 = vmatprep.mubr.msk.f32.mxu0 %vm6389_vm10, %v7771_v33  ;;  %v8455_v33 = vld [vmem:[#allocation16 + $0x1c88] sm:$0xff] }
 0xe32   : > { %8138 = vmatmul.mubr.f32.vlgmr.msra.gmra.mxu1 %v7769_v62  ;;  %8280 = vmatmul.mubr.f32.vlgmr.msra.gmra.mxu0 %v7769_v62  ;;  %v7785_v62 = vld [vmem:[#allocation16 + $0x1550] sm:$0xff] }
 0xe33   : > { %8145 = vmatpush1.msra.mxu1 %v7837_v12  ;;  %10017 = vmatpush1.msk.msra.mxu0 %vm5638_vm8, %v12062_v55  ;;  %v7822_v55 = vld [vmem:[#allocation16 + $0x1678] sm:$0xff] }
 0xe34   : > { %8146 = vmatprep.subr.mxu1 %v7834_v59  ;;  %8359 = vmatprep.mubr.f32.mxu0 %v11006_v0  ;;  %v7782_v12 = vld [vmem:[#allocation16 + $0x1538] sm:$0xff]  ;;  %v8454_v59 = vld [vmem:[#allocation16 + $0x1c80] sm:$0xff] }
 0xe35   : > { %8147 = vmatpush1.msra.mxu1 %v7833_v40  ;;  %8208 = vmatprep.mubr.f32.mxu1 %v12212_v51  ;;  %v7817_v51 = vld [vmem:[#allocation16 + $0x1650] sm:$0xff] }
 0xe36   : > { %8148 = vmatprep.subr.mxu1 %v7830_v35  ;;  %10018 = vmatmul.mubr.msk.f32.vlgmr.msra.gmra.mxu0 %vm5634_vm9, %v12232_v29  ;;  %v7781_v40 = vld [vmem:[#allocation16 + $0x1530] sm:$0xff]  ;;  %v8451_v35 = vld [vmem:[#allocation16 + $0x1c68] sm:$0xff] }
 0xe37   : > { %8149 = vmatpush1.msra.mxu1 %v7829_v1  ;;  %8665 = vmatprep.subr.mxu0 %v8499_v19  ;;  %v7778_v1 = vld [vmem:[#allocation16 + $0x1518] sm:$0xff]  ;;  %v8450_v19 = vld [vmem:[#allocation16 + $0x1c60] sm:$0xff] }
 0xe38   : > { %8150 = vmatprep.subr.mxu1 %v7826_v44  ;;  %8666 = vmatpush1.msra.mxu0 %v8498_v24  ;;  %v7777_v44 = vld [vmem:[#allocation16 + $0x1510] sm:$0xff]  ;;  %v8447_v24 = vld [vmem:[#allocation16 + $0x1c48] sm:$0xff] }
 0xe39   : > { %8151 = vmatpush1.msra.mxu1 %v7825_v41  ;;  %8667 = vmatprep.subr.mxu0 %v8495_v46  ;;  %v7902_v41 = vld [vmem:[#allocation16 + $0x18f8] sm:$0xff]  ;;  %v8446_v46 = vld [vmem:[#allocation16 + $0x1c40] sm:$0xff] }
 0xe3a   : > { %8152 = vmatprep.subr.mxu1 %v7822_v55  ;;  %8668 = vmatpush1.msra.mxu0 %v8494_v48  ;;  %v7901_v55 = vld [vmem:[#allocation16 + $0x18f0] sm:$0xff]  ;;  %v8443_v48 = vld [vmem:[#allocation16 + $0x1c28] sm:$0xff] }
 0xe3b   : > { %8153 = vmatpush1.msra.mxu1 %v7821_v15  ;;  %8669 = vmatprep.subr.mxu0 %v8491_v43  ;;  %v7898_v15 = vld [vmem:[#allocation16 + $0x18d8] sm:$0xff]  ;;  %v8442_v43 = vld [vmem:[#allocation16 + $0x1c20] sm:$0xff] }
 0xe3c   : > { %8154 = vmatprep.subr.mxu1 %v7818_v39  ;;  %8670 = vmatpush1.msra.mxu0 %v8490_v57  ;;  %v7897_v39 = vld [vmem:[#allocation16 + $0x18d0] sm:$0xff]  ;;  %v8439_v57 = vld [vmem:[#allocation16 + $0x1c08] sm:$0xff] }
 0xe3d   : > { %8155 = vmatpush1.msra.mxu1 %v7817_v51  ;;  %8671 = vmatprep.subr.mxu0 %v8487_v54  ;;  %v7894_v51 = vld [vmem:[#allocation16 + $0x18b8] sm:$0xff]  ;;  %v8438_v54 = vld [vmem:[#allocation16 + $0x1c00] sm:$0xff] }
 0xe3e   : > { %8156 = vmatprep.subr.mxu1 %v7814_v27  ;;  %8672 = vmatpush1.msra.mxu0 %v8486_v60  ;;  %v7893_v27 = vld [vmem:[#allocation16 + $0x18b0] sm:$0xff]  ;;  %v8563_v60 = vld [vmem:[#allocation16 + $0x1fe8] sm:$0xff] }
 0xe3f   : > { %8157 = vmatpush1.msra.mxu1 %v7813_v61  ;;  %8673 = vmatprep.subr.mxu0 %v8483_v63  ;;  %v7890_v61 = vld [vmem:[#allocation16 + $0x1898] sm:$0xff]  ;;  %v8562_v63 = vld [vmem:[#allocation16 + $0x1fe0] sm:$0xff] }
 0xe40   : > { %8158 = vmatprep.subr.mxu1 %v7810_v4  ;;  %8674 = vmatpush1.msra.mxu0 %v8482_v37  ;;  %v7889_v4 = vld [vmem:[#allocation16 + $0x1890] sm:$0xff]  ;;  %v8559_v37 = vld [vmem:[#allocation16 + $0x1fc8] sm:$0xff] }
 0xe41   : > { %8159 = vmatpush1.msra.mxu1 %v7809_v5  ;;  %8675 = vmatprep.subr.mxu0 %v8479_v14  ;;  %v7886_v5 = vld [vmem:[#allocation16 + $0x1878] sm:$0xff]  ;;  %v8558_v14 = vld [vmem:[#allocation16 + $0x1fc0] sm:$0xff] }
 0xe42   : > { %8160 = vmatprep.subr.mxu1 %v7806_v2  ;;  %8676 = vmatpush1.msra.mxu0 %v8478_v8  ;;  %v7885_v2 = vld [vmem:[#allocation16 + $0x1870] sm:$0xff]  ;;  %v8555_v8 = vld [vmem:[#allocation16 + $0x1fa8] sm:$0xff] }
 0xe43   : > { %8161 = vmatpush1.msra.mxu1 %v7805_v45  ;;  %8677 = vmatprep.subr.mxu0 %v8475_v47  ;;  %v7882_v45 = vld [vmem:[#allocation16 + $0x1858] sm:$0xff]  ;;  %v8554_v47 = vld [vmem:[#allocation16 + $0x1fa0] sm:$0xff] }
 0xe44   : > { %8162 = vmatprep.subr.mxu1 %v7802_v34  ;;  %8678 = vmatpush1.msra.mxu0 %v8474_v30  ;;  %v7881_v34 = vld [vmem:[#allocation16 + $0x1850] sm:$0xff]  ;;  %v8551_v30 = vld [vmem:[#allocation16 + $0x1f88] sm:$0xff] }
 0xe45   : > { %8163 = vmatpush1.msra.mxu1 %v7801_v31  ;;  %8679 = vmatprep.subr.mxu0 %v8471_v21  ;;  %v7878_v31 = vld [vmem:[#allocation16 + $0x1838] sm:$0xff]  ;;  %v8550_v21 = vld [vmem:[#allocation16 + $0x1f80] sm:$0xff] }
 0xe46   : > { %8164 = vmatprep.subr.mxu1 %v7798_v20  ;;  %8680 = vmatpush1.msra.mxu0 %v8470_v3  ;;  %v7877_v20 = vld [vmem:[#allocation16 + $0x1830] sm:$0xff]  ;;  %v7874_v3 = vld [vmem:[#allocation16 + $0x1818] sm:$0xff] }
 0xe47   : > { %8165 = vmatpush1.msra.mxu1 %v7797_v9  ;;  %8681 = vmatprep.subr.mxu0 %v8467_v42  ;;  %v7873_v9 = vld [vmem:[#allocation16 + $0x1810] sm:$0xff]  ;;  %v7870_v42 = vld [vmem:[#allocation16 + $0x17f8] sm:$0xff] }
 0xe48   : > { %8166 = vmatprep.subr.mxu1 %v7794_v28  ;;  %8682 = vmatpush1.msra.mxu0 %v8466_v56  ;;  %v7869_v28 = vld [vmem:[#allocation16 + $0x17f0] sm:$0xff]  ;;  %v7866_v56 = vld [vmem:[#allocation16 + $0x17d8] sm:$0xff] }
 0xe49   : > { %8167 = vmatpush1.msra.mxu1 %v7793_v17  ;;  %8683 = vmatprep.subr.mxu0 %v8463_v11  ;;  %v7865_v17 = vld [vmem:[#allocation16 + $0x17d0] sm:$0xff]  ;;  %v7862_v11 = vld [vmem:[#allocation16 + $0x17b8] sm:$0xff] }
 0xe4a   : > { %8168 = vmatprep.subr.mxu1 %v7790_v26  ;;  %8684 = vmatpush1.msra.mxu0 %v8462_v10  ;;  %v7861_v26 = vld [vmem:[#allocation16 + $0x17b0] sm:$0xff]  ;;  %v7858_v10 = vld [vmem:[#allocation16 + $0x1798] sm:$0xff] }
 0xe4b   : > { %8169 = vmatpush1.msra.mxu1 %v7789_v38  ;;  %8685 = vmatprep.subr.mxu0 %v8459_v52  ;;  %v7857_v38 = vld [vmem:[#allocation16 + $0x1790] sm:$0xff]  ;;  %v7854_v52 = vld [vmem:[#allocation16 + $0x1778] sm:$0xff] }
 0xe4c   : > { %8170 = vmatprep.subr.mxu1 %v7786_v7  ;;  %8686 = vmatpush1.msra.mxu0 %v8458_v53  ;;  %v7853_v7 = vld [vmem:[#allocation16 + $0x1770] sm:$0xff]  ;;  %v7850_v53 = vld [vmem:[#allocation16 + $0x1758] sm:$0xff] }
 0xe4d   : > { %8171 = vmatpush1.msra.mxu1 %v7785_v62  ;;  %8687 = vmatprep.subr.mxu0 %v8455_v33  ;;  %v7849_v62 = vld [vmem:[#allocation16 + $0x1750] sm:$0xff]  ;;  %v7846_v33 = vld [vmem:[#allocation16 + $0x1738] sm:$0xff] }
 0xe4e   : > { %8172 = vmatprep.subr.mxu1 %v7782_v12  ;;  %8688 = vmatpush1.msra.mxu0 %v8454_v59  ;;  %v7845_v12 = vld [vmem:[#allocation16 + $0x1730] sm:$0xff]  ;;  %v7842_v59 = vld [vmem:[#allocation16 + $0x1718] sm:$0xff] }
 0xe4f   : > { %8173 = vmatpush1.msra.mxu1 %v7781_v40  ;;  %8689 = vmatprep.subr.mxu0 %v8451_v35  ;;  %v7841_v40 = vld [vmem:[#allocation16 + $0x1710] sm:$0xff]  ;;  %v8547_v35 = vld [vmem:[#allocation16 + $0x1f68] sm:$0xff] }
 0xe50   : > { %8174 = vmatprep.subr.mxu1 %v7778_v1  ;;  %8690 = vmatpush1.msra.mxu0 %v8450_v19  ;;  %v8546_v1 = vld [vmem:[#allocation16 + $0x1f60] sm:$0xff]  ;;  %v8543_v19 = vld [vmem:[#allocation16 + $0x1f48] sm:$0xff] }
 0xe51   : > { %8175 = vmatpush1.msra.mxu1 %v7777_v44  ;;  %8691 = vmatprep.subr.mxu0 %v8447_v24  ;;  %v8542_v44 = vld [vmem:[#allocation16 + $0x1f40] sm:$0xff]  ;;  %v8539_v24 = vld [vmem:[#allocation16 + $0x1f28] sm:$0xff] }
 0xe52   : > { %8176 = vmatprep.subr.mxu1 %v7902_v41  ;;  %8692 = vmatpush1.msra.mxu0 %v8446_v46  ;;  %v8538_v41 = vld [vmem:[#allocation16 + $0x1f20] sm:$0xff]  ;;  %v8531_v46 = vld [vmem:[#allocation16 + $0x1ee8] sm:$0xff] }
 0xe53   : > { %8177 = vmatpush2.msra.mxu1 %v7901_v55  ;;  %8693 = vmatprep.subr.mxu0 %v8443_v48  ;;  %v8527_v55 = vld [vmem:[#allocation16 + $0x1ec8] sm:$0xff]  ;;  %v8526_v48 = vld [vmem:[#allocation16 + $0x1ec0] sm:$0xff] }
 0xe54   : > { %8178 = vmatprep.subr.mxu1 %v7898_v15  ;;  %8694 = vmatpush1.msra.mxu0 %v8442_v43  ;;  %v8627_v15 = vld [vmem:[#allocation16 + $0x21e8] sm:$0xff] }
 0xe55   : > { %8179 = vmatpush2.msra.mxu1 %v7897_v39  ;;  %8695 = vmatprep.subr.mxu0 %v8439_v57  ;;  %v8523_v43 = vld [vmem:[#allocation16 + $0x1ea8] sm:$0xff]  ;;  %v8626_v39 = vld [vmem:[#allocation16 + $0x21e0] sm:$0xff] }
 0xe56   : > { %8180 = vmatprep.subr.mxu1 %v7894_v51  ;;  %8696 = vmatpush1.msra.mxu0 %v8438_v54  ;;  %v8522_v57 = vld [vmem:[#allocation16 + $0x1ea0] sm:$0xff]  ;;  %v8519_v54 = vld [vmem:[#allocation16 + $0x1e88] sm:$0xff] }
 0xe57   : > { %8181 = vmatpush2.msra.mxu1 %v7893_v27  ;;  %8697 = vmatprep.subr.mxu0 %v8563_v60  ;;  %v8622_v51 = vld [vmem:[#allocation16 + $0x21c0] sm:$0xff]  ;;  %v8619_v27 = vld [vmem:[#allocation16 + $0x21a8] sm:$0xff] }
 0xe58   : > { %8182 = vmatprep.subr.mxu1 %v7890_v61  ;;  %8698 = vmatpush2.msra.mxu0 %v8562_v63  ;;  %v8618_v60 = vld [vmem:[#allocation16 + $0x21a0] sm:$0xff]  ;;  %v8615_v63 = vld [vmem:[#allocation16 + $0x2188] sm:$0xff] }
 0xe59   : > { %8183 = vmatpush2.msra.mxu1 %v7889_v4  ;;  %8699 = vmatprep.subr.mxu0 %v8559_v37  ;;  %v8518_v61 = vld [vmem:[#allocation16 + $0x1e80] sm:$0xff]  ;;  %v8515_v4 = vld [vmem:[#allocation16 + $0x1e68] sm:$0xff] }
 0xe5a   : > { %8184 = vmatprep.subr.mxu1 %v7886_v5  ;;  %8700 = vmatpush2.msra.mxu0 %v8558_v14  ;;  %v8614_v37 = vld [vmem:[#allocation16 + $0x2180] sm:$0xff]  ;;  %v8611_v14 = vld [vmem:[#allocation16 + $0x2168] sm:$0xff] }
 0xe5b   : > { %8185 = vmatpush2.msra.mxu1 %v7885_v2  ;;  %8701 = vmatprep.subr.mxu0 %v8555_v8  ;;  %v8514_v5 = vld [vmem:[#allocation16 + $0x1e60] sm:$0xff]  ;;  %v8511_v2 = vld [vmem:[#allocation16 + $0x1e48] sm:$0xff] }
 0xe5c   : > { %8186 = vmatprep.subr.mxu1 %v7882_v45  ;;  %8702 = vmatpush2.msra.mxu0 %v8554_v47  ;;  %v8610_v8 = vld [vmem:[#allocation16 + $0x2160] sm:$0xff]  ;;  %v8607_v47 = vld [vmem:[#allocation16 + $0x2148] sm:$0xff] }
 0xe5d   : > { %8187 = vmatpush2.msra.mxu1 %v7881_v34  ;;  %8703 = vmatprep.subr.mxu0 %v8551_v30  ;;  %v8510_v45 = vld [vmem:[#allocation16 + $0x1e40] sm:$0xff]  ;;  %v8507_v34 = vld [vmem:[#allocation16 + $0x1e28] sm:$0xff] }
 0xe5e   : > { %8188 = vmatprep.subr.mxu1 %v7878_v31  ;;  %8704 = vmatpush2.msra.mxu0 %v8550_v21  ;;  %v8606_v30 = vld [vmem:[#allocation16 + $0x2140] sm:$0xff]  ;;  %v8603_v21 = vld [vmem:[#allocation16 + $0x2128] sm:$0xff] }
 0xe5f   : > { %8189 = vmatpush2.msra.mxu1 %v7877_v20  ;;  %8705 = vmatprep.subr.mxu0 %v8547_v35  ;;  %v8506_v31 = vld [vmem:[#allocation16 + $0x1e20] sm:$0xff]  ;;  %v8503_v20 = vld [vmem:[#allocation16 + $0x1e08] sm:$0xff] }
 0xe60   : > { %8190 = vmatprep.subr.mxu1 %v7874_v3  ;;  %8706 = vmatpush2.msra.mxu0 %v8546_v1  ;;  %v8602_v3 = vld [vmem:[#allocation16 + $0x2120] sm:$0xff]  ;;  %v8567_v1 = vld [vmem:[#allocation16 + $0x2008] sm:$0xff] }
 0xe61   : > { %8191 = vmatpush2.msra.mxu1 %v7873_v9  ;;  %8707 = vmatprep.subr.mxu0 %v8543_v19  ;;  %v8502_v9 = vld [vmem:[#allocation16 + $0x1e00] sm:$0xff] }
 0xe62   : > { %8192 = vmatprep.subr.mxu1 %v7870_v42  ;;  %8708 = vmatpush2.msra.mxu0 %v8542_v44  ;;  %v8599_v42 = vld [vmem:[#allocation16 + $0x2108] sm:$0xff]  ;;  %v8570_v35 = vld [vmem:[#allocation16 + $0x2020] sm:$0xff] }
 0xe63   : > { %8193 = vmatpush2.msra.mxu1 %v7869_v28  ;;  %8709 = vmatprep.subr.mxu0 %v8539_v24  ;;  %v8629_v28 = vld [vmem:[#allocation16 + $0x21f8] sm:$0xff]  ;;  %v8566_v19 = vld [vmem:[#allocation16 + $0x2000] sm:$0xff]  ;;  %v8659_v44 = vld [vmem:[#allocation16 + $0x22e8] sm:$0xff] }
 0xe64   : > { %8194 = vmatprep.subr.mxu1 %v7866_v56  ;;  %8710 = vmatpush2.msra.mxu0 %v8538_v41  ;;  %v8598_v56 = vld [vmem:[#allocation16 + $0x2100] sm:$0xff]  ;;  %v8655_v41 = vld [vmem:[#allocation16 + $0x22c8] sm:$0xff] }
 0xe65   : > { %8195 = vmatpush2.msra.mxu1 %v7865_v17  ;;  %v8595_v17 = vld [vmem:[#allocation16 + $0x20e8] sm:$0xff]  ;;  %v8658_v24 = vld [vmem:[#allocation16 + $0x22e0] sm:$0xff] }
 0xe66   : > { %8196 = vmatprep.subr.mxu1 %v7862_v11  ;;  %v8594_v11 = vld [vmem:[#allocation16 + $0x20e0] sm:$0xff] }
 0xe67   : > { %8197 = vmatpush2.msra.mxu1 %v7861_v26  ;;  %v8591_v26 = vld [vmem:[#allocation16 + $0x20c8] sm:$0xff] }
 0xe68   : > { %8198 = vmatprep.subr.mxu1 %v7858_v10  ;;  %v8590_v10 = vld [vmem:[#allocation16 + $0x20c0] sm:$0xff] }
 0xe69   : > { %8199 = vmatpush2.msra.mxu1 %v7857_v38  ;;  %v8587_v38 = vld [vmem:[#allocation16 + $0x20a8] sm:$0xff] }
 0xe6a   : > { %8200 = vmatprep.subr.mxu1 %v7854_v52  ;;  %v8586_v52 = vld [vmem:[#allocation16 + $0x20a0] sm:$0xff] }
 0xe6b   : > { %8201 = vmatpush2.msra.mxu1 %v7853_v7  ;;  %v8583_v7 = vld [vmem:[#allocation16 + $0x2088] sm:$0xff] }
 0xe6c   : > { %8202 = vmatprep.subr.mxu1 %v7850_v53  ;;  %v8582_v53 = vld [vmem:[#allocation16 + $0x2080] sm:$0xff] }
 0xe6d   : > { %8203 = vmatpush2.msra.mxu1 %v7849_v62  ;;  %v8579_v62 = vld [vmem:[#allocation16 + $0x2068] sm:$0xff] }
 0xe6e   : > { %8204 = vmatprep.subr.mxu1 %v7846_v33  ;;  %v8578_v33 = vld [vmem:[#allocation16 + $0x2060] sm:$0xff] }
 0xe6f   : > { %8205 = vmatpush2.msra.mxu1 %v7845_v12  ;;  %v8575_v12 = vld [vmem:[#allocation16 + $0x2048] sm:$0xff] }
 0xe70   : > { %8206 = vmatprep.subr.mxu1 %v7842_v59  ;;  %v8574_v59 = vld [vmem:[#allocation16 + $0x2040] sm:$0xff] }
 0xe71   : > { %8207 = vmatpush2.msra.mxu1 %v7841_v40  ;;  %v8571_v40 = vld [vmem:[#allocation16 + $0x2028] sm:$0xff] }
 0xe72   : > { %8209 = vmatmul.mubr.f32.vlgmr.msra.gmra.mxu1 %v12207_v6  ;;  %10019 = vmatprep.subr.msk.mxu1 %vm5638_vm8, %v12089_v23  ;;  %v8535_v6 = vld [vmem:[#allocation16 + $0x1f08] sm:$0xff]  ;;  %v8534_v23 = vld [vmem:[#allocation16 + $0x1f00] sm:$0xff] }
 0xe73   : > { %10020 = vmatpush1.msk.msra.mxu1 %vm5638_vm8, %v12091_v16  ;;  %8430 = vmatprep.mubr.f32.mxu1 %v11006_v0  ;;  %v8530_v16 = vld [vmem:[#allocation16 + $0x1ee0] sm:$0xff] }
 0xe74   : > { %8711 = vmatprep.subr.mxu0 %v8535_v6  ;;  %8736 = vmatprep.subr.mxu1 %v8627_v15  ;;  %v8654_v6 = vld [vmem:[#allocation16 + $0x22c0] sm:$0xff] }
 0xe75   : > { %8712 = vmatpush2.msra.mxu0 %v8534_v23  ;;  %v8651_v23 = vld [vmem:[#allocation16 + $0x22a8] sm:$0xff]  ;;  %v8642_v15 = vld [vmem:[#allocation16 + $0x2260] sm:$0xff] }
 0xe76   : > { %10021 = vmatmul.mubr.msk.f32.vlgmr.msra.gmra.mxu1 %vm5634_vm9, %v12232_v29  ;;  %8713 = vmatprep.subr.mxu0 %v8531_v46  ;;  %v8623_v29 = vld [vmem:[#allocation16 + $0x21c8] sm:$0xff]  ;;  %v8650_v46 = vld [vmem:[#allocation16 + $0x22a0] sm:$0xff] }
 0xe77   : > { %8714 = vmatpush2.msra.mxu0 %v8530_v16  ;;  %8737 = vmatpush1.msra.mxu1 %v8626_v39  ;;  %v8647_v16 = vld [vmem:[#allocation16 + $0x2288] sm:$0xff]  ;;  %v8638_v39 = vld [vmem:[#allocation16 + $0x2240] sm:$0xff] }
 0xe78   : > { %8715 = vmatprep.subr.mxu0 %v8527_v55  ;;  %8738 = vmatprep.subr.mxu1 %v8623_v29  ;;  %v8646_v55 = vld [vmem:[#allocation16 + $0x2280] sm:$0xff]  ;;  %v8635_v29 = vld [vmem:[#allocation16 + $0x2228] sm:$0xff] }
 0xe79   : > { %8716 = vmatpush2.msra.mxu0 %v8526_v48  ;;  %8739 = vmatpush1.msra.mxu1 %v8622_v51  ;;  %v8643_v48 = vld [vmem:[#allocation16 + $0x2268] sm:$0xff] }
 0xe7a   : > { %8717 = vmatprep.subr.mxu0 %v8523_v43  ;;  %8740 = vmatprep.subr.mxu1 %v8619_v27  ;;  %v8639_v43 = vld [vmem:[#allocation16 + $0x2248] sm:$0xff]  ;;  %v8501_v27 = vld [vmem:[#allocation16 + $0x1df8] sm:$0xff] }
 0xe7b   : > { %8718 = vmatpush2.msra.mxu0 %v8522_v57  ;;  %8741 = vmatpush1.msra.mxu1 %v8618_v60  ;;  %v8634_v57 = vld [vmem:[#allocation16 + $0x2220] sm:$0xff]  ;;  %v8631_v51 = vld [vmem:[#allocation16 + $0x2208] sm:$0xff] }
 0xe7c   : > { %8719 = vmatprep.subr.mxu0 %v8519_v54  ;;  %8742 = vmatprep.subr.mxu1 %v8615_v63  ;;  %v8630_v54 = vld [vmem:[#allocation16 + $0x2200] sm:$0xff] }
 0xe7d   : > { %8720 = vmatpush2.msra.mxu0 %v8518_v61  ;;  %8743 = vmatpush1.msra.mxu1 %v8614_v37 }
 0xe7e   : > { %8721 = vmatprep.subr.mxu0 %v8515_v4  ;;  %8744 = vmatprep.subr.mxu1 %v8611_v14 }
 0xe7f   : > { %8722 = vmatpush2.msra.mxu0 %v8514_v5  ;;  %8745 = vmatpush1.msra.mxu1 %v8610_v8 }
 0xe80   : > { %8723 = vmatprep.subr.mxu0 %v8511_v2  ;;  %8746 = vmatprep.subr.mxu1 %v8607_v47 }
 0xe81   : > { %8724 = vmatpush2.msra.mxu0 %v8510_v45  ;;  %8747 = vmatpush1.msra.mxu1 %v8606_v30  ;;  %v8628_v30 = vld [vmem:[#allocation16 + $0x21f0] sm:$0xff] }
 0xe82   : > { %8725 = vmatprep.subr.mxu0 %v8507_v34  ;;  %8748 = vmatprep.subr.mxu1 %v8603_v21  ;;  %v8624_v21 = vld [vmem:[#allocation16 + $0x21d0] sm:$0xff] }
 0xe83   : > { %8726 = vmatpush2.msra.mxu0 %v8506_v31  ;;  %8749 = vmatpush1.msra.mxu1 %v8602_v3  ;;  %v8625_v31 = vld [vmem:[#allocation16 + $0x21d8] sm:$0xff] }
 0xe84   : > { %8727 = vmatprep.subr.mxu0 %v8503_v20  ;;  %8750 = vmatprep.subr.mxu1 %v8599_v42  ;;  %v8621_v20 = vld [vmem:[#allocation16 + $0x21b8] sm:$0xff]  ;;  %v8612_v42 = vld [vmem:[#allocation16 + $0x2170] sm:$0xff] }
 0xe85   : > { %8728 = vmatpush2.msra.mxu0 %v8502_v9  ;;  %8751 = vmatpush1.msra.mxu1 %v8598_v56  ;;  %v8617_v3 = vld [vmem:[#allocation16 + $0x2198] sm:$0xff]  ;;  %v8616_v9 = vld [vmem:[#allocation16 + $0x2190] sm:$0xff] }
 0xe86   : > { %8878 = vmatprep.subr.mxu0 %v8629_v28  ;;  %8752 = vmatprep.subr.mxu1 %v8595_v17  ;;  %v8609_v28 = vld [vmem:[#allocation16 + $0x2158] sm:$0xff]  ;;  %v8608_v56 = vld [vmem:[#allocation16 + $0x2150] sm:$0xff] }
 0xe87   : > { %8753 = vmatpush1.msra.mxu1 %v8594_v11  ;;  %v8605_v17 = vld [vmem:[#allocation16 + $0x2138] sm:$0xff]  ;;  %v8604_v11 = vld [vmem:[#allocation16 + $0x2130] sm:$0xff] }
 0xe88   : > { %8754 = vmatprep.subr.mxu1 %v8591_v26  ;;  %v8601_v26 = vld [vmem:[#allocation16 + $0x2118] sm:$0xff] }
 0xe89   : > { %8755 = vmatpush1.msra.mxu1 %v8590_v10  ;;  %v8600_v10 = vld [vmem:[#allocation16 + $0x2110] sm:$0xff] }
 0xe8a   : > { %8756 = vmatprep.subr.mxu1 %v8587_v38  ;;  %v8597_v38 = vld [vmem:[#allocation16 + $0x20f8] sm:$0xff] }
 0xe8b   : > { %8757 = vmatpush1.msra.mxu1 %v8586_v52  ;;  %v8596_v52 = vld [vmem:[#allocation16 + $0x20f0] sm:$0xff] }
 0xe8c   : > { %8758 = vmatprep.subr.mxu1 %v8583_v7  ;;  %v8593_v7 = vld [vmem:[#allocation16 + $0x20d8] sm:$0xff] }
 0xe8d   : > { %8759 = vmatpush1.msra.mxu1 %v8582_v53  ;;  %v8592_v53 = vld [vmem:[#allocation16 + $0x20d0] sm:$0xff] }
 0xe8e   : > { %8760 = vmatprep.subr.mxu1 %v8579_v62  ;;  %v8589_v62 = vld [vmem:[#allocation16 + $0x20b8] sm:$0xff] }
 0xe8f   : > { %8761 = vmatpush1.msra.mxu1 %v8578_v33  ;;  %v8588_v33 = vld [vmem:[#allocation16 + $0x20b0] sm:$0xff] }
 0xe90   : > { %8762 = vmatprep.subr.mxu1 %v8575_v12  ;;  %v8585_v12 = vld [vmem:[#allocation16 + $0x2098] sm:$0xff] }
 0xe91   : > { %8763 = vmatpush1.msra.mxu1 %v8574_v59  ;;  %v8584_v59 = vld [vmem:[#allocation16 + $0x2090] sm:$0xff] }
 0xe92   : > { %8764 = vmatprep.subr.mxu1 %v8571_v40  ;;  %v8581_v40 = vld [vmem:[#allocation16 + $0x2078] sm:$0xff] }
 0xe93   : > { %8765 = vmatpush1.msra.mxu1 %v8570_v35  ;;  %v8580_v35 = vld [vmem:[#allocation16 + $0x2070] sm:$0xff] }
 0xe94   : > { %8766 = vmatprep.subr.mxu1 %v8567_v1  ;;  %v8577_v1 = vld [vmem:[#allocation16 + $0x2058] sm:$0xff] }
 0xe95   : > { %8767 = vmatpush1.msra.mxu1 %v8566_v19  ;;  %v8576_v19 = vld [vmem:[#allocation16 + $0x2050] sm:$0xff] }
 0xe96   : > { %8784 = vmatprep.subr.mxu1 %v8659_v44  ;;  %v8573_v44 = vld [vmem:[#allocation16 + $0x2038] sm:$0xff] }
 0xe97   : > { %8785 = vmatpush2.msra.mxu1 %v8658_v24  ;;  %v8572_v24 = vld [vmem:[#allocation16 + $0x2030] sm:$0xff] }
 0xe98   : > { %8786 = vmatprep.subr.mxu1 %v8655_v41  ;;  %v8569_v41 = vld [vmem:[#allocation16 + $0x2018] sm:$0xff] }
 0xe99   : > { %8787 = vmatpush2.msra.mxu1 %v8654_v6  ;;  %v8568_v6 = vld [vmem:[#allocation16 + $0x2010] sm:$0xff] }
 0xe9a   : > { %8788 = vmatprep.subr.mxu1 %v8651_v23  ;;  %v8661_v23 = vld [vmem:[#allocation16 + $0x22f8] sm:$0xff] }
 0xe9b   : > { %8789 = vmatpush2.msra.mxu1 %v8650_v46  ;;  %v8660_v46 = vld [vmem:[#allocation16 + $0x22f0] sm:$0xff] }
 0xe9c   : > { %8790 = vmatprep.subr.mxu1 %v8647_v16  ;;  %v8657_v16 = vld [vmem:[#allocation16 + $0x22d8] sm:$0xff] }
 0xe9d   : > { %8791 = vmatpush2.msra.mxu1 %v8646_v55  ;;  %v8656_v55 = vld [vmem:[#allocation16 + $0x22d0] sm:$0xff] }
 0xe9e   : > { %8792 = vmatprep.subr.mxu1 %v8643_v48  ;;  %v8653_v48 = vld [vmem:[#allocation16 + $0x22b8] sm:$0xff] }
 0xe9f   : > { %8793 = vmatpush2.msra.mxu1 %v8642_v15  ;;  %v8652_v15 = vld [vmem:[#allocation16 + $0x22b0] sm:$0xff] }
 0xea0   : > { %8794 = vmatprep.subr.mxu1 %v8639_v43  ;;  %v8649_v43 = vld [vmem:[#allocation16 + $0x2298] sm:$0xff] }
 0xea1   : > { %8795 = vmatpush2.msra.mxu1 %v8638_v39  ;;  %v8648_v39 = vld [vmem:[#allocation16 + $0x2290] sm:$0xff] }
 0xea2   : > { %8796 = vmatprep.subr.mxu1 %v8635_v29  ;;  %v8645_v29 = vld [vmem:[#allocation16 + $0x2278] sm:$0xff] }
 0xea3   : > { %8797 = vmatpush2.msra.mxu1 %v8634_v57  ;;  %v8644_v57 = vld [vmem:[#allocation16 + $0x2270] sm:$0xff] }
 0xea4   : > { %8798 = vmatprep.subr.mxu1 %v8631_v51  ;;  %v8641_v51 = vld [vmem:[#allocation16 + $0x2258] sm:$0xff] }
 0xea5   : > { %8799 = vmatpush2.msra.mxu1 %v8630_v54  ;;  %v8640_v54 = vld [vmem:[#allocation16 + $0x2250] sm:$0xff] }
 0xea6   : > { %8807 = vmatprep.subr.mxu1 %v8501_v27  ;;  %v8637_v27 = vld [vmem:[#allocation16 + $0x2238] sm:$0xff] }
 0xeb2   : > { %v8068_v60 = vpop.f32.mrf.mxu0 }
 0xeb4   : > { %v8070_v61 = vpop.f32.mrf.mxu0 }
 0xef2   : > { %v8139_v63 = vpop.f32.mrf.mxu1  ;;  %v12246_v4 = vpop.f32.mrf.mxu0 }
 0xef3   : > { %v8140_v37 = vadd.f32 %v8139_v63, %v8068_v60  ;;  %v8636_v60 = vld [vmem:[#allocation16 + $0x2230] sm:$0xff] }
 0xef4   : > { %v8141_v5 = vpop.f32.mrf.mxu1  ;;  %v12248_v14 = vpop.f32.mrf.mxu0  ;;  %v8632_v63 = vld [vmem:[#allocation16 + $0x2210] sm:$0xff] }
 0xef5   : > { %v12251_v2 = vadd.f32 %v8140_v37, %v12205_v58  ;;  %v8142_v8 = vadd.f32 %v8141_v5, %v8070_v61  ;;  %v8620_v58 = vld [vmem:[#allocation16 + $0x21b0] sm:$0xff]  ;;  %v8633_v61 = vld [vmem:[#allocation16 + $0x2218] sm:$0xff] }
 0xef6   : > { %v12253_v45 = vpop.f32.mrf.mxu0 }
 0xef7   : > { %v12256_v47 = vadd.f32 %v8142_v8, %v12210_v50  ;;  %v8613_v50 = vld [vmem:[#allocation16 + $0x2178] sm:$0xff] }
 0xef8   : > { %v12258_v34 = vpop.f32.mrf.mxu0 }
 0xef9   : > { %8729 = vmatprep.mubr.f32.mxu0 %v12258_v34 }
 0xefa   : > { %8730 = vmatmul.mubr.f32.vlgmr.msra.gmra.mxu0 %v12253_v45 }
 0xefb   : > { %8879 = vmatpush1.msra.mxu0 %v8628_v30 }
 0xefc   : > { %8880 = vmatprep.subr.mxu0 %v8625_v31 }
 0xefd   : > { %8881 = vmatpush1.msra.mxu0 %v8624_v21 }
 0xefe   : > { %8882 = vmatprep.subr.mxu0 %v8621_v20 }
 0xeff   : > { %8883 = vmatpush1.msra.mxu0 %v8620_v58 }
 0xf00   : > { %8884 = vmatprep.subr.mxu0 %v8617_v3  ;;  %v8500_v3 = vld [vmem:[#allocation16 + $0x1df0] sm:$0xff] }
 0xf01   : > { %8885 = vmatpush1.msra.mxu0 %v8616_v9  ;;  %v8497_v9 = vld [vmem:[#allocation16 + $0x1dd8] sm:$0xff] }
 0xf02   : > { %8886 = vmatprep.subr.mxu0 %v8613_v50  ;;  %v9003_v50 = vld [vmem:[#allocation19] sm:$0xff] }
 0xf03   : > { %8887 = vmatpush1.msra.mxu0 %v8612_v42  ;;  %v8489_v42 = vld [vmem:[#allocation16 + $0x1d98] sm:$0xff] }
 0xf04   : > { %8888 = vmatprep.subr.mxu0 %v8609_v28  ;;  %v8488_v28 = vld [vmem:[#allocation16 + $0x1d90] sm:$0xff] }
 0xf05   : > { %8889 = vmatpush1.msra.mxu0 %v8608_v56  ;;  %v8485_v56 = vld [vmem:[#allocation16 + $0x1d78] sm:$0xff] }
 0xf06   : > { %8890 = vmatprep.subr.mxu0 %v8605_v17  ;;  %v8484_v17 = vld [vmem:[#allocation16 + $0x1d70] sm:$0xff] }
 0xf07   : > { %8891 = vmatpush1.msra.mxu0 %v8604_v11  ;;  %v8480_v11 = vld [vmem:[#allocation16 + $0x1d50] sm:$0xff] }
 0xf08   : > { %8892 = vmatprep.subr.mxu0 %v8601_v26  ;;  %v8477_v26 = vld [vmem:[#allocation16 + $0x1d38] sm:$0xff] }
 0xf09   : > { %8893 = vmatpush1.msra.mxu0 %v8600_v10  ;;  %v8476_v10 = vld [vmem:[#allocation16 + $0x1d30] sm:$0xff] }
 0xf0a   : > { %8894 = vmatprep.subr.mxu0 %v8597_v38  ;;  %v8473_v38 = vld [vmem:[#allocation16 + $0x1d18] sm:$0xff] }
 0xf0b   : > { %8895 = vmatpush1.msra.mxu0 %v8596_v52  ;;  %v8472_v52 = vld [vmem:[#allocation16 + $0x1d10] sm:$0xff] }
 0xf0c   : > { %8896 = vmatprep.subr.mxu0 %v8593_v7  ;;  %v8469_v7 = vld [vmem:[#allocation16 + $0x1cf8] sm:$0xff] }
 0xf0d   : > { %8897 = vmatpush1.msra.mxu0 %v8592_v53  ;;  %v8468_v53 = vld [vmem:[#allocation16 + $0x1cf0] sm:$0xff] }
 0xf0e   : > { %8898 = vmatprep.subr.mxu0 %v8589_v62  ;;  %v8465_v62 = vld [vmem:[#allocation16 + $0x1cd8] sm:$0xff] }
 0xf0f   : > { %8899 = vmatpush1.msra.mxu0 %v8588_v33  ;;  %v8464_v33 = vld [vmem:[#allocation16 + $0x1cd0] sm:$0xff] }
 0xf10   : > { %8900 = vmatprep.subr.mxu0 %v8585_v12  ;;  %v8461_v12 = vld [vmem:[#allocation16 + $0x1cb8] sm:$0xff] }
 0xf11   : > { %8901 = vmatpush1.msra.mxu0 %v8584_v59  ;;  %v8460_v59 = vld [vmem:[#allocation16 + $0x1cb0] sm:$0xff] }
 0xf12   : > { %8902 = vmatprep.subr.mxu0 %v8581_v40  ;;  %v8457_v40 = vld [vmem:[#allocation16 + $0x1c98] sm:$0xff] }
 0xf13   : > { %8903 = vmatpush1.msra.mxu0 %v8580_v35  ;;  %v8456_v35 = vld [vmem:[#allocation16 + $0x1c90] sm:$0xff] }
 0xf14   : > { %8904 = vmatprep.subr.mxu0 %v8577_v1  ;;  %v8453_v1 = vld [vmem:[#allocation16 + $0x1c78] sm:$0xff] }
 0xf15   : > { %8905 = vmatpush1.msra.mxu0 %v8576_v19  ;;  %v8452_v19 = vld [vmem:[#allocation16 + $0x1c70] sm:$0xff] }
 0xf16   : > { %8906 = vmatprep.subr.mxu0 %v8573_v44  ;;  %v8449_v44 = vld [vmem:[#allocation16 + $0x1c58] sm:$0xff] }
 0xf17   : > { %8907 = vmatpush1.msra.mxu0 %v8572_v24  ;;  %v8448_v24 = vld [vmem:[#allocation16 + $0x1c50] sm:$0xff] }
 0xf18   : > { %8908 = vmatprep.subr.mxu0 %v8569_v41  ;;  %v8445_v41 = vld [vmem:[#allocation16 + $0x1c38] sm:$0xff] }
 0xf19   : > { %8909 = vmatpush1.msra.mxu0 %v8568_v6  ;;  %v8444_v6 = vld [vmem:[#allocation16 + $0x1c30] sm:$0xff] }
 0xf1a   : > { %8926 = vmatprep.subr.mxu0 %v8661_v23  ;;  %v8441_v23 = vld [vmem:[#allocation16 + $0x1c18] sm:$0xff] }
 0xf1b   : > { %8927 = vmatpush2.msra.mxu0 %v8660_v46  ;;  %v8440_v46 = vld [vmem:[#allocation16 + $0x1c10] sm:$0xff] }
 0xf1c   : > { %8928 = vmatprep.subr.mxu0 %v8657_v16  ;;  %v8565_v16 = vld [vmem:[#allocation16 + $0x1ff8] sm:$0xff] }
 0xf1d   : > { %8929 = vmatpush2.msra.mxu0 %v8656_v55  ;;  %v8564_v55 = vld [vmem:[#allocation16 + $0x1ff0] sm:$0xff] }
 0xf1e   : > { %8930 = vmatprep.subr.mxu0 %v8653_v48  ;;  %v8561_v48 = vld [vmem:[#allocation16 + $0x1fd8] sm:$0xff] }
 0xf1f   : > { %8931 = vmatpush2.msra.mxu0 %v8652_v15  ;;  %v8560_v15 = vld [vmem:[#allocation16 + $0x1fd0] sm:$0xff] }
 0xf20   : > { %8932 = vmatprep.subr.mxu0 %v8649_v43  ;;  %v8557_v43 = vld [vmem:[#allocation16 + $0x1fb8] sm:$0xff] }
 0xf21   : > { %8933 = vmatpush2.msra.mxu0 %v8648_v39  ;;  %v8556_v39 = vld [vmem:[#allocation16 + $0x1fb0] sm:$0xff] }
 0xf22   : > { %8934 = vmatprep.subr.mxu0 %v8645_v29  ;;  %v8553_v29 = vld [vmem:[#allocation16 + $0x1f98] sm:$0xff] }
 0xf23   : > { %8935 = vmatpush2.msra.mxu0 %v8644_v57  ;;  %v8552_v57 = vld [vmem:[#allocation16 + $0x1f90] sm:$0xff] }
 0xf24   : > { %8936 = vmatprep.subr.mxu0 %v8641_v51  ;;  %v8549_v51 = vld [vmem:[#allocation16 + $0x1f78] sm:$0xff] }
 0xf25   : > { %8937 = vmatpush2.msra.mxu0 %v8640_v54  ;;  %v8548_v54 = vld [vmem:[#allocation16 + $0x1f70] sm:$0xff] }
 0xf26   : > { %8938 = vmatprep.subr.mxu0 %v8637_v27  ;;  %v8545_v27 = vld [vmem:[#allocation16 + $0x1f58] sm:$0xff] }
 0xf27   : > { %8939 = vmatpush2.msra.mxu0 %v8636_v60  ;;  %v8544_v60 = vld [vmem:[#allocation16 + $0x1f50] sm:$0xff] }
 0xf28   : > { %8940 = vmatprep.subr.mxu0 %v8633_v61  ;;  %v8541_v61 = vld [vmem:[#allocation16 + $0x1f38] sm:$0xff] }
 0xf29   : > { %8941 = vmatpush2.msra.mxu0 %v8632_v63  ;;  %v8540_v63 = vld [vmem:[#allocation16 + $0x1f30] sm:$0xff] }
 0xf2a   : > { %10143 = vmatprep.subr.mxu0 %v11006_v0 }
 0xf32   : > { %v8210_v37 = vpop.f32.mrf.mxu1 }
 0xf33   : > { %v8282_v5 = vadd.f32 %v12246_v4, %v8210_v37  ;;  %v8496_v4 = vld [vmem:[#allocation16 + $0x1dd0] sm:$0xff]  ;;  %v8537_v37 = vld [vmem:[#allocation16 + $0x1f18] sm:$0xff] }
 0xf34   : > { %v8212_v8 = vpop.f32.mrf.mxu1 }
 0xf35   : > { %v12265_v30 = vadd.f32 %v8282_v5, %v12223_v18  ;;  %v8284_v31 = vadd.f32 %v12248_v14, %v8212_v8  ;;  %v8493_v18 = vld [vmem:[#allocation16 + $0x1db8] sm:$0xff]  ;;  %v9002_v14 = vld [vmem:[%s825_s11] sm:$0x1]  ;;  %v8536_v5 = vld [vmem:[#allocation16 + $0x1f10] sm:$0xff] }
 0xf36   : > { %v8432_v21 = vpop.f32.mrf.mxu1  ;;  %v8533_v8 = vld [vmem:[#allocation16 + $0x1ef8] sm:$0xff] }
 0xf37   : > { %v12269_v20 = vadd.f32 %v8284_v31, %v12226_v13  ;;  %v8492_v13 = vld [vmem:[#allocation16 + $0x1db0] sm:$0xff] }
 0xf38   : > { %v8434_v58 = vpop.f32.mrf.mxu1  ;;  %v8532_v31 = vld [vmem:[#allocation16 + $0x1ef0] sm:$0xff] }
 0xf39   : > { %10022 = vmatprep.mubr.msk.f32.mxu1 %vm6389_vm10, %v8434_v58  ;;  %10023 = vmatprep.mubr.msk.f32.mxu0 %vm6389_vm10, %v8434_v58  ;;  %v8528_v58 = vld [vmem:[#allocation16 + $0x1ed0] sm:$0xff] }
 0xf3a   : > { %8801 = vmatmul.mubr.f32.vlgmr.msra.gmra.mxu1 %v8432_v21  ;;  %8943 = vmatmul.mubr.f32.vlgmr.msra.gmra.mxu0 %v8432_v21  ;;  %v8529_v21 = vld [vmem:[#allocation16 + $0x1ed8] sm:$0xff] }
 0xf3b   : > { %8808 = vmatpush1.msra.mxu1 %v8500_v3  ;;  %8871 = vmatprep.mubr.f32.mxu1 %v12258_v34  ;;  %v8481_v34 = vld [vmem:[#allocation16 + $0x1d58] sm:$0xff] }
 0xf3c   : > { %8809 = vmatprep.subr.mxu1 %v8497_v9  ;;  %10144 = vmatpush3.msra.mxu0 %v9003_v50  ;;  %v8525_v3 = vld [vmem:[#allocation16 + $0x1eb8] sm:$0xff]  ;;  %v8524_v9 = vld [vmem:[#allocation16 + $0x1eb0] sm:$0xff] }
 0xf3d   : > { %8810 = vmatpush1.msra.mxu1 %v8496_v4  ;;  %10145 = vmatprep.mubr.msk.f32.mxu0 %vm11007_vm6, %v11006_v0  ;;  %v8521_v50 = vld [vmem:[#allocation16 + $0x1e98] sm:$0xff]  ;;  %v8520_v4 = vld [vmem:[#allocation16 + $0x1e90] sm:$0xff] }
 0xf3e   : > { %8811 = vmatprep.subr.mxu1 %v8493_v18  ;;  %10146 = vmatmul.mubr.msk.f32.vlgmr.msra.gmra.mxu0 %vm9005_vm11, %v9002_v14  ;;  %v8517_v18 = vld [vmem:[#allocation16 + $0x1e78] sm:$0xff]  ;;  %v8516_v14 = vld [vmem:[#allocation16 + $0x1e70] sm:$0xff] }
 0xf3f   : > { %8812 = vmatpush1.msra.mxu1 %v8492_v13  ;;  %v8513_v13 = vld [vmem:[#allocation16 + $0x1e58] sm:$0xff] }
 0xf40   : > { %8813 = vmatprep.subr.mxu1 %v8489_v42  ;;  %v8512_v42 = vld [vmem:[#allocation16 + $0x1e50] sm:$0xff] }
 0xf41   : > { %8814 = vmatpush1.msra.mxu1 %v8488_v28  ;;  %v8509_v28 = vld [vmem:[#allocation16 + $0x1e38] sm:$0xff] }
 0xf42   : > { %8815 = vmatprep.subr.mxu1 %v8485_v56  ;;  %v8508_v56 = vld [vmem:[#allocation16 + $0x1e30] sm:$0xff] }
 0xf43   : > { %8816 = vmatpush1.msra.mxu1 %v8484_v17  ;;  %v8505_v17 = vld [vmem:[#allocation16 + $0x1e18] sm:$0xff] }
 0xf44   : > { %8817 = vmatprep.subr.mxu1 %v8481_v34  ;;  %v8504_v34 = vld [vmem:[#allocation16 + $0x1e10] sm:$0xff] }
 0xf45   : > { %8818 = vmatpush1.msra.mxu1 %v8480_v11  ;;  %v9111_v11 = vld [vmem:[#allocation22 + $0xf8] sm:$0xff] }
 0xf46   : > { %8819 = vmatprep.subr.mxu1 %v8477_v26  ;;  %v9110_v26 = vld [vmem:[#allocation22 + $0xf0] sm:$0xff]  ;;  %9227 = vmatprep.subr.mxu0 %v9111_v11  ;;  %v9151_v11 = vld [vmem:[#allocation24 + $0x38] sm:$0xff] }
 0xf47   : > { %8820 = vmatpush1.msra.mxu1 %v8476_v10  ;;  %v9109_v10 = vld [vmem:[#allocation22 + $0xe8] sm:$0xff]  ;;  %9228 = vmatpush1.msra.mxu0 %v9110_v26 }
 0xf48   : > { %8821 = vmatprep.subr.mxu1 %v8473_v38  ;;  %v9108_v38 = vld [vmem:[#allocation22 + $0xe0] sm:$0xff]  ;;  %9229 = vmatprep.subr.mxu0 %v9109_v10  ;;  %v9121_v26 = vld [vmem:[#allocation22 + $0x148] sm:$0xff]  ;;  %v9150_v10 = vld [vmem:[#allocation24 + $0x30] sm:$0xff] }
 0xf49   : > { %8822 = vmatpush1.msra.mxu1 %v8472_v52  ;;  %v9107_v52 = vld [vmem:[#allocation22 + $0xd8] sm:$0xff]  ;;  %9230 = vmatpush1.msra.mxu0 %v9108_v38  ;;  %v9149_v38 = vld [vmem:[#allocation24 + $0x28] sm:$0xff] }
 0xf4a   : > { %8823 = vmatprep.subr.mxu1 %v8469_v7  ;;  %v9106_v7 = vld [vmem:[#allocation22 + $0xd0] sm:$0xff]  ;;  %9231 = vmatprep.subr.mxu0 %v9107_v52  ;;  %v9120_v52 = vld [vmem:[#allocation22 + $0x140] sm:$0xff] }
 0xf4b   : > { %8824 = vmatpush1.msra.mxu1 %v8468_v53  ;;  %v9105_v53 = vld [vmem:[#allocation22 + $0xc8] sm:$0xff]  ;;  %9232 = vmatpush1.msra.mxu0 %v9106_v7  ;;  %v9148_v7 = vld [vmem:[#allocation24 + $0x20] sm:$0xff] }
 0xf4c   : > { %8825 = vmatprep.subr.mxu1 %v8465_v62  ;;  %v9104_v62 = vld [vmem:[#allocation22 + $0xc0] sm:$0xff]  ;;  %9233 = vmatprep.subr.mxu0 %v9105_v53  ;;  %v9119_v53 = vld [vmem:[#allocation22 + $0x138] sm:$0xff] }
 0xf4d   : > { %8826 = vmatpush1.msra.mxu1 %v8464_v33  ;;  %v9103_v33 = vld [vmem:[#allocation22 + $0xb8] sm:$0xff]  ;;  %9234 = vmatpush1.msra.mxu0 %v9104_v62 }
 0xf4e   : > { %8827 = vmatprep.subr.mxu1 %v8461_v12  ;;  %v9102_v12 = vld [vmem:[#allocation22 + $0xb0] sm:$0xff]  ;;  %9235 = vmatprep.subr.mxu0 %v9103_v33  ;;  %v9147_v62 = vld [vmem:[#allocation24 + $0x18] sm:$0xff] }
 0xf4f   : > { %8828 = vmatpush1.msra.mxu1 %v8460_v59  ;;  %v9100_v59 = vld [vmem:[#allocation22 + $0xa0] sm:$0xff]  ;;  %9236 = vmatpush1.msra.mxu0 %v9102_v12  ;;  %v9118_v33 = vld [vmem:[#allocation22 + $0x130] sm:$0xff] }
 0xf50   : > { %8829 = vmatprep.subr.mxu1 %v8457_v40  ;;  %v9099_v40 = vld [vmem:[#allocation22 + $0x98] sm:$0xff]  ;;  %v9146_v12 = vld [vmem:[#allocation24 + $0x10] sm:$0xff] }
 0xf51   : > { %8830 = vmatpush1.msra.mxu1 %v8456_v35  ;;  %v9098_v35 = vld [vmem:[#allocation22 + $0x90] sm:$0xff] }
 0xf52   : > { %8831 = vmatprep.subr.mxu1 %v8453_v1  ;;  %v9097_v1 = vld [vmem:[#allocation22 + $0x88] sm:$0xff] }
 0xf53   : > { %8832 = vmatpush1.msra.mxu1 %v8452_v19  ;;  %v9096_v19 = vld [vmem:[#allocation22 + $0x80] sm:$0xff] }
 0xf54   : > { %8833 = vmatprep.subr.mxu1 %v8449_v44  ;;  %v9095_v44 = vld [vmem:[#allocation22 + $0x78] sm:$0xff] }
 0xf55   : > { %8834 = vmatpush1.msra.mxu1 %v8448_v24  ;;  %v9094_v24 = vld [vmem:[#allocation22 + $0x70] sm:$0xff] }
 0xf56   : > { %8835 = vmatprep.subr.mxu1 %v8445_v41  ;;  %v9093_v41 = vld [vmem:[#allocation22 + $0x68] sm:$0xff] }
 0xf57   : > { %8836 = vmatpush1.msra.mxu1 %v8444_v6  ;;  %v9092_v6 = vld [vmem:[#allocation22 + $0x60] sm:$0xff] }
 0xf58   : > { %8837 = vmatprep.subr.mxu1 %v8441_v23  ;;  %v9091_v23 = vld [vmem:[#allocation22 + $0x58] sm:$0xff] }
 0xf59   : > { %8838 = vmatpush1.msra.mxu1 %v8440_v46  ;;  %v9090_v46 = vld [vmem:[#allocation22 + $0x50] sm:$0xff] }
 0xf5a   : > { %8839 = vmatprep.subr.mxu1 %v8565_v16  ;;  %v9089_v16 = vld [vmem:[#allocation22 + $0x48] sm:$0xff] }
 0xf5b   : > { %8840 = vmatpush2.msra.mxu1 %v8564_v55  ;;  %v9088_v55 = vld [vmem:[#allocation22 + $0x40] sm:$0xff] }
 0xf5c   : > { %8841 = vmatprep.subr.mxu1 %v8561_v48  ;;  %v9087_v48 = vld [vmem:[#allocation22 + $0x38] sm:$0xff] }
 0xf5d   : > { %8842 = vmatpush2.msra.mxu1 %v8560_v15  ;;  %v9086_v15 = vld [vmem:[#allocation22 + $0x30] sm:$0xff] }
 0xf5e   : > { %8843 = vmatprep.subr.mxu1 %v8557_v43  ;;  %v9085_v43 = vld [vmem:[#allocation22 + $0x28] sm:$0xff] }
 0xf5f   : > { %8844 = vmatpush2.msra.mxu1 %v8556_v39  ;;  %v9084_v39 = vld [vmem:[#allocation22 + $0x20] sm:$0xff] }
 0xf60   : > { %8845 = vmatprep.subr.mxu1 %v8553_v29  ;;  %v9083_v29 = vld [vmem:[#allocation22 + $0x18] sm:$0xff] }
 0xf61   : > { %8846 = vmatpush2.msra.mxu1 %v8552_v57  ;;  %v9082_v57 = vld [vmem:[#allocation22 + $0x10] sm:$0xff] }
 0xf62   : > { %8847 = vmatprep.subr.mxu1 %v8549_v51  ;;  %v9081_v51 = vld [vmem:[#allocation22 + $0x8] sm:$0xff] }
 0xf63   : > { %8848 = vmatpush2.msra.mxu1 %v8548_v54  ;;  %v9080_v54 = vld [vmem:[#allocation22] sm:$0xff] }
 0xf64   : > { %8849 = vmatprep.subr.mxu1 %v8545_v27  ;;  %v9143_v27 = vld [vmem:[#allocation22 + $0x1f8] sm:$0xff] }
 0xf65   : > { %8850 = vmatpush2.msra.mxu1 %v8544_v60  ;;  %v9142_v60 = vld [vmem:[#allocation22 + $0x1f0] sm:$0xff] }
 0xf66   : > { %8851 = vmatprep.subr.mxu1 %v8541_v61  ;;  %v9141_v61 = vld [vmem:[#allocation22 + $0x1e8] sm:$0xff] }
 0xf67   : > { %8852 = vmatpush2.msra.mxu1 %v8540_v63  ;;  %v9140_v63 = vld [vmem:[#allocation22 + $0x1e0] sm:$0xff] }
 0xf68   : > { %8853 = vmatprep.subr.mxu1 %v8537_v37  ;;  %v9139_v37 = vld [vmem:[#allocation22 + $0x1d8] sm:$0xff] }
 0xf69   : > { %8854 = vmatpush2.msra.mxu1 %v8536_v5  ;;  %v9138_v5 = vld [vmem:[#allocation22 + $0x1d0] sm:$0xff] }
 0xf6a   : > { %8855 = vmatprep.subr.mxu1 %v8533_v8  ;;  %v9137_v8 = vld [vmem:[#allocation22 + $0x1c8] sm:$0xff] }
 0xf6b   : > { %8856 = vmatpush2.msra.mxu1 %v8532_v31  ;;  %v9136_v31 = vld [vmem:[#allocation22 + $0x1c0] sm:$0xff] }
 0xf6c   : > { %8857 = vmatprep.subr.mxu1 %v8529_v21  ;;  %v9135_v21 = vld [vmem:[#allocation22 + $0x1b8] sm:$0xff] }
 0xf6d   : > { %8858 = vmatpush2.msra.mxu1 %v8528_v58  ;;  %v9134_v58 = vld [vmem:[#allocation22 + $0x1b0] sm:$0xff] }
 0xf6e   : > { %8859 = vmatprep.subr.mxu1 %v8525_v3  ;;  %v9133_v3 = vld [vmem:[#allocation22 + $0x1a8] sm:$0xff] }
 0xf6f   : > { %8860 = vmatpush2.msra.mxu1 %v8524_v9  ;;  %v9132_v9 = vld [vmem:[#allocation22 + $0x1a0] sm:$0xff] }
 0xf70   : > { %8861 = vmatprep.subr.mxu1 %v8521_v50  ;;  %v9131_v50 = vld [vmem:[#allocation22 + $0x198] sm:$0xff] }
 0xf71   : > { %8862 = vmatpush2.msra.mxu1 %v8520_v4  ;;  %v9130_v4 = vld [vmem:[#allocation22 + $0x190] sm:$0xff] }
 0xf72   : > { %8863 = vmatprep.subr.mxu1 %v8517_v18  ;;  %v9129_v18 = vld [vmem:[#allocation22 + $0x188] sm:$0xff] }
 0xf73   : > { %8864 = vmatpush2.msra.mxu1 %v8516_v14  ;;  %v9128_v14 = vld [vmem:[#allocation22 + $0x180] sm:$0xff] }
 0xf74   : > { %8865 = vmatprep.subr.mxu1 %v8513_v13  ;;  %v9127_v13 = vld [vmem:[#allocation22 + $0x178] sm:$0xff] }
 0xf75   : > { %8866 = vmatpush2.msra.mxu1 %v8512_v42  ;;  %v9126_v42 = vld [vmem:[#allocation22 + $0x170] sm:$0xff] }
 0xf76   : > { %8867 = vmatprep.subr.mxu1 %v8509_v28  ;;  %v9125_v28 = vld [vmem:[#allocation22 + $0x168] sm:$0xff] }
 0xf77   : > { %8868 = vmatpush2.msra.mxu1 %v8508_v56  ;;  %v9124_v56 = vld [vmem:[#allocation22 + $0x160] sm:$0xff] }
 0xf78   : > { %8869 = vmatprep.subr.mxu1 %v8505_v17  ;;  %v9123_v17 = vld [vmem:[#allocation22 + $0x158] sm:$0xff] }
 0xf79   : > { %8870 = vmatpush2.msra.mxu1 %v8504_v34  ;;  %v9122_v34 = vld [vmem:[#allocation22 + $0x150] sm:$0xff] }
 0xf7a   : > { %8872 = vmatmul.mubr.f32.vlgmr.msra.gmra.mxu1 %v12253_v45  ;;  %v9101_v45 = vld [vmem:[#allocation22 + $0xa8] sm:$0xff]  ;;  %9180 = vmatprep.subr.mxu1 %v9151_v11 }
 0xf7b   : > { %9220 = vmatprep.mubr.f32.mxu1 %v11006_v0  ;;  %9237 = vmatprep.subr.mxu0 %v9101_v45  ;;  %v9145_v45 = vld [vmem:[#allocation24 + $0x8] sm:$0xff] }
 0xf7c   : > { %9238 = vmatpush1.msra.mxu0 %v9100_v59  ;;  %9181 = vmatpush1.msra.mxu1 %v9150_v10  ;;  %v9117_v59 = vld [vmem:[#allocation22 + $0x128] sm:$0xff] }
 0xf7d   : > { %9239 = vmatprep.subr.mxu0 %v9099_v40  ;;  %9182 = vmatprep.subr.mxu1 %v9149_v38  ;;  %v9144_v40 = vld [vmem:[#allocation24] sm:$0xff] }
 0xf7e   : > { %9240 = vmatpush1.msra.mxu0 %v9098_v35  ;;  %9183 = vmatpush1.msra.mxu1 %v9148_v7  ;;  %v9116_v35 = vld [vmem:[#allocation22 + $0x120] sm:$0xff] }
 0xf7f   : > { %9241 = vmatprep.subr.mxu0 %v9097_v1  ;;  %9184 = vmatprep.subr.mxu1 %v9147_v62  ;;  %v9115_v1 = vld [vmem:[#allocation22 + $0x118] sm:$0xff] }
 0xf80   : > { %9242 = vmatpush1.msra.mxu0 %v9096_v19  ;;  %9185 = vmatpush1.msra.mxu1 %v9146_v12  ;;  %v9114_v19 = vld [vmem:[#allocation22 + $0x110] sm:$0xff] }
 0xf81   : > { %9243 = vmatprep.subr.mxu0 %v9095_v44  ;;  %9186 = vmatprep.subr.mxu1 %v9145_v45  ;;  %v9113_v44 = vld [vmem:[#allocation22 + $0x108] sm:$0xff] }
 0xf82   : > { %9244 = vmatpush1.msra.mxu0 %v9094_v24  ;;  %9187 = vmatpush1.msra.mxu1 %v9144_v40  ;;  %v9112_v24 = vld [vmem:[#allocation22 + $0x100] sm:$0xff] }
 0xf83   : > { %9245 = vmatprep.subr.mxu0 %v9093_v41  ;;  %v9300_v41 = vld [vmem:[#allocation25 + $0x8] sm:$0x3f] }
 0xf84   : > { %9246 = vmatpush1.msra.mxu0 %v9092_v6  ;;  %10026 = vmatprep.subr.msk.mxu1 %vm9305_vm12, %v9300_v41 }
 0xf85   : > { %9247 = vmatprep.subr.mxu0 %v9091_v23 }
 0xf86   : > { %9248 = vmatpush1.msra.mxu0 %v9090_v46 }
 0xf87   : > { %9249 = vmatprep.subr.mxu0 %v9089_v16 }
 0xf88   : > { %9250 = vmatpush1.msra.mxu0 %v9088_v55 }
 0xf89   : > { %9251 = vmatprep.subr.mxu0 %v9087_v48 }
 0xf8a   : > { %9252 = vmatpush1.msra.mxu0 %v9086_v15 }
 0xf8b   : > { %9253 = vmatprep.subr.mxu0 %v9085_v43  ;;  %v9004_v43 = vld [vmem:[#allocation21] sm:$0x1] }
 0xf8c   : > { %9254 = vmatpush1.msra.mxu0 %v9084_v39 }
 0xf8d   : > { %9255 = vmatprep.subr.mxu0 %v9083_v29 }
 0xf8e   : > { %9256 = vmatpush1.msra.mxu0 %v9082_v57 }
 0xf8f   : > { %9257 = vmatprep.subr.mxu0 %v9081_v51 }
 0xf90   : > { %9258 = vmatpush1.msra.mxu0 %v9080_v54 }
 0xf91   : > { %9259 = vmatprep.subr.mxu0 %v9143_v27 }
 0xf92   : > { %9260 = vmatpush2.msra.mxu0 %v9142_v60 }
 0xf93   : > { %9261 = vmatprep.subr.mxu0 %v9141_v61  ;;  %v9299_v61 = vld [vmem:[#allocation25] sm:$0x3f] }
 0xf94   : > { %9262 = vmatpush2.msra.mxu0 %v9140_v63  ;;  %v9432_v63 = vld [vmem:[%s12541_s23 + $0xf8] sm:$0xff] }
 0xf95   : > { %9263 = vmatprep.subr.mxu0 %v9139_v37  ;;  %v9431_v37 = vld [vmem:[%s12541_s23 + $0xf0] sm:$0xff] }
 0xf96   : > { %9264 = vmatpush2.msra.mxu0 %v9138_v5  ;;  %v9415_v5 = vld [vmem:[%s12541_s23 + $0x70] sm:$0xff] }
 0xf97   : > { %9265 = vmatprep.subr.mxu0 %v9137_v8  ;;  %v9430_v8 = vld [vmem:[%s12541_s23 + $0xe8] sm:$0xff] }
 0xf98   : > { %9266 = vmatpush2.msra.mxu0 %v9136_v31  ;;  %v9414_v31 = vld [vmem:[%s12541_s23 + $0x68] sm:$0xff] }
 0xf99   : > { %9267 = vmatprep.subr.mxu0 %v9135_v21  ;;  %v9429_v21 = vld [vmem:[%s12541_s23 + $0xe0] sm:$0xff] }
 0xf9a   : > { %9268 = vmatpush2.msra.mxu0 %v9134_v58  ;;  %v9413_v58 = vld [vmem:[%s12541_s23 + $0x60] sm:$0xff] }
 0xf9b   : > { %9269 = vmatprep.subr.mxu0 %v9133_v3  ;;  %v9428_v3 = vld [vmem:[%s12541_s23 + $0xd8] sm:$0xff] }
 0xf9c   : > { %9270 = vmatpush2.msra.mxu0 %v9132_v9  ;;  %v9412_v9 = vld [vmem:[%s12541_s23 + $0x58] sm:$0xff] }
 0xf9d   : > { %9271 = vmatprep.subr.mxu0 %v9131_v50  ;;  %v9427_v50 = vld [vmem:[%s12541_s23 + $0xd0] sm:$0xff] }
 0xf9e   : > { %9272 = vmatpush2.msra.mxu0 %v9130_v4  ;;  %v9411_v4 = vld [vmem:[%s12541_s23 + $0x50] sm:$0xff] }
 0xf9f   : > { %9273 = vmatprep.subr.mxu0 %v9129_v18  ;;  %v9426_v18 = vld [vmem:[%s12541_s23 + $0xc8] sm:$0xff] }
 0xfa0   : > { %9274 = vmatpush2.msra.mxu0 %v9128_v14  ;;  %v9410_v14 = vld [vmem:[%s12541_s23 + $0x48] sm:$0xff] }
 0xfa1   : > { %9275 = vmatprep.subr.mxu0 %v9127_v13  ;;  %v9425_v13 = vld [vmem:[%s12541_s23 + $0xc0] sm:$0xff] }
 0xfa2   : > { %9276 = vmatpush2.msra.mxu0 %v9126_v42  ;;  %v9409_v42 = vld [vmem:[%s12541_s23 + $0x40] sm:$0xff] }
 0xfa3   : > { %9277 = vmatprep.subr.mxu0 %v9125_v28  ;;  %v9424_v28 = vld [vmem:[%s12541_s23 + $0xb8] sm:$0xff] }
 0xfa4   : > { %9278 = vmatpush2.msra.mxu0 %v9124_v56  ;;  %v9408_v56 = vld [vmem:[%s12541_s23 + $0x38] sm:$0xff] }
 0xfa5   : > { %9279 = vmatprep.subr.mxu0 %v9123_v17  ;;  %v8953_v17 = vld [vmem:[#allocation18] sm:$0xf] }
 0xfa6   : > { %9280 = vmatpush2.msra.mxu0 %v9122_v34  ;;  %v8958_v34 = vrot.slane %v8953_v17, %v11814_v32  ;;  %v8966_v38 = vrot.slane %v8953_v17, %v11823_v49  ;;  %v9423_v49 = vld [vmem:[%s12541_s23 + $0xb0] sm:$0xff] }
 0xfa7   : > { %9281 = vmatprep.subr.mxu0 %v9121_v26  ;;  %v8962_v26 = vrot.slane %v8953_v17, %v11817_v36 }
 0xfa8   : > { %9282 = vmatpush2.msra.mxu0 %v9120_v52 }
 0xfa9   : > { %9283 = vmatprep.subr.mxu0 %v9119_v53 }
 0xfaa   : > { %9284 = vmatpush2.msra.mxu0 %v9118_v33  ;;  %v8970_v33 = vrot.slane %v8953_v17, %v5619_v22 }
 0xfab   : > { %9285 = vmatprep.subr.mxu0 %v9117_v59 }
 0xfac   : > { %9286 = vmatpush2.msra.mxu0 %v9116_v35 }
 0xfad   : > { %9287 = vmatprep.subr.mxu0 %v9115_v1 }
 0xfae   : > { %9288 = vmatpush2.msra.mxu0 %v9114_v19 }
 0xfaf   : > { %9289 = vmatprep.subr.mxu0 %v9113_v44 }
 0xfb0   : > { %9290 = vmatpush2.msra.mxu0 %v9112_v24 }
 0xfba   : > { %v8731_v6 = vpop.f32.mrf.mxu0 }
 0xfbc   : > { %v8733_v23 = vpop.f32.mrf.mxu0 }
 0xffa   : > { %v8802_v46 = vpop.f32.mrf.mxu1  ;;  %v8944_v16 = vpop.f32.mrf.mxu0 }
 0xffb   : > { %v8803_v55 = vadd.f32 %v8802_v46, %v8731_v6 }
 0xffc   : > { %v8804_v48 = vpop.f32.mrf.mxu1  ;;  %v8946_v15 = vpop.f32.mrf.mxu0 }
 0xffd   : > { %v8949_v39 = vadd.f32 %v8803_v55, %v12251_v2  ;;  %v8805_v29 = vadd.f32 %v8804_v48, %v8733_v23  ;;  %v9298_v2 = vld [vmem:[%s833_s10] sm:$0x1] }
 0xffe   : > { %v9075_v57 = vpop.f32.mrf.mxu0 }
 0xfff   : > { %v8950_v51 = vadd.f32 %v8805_v29, %v12256_v47  ;;  %v9076_v54 = vadd.f32 %v9075_v57, %v9004_v43  ;;  %v9416_v47 = vld [vmem:[%s12541_s23 + $0x78] sm:$0xff]  ;;  %v8975_v7 = vadd.f32 %v8958_v34, %v8949_v39 }
0x1000   : > { %v10147_v27 = vpop.f32.mrf.mxu0 }
0x1001   : > { %v9079_v60 = vmax.f32 %v9076_v54, 0.0  ;;  %v8976_v12 = vadd.f32 %v8962_v26, %v8950_v51  ;;  %v8979_v40 = vmax.f32 %v8975_v7, 0.0  ;;  %v9422_v27 = vld [vmem:[%s12541_s23 + $0xa8] sm:$0xff]  ;;  %v9512_v7 = vld [vmem:[%s12542_s4 + $0x38] sm:$0xff] }
0x1003   : > { %10025 = vmatmul.mubr.msk.f32.vlgmr.msra.gmra.mxu1 %vm9152_vm13, %v9079_v60  ;;  %v8980_v19 = vmax.f32 %v8976_v12, 0.0  ;;  %v9406_v60 = vld [vmem:[%s12541_s23 + $0x28] sm:$0xff] }
0x1004   : > { %10027 = vmatpush1.msk.msra.mxu1 %vm9305_vm12, %v9299_v61  ;;  %9376 = vmatprep.mubr.f32.mxu1 %v11006_v0  ;;  %v9421_v61 = vld [vmem:[%s12541_s23 + $0xa0] sm:$0xff]  ;;  %v9506_v12 = vld [vmem:[%s12542_s4 + $0x8] sm:$0xff] }
0x1005   : > { %10054 = vmatprep.subr.mxu1 %v9432_v63  ;;  %v9405_v63 = vld [vmem:[%s12541_s23 + $0x20] sm:$0xff] }
0x1007   : > { %10028 = vmatmul.mubr.msk.f32.vlgmr.msra.gmra.mxu1 %vm9301_vm14, %v9298_v2  ;;  %v9420_v2 = vld [vmem:[%s12541_s23 + $0x98] sm:$0xff] }
0x1008   : > { %10055 = vmatpush3.msra.mxu1 %v9416_v47  ;;  %v9404_v47 = vld [vmem:[%s12541_s23 + $0x18] sm:$0xff] }
0x1009   : > { %10056 = vmatprep.subr.mxu1 %v9431_v37  ;;  %v9419_v37 = vld [vmem:[%s12541_s23 + $0x90] sm:$0xff] }
0x100a   : > { %10057 = vmatpush3.msra.mxu1 %v9415_v5  ;;  %v9403_v5 = vld [vmem:[%s12541_s23 + $0x10] sm:$0xff] }
0x100b   : > { %10058 = vmatprep.subr.mxu1 %v9430_v8  ;;  %v9418_v8 = vld [vmem:[%s12541_s23 + $0x88] sm:$0xff] }
0x100c   : > { %10059 = vmatpush3.msra.mxu1 %v9414_v31  ;;  %v9402_v31 = vld [vmem:[%s12541_s23 + $0x8] sm:$0xff] }
0x100d   : > { %10060 = vmatprep.subr.mxu1 %v9429_v21  ;;  %v9417_v21 = vld [vmem:[%s12541_s23 + $0x80] sm:$0xff] }
0x100e   : > { %10061 = vmatpush3.msra.mxu1 %v9413_v58  ;;  %v9401_v58 = vld [vmem:[%s12541_s23] sm:$0xff] }
0x100f   : > { %10062 = vmatprep.subr.mxu1 %v9428_v3 }
0x1010   : > { %10063 = vmatpush3.msra.mxu1 %v9412_v9 }
0x1011   : > { %10064 = vmatprep.subr.mxu1 %v9427_v50  ;;  %v9385_v50 = vld [vmem:[#allocation27] sm:$0x3] }
0x1012   : > { %10065 = vmatpush3.msra.mxu1 %v9411_v4  ;;  %v9394_v17 = vrot.slane %v9385_v50, %v11817_v36  ;;  %v9510_v36 = vld [vmem:[%s12542_s4 + $0x28] sm:$0xff] }
0x1013   : > { %10066 = vmatprep.subr.mxu1 %v9426_v18 }
0x1014   : > { %10067 = vmatpush3.msra.mxu1 %v9410_v14 }
0x1015   : > { %10068 = vmatprep.subr.mxu1 %v9425_v13 }
0x1016   : > { %10069 = vmatpush3.msra.mxu1 %v9409_v42  ;;  %v9390_v42 = vrot.slane %v9385_v50, %v11814_v32  ;;  %v9511_v32 = vld [vmem:[%s12542_s4 + $0x30] sm:$0xff] }
0x1017   : > { %10070 = vmatprep.subr.mxu1 %v9424_v28 }
0x1018   : > { %10071 = vmatpush3.msra.mxu1 %v9408_v56 }
0x1019   : > { %10072 = vmatprep.subr.mxu1 %v9423_v49 }
0x101a   : > { %10073 = vmatpush3.msra.mxu1 %v9407_v25 }
0x101b   : > { %10074 = vmatprep.subr.mxu1 %v9422_v27 }
0x101c   : > { %10075 = vmatpush3.msra.mxu1 %v9406_v60 }
0x101d   : > { %10076 = vmatprep.subr.mxu1 %v9421_v61 }
0x101e   : > { %10077 = vmatpush3.msra.mxu1 %v9405_v63 }
0x101f   : > { %10078 = vmatprep.subr.mxu1 %v9420_v2 }
0x1020   : > { %10079 = vmatpush3.msra.mxu1 %v9404_v47 }
0x1021   : > { %10080 = vmatprep.subr.mxu1 %v9419_v37 }
0x1022   : > { %10081 = vmatpush3.msra.mxu1 %v9403_v5 }
0x1023   : > { %10082 = vmatprep.subr.mxu1 %v9418_v8 }
0x1024   : > { %10083 = vmatpush3.msra.mxu1 %v9402_v31 }
0x1025   : > { %10084 = vmatprep.subr.mxu1 %v9417_v21 }
0x1026   : > { %10085 = vmatpush3.msra.mxu1 %v9401_v58 }
0x1027   : > { %10148 = vmatprep.subr.mxu1 %v11006_v0 }
0x103a   : > { %v8873_v11 = vpop.f32.mrf.mxu1 }
0x103b   : > { %v8945_v10 = vadd.f32 %v8944_v16, %v8873_v11 }
0x103c   : > { %v8875_v52 = vpop.f32.mrf.mxu1 }
0x103d   : > { %v8951_v53 = vadd.f32 %v8945_v10, %v12265_v30  ;;  %v8947_v62 = vadd.f32 %v8946_v15, %v8875_v52 }
0x103f   : > { %v8977_v45 = vadd.f32 %v8966_v38, %v8951_v53  ;;  %v8952_v59 = vadd.f32 %v8947_v62, %v12269_v20  ;;  %v9509_v53 = vld [vmem:[%s12542_s4 + $0x20] sm:$0xff]  ;;  %v9508_v62 = vld [vmem:[%s12542_s4 + $0x18] sm:$0xff] }
0x1041   : > { %v8981_v35 = vmax.f32 %v8977_v45, 0.0  ;;  %v8978_v1 = vadd.f32 %v8970_v33, %v8952_v59  ;;  %v9507_v33 = vld [vmem:[%s12542_s4 + $0x10] sm:$0xff]  ;;  %v9505_v45 = vld [vmem:[%s12542_s4] sm:$0xff] }
0x1043   : > { %v8983_v44 = vadd.f32 %v8981_v35, %v8979_v40  ;;  %v8982_v24 = vmax.f32 %v8978_v1, 0.0  ;;  %v9433_v40 = vld [vmem:[#allocation28] sm:$0x1] }
0x1045   : > { %v8986_v22 = vsel %vm8985_vm15, %v8983_v44, 0.0  ;;  %v8984_v30 = vadd.f32 %v8982_v24, %v8980_v19  ;;  %v9513_v24 = vld [vmem:[#allocation30] sm:$0x1] }
0x1046   : > { %v8987_v20 = vrot.slane %v8986_v22, 4 }
0x1047   : > { %v8993_v41 = vsel %vm8985_vm15, %v8984_v30, 0.0 }
0x1048   : > { %v8988_v6 = vadd.f32 %v8987_v20, %v8986_v22  ;;  %v8994_v23 = vrot.slane %v8993_v41, 4 }
0x104a   : > { %v8995_v46 = vadd.f32 %v8994_v23, %v8993_v41  ;;  %v8989_v16 = vrot.slane %v8988_v6, 2 }
0x104c   : > { %v8996_v55 = vrot.slane %v8995_v46, 2  ;;  %v8990_v48 = vadd.f32 %v8989_v16, %v8988_v6 }
0x104e   : > { %v8997_v15 = vadd.f32 %v8996_v55, %v8995_v46  ;;  %v8991_v43 = vrot.slane %v8990_v48, 1 }
0x1050   : > { %v8998_v39 = vrot.slane %v8997_v15, 1  ;;  %v8992_v29 = vadd.f32 %v8991_v43, %v8990_v48 }
0x1052   : > { %v8999_v57 = vadd.f32 %v8998_v39, %v8997_v15  ;;  %v9000_v54 = vmul.f32 0.25, %v8992_v29 }
0x1054   : > { %v9001_v51 = vmul.f32 0.25, %v8999_v57 }
0x1056   : > { %9291 = vmatprep.mubr.f32.mxu0 %v9001_v51 }
0x1057   : > { %9292 = vmatmul.mubr.f32.vlgmr.msra.gmra.mxu0 %v9000_v54 }
0x10c3   : > { %v9222_v3 = vpop.f32.mrf.mxu1 }
0x10c5   : > { %v9224_v9 = vpop.f32.mrf.mxu1 }
0x10c7   : > { %v9378_v18 = vpop.f32.mrf.mxu1 }
0x10c9   : > { %v9380_v34 = vpop.f32.mrf.mxu1 }
0x1117   : > { %v9293_v4 = vpop.f32.mrf.mxu0 }
0x1118   : > { %v9294_v14 = vadd.f32 %v9293_v4, %v9222_v3 }
0x1119   : > { %v9295_v13 = vpop.f32.mrf.mxu0 }
0x111a   : > { %v9296_v28 = vadd.f32 %v9295_v13, %v9224_v9  ;;  %v9383_v56 = vadd.f32 %v9378_v18, %v9294_v14 }
0x111c   : > { %v9384_v11 = vadd.f32 %v9380_v34, %v9296_v28  ;;  %v9397_v26 = vadd.f32 %v9390_v42, %v9383_v56 }
0x111e   : > { %v9398_v10 = vadd.f32 %v9394_v17, %v9384_v11  ;;  %v9399_v52 = vmax.f32 %v9397_v26, 0.0 }
0x1120   : > { %v9400_v38 = vmax.f32 %v9398_v10, 0.0 }
0x1122   : > { %9498 = vmatprep.mubr.f32.mxu1 %v9400_v38 }
0x1123   : > { %9499 = vmatmul.mubr.f32.vlgmr.msra.gmra.mxu1 %v9399_v52 }
0x1124   : > { %10149 = vmatpush3.msra.mxu1 %v9512_v7  ;;  %10164 = vmatprep.mubr.msk.f32.mxu1 %vm11007_vm6, %v11006_v0 }
0x1125   : > { %10150 = vmatprep.subr.mxu1 %v11006_v0 }
0x1126   : > { %10151 = vmatpush3.msra.mxu1 %v9511_v32 }
0x1127   : > { %10152 = vmatprep.subr.mxu1 %v11006_v0 }
0x1128   : > { %10153 = vmatpush3.msra.mxu1 %v9510_v36 }
0x1129   : > { %10154 = vmatprep.subr.mxu1 %v11006_v0 }
0x112a   : > { %10155 = vmatpush3.msra.mxu1 %v9509_v53 }
0x112b   : > { %10156 = vmatprep.subr.mxu1 %v11006_v0 }
0x112c   : > { %10157 = vmatpush3.msra.mxu1 %v9508_v62 }
0x112d   : > { %10158 = vmatprep.subr.mxu1 %v11006_v0 }
0x112e   : > { %10159 = vmatpush3.msra.mxu1 %v9507_v33 }
0x112f   : > { %10160 = vmatprep.subr.mxu1 %v11006_v0 }
0x1130   : > { %10161 = vmatpush3.msra.mxu1 %v9506_v12 }
0x1131   : > { %10162 = vmatprep.subr.mxu1 %v11006_v0 }
0x1132   : > { %10163 = vmatpush3.msra.mxu1 %v9505_v45 }
0x11e3   : > { %v10086_v59 = vpop.f32.mrf.mxu1 }
0x11e5   : > { %v10087_v35 = vpop.f32.mrf.mxu1 }
0x11e6   : > { %v10088_v1 = vadd.f32 %v10087_v35, %v10086_v59 }
0x11e8   : > { %v9501_v19 = vadd.f32 %v10088_v1, %v9433_v40 }
0x11ea   : > { %v9504_v44 = vmax.f32 %v9501_v19, 0.0 }
0x11ec   : > { %10165 = vmatmul.mubr.msk.f32.vlgmr.msra.gmra.mxu1 %vm6389_vm10, %v9504_v44 }
0x12ac   : > { %v9583_v49 = vpop.f32.mrf.mxu1 }
0x12ad   : > { %v9584_v0 = vadd.f32 %v9583_v49, %v9513_v24 }
0x12ae   : > { %v10166_v25 = vpop.f32.mrf.mxu1 }
0x12af   : > { %9588 = vst.msk [vmem:[%s975_s8] sm:$0x1] %vm9587_vm0, %v9584_v0 }
0x12b0 PF: > { %s12544_s11 = smov %s11323_s3  ;;  %p43_p8 = scmp.ge.s32.totalorder %s11311_s20, 4  }
0x12b1   : > { %s12545_s3 = smov %s10968_s28  ;;  %s12546_s28 = smov %s10972_s29 }
0x12b2   : > { %s12547_s29 = smov %s12544_s11  ;;  %s12548_s30 = smov %s11311_s20 }
0x12b3   :  { %45 = sbr.rel (!%p43_p8) target bundleno = 29 (0x1d), region = 256 }
0x12b8   :  { %9606 = vsyncpa [#allocation3], 1 }
0x12b9   :  { %9608 = vsyncpa [#allocation3 + $0x1], 1 }
0x12ba   :  { %9609 = vsyncpa [#allocation5], 1 }
0x12bb   :  { %9611 = vsyncpa [#allocation5 + $0x1], 1 }
0x12bc   :  { %9612 = vsyncpa [#allocation8], 1 }
0x12bd   :  { %9613 = vsyncpa [#allocation11], 1 }
0x12be   :  { %9614 = vsyncpa [#allocation14], 1 }
0x12bf   :  { %9615 = vsyncpa [#allocation17], 1 }
0x12c0   :  { %9616 = vsyncpa [#allocation20], 1 }
0x12c1   :  { %9617 = vsyncpa [#allocation23], 1 }
0x12c2   :  { %9618 = vsyncpa [#allocation26], 1 }
0x12c3   :  { %9619 = vsyncpa [#allocation29], 1 }

</bundles_post_ra>
